<compile_context>
chip_gen: v5e
topology: v5e:2x2
jax: 0.10.0
libtpu: 0.0.40
codegen_flags: <defaults>
</compile_context>

<pallas_src>
import functools
import math

import jax
import jax.numpy as jnp
from jax.experimental import pallas as pl
from jax.experimental.pallas import tpu as pltpu

# ---- hyperparameters (mirror the PyTorch module constants) ------------------
N_EMBD = 64 * 3               # 192
BLOCK_SIZE = 32 * 4           # 128
N_HEAD = 4 * 3                # 12
N_LAYER = 4 * 3               # 12
HEAD_SIZE = N_EMBD // N_HEAD  # 16
DROPOUT = 0.0                 # dropout == 0.0 -> identity (inference no-op)

_NEG_INF = -1e30              # finite large-negative mask value (robust vs -inf)


# ---- in-kernel helpers -------------------------------------------------------
def _ln(x, g, b, eps=1e-5):
    """LayerNorm over the last dim (biased variance, affine), all f32."""
    mean = jnp.mean(x, axis=-1, keepdims=True)
    var = jnp.mean(jnp.square(x - mean), axis=-1, keepdims=True)
    return (x - mean) * jax.lax.rsqrt(var + eps) * g + b


# ---- fully fused encoder kernel (grid = (N_LAYER,)) --------------------------
def _encoder_kernel(x_ref,
                    ln1g_ref, ln1b_ref, wqkv_ref, bqkv_ref, wo_ref, bo_ref,
                    ln2g_ref, ln2b_ref, w1_ref, b1_ref, w2_ref, b2_ref,
                    lnfg_ref, lnfb_ref, lmw_ref, lmb_ref,
                    logits_ref,
                    resid_sc, mask_sc,
                    *, B, T, H, hs, scale):
    """One transformer Block per grid step; residual stream stays in VMEM."""
    C = H * hs
    M = B * T

    @pl.when(pl.program_id(0) == 0)
    def _init():
        resid_sc[...] = x_ref[...]                 # load tok+pos embedding once
        row = jax.lax.broadcasted_iota(jnp.int32, (T, T), 0)
        col = jax.lax.broadcasted_iota(jnp.int32, (T, T), 1)
        mask_sc[...] = jnp.where(col <= row,       # additive causal mask, built once
                                 jnp.float32(0.0), jnp.float32(_NEG_INF))

    x = resid_sc[...]                              # (M, C) f32 residual stream

    # --- self-attention sub-block: x = x + proj(MHA(ln1(x))) -----------------
    xn = _ln(x, ln1g_ref[0], ln1b_ref[0]).astype(jnp.bfloat16)
    q = jnp.dot(xn, wqkv_ref[0, 0, :, :], preferred_element_type=jnp.float32) \
        + bqkv_ref[0, 0, :, :]
    k = jnp.dot(xn, wqkv_ref[0, 1, :, :], preferred_element_type=jnp.float32) \
        + bqkv_ref[0, 1, :, :]
    v = jnp.dot(xn, wqkv_ref[0, 2, :, :], preferred_element_type=jnp.float32) \
        + bqkv_ref[0, 2, :, :]

    # head-batched attention: loop over H heads, each dot batched over B
    q3 = (q * scale).reshape(B, T, C)              # fold C**-0.5 into q once
    k3 = k.reshape(B, T, C)
    v3 = v.reshape(B, T, C)
    mask = mask_sc[...]                            # (T, T) additive causal mask

    head_outs = []
    for h in range(H):
        sl = slice(h * hs, (h + 1) * hs)
        qh = q3[:, :, sl]                          # (B, T, hs)
        kh = k3[:, :, sl]
        vh = v3[:, :, sl]
        # q @ k^T batched over B, contracting the head dim (no transposes)
        s = jax.lax.dot_general(qh, kh, (((2,), (2,)), ((0,), (0,))),
                                preferred_element_type=jnp.float32) + mask
        s = s - jnp.max(s, axis=-1, keepdims=True)
        p = jnp.exp(s)
        p = p * pl.reciprocal(jnp.sum(p, axis=-1, keepdims=True), approx=True)
        head_outs.append(
            jax.lax.dot_general(p, vh, (((2,), (1,)), ((0,), (0,))),
                                preferred_element_type=jnp.float32)
            .reshape(M, hs))
    # lane-dense merged head output fed straight into the out-projection
    attn = jnp.concatenate(head_outs, axis=-1)     # (M, C)

    x = x + (jnp.dot(attn.astype(jnp.bfloat16), wo_ref[0],
                     preferred_element_type=jnp.float32) + bo_ref[0])

    # --- feed-forward sub-block: x = x + W2(relu(W1(ln2(x)))) ----------------
    xn2 = _ln(x, ln2g_ref[0], ln2b_ref[0]).astype(jnp.bfloat16)
    h1 = jnp.maximum(
        jnp.dot(xn2, w1_ref[0], preferred_element_type=jnp.float32) + b1_ref[0],
        0.0)
    x = x + (jnp.dot(h1.astype(jnp.bfloat16), w2_ref[0],
                     preferred_element_type=jnp.float32) + b2_ref[0])

    resid_sc[...] = x                              # carry residual to next layer

    # --- fused final LayerNorm + lm_head on the last grid step ---------------
    @pl.when(pl.program_id(0) == pl.num_programs(0) - 1)
    def _final():
        xf = _ln(x, lnfg_ref[...], lnfb_ref[...]).astype(jnp.bfloat16)
        logits_ref[...] = (jnp.dot(xf, lmw_ref[...],
                                   preferred_element_type=jnp.float32)
                           + lmb_ref[...])


# ---- pallas_call wrapper -----------------------------------------------------
def _encoder_call(x, layers, lnf_g, lnf_b, lm_w, lm_b, B, T):
    M, C = x.shape
    VP = lm_w.shape[1]
    kernel = functools.partial(_encoder_kernel, B=B, T=T, H=N_HEAD,
                               hs=HEAD_SIZE, scale=float(N_EMBD) ** (-0.5))

    def lspec(*shape):        # per-layer stacked weight, streamed along L
        n = len(shape)
        return pl.BlockSpec((1,) + shape, lambda l, _n=n: (l,) + (0,) * _n)

    def cspec(shape):         # grid-constant input (fetched once, resident)
        n = len(shape)
        return pl.BlockSpec(shape, lambda l, _n=n: (0,) * _n)

    return pl.pallas_call(
        kernel,
        grid=(N_LAYER,),
        in_specs=[
            cspec((M, C)),                              # tok+pos embedding
            lspec(1, C), lspec(1, C),                   # ln1 gamma, beta
            lspec(3, C, C), lspec(3, 1, C),             # wq/wk/wv (bf16), biases
            lspec(C, C), lspec(1, C),                   # wo (bf16), bo
            lspec(1, C), lspec(1, C),                   # ln2 gamma, beta
            lspec(C, 4 * C), lspec(1, 4 * C),           # w1 (bf16), b1
            lspec(4 * C, C), lspec(1, C),               # w2 (bf16), b2
            cspec((1, C)), cspec((1, C)),               # ln_f gamma, beta
            cspec((C, VP)), cspec((1, VP)),             # lm_head w (bf16), bias
        ],
        out_specs=pl.BlockSpec((M, VP), lambda l: (0, 0)),
        out_shape=jax.ShapeDtypeStruct((M, VP), jnp.float32),
        scratch_shapes=[
            pltpu.VMEM((M, C), jnp.float32),            # resident residual stream
            pltpu.VMEM((T, T), jnp.float32),            # additive causal mask
        ],
        compiler_params=pltpu.CompilerParams(
            dimension_semantics=("arbitrary",),         # layers are sequential
            vmem_limit_bytes=32 * 1024 * 1024),         # safe on v5e/v6e/v7x
    )(x, layers["ln1_g"], layers["ln1_b"], layers["wqkv"], layers["bqkv"],
      layers["wo"], layers["bo"], layers["ln2_g"], layers["ln2_b"],
      layers["w1"], layers["b1"], layers["w2"], layers["b2"],
      lnf_g, lnf_b, lm_w, lm_b)


# ---- parameter initialization (deterministic, synthetic) ---------------------
def _dense_init(key, fan_in, fan_out):
    kw, kb = jax.random.split(key)
    bound = 1.0 / math.sqrt(fan_in)
    w = jax.random.uniform(kw, (fan_in, fan_out), jnp.float32, -bound, bound)
    b = jax.random.uniform(kb, (fan_out,), jnp.float32, -bound, bound)
    return w, b


def init_params(key, vocab_size):
    C = N_EMBD
    keys = jax.random.split(key, 3 + N_LAYER)
    params = {
        "tok_emb": 0.02 * jax.random.normal(keys[0], (vocab_size, C), jnp.float32),
        "pos_emb": 0.02 * jax.random.normal(keys[1], (BLOCK_SIZE, C), jnp.float32),
        "lnf_g": jnp.ones((1, C), jnp.float32),
        "lnf_b": jnp.zeros((1, C), jnp.float32),
    }
    lm_w, lm_b = _dense_init(keys[2], C, vocab_size)
    VP = max(128, ((vocab_size + 127) // 128) * 128)    # lane-dense lm_head
    params["lm_w_pad"] = (jnp.zeros((C, VP), jnp.float32)
                          .at[:, :vocab_size].set(lm_w).astype(jnp.bfloat16))
    params["lm_b_pad"] = jnp.zeros((1, VP), jnp.float32).at[0, :vocab_size].set(lm_b)

    def make_layer(k):
        ks = jax.random.split(k, 6)
        # per-head q/k/v linears concatenated along the output dim
        wq, bq = _dense_init(ks[0], C, N_HEAD * HEAD_SIZE)
        wk, bk = _dense_init(ks[1], C, N_HEAD * HEAD_SIZE)
        wv, bv = _dense_init(ks[2], C, N_HEAD * HEAD_SIZE)
        wo, bo = _dense_init(ks[3], C, C)
        w1, b1 = _dense_init(ks[4], C, 4 * C)
        w2, b2 = _dense_init(ks[5], 4 * C, C)
        return {
            "ln1_g": jnp.ones((1, C), jnp.float32),
            "ln1_b": jnp.zeros((1, C), jnp.float32),
            # matmul weights streamed in bf16 (halves HBM weight DMA)
            "wqkv": jnp.stack([wq, wk, wv], axis=0).astype(jnp.bfloat16),  # (3,C,C)
            "bqkv": jnp.stack([bq, bk, bv], axis=0).reshape(3, 1, C),      # f32
            "wo": wo.astype(jnp.bfloat16), "bo": bo.reshape(1, C),
            "ln2_g": jnp.ones((1, C), jnp.float32),
            "ln2_b": jnp.zeros((1, C), jnp.float32),
            "w1": w1.astype(jnp.bfloat16), "b1": b1.reshape(1, 4 * C),
            "w2": w2.astype(jnp.bfloat16), "b2": b2.reshape(1, C),
        }

    layer_list = [make_layer(keys[3 + l]) for l in range(N_LAYER)]
    # stack all layers along a leading (L, ...) axis -> streamed by BlockSpec
    params["layers"] = {name: jnp.stack([lyr[name] for lyr in layer_list], axis=0)
                        for name in layer_list[0]}
    return params


# ---- Encoder forward ---------------------------------------------------------
def encoder_forward(params, idx):
    B, T = idx.shape
    C = N_EMBD
    tok = jnp.take(params["tok_emb"], idx, axis=0)   # (B, T, C) embedding gather
    pos = params["pos_emb"][:T]                      # (T, C)
    x = (tok + pos).reshape(B * T, C).astype(jnp.float32)

    # all 12 blocks + final LayerNorm + lm_head in a single fused pallas_call
    logits_pad = _encoder_call(x, params["layers"], params["lnf_g"],
                               params["lnf_b"], params["lm_w_pad"],
                               params["lm_b_pad"], B, T)
    vocab = params["tok_emb"].shape[0]
    logits = logits_pad[:, :vocab].reshape(B, T, vocab)
    # targets=None path of the PyTorch module -> loss is None
    return logits, None


if __name__ == "__main__":
    VOCAB_SIZE = 65
    B, T = 2, 16  # small shapes; T <= block_size (128), T a multiple of 8

    key = jax.random.PRNGKey(0)
    k_params, k_idx = jax.random.split(key)
    params = init_params(k_params, VOCAB_SIZE)
    idx = jax.random.randint(k_idx, (B, T), 0, VOCAB_SIZE, dtype=jnp.int32)

    fwd = jax.jit(encoder_forward)
    logits, loss = fwd(params, idx)
    logits = jax.block_until_ready(logits)

    assert logits.shape == (B, T, VOCAB_SIZE)
    assert loss is None
    assert bool(jnp.all(jnp.isfinite(logits)))
    print("KERNEL_OK")
</pallas_src>

<mosaic_0001>
module attributes {stable_mosaic.version = 11 : i64} {
  func.func @_encoder_kernel(%arg0: i32, %arg1: memref<32x192xf32, #tpu.memory_space<vmem>>, %arg2: memref<1x1x192xf32, #tpu.memory_space<vmem>>, %arg3: memref<1x1x192xf32, #tpu.memory_space<vmem>>, %arg4: memref<1x3x192x192xbf16, #tpu.memory_space<vmem>>, %arg5: memref<1x3x1x192xf32, #tpu.memory_space<vmem>>, %arg6: memref<1x192x192xbf16, #tpu.memory_space<vmem>>, %arg7: memref<1x1x192xf32, #tpu.memory_space<vmem>>, %arg8: memref<1x1x192xf32, #tpu.memory_space<vmem>>, %arg9: memref<1x1x192xf32, #tpu.memory_space<vmem>>, %arg10: memref<1x192x768xbf16, #tpu.memory_space<vmem>>, %arg11: memref<1x1x768xf32, #tpu.memory_space<vmem>>, %arg12: memref<1x768x192xbf16, #tpu.memory_space<vmem>>, %arg13: memref<1x1x192xf32, #tpu.memory_space<vmem>>, %arg14: memref<1x192xf32, #tpu.memory_space<vmem>>, %arg15: memref<1x192xf32, #tpu.memory_space<vmem>>, %arg16: memref<192x128xbf16, #tpu.memory_space<vmem>>, %arg17: memref<1x128xf32, #tpu.memory_space<vmem>>, %arg18: memref<32x128xf32, #tpu.memory_space<vmem>>, %arg19: memref<32x192xf32, #tpu.memory_space<vmem>>, %arg20: memref<16x16xf32, #tpu.memory_space<vmem>>) attributes {dimension_semantics = [#tpu.dimension_semantics<arbitrary>], iteration_bounds = array<i64: 12>, scalar_prefetch = 0 : i64, scratch_operands = 2 : i64, tpu.core_type = #tpu.core_type<tc>, window_params = [{pipeline_mode = #tpu.pipeline_mode<synchronous>, transform_indices = @transform_0, window_bounds = array<i64: 32, 192>}, {transform_indices = @transform_1, window_bounds = array<i64: 1, 1, 192>}, {transform_indices = @transform_2, window_bounds = array<i64: 1, 1, 192>}, {transform_indices = @transform_3, window_bounds = array<i64: 1, 3, 192, 192>}, {transform_indices = @transform_4, window_bounds = array<i64: 1, 3, 1, 192>}, {transform_indices = @transform_5, window_bounds = array<i64: 1, 192, 192>}, {transform_indices = @transform_6, window_bounds = array<i64: 1, 1, 192>}, {transform_indices = @transform_7, window_bounds = array<i64: 1, 1, 192>}, {transform_indices = @transform_8, window_bounds = array<i64: 1, 1, 192>}, {transform_indices = @transform_9, window_bounds = array<i64: 1, 192, 768>}, {transform_indices = @transform_10, window_bounds = array<i64: 1, 1, 768>}, {transform_indices = @transform_11, window_bounds = array<i64: 1, 768, 192>}, {transform_indices = @transform_12, window_bounds = array<i64: 1, 1, 192>}, {pipeline_mode = #tpu.pipeline_mode<synchronous>, transform_indices = @transform_13, window_bounds = array<i64: 1, 192>}, {pipeline_mode = #tpu.pipeline_mode<synchronous>, transform_indices = @transform_14, window_bounds = array<i64: 1, 192>}, {pipeline_mode = #tpu.pipeline_mode<synchronous>, transform_indices = @transform_15, window_bounds = array<i64: 192, 128>}, {pipeline_mode = #tpu.pipeline_mode<synchronous>, transform_indices = @transform_16, window_bounds = array<i64: 1, 128>}, {pipeline_mode = #tpu.pipeline_mode<synchronous>, transform_indices = @transform_17, window_bounds = array<i64: 32, 128>}]} {
    %c0_i32 = arith.constant 0 : i32
    %0 = arith.cmpi eq, %arg0, %c0_i32 : i32
    %1 = arith.extui %0 : i1 to i32
    %c0_i32_0 = arith.constant 0 : i32
    %2 = arith.cmpi ne, %1, %c0_i32_0 : i32
    scf.if %2 {
      %c0_124 = arith.constant 0 : index
      %c0_125 = arith.constant 0 : index
      %345 = vector.load %arg1[%c0_124, %c0_125] : memref<32x192xf32, #tpu.memory_space<vmem>>, vector<32x192xf32>
      %c0_126 = arith.constant 0 : index
      %c0_127 = arith.constant 0 : index
      %346 = vector.load %arg19[%c0_126, %c0_127] : memref<32x192xf32, #tpu.memory_space<vmem>>, vector<32x192xf32>
      tpu.vector_store %arg19[%c0_126, %c0_127], %345 {strides = array<i32>} : memref<32x192xf32, #tpu.memory_space<vmem>>, vector<32x192xf32>,
      %347 = tpu.iota {dimensions = array<i32: 0>} : vector<16x16xi32>
      %348 = tpu.iota {dimensions = array<i32: 1>} : vector<16x16xi32>
      %349 = arith.cmpi sle, %348, %347 : vector<16x16xi32>
      %cst_128 = arith.constant 0.000000e+00 : f32
      %cst_129 = arith.constant -1.000000e+30 : f32
      %350 = vector.broadcast %cst_128 : f32 to vector<16x16xf32>
      %351 = vector.broadcast %cst_129 : f32 to vector<16x16xf32>
      %352 = arith.select %349, %350, %351 : vector<16x16xi1>, vector<16x16xf32>
      %c0_130 = arith.constant 0 : index
      %c0_131 = arith.constant 0 : index
      %353 = vector.load %arg20[%c0_130, %c0_131] : memref<16x16xf32, #tpu.memory_space<vmem>>, vector<16x16xf32>
      tpu.vector_store %arg20[%c0_130, %c0_131], %352 {strides = array<i32>} : memref<16x16xf32, #tpu.memory_space<vmem>>, vector<16x16xf32>,
    } else {
    }
    %c0 = arith.constant 0 : index
    %c0_1 = arith.constant 0 : index
    %3 = vector.load %arg19[%c0, %c0_1] : memref<32x192xf32, #tpu.memory_space<vmem>>, vector<32x192xf32>
    %c0_2 = arith.constant 0 : index
    %c0_3 = arith.constant 0 : index
    %c0_4 = arith.constant 0 : index
    %4 = vector.load %arg2[%c0_2, %c0_3, %c0_4] : memref<1x1x192xf32, #tpu.memory_space<vmem>>, vector<1x1x192xf32>
    %5 = vector.shape_cast %4 : vector<1x1x192xf32> to vector<1x192xf32>
    %c0_5 = arith.constant 0 : index
    %c0_6 = arith.constant 0 : index
    %c0_7 = arith.constant 0 : index
    %6 = vector.load %arg3[%c0_5, %c0_6, %c0_7] : memref<1x1x192xf32, #tpu.memory_space<vmem>>, vector<1x1x192xf32>
    %7 = vector.shape_cast %6 : vector<1x1x192xf32> to vector<1x192xf32>
    %cst = arith.constant dense<0.000000e+00> : vector<32xf32>
    %8 = vector.multi_reduction <add>, %3, %cst [1] : vector<32x192xf32> to vector<32xf32>
    %9 = vector.shape_cast %8 : vector<32xf32> to vector<32x1xf32>
    %cst_8 = arith.constant 1.920000e+02 : f32
    %10 = vector.broadcast %cst_8 : f32 to vector<32x1xf32>
    %11 = arith.divf %9, %10 : vector<32x1xf32>
    %12 = vector.broadcast %11 : vector<32x1xf32> to vector<32x192xf32>
    %13 = arith.subf %3, %12 : vector<32x192xf32>
    %14 = arith.mulf %13, %13 : vector<32x192xf32>
    %cst_9 = arith.constant dense<0.000000e+00> : vector<32xf32>
    %15 = vector.multi_reduction <add>, %14, %cst_9 [1] : vector<32x192xf32> to vector<32xf32>
    %16 = vector.shape_cast %15 : vector<32xf32> to vector<32x1xf32>
    %cst_10 = arith.constant 1.920000e+02 : f32
    %17 = vector.broadcast %cst_10 : f32 to vector<32x1xf32>
    %18 = arith.divf %16, %17 : vector<32x1xf32>
    %19 = vector.broadcast %11 : vector<32x1xf32> to vector<32x192xf32>
    %20 = arith.subf %3, %19 : vector<32x192xf32>
    %cst_11 = arith.constant 9.99999974E-6 : f32
    %21 = vector.broadcast %cst_11 : f32 to vector<32x1xf32>
    %22 = arith.addf %18, %21 : vector<32x1xf32>
    %23 = math.rsqrt %22 : vector<32x1xf32>
    %24 = vector.broadcast %23 : vector<32x1xf32> to vector<32x192xf32>
    %25 = arith.mulf %20, %24 : vector<32x192xf32>
    %26 = vector.broadcast %5 : vector<1x192xf32> to vector<32x192xf32>
    %27 = arith.mulf %25, %26 : vector<32x192xf32>
    %28 = vector.broadcast %7 : vector<1x192xf32> to vector<32x192xf32>
    %29 = arith.addf %27, %28 : vector<32x192xf32>
    %30 = arith.truncf %29 : vector<32x192xf32> to vector<32x192xbf16>
    %c0_12 = arith.constant 0 : index
    %c0_13 = arith.constant 0 : index
    %c0_14 = arith.constant 0 : index
    %c0_15 = arith.constant 0 : index
    %31 = vector.load %arg4[%c0_12, %c0_13, %c0_14, %c0_15] : memref<1x3x192x192xbf16, #tpu.memory_space<vmem>>, vector<1x1x192x192xbf16>
    %32 = vector.shape_cast %31 : vector<1x1x192x192xbf16> to vector<192x192xbf16>
    %cst_16 = arith.constant dense<0.000000e+00> : vector<32x192xf32>
    %33 = tpu.matmul %30, %32, %cst_16 {dimension_numbers = #tpu.dot_dimension_numbers<[1], [0], [0], [1], [0, 0, 1, 1], [], []>} : vector<32x192xbf16>, vector<192x192xbf16>, vector<32x192xf32> -> vector<32x192xf32>
    %c0_17 = arith.constant 0 : index
    %c0_18 = arith.constant 0 : index
    %c0_19 = arith.constant 0 : index
    %c0_20 = arith.constant 0 : index
    %34 = vector.load %arg5[%c0_17, %c0_18, %c0_19, %c0_20] : memref<1x3x1x192xf32, #tpu.memory_space<vmem>>, vector<1x1x1x192xf32>
    %35 = vector.shape_cast %34 : vector<1x1x1x192xf32> to vector<1x192xf32>
    %36 = vector.broadcast %35 : vector<1x192xf32> to vector<32x192xf32>
    %37 = arith.addf %33, %36 : vector<32x192xf32>
    %c0_21 = arith.constant 0 : index
    %c1 = arith.constant 1 : index
    %c0_22 = arith.constant 0 : index
    %c0_23 = arith.constant 0 : index
    %38 = vector.load %arg4[%c0_21, %c1, %c0_22, %c0_23] : memref<1x3x192x192xbf16, #tpu.memory_space<vmem>>, vector<1x1x192x192xbf16>
    %39 = vector.shape_cast %38 : vector<1x1x192x192xbf16> to vector<192x192xbf16>
    %cst_24 = arith.constant dense<0.000000e+00> : vector<32x192xf32>
    %40 = tpu.matmul %30, %39, %cst_24 {dimension_numbers = #tpu.dot_dimension_numbers<[1], [0], [0], [1], [0, 0, 1, 1], [], []>} : vector<32x192xbf16>, vector<192x192xbf16>, vector<32x192xf32> -> vector<32x192xf32>
    %c0_25 = arith.constant 0 : index
    %c1_26 = arith.constant 1 : index
    %c0_27 = arith.constant 0 : index
    %c0_28 = arith.constant 0 : index
    %41 = vector.load %arg5[%c0_25, %c1_26, %c0_27, %c0_28] : memref<1x3x1x192xf32, #tpu.memory_space<vmem>>, vector<1x1x1x192xf32>
    %42 = vector.shape_cast %41 : vector<1x1x1x192xf32> to vector<1x192xf32>
    %43 = vector.broadcast %42 : vector<1x192xf32> to vector<32x192xf32>
    %44 = arith.addf %40, %43 : vector<32x192xf32>
    %c0_29 = arith.constant 0 : index
    %c2 = arith.constant 2 : index
    %c0_30 = arith.constant 0 : index
    %c0_31 = arith.constant 0 : index
    %45 = vector.load %arg4[%c0_29, %c2, %c0_30, %c0_31] : memref<1x3x192x192xbf16, #tpu.memory_space<vmem>>, vector<1x1x192x192xbf16>
    %46 = vector.shape_cast %45 : vector<1x1x192x192xbf16> to vector<192x192xbf16>
    %cst_32 = arith.constant dense<0.000000e+00> : vector<32x192xf32>
    %47 = tpu.matmul %30, %46, %cst_32 {dimension_numbers = #tpu.dot_dimension_numbers<[1], [0], [0], [1], [0, 0, 1, 1], [], []>} : vector<32x192xbf16>, vector<192x192xbf16>, vector<32x192xf32> -> vector<32x192xf32>
    %c0_33 = arith.constant 0 : index
    %c2_34 = arith.constant 2 : index
    %c0_35 = arith.constant 0 : index
    %c0_36 = arith.constant 0 : index
    %48 = vector.load %arg5[%c0_33, %c2_34, %c0_35, %c0_36] : memref<1x3x1x192xf32, #tpu.memory_space<vmem>>, vector<1x1x1x192xf32>
    %49 = vector.shape_cast %48 : vector<1x1x1x192xf32> to vector<1x192xf32>
    %50 = vector.broadcast %49 : vector<1x192xf32> to vector<32x192xf32>
    %51 = arith.addf %47, %50 : vector<32x192xf32>
    %cst_37 = arith.constant 0.0721687824 : f32
    %52 = vector.broadcast %cst_37 : f32 to vector<32x192xf32>
    %53 = arith.mulf %37, %52 : vector<32x192xf32>
    %54 = vector.shape_cast %53 : vector<32x192xf32> to vector<2x16x192xf32>
    %55 = vector.shape_cast %44 : vector<32x192xf32> to vector<2x16x192xf32>
    %56 = vector.shape_cast %51 : vector<32x192xf32> to vector<2x16x192xf32>
    %c0_38 = arith.constant 0 : index
    %c0_39 = arith.constant 0 : index
    %57 = vector.load %arg20[%c0_38, %c0_39] : memref<16x16xf32, #tpu.memory_space<vmem>>, vector<16x16xf32>
    %58 = vector.extract_strided_slice %54 {offsets = [0, 0, 0], sizes = [2, 16, 16], strides = [1, 1, 1]} : vector<2x16x192xf32> to vector<2x16x16xf32>
    %59 = vector.extract_strided_slice %55 {offsets = [0, 0, 0], sizes = [2, 16, 16], strides = [1, 1, 1]} : vector<2x16x192xf32> to vector<2x16x16xf32>
    %60 = vector.extract_strided_slice %56 {offsets = [0, 0, 0], sizes = [2, 16, 16], strides = [1, 1, 1]} : vector<2x16x192xf32> to vector<2x16x16xf32>
    %cst_40 = arith.constant dense<0.000000e+00> : vector<2x16x16xf32>
    %61 = tpu.matmul %58, %59, %cst_40 {dimension_numbers = #tpu.dot_dimension_numbers<[2], [2], [1], [1], [0, 0, 0, 1, 1, 1], [0], [0]>} : vector<2x16x16xf32>, vector<2x16x16xf32>, vector<2x16x16xf32> -> vector<2x16x16xf32>
    %62 = vector.shape_cast %57 : vector<16x16xf32> to vector<1x16x16xf32>
    %63 = vector.broadcast %62 : vector<1x16x16xf32> to vector<2x16x16xf32>
    %64 = arith.addf %61, %63 : vector<2x16x16xf32>
    %cst_41 = arith.constant dense<0xFF800000> : vector<2x16xf32>
    %65 = vector.multi_reduction <maximumf>, %64, %cst_41 [2] : vector<2x16x16xf32> to vector<2x16xf32>
    %66 = vector.shape_cast %65 : vector<2x16xf32> to vector<2x16x1xf32>
    %67 = vector.broadcast %66 : vector<2x16x1xf32> to vector<2x16x16xf32>
    %68 = arith.subf %64, %67 : vector<2x16x16xf32>
    %69 = math.exp %68 : vector<2x16x16xf32>
    %cst_42 = arith.constant dense<0.000000e+00> : vector<2x16xf32>
    %70 = vector.multi_reduction <add>, %69, %cst_42 [2] : vector<2x16x16xf32> to vector<2x16xf32>
    %71 = vector.shape_cast %70 : vector<2x16xf32> to vector<2x16x1xf32>
    %72 = tpu.reciprocal %71 {approx = true} : vector<2x16x1xf32> -> vector<2x16x1xf32>
    %73 = vector.broadcast %72 : vector<2x16x1xf32> to vector<2x16x16xf32>
    %74 = arith.mulf %69, %73 : vector<2x16x16xf32>
    %cst_43 = arith.constant dense<0.000000e+00> : vector<2x16x16xf32>
    %75 = tpu.matmul %74, %60, %cst_43 {dimension_numbers = #tpu.dot_dimension_numbers<[2], [1], [1], [2], [0, 0, 0, 1, 1, 2], [0], [0]>} : vector<2x16x16xf32>, vector<2x16x16xf32>, vector<2x16x16xf32> -> vector<2x16x16xf32>
    %76 = vector.shape_cast %75 : vector<2x16x16xf32> to vector<32x16xf32>
    %77 = vector.extract_strided_slice %54 {offsets = [0, 0, 16], sizes = [2, 16, 16], strides = [1, 1, 1]} : vector<2x16x192xf32> to vector<2x16x16xf32>
    %78 = vector.extract_strided_slice %55 {offsets = [0, 0, 16], sizes = [2, 16, 16], strides = [1, 1, 1]} : vector<2x16x192xf32> to vector<2x16x16xf32>
    %79 = vector.extract_strided_slice %56 {offsets = [0, 0, 16], sizes = [2, 16, 16], strides = [1, 1, 1]} : vector<2x16x192xf32> to vector<2x16x16xf32>
    %cst_44 = arith.constant dense<0.000000e+00> : vector<2x16x16xf32>
    %80 = tpu.matmul %77, %78, %cst_44 {dimension_numbers = #tpu.dot_dimension_numbers<[2], [2], [1], [1], [0, 0, 0, 1, 1, 1], [0], [0]>} : vector<2x16x16xf32>, vector<2x16x16xf32>, vector<2x16x16xf32> -> vector<2x16x16xf32>
    %81 = vector.shape_cast %57 : vector<16x16xf32> to vector<1x16x16xf32>
    %82 = vector.broadcast %81 : vector<1x16x16xf32> to vector<2x16x16xf32>
    %83 = arith.addf %80, %82 : vector<2x16x16xf32>
    %cst_45 = arith.constant dense<0xFF800000> : vector<2x16xf32>
    %84 = vector.multi_reduction <maximumf>, %83, %cst_45 [2] : vector<2x16x16xf32> to vector<2x16xf32>
    %85 = vector.shape_cast %84 : vector<2x16xf32> to vector<2x16x1xf32>
    %86 = vector.broadcast %85 : vector<2x16x1xf32> to vector<2x16x16xf32>
    %87 = arith.subf %83, %86 : vector<2x16x16xf32>
    %88 = math.exp %87 : vector<2x16x16xf32>
    %cst_46 = arith.constant dense<0.000000e+00> : vector<2x16xf32>
    %89 = vector.multi_reduction <add>, %88, %cst_46 [2] : vector<2x16x16xf32> to vector<2x16xf32>
    %90 = vector.shape_cast %89 : vector<2x16xf32> to vector<2x16x1xf32>
    %91 = tpu.reciprocal %90 {approx = true} : vector<2x16x1xf32> -> vector<2x16x1xf32>
    %92 = vector.broadcast %91 : vector<2x16x1xf32> to vector<2x16x16xf32>
    %93 = arith.mulf %88, %92 : vector<2x16x16xf32>
    %cst_47 = arith.constant dense<0.000000e+00> : vector<2x16x16xf32>
    %94 = tpu.matmul %93, %79, %cst_47 {dimension_numbers = #tpu.dot_dimension_numbers<[2], [1], [1], [2], [0, 0, 0, 1, 1, 2], [0], [0]>} : vector<2x16x16xf32>, vector<2x16x16xf32>, vector<2x16x16xf32> -> vector<2x16x16xf32>
    %95 = vector.shape_cast %94 : vector<2x16x16xf32> to vector<32x16xf32>
    %96 = vector.extract_strided_slice %54 {offsets = [0, 0, 32], sizes = [2, 16, 16], strides = [1, 1, 1]} : vector<2x16x192xf32> to vector<2x16x16xf32>
    %97 = vector.extract_strided_slice %55 {offsets = [0, 0, 32], sizes = [2, 16, 16], strides = [1, 1, 1]} : vector<2x16x192xf32> to vector<2x16x16xf32>
    %98 = vector.extract_strided_slice %56 {offsets = [0, 0, 32], sizes = [2, 16, 16], strides = [1, 1, 1]} : vector<2x16x192xf32> to vector<2x16x16xf32>
    %cst_48 = arith.constant dense<0.000000e+00> : vector<2x16x16xf32>
    %99 = tpu.matmul %96, %97, %cst_48 {dimension_numbers = #tpu.dot_dimension_numbers<[2], [2], [1], [1], [0, 0, 0, 1, 1, 1], [0], [0]>} : vector<2x16x16xf32>, vector<2x16x16xf32>, vector<2x16x16xf32> -> vector<2x16x16xf32>
    %100 = vector.shape_cast %57 : vector<16x16xf32> to vector<1x16x16xf32>
    %101 = vector.broadcast %100 : vector<1x16x16xf32> to vector<2x16x16xf32>
    %102 = arith.addf %99, %101 : vector<2x16x16xf32>
    %cst_49 = arith.constant dense<0xFF800000> : vector<2x16xf32>
    %103 = vector.multi_reduction <maximumf>, %102, %cst_49 [2] : vector<2x16x16xf32> to vector<2x16xf32>
    %104 = vector.shape_cast %103 : vector<2x16xf32> to vector<2x16x1xf32>
    %105 = vector.broadcast %104 : vector<2x16x1xf32> to vector<2x16x16xf32>
    %106 = arith.subf %102, %105 : vector<2x16x16xf32>
    %107 = math.exp %106 : vector<2x16x16xf32>
    %cst_50 = arith.constant dense<0.000000e+00> : vector<2x16xf32>
    %108 = vector.multi_reduction <add>, %107, %cst_50 [2] : vector<2x16x16xf32> to vector<2x16xf32>
    %109 = vector.shape_cast %108 : vector<2x16xf32> to vector<2x16x1xf32>
    %110 = tpu.reciprocal %109 {approx = true} : vector<2x16x1xf32> -> vector<2x16x1xf32>
    %111 = vector.broadcast %110 : vector<2x16x1xf32> to vector<2x16x16xf32>
    %112 = arith.mulf %107, %111 : vector<2x16x16xf32>
    %cst_51 = arith.constant dense<0.000000e+00> : vector<2x16x16xf32>
    %113 = tpu.matmul %112, %98, %cst_51 {dimension_numbers = #tpu.dot_dimension_numbers<[2], [1], [1], [2], [0, 0, 0, 1, 1, 2], [0], [0]>} : vector<2x16x16xf32>, vector<2x16x16xf32>, vector<2x16x16xf32> -> vector<2x16x16xf32>
    %114 = vector.shape_cast %113 : vector<2x16x16xf32> to vector<32x16xf32>
    %115 = vector.extract_strided_slice %54 {offsets = [0, 0, 48], sizes = [2, 16, 16], strides = [1, 1, 1]} : vector<2x16x192xf32> to vector<2x16x16xf32>
    %116 = vector.extract_strided_slice %55 {offsets = [0, 0, 48], sizes = [2, 16, 16], strides = [1, 1, 1]} : vector<2x16x192xf32> to vector<2x16x16xf32>
    %117 = vector.extract_strided_slice %56 {offsets = [0, 0, 48], sizes = [2, 16, 16], strides = [1, 1, 1]} : vector<2x16x192xf32> to vector<2x16x16xf32>
    %cst_52 = arith.constant dense<0.000000e+00> : vector<2x16x16xf32>
    %118 = tpu.matmul %115, %116, %cst_52 {dimension_numbers = #tpu.dot_dimension_numbers<[2], [2], [1], [1], [0, 0, 0, 1, 1, 1], [0], [0]>} : vector<2x16x16xf32>, vector<2x16x16xf32>, vector<2x16x16xf32> -> vector<2x16x16xf32>
    %119 = vector.shape_cast %57 : vector<16x16xf32> to vector<1x16x16xf32>
    %120 = vector.broadcast %119 : vector<1x16x16xf32> to vector<2x16x16xf32>
    %121 = arith.addf %118, %120 : vector<2x16x16xf32>
    %cst_53 = arith.constant dense<0xFF800000> : vector<2x16xf32>
    %122 = vector.multi_reduction <maximumf>, %121, %cst_53 [2] : vector<2x16x16xf32> to vector<2x16xf32>
    %123 = vector.shape_cast %122 : vector<2x16xf32> to vector<2x16x1xf32>
    %124 = vector.broadcast %123 : vector<2x16x1xf32> to vector<2x16x16xf32>
    %125 = arith.subf %121, %124 : vector<2x16x16xf32>
    %126 = math.exp %125 : vector<2x16x16xf32>
    %cst_54 = arith.constant dense<0.000000e+00> : vector<2x16xf32>
    %127 = vector.multi_reduction <add>, %126, %cst_54 [2] : vector<2x16x16xf32> to vector<2x16xf32>
    %128 = vector.shape_cast %127 : vector<2x16xf32> to vector<2x16x1xf32>
    %129 = tpu.reciprocal %128 {approx = true} : vector<2x16x1xf32> -> vector<2x16x1xf32>
    %130 = vector.broadcast %129 : vector<2x16x1xf32> to vector<2x16x16xf32>
    %131 = arith.mulf %126, %130 : vector<2x16x16xf32>
    %cst_55 = arith.constant dense<0.000000e+00> : vector<2x16x16xf32>
    %132 = tpu.matmul %131, %117, %cst_55 {dimension_numbers = #tpu.dot_dimension_numbers<[2], [1], [1], [2], [0, 0, 0, 1, 1, 2], [0], [0]>} : vector<2x16x16xf32>, vector<2x16x16xf32>, vector<2x16x16xf32> -> vector<2x16x16xf32>
    %133 = vector.shape_cast %132 : vector<2x16x16xf32> to vector<32x16xf32>
    %134 = vector.extract_strided_slice %54 {offsets = [0, 0, 64], sizes = [2, 16, 16], strides = [1, 1, 1]} : vector<2x16x192xf32> to vector<2x16x16xf32>
    %135 = vector.extract_strided_slice %55 {offsets = [0, 0, 64], sizes = [2, 16, 16], strides = [1, 1, 1]} : vector<2x16x192xf32> to vector<2x16x16xf32>
    %136 = vector.extract_strided_slice %56 {offsets = [0, 0, 64], sizes = [2, 16, 16], strides = [1, 1, 1]} : vector<2x16x192xf32> to vector<2x16x16xf32>
    %cst_56 = arith.constant dense<0.000000e+00> : vector<2x16x16xf32>
    %137 = tpu.matmul %134, %135, %cst_56 {dimension_numbers = #tpu.dot_dimension_numbers<[2], [2], [1], [1], [0, 0, 0, 1, 1, 1], [0], [0]>} : vector<2x16x16xf32>, vector<2x16x16xf32>, vector<2x16x16xf32> -> vector<2x16x16xf32>
    %138 = vector.shape_cast %57 : vector<16x16xf32> to vector<1x16x16xf32>
    %139 = vector.broadcast %138 : vector<1x16x16xf32> to vector<2x16x16xf32>
    %140 = arith.addf %137, %139 : vector<2x16x16xf32>
    %cst_57 = arith.constant dense<0xFF800000> : vector<2x16xf32>
    %141 = vector.multi_reduction <maximumf>, %140, %cst_57 [2] : vector<2x16x16xf32> to vector<2x16xf32>
    %142 = vector.shape_cast %141 : vector<2x16xf32> to vector<2x16x1xf32>
    %143 = vector.broadcast %142 : vector<2x16x1xf32> to vector<2x16x16xf32>
    %144 = arith.subf %140, %143 : vector<2x16x16xf32>
    %145 = math.exp %144 : vector<2x16x16xf32>
    %cst_58 = arith.constant dense<0.000000e+00> : vector<2x16xf32>
    %146 = vector.multi_reduction <add>, %145, %cst_58 [2] : vector<2x16x16xf32> to vector<2x16xf32>
    %147 = vector.shape_cast %146 : vector<2x16xf32> to vector<2x16x1xf32>
    %148 = tpu.reciprocal %147 {approx = true} : vector<2x16x1xf32> -> vector<2x16x1xf32>
    %149 = vector.broadcast %148 : vector<2x16x1xf32> to vector<2x16x16xf32>
    %150 = arith.mulf %145, %149 : vector<2x16x16xf32>
    %cst_59 = arith.constant dense<0.000000e+00> : vector<2x16x16xf32>
    %151 = tpu.matmul %150, %136, %cst_59 {dimension_numbers = #tpu.dot_dimension_numbers<[2], [1], [1], [2], [0, 0, 0, 1, 1, 2], [0], [0]>} : vector<2x16x16xf32>, vector<2x16x16xf32>, vector<2x16x16xf32> -> vector<2x16x16xf32>
    %152 = vector.shape_cast %151 : vector<2x16x16xf32> to vector<32x16xf32>
    %153 = vector.extract_strided_slice %54 {offsets = [0, 0, 80], sizes = [2, 16, 16], strides = [1, 1, 1]} : vector<2x16x192xf32> to vector<2x16x16xf32>
    %154 = vector.extract_strided_slice %55 {offsets = [0, 0, 80], sizes = [2, 16, 16], strides = [1, 1, 1]} : vector<2x16x192xf32> to vector<2x16x16xf32>
    %155 = vector.extract_strided_slice %56 {offsets = [0, 0, 80], sizes = [2, 16, 16], strides = [1, 1, 1]} : vector<2x16x192xf32> to vector<2x16x16xf32>
    %cst_60 = arith.constant dense<0.000000e+00> : vector<2x16x16xf32>
    %156 = tpu.matmul %153, %154, %cst_60 {dimension_numbers = #tpu.dot_dimension_numbers<[2], [2], [1], [1], [0, 0, 0, 1, 1, 1], [0], [0]>} : vector<2x16x16xf32>, vector<2x16x16xf32>, vector<2x16x16xf32> -> vector<2x16x16xf32>
    %157 = vector.shape_cast %57 : vector<16x16xf32> to vector<1x16x16xf32>
    %158 = vector.broadcast %157 : vector<1x16x16xf32> to vector<2x16x16xf32>
    %159 = arith.addf %156, %158 : vector<2x16x16xf32>
    %cst_61 = arith.constant dense<0xFF800000> : vector<2x16xf32>
    %160 = vector.multi_reduction <maximumf>, %159, %cst_61 [2] : vector<2x16x16xf32> to vector<2x16xf32>
    %161 = vector.shape_cast %160 : vector<2x16xf32> to vector<2x16x1xf32>
    %162 = vector.broadcast %161 : vector<2x16x1xf32> to vector<2x16x16xf32>
    %163 = arith.subf %159, %162 : vector<2x16x16xf32>
    %164 = math.exp %163 : vector<2x16x16xf32>
    %cst_62 = arith.constant dense<0.000000e+00> : vector<2x16xf32>
    %165 = vector.multi_reduction <add>, %164, %cst_62 [2] : vector<2x16x16xf32> to vector<2x16xf32>
    %166 = vector.shape_cast %165 : vector<2x16xf32> to vector<2x16x1xf32>
    %167 = tpu.reciprocal %166 {approx = true} : vector<2x16x1xf32> -> vector<2x16x1xf32>
    %168 = vector.broadcast %167 : vector<2x16x1xf32> to vector<2x16x16xf32>
    %169 = arith.mulf %164, %168 : vector<2x16x16xf32>
    %cst_63 = arith.constant dense<0.000000e+00> : vector<2x16x16xf32>
    %170 = tpu.matmul %169, %155, %cst_63 {dimension_numbers = #tpu.dot_dimension_numbers<[2], [1], [1], [2], [0, 0, 0, 1, 1, 2], [0], [0]>} : vector<2x16x16xf32>, vector<2x16x16xf32>, vector<2x16x16xf32> -> vector<2x16x16xf32>
    %171 = vector.shape_cast %170 : vector<2x16x16xf32> to vector<32x16xf32>
    %172 = vector.extract_strided_slice %54 {offsets = [0, 0, 96], sizes = [2, 16, 16], strides = [1, 1, 1]} : vector<2x16x192xf32> to vector<2x16x16xf32>
    %173 = vector.extract_strided_slice %55 {offsets = [0, 0, 96], sizes = [2, 16, 16], strides = [1, 1, 1]} : vector<2x16x192xf32> to vector<2x16x16xf32>
    %174 = vector.extract_strided_slice %56 {offsets = [0, 0, 96], sizes = [2, 16, 16], strides = [1, 1, 1]} : vector<2x16x192xf32> to vector<2x16x16xf32>
    %cst_64 = arith.constant dense<0.000000e+00> : vector<2x16x16xf32>
    %175 = tpu.matmul %172, %173, %cst_64 {dimension_numbers = #tpu.dot_dimension_numbers<[2], [2], [1], [1], [0, 0, 0, 1, 1, 1], [0], [0]>} : vector<2x16x16xf32>, vector<2x16x16xf32>, vector<2x16x16xf32> -> vector<2x16x16xf32>
    %176 = vector.shape_cast %57 : vector<16x16xf32> to vector<1x16x16xf32>
    %177 = vector.broadcast %176 : vector<1x16x16xf32> to vector<2x16x16xf32>
    %178 = arith.addf %175, %177 : vector<2x16x16xf32>
    %cst_65 = arith.constant dense<0xFF800000> : vector<2x16xf32>
    %179 = vector.multi_reduction <maximumf>, %178, %cst_65 [2] : vector<2x16x16xf32> to vector<2x16xf32>
    %180 = vector.shape_cast %179 : vector<2x16xf32> to vector<2x16x1xf32>
    %181 = vector.broadcast %180 : vector<2x16x1xf32> to vector<2x16x16xf32>
    %182 = arith.subf %178, %181 : vector<2x16x16xf32>
    %183 = math.exp %182 : vector<2x16x16xf32>
    %cst_66 = arith.constant dense<0.000000e+00> : vector<2x16xf32>
    %184 = vector.multi_reduction <add>, %183, %cst_66 [2] : vector<2x16x16xf32> to vector<2x16xf32>
    %185 = vector.shape_cast %184 : vector<2x16xf32> to vector<2x16x1xf32>
    %186 = tpu.reciprocal %185 {approx = true} : vector<2x16x1xf32> -> vector<2x16x1xf32>
    %187 = vector.broadcast %186 : vector<2x16x1xf32> to vector<2x16x16xf32>
    %188 = arith.mulf %183, %187 : vector<2x16x16xf32>
    %cst_67 = arith.constant dense<0.000000e+00> : vector<2x16x16xf32>
    %189 = tpu.matmul %188, %174, %cst_67 {dimension_numbers = #tpu.dot_dimension_numbers<[2], [1], [1], [2], [0, 0, 0, 1, 1, 2], [0], [0]>} : vector<2x16x16xf32>, vector<2x16x16xf32>, vector<2x16x16xf32> -> vector<2x16x16xf32>
    %190 = vector.shape_cast %189 : vector<2x16x16xf32> to vector<32x16xf32>
    %191 = vector.extract_strided_slice %54 {offsets = [0, 0, 112], sizes = [2, 16, 16], strides = [1, 1, 1]} : vector<2x16x192xf32> to vector<2x16x16xf32>
    %192 = vector.extract_strided_slice %55 {offsets = [0, 0, 112], sizes = [2, 16, 16], strides = [1, 1, 1]} : vector<2x16x192xf32> to vector<2x16x16xf32>
    %193 = vector.extract_strided_slice %56 {offsets = [0, 0, 112], sizes = [2, 16, 16], strides = [1, 1, 1]} : vector<2x16x192xf32> to vector<2x16x16xf32>
    %cst_68 = arith.constant dense<0.000000e+00> : vector<2x16x16xf32>
    %194 = tpu.matmul %191, %192, %cst_68 {dimension_numbers = #tpu.dot_dimension_numbers<[2], [2], [1], [1], [0, 0, 0, 1, 1, 1], [0], [0]>} : vector<2x16x16xf32>, vector<2x16x16xf32>, vector<2x16x16xf32> -> vector<2x16x16xf32>
    %195 = vector.shape_cast %57 : vector<16x16xf32> to vector<1x16x16xf32>
    %196 = vector.broadcast %195 : vector<1x16x16xf32> to vector<2x16x16xf32>
    %197 = arith.addf %194, %196 : vector<2x16x16xf32>
    %cst_69 = arith.constant dense<0xFF800000> : vector<2x16xf32>
    %198 = vector.multi_reduction <maximumf>, %197, %cst_69 [2] : vector<2x16x16xf32> to vector<2x16xf32>
    %199 = vector.shape_cast %198 : vector<2x16xf32> to vector<2x16x1xf32>
    %200 = vector.broadcast %199 : vector<2x16x1xf32> to vector<2x16x16xf32>
    %201 = arith.subf %197, %200 : vector<2x16x16xf32>
    %202 = math.exp %201 : vector<2x16x16xf32>
    %cst_70 = arith.constant dense<0.000000e+00> : vector<2x16xf32>
    %203 = vector.multi_reduction <add>, %202, %cst_70 [2] : vector<2x16x16xf32> to vector<2x16xf32>
    %204 = vector.shape_cast %203 : vector<2x16xf32> to vector<2x16x1xf32>
    %205 = tpu.reciprocal %204 {approx = true} : vector<2x16x1xf32> -> vector<2x16x1xf32>
    %206 = vector.broadcast %205 : vector<2x16x1xf32> to vector<2x16x16xf32>
    %207 = arith.mulf %202, %206 : vector<2x16x16xf32>
    %cst_71 = arith.constant dense<0.000000e+00> : vector<2x16x16xf32>
    %208 = tpu.matmul %207, %193, %cst_71 {dimension_numbers = #tpu.dot_dimension_numbers<[2], [1], [1], [2], [0, 0, 0, 1, 1, 2], [0], [0]>} : vector<2x16x16xf32>, vector<2x16x16xf32>, vector<2x16x16xf32> -> vector<2x16x16xf32>
    %209 = vector.shape_cast %208 : vector<2x16x16xf32> to vector<32x16xf32>
    %210 = vector.extract_strided_slice %54 {offsets = [0, 0, 128], sizes = [2, 16, 16], strides = [1, 1, 1]} : vector<2x16x192xf32> to vector<2x16x16xf32>
    %211 = vector.extract_strided_slice %55 {offsets = [0, 0, 128], sizes = [2, 16, 16], strides = [1, 1, 1]} : vector<2x16x192xf32> to vector<2x16x16xf32>
    %212 = vector.extract_strided_slice %56 {offsets = [0, 0, 128], sizes = [2, 16, 16], strides = [1, 1, 1]} : vector<2x16x192xf32> to vector<2x16x16xf32>
    %cst_72 = arith.constant dense<0.000000e+00> : vector<2x16x16xf32>
    %213 = tpu.matmul %210, %211, %cst_72 {dimension_numbers = #tpu.dot_dimension_numbers<[2], [2], [1], [1], [0, 0, 0, 1, 1, 1], [0], [0]>} : vector<2x16x16xf32>, vector<2x16x16xf32>, vector<2x16x16xf32> -> vector<2x16x16xf32>
    %214 = vector.shape_cast %57 : vector<16x16xf32> to vector<1x16x16xf32>
    %215 = vector.broadcast %214 : vector<1x16x16xf32> to vector<2x16x16xf32>
    %216 = arith.addf %213, %215 : vector<2x16x16xf32>
    %cst_73 = arith.constant dense<0xFF800000> : vector<2x16xf32>
    %217 = vector.multi_reduction <maximumf>, %216, %cst_73 [2] : vector<2x16x16xf32> to vector<2x16xf32>
    %218 = vector.shape_cast %217 : vector<2x16xf32> to vector<2x16x1xf32>
    %219 = vector.broadcast %218 : vector<2x16x1xf32> to vector<2x16x16xf32>
    %220 = arith.subf %216, %219 : vector<2x16x16xf32>
    %221 = math.exp %220 : vector<2x16x16xf32>
    %cst_74 = arith.constant dense<0.000000e+00> : vector<2x16xf32>
    %222 = vector.multi_reduction <add>, %221, %cst_74 [2] : vector<2x16x16xf32> to vector<2x16xf32>
    %223 = vector.shape_cast %222 : vector<2x16xf32> to vector<2x16x1xf32>
    %224 = tpu.reciprocal %223 {approx = true} : vector<2x16x1xf32> -> vector<2x16x1xf32>
    %225 = vector.broadcast %224 : vector<2x16x1xf32> to vector<2x16x16xf32>
    %226 = arith.mulf %221, %225 : vector<2x16x16xf32>
    %cst_75 = arith.constant dense<0.000000e+00> : vector<2x16x16xf32>
    %227 = tpu.matmul %226, %212, %cst_75 {dimension_numbers = #tpu.dot_dimension_numbers<[2], [1], [1], [2], [0, 0, 0, 1, 1, 2], [0], [0]>} : vector<2x16x16xf32>, vector<2x16x16xf32>, vector<2x16x16xf32> -> vector<2x16x16xf32>
    %228 = vector.shape_cast %227 : vector<2x16x16xf32> to vector<32x16xf32>
    %229 = vector.extract_strided_slice %54 {offsets = [0, 0, 144], sizes = [2, 16, 16], strides = [1, 1, 1]} : vector<2x16x192xf32> to vector<2x16x16xf32>
    %230 = vector.extract_strided_slice %55 {offsets = [0, 0, 144], sizes = [2, 16, 16], strides = [1, 1, 1]} : vector<2x16x192xf32> to vector<2x16x16xf32>
    %231 = vector.extract_strided_slice %56 {offsets = [0, 0, 144], sizes = [2, 16, 16], strides = [1, 1, 1]} : vector<2x16x192xf32> to vector<2x16x16xf32>
    %cst_76 = arith.constant dense<0.000000e+00> : vector<2x16x16xf32>
    %232 = tpu.matmul %229, %230, %cst_76 {dimension_numbers = #tpu.dot_dimension_numbers<[2], [2], [1], [1], [0, 0, 0, 1, 1, 1], [0], [0]>} : vector<2x16x16xf32>, vector<2x16x16xf32>, vector<2x16x16xf32> -> vector<2x16x16xf32>
    %233 = vector.shape_cast %57 : vector<16x16xf32> to vector<1x16x16xf32>
    %234 = vector.broadcast %233 : vector<1x16x16xf32> to vector<2x16x16xf32>
    %235 = arith.addf %232, %234 : vector<2x16x16xf32>
    %cst_77 = arith.constant dense<0xFF800000> : vector<2x16xf32>
    %236 = vector.multi_reduction <maximumf>, %235, %cst_77 [2] : vector<2x16x16xf32> to vector<2x16xf32>
    %237 = vector.shape_cast %236 : vector<2x16xf32> to vector<2x16x1xf32>
    %238 = vector.broadcast %237 : vector<2x16x1xf32> to vector<2x16x16xf32>
    %239 = arith.subf %235, %238 : vector<2x16x16xf32>
    %240 = math.exp %239 : vector<2x16x16xf32>
    %cst_78 = arith.constant dense<0.000000e+00> : vector<2x16xf32>
    %241 = vector.multi_reduction <add>, %240, %cst_78 [2] : vector<2x16x16xf32> to vector<2x16xf32>
    %242 = vector.shape_cast %241 : vector<2x16xf32> to vector<2x16x1xf32>
    %243 = tpu.reciprocal %242 {approx = true} : vector<2x16x1xf32> -> vector<2x16x1xf32>
    %244 = vector.broadcast %243 : vector<2x16x1xf32> to vector<2x16x16xf32>
    %245 = arith.mulf %240, %244 : vector<2x16x16xf32>
    %cst_79 = arith.constant dense<0.000000e+00> : vector<2x16x16xf32>
    %246 = tpu.matmul %245, %231, %cst_79 {dimension_numbers = #tpu.dot_dimension_numbers<[2], [1], [1], [2], [0, 0, 0, 1, 1, 2], [0], [0]>} : vector<2x16x16xf32>, vector<2x16x16xf32>, vector<2x16x16xf32> -> vector<2x16x16xf32>
    %247 = vector.shape_cast %246 : vector<2x16x16xf32> to vector<32x16xf32>
    %248 = vector.extract_strided_slice %54 {offsets = [0, 0, 160], sizes = [2, 16, 16], strides = [1, 1, 1]} : vector<2x16x192xf32> to vector<2x16x16xf32>
    %249 = vector.extract_strided_slice %55 {offsets = [0, 0, 160], sizes = [2, 16, 16], strides = [1, 1, 1]} : vector<2x16x192xf32> to vector<2x16x16xf32>
    %250 = vector.extract_strided_slice %56 {offsets = [0, 0, 160], sizes = [2, 16, 16], strides = [1, 1, 1]} : vector<2x16x192xf32> to vector<2x16x16xf32>
    %cst_80 = arith.constant dense<0.000000e+00> : vector<2x16x16xf32>
    %251 = tpu.matmul %248, %249, %cst_80 {dimension_numbers = #tpu.dot_dimension_numbers<[2], [2], [1], [1], [0, 0, 0, 1, 1, 1], [0], [0]>} : vector<2x16x16xf32>, vector<2x16x16xf32>, vector<2x16x16xf32> -> vector<2x16x16xf32>
    %252 = vector.shape_cast %57 : vector<16x16xf32> to vector<1x16x16xf32>
    %253 = vector.broadcast %252 : vector<1x16x16xf32> to vector<2x16x16xf32>
    %254 = arith.addf %251, %253 : vector<2x16x16xf32>
    %cst_81 = arith.constant dense<0xFF800000> : vector<2x16xf32>
    %255 = vector.multi_reduction <maximumf>, %254, %cst_81 [2] : vector<2x16x16xf32> to vector<2x16xf32>
    %256 = vector.shape_cast %255 : vector<2x16xf32> to vector<2x16x1xf32>
    %257 = vector.broadcast %256 : vector<2x16x1xf32> to vector<2x16x16xf32>
    %258 = arith.subf %254, %257 : vector<2x16x16xf32>
    %259 = math.exp %258 : vector<2x16x16xf32>
    %cst_82 = arith.constant dense<0.000000e+00> : vector<2x16xf32>
    %260 = vector.multi_reduction <add>, %259, %cst_82 [2] : vector<2x16x16xf32> to vector<2x16xf32>
    %261 = vector.shape_cast %260 : vector<2x16xf32> to vector<2x16x1xf32>
    %262 = tpu.reciprocal %261 {approx = true} : vector<2x16x1xf32> -> vector<2x16x1xf32>
    %263 = vector.broadcast %262 : vector<2x16x1xf32> to vector<2x16x16xf32>
    %264 = arith.mulf %259, %263 : vector<2x16x16xf32>
    %cst_83 = arith.constant dense<0.000000e+00> : vector<2x16x16xf32>
    %265 = tpu.matmul %264, %250, %cst_83 {dimension_numbers = #tpu.dot_dimension_numbers<[2], [1], [1], [2], [0, 0, 0, 1, 1, 2], [0], [0]>} : vector<2x16x16xf32>, vector<2x16x16xf32>, vector<2x16x16xf32> -> vector<2x16x16xf32>
    %266 = vector.shape_cast %265 : vector<2x16x16xf32> to vector<32x16xf32>
    %267 = vector.extract_strided_slice %54 {offsets = [0, 0, 176], sizes = [2, 16, 16], strides = [1, 1, 1]} : vector<2x16x192xf32> to vector<2x16x16xf32>
    %268 = vector.extract_strided_slice %55 {offsets = [0, 0, 176], sizes = [2, 16, 16], strides = [1, 1, 1]} : vector<2x16x192xf32> to vector<2x16x16xf32>
    %269 = vector.extract_strided_slice %56 {offsets = [0, 0, 176], sizes = [2, 16, 16], strides = [1, 1, 1]} : vector<2x16x192xf32> to vector<2x16x16xf32>
    %cst_84 = arith.constant dense<0.000000e+00> : vector<2x16x16xf32>
    %270 = tpu.matmul %267, %268, %cst_84 {dimension_numbers = #tpu.dot_dimension_numbers<[2], [2], [1], [1], [0, 0, 0, 1, 1, 1], [0], [0]>} : vector<2x16x16xf32>, vector<2x16x16xf32>, vector<2x16x16xf32> -> vector<2x16x16xf32>
    %271 = vector.shape_cast %57 : vector<16x16xf32> to vector<1x16x16xf32>
    %272 = vector.broadcast %271 : vector<1x16x16xf32> to vector<2x16x16xf32>
    %273 = arith.addf %270, %272 : vector<2x16x16xf32>
    %cst_85 = arith.constant dense<0xFF800000> : vector<2x16xf32>
    %274 = vector.multi_reduction <maximumf>, %273, %cst_85 [2] : vector<2x16x16xf32> to vector<2x16xf32>
    %275 = vector.shape_cast %274 : vector<2x16xf32> to vector<2x16x1xf32>
    %276 = vector.broadcast %275 : vector<2x16x1xf32> to vector<2x16x16xf32>
    %277 = arith.subf %273, %276 : vector<2x16x16xf32>
    %278 = math.exp %277 : vector<2x16x16xf32>
    %cst_86 = arith.constant dense<0.000000e+00> : vector<2x16xf32>
    %279 = vector.multi_reduction <add>, %278, %cst_86 [2] : vector<2x16x16xf32> to vector<2x16xf32>
    %280 = vector.shape_cast %279 : vector<2x16xf32> to vector<2x16x1xf32>
    %281 = tpu.reciprocal %280 {approx = true} : vector<2x16x1xf32> -> vector<2x16x1xf32>
    %282 = vector.broadcast %281 : vector<2x16x1xf32> to vector<2x16x16xf32>
    %283 = arith.mulf %278, %282 : vector<2x16x16xf32>
    %cst_87 = arith.constant dense<0.000000e+00> : vector<2x16x16xf32>
    %284 = tpu.matmul %283, %269, %cst_87 {dimension_numbers = #tpu.dot_dimension_numbers<[2], [1], [1], [2], [0, 0, 0, 1, 1, 2], [0], [0]>} : vector<2x16x16xf32>, vector<2x16x16xf32>, vector<2x16x16xf32> -> vector<2x16x16xf32>
    %285 = vector.shape_cast %284 : vector<2x16x16xf32> to vector<32x16xf32>
    %286 = tpu.concatenate %76, %95, %114, %133, %152, %171, %190, %209, %228, %247, %266, %285 in 1 : vector<32x16xf32>, vector<32x16xf32>, vector<32x16xf32>, vector<32x16xf32>, vector<32x16xf32>, vector<32x16xf32>, vector<32x16xf32>, vector<32x16xf32>, vector<32x16xf32>, vector<32x16xf32>, vector<32x16xf32>, vector<32x16xf32> -> vector<32x192xf32>
    %287 = arith.truncf %286 : vector<32x192xf32> to vector<32x192xbf16>
    %c0_88 = arith.constant 0 : index
    %c0_89 = arith.constant 0 : index
    %c0_90 = arith.constant 0 : index
    %288 = vector.load %arg6[%c0_88, %c0_89, %c0_90] : memref<1x192x192xbf16, #tpu.memory_space<vmem>>, vector<1x192x192xbf16>
    %289 = vector.shape_cast %288 : vector<1x192x192xbf16> to vector<192x192xbf16>
    %cst_91 = arith.constant dense<0.000000e+00> : vector<32x192xf32>
    %290 = tpu.matmul %287, %289, %cst_91 {dimension_numbers = #tpu.dot_dimension_numbers<[1], [0], [0], [1], [0, 0, 1, 1], [], []>} : vector<32x192xbf16>, vector<192x192xbf16>, vector<32x192xf32> -> vector<32x192xf32>
    %c0_92 = arith.constant 0 : index
    %c0_93 = arith.constant 0 : index
    %c0_94 = arith.constant 0 : index
    %291 = vector.load %arg7[%c0_92, %c0_93, %c0_94] : memref<1x1x192xf32, #tpu.memory_space<vmem>>, vector<1x1x192xf32>
    %292 = vector.shape_cast %291 : vector<1x1x192xf32> to vector<1x192xf32>
    %293 = vector.broadcast %292 : vector<1x192xf32> to vector<32x192xf32>
    %294 = arith.addf %290, %293 : vector<32x192xf32>
    %295 = arith.addf %3, %294 : vector<32x192xf32>
    %c0_95 = arith.constant 0 : index
    %c0_96 = arith.constant 0 : index
    %c0_97 = arith.constant 0 : index
    %296 = vector.load %arg8[%c0_95, %c0_96, %c0_97] : memref<1x1x192xf32, #tpu.memory_space<vmem>>, vector<1x1x192xf32>
    %297 = vector.shape_cast %296 : vector<1x1x192xf32> to vector<1x192xf32>
    %c0_98 = arith.constant 0 : index
    %c0_99 = arith.constant 0 : index
    %c0_100 = arith.constant 0 : index
    %298 = vector.load %arg9[%c0_98, %c0_99, %c0_100] : memref<1x1x192xf32, #tpu.memory_space<vmem>>, vector<1x1x192xf32>
    %299 = vector.shape_cast %298 : vector<1x1x192xf32> to vector<1x192xf32>
    %cst_101 = arith.constant dense<0.000000e+00> : vector<32xf32>
    %300 = vector.multi_reduction <add>, %295, %cst_101 [1] : vector<32x192xf32> to vector<32xf32>
    %301 = vector.shape_cast %300 : vector<32xf32> to vector<32x1xf32>
    %cst_102 = arith.constant 1.920000e+02 : f32
    %302 = vector.broadcast %cst_102 : f32 to vector<32x1xf32>
    %303 = arith.divf %301, %302 : vector<32x1xf32>
    %304 = vector.broadcast %303 : vector<32x1xf32> to vector<32x192xf32>
    %305 = arith.subf %295, %304 : vector<32x192xf32>
    %306 = arith.mulf %305, %305 : vector<32x192xf32>
    %cst_103 = arith.constant dense<0.000000e+00> : vector<32xf32>
    %307 = vector.multi_reduction <add>, %306, %cst_103 [1] : vector<32x192xf32> to vector<32xf32>
    %308 = vector.shape_cast %307 : vector<32xf32> to vector<32x1xf32>
    %cst_104 = arith.constant 1.920000e+02 : f32
    %309 = vector.broadcast %cst_104 : f32 to vector<32x1xf32>
    %310 = arith.divf %308, %309 : vector<32x1xf32>
    %311 = vector.broadcast %303 : vector<32x1xf32> to vector<32x192xf32>
    %312 = arith.subf %295, %311 : vector<32x192xf32>
    %cst_105 = arith.constant 9.99999974E-6 : f32
    %313 = vector.broadcast %cst_105 : f32 to vector<32x1xf32>
    %314 = arith.addf %310, %313 : vector<32x1xf32>
    %315 = math.rsqrt %314 : vector<32x1xf32>
    %316 = vector.broadcast %315 : vector<32x1xf32> to vector<32x192xf32>
    %317 = arith.mulf %312, %316 : vector<32x192xf32>
    %318 = vector.broadcast %297 : vector<1x192xf32> to vector<32x192xf32>
    %319 = arith.mulf %317, %318 : vector<32x192xf32>
    %320 = vector.broadcast %299 : vector<1x192xf32> to vector<32x192xf32>
    %321 = arith.addf %319, %320 : vector<32x192xf32>
    %322 = arith.truncf %321 : vector<32x192xf32> to vector<32x192xbf16>
    %c0_106 = arith.constant 0 : index
    %c0_107 = arith.constant 0 : index
    %c0_108 = arith.constant 0 : index
    %323 = vector.load %arg10[%c0_106, %c0_107, %c0_108] : memref<1x192x768xbf16, #tpu.memory_space<vmem>>, vector<1x192x768xbf16>
    %324 = vector.shape_cast %323 : vector<1x192x768xbf16> to vector<192x768xbf16>
    %cst_109 = arith.constant dense<0.000000e+00> : vector<32x768xf32>
    %325 = tpu.matmul %322, %324, %cst_109 {dimension_numbers = #tpu.dot_dimension_numbers<[1], [0], [0], [1], [0, 0, 1, 1], [], []>} : vector<32x192xbf16>, vector<192x768xbf16>, vector<32x768xf32> -> vector<32x768xf32>
    %c0_110 = arith.constant 0 : index
    %c0_111 = arith.constant 0 : index
    %c0_112 = arith.constant 0 : index
    %326 = vector.load %arg11[%c0_110, %c0_111, %c0_112] : memref<1x1x768xf32, #tpu.memory_space<vmem>>, vector<1x1x768xf32>
    %327 = vector.shape_cast %326 : vector<1x1x768xf32> to vector<1x768xf32>
    %328 = vector.broadcast %327 : vector<1x768xf32> to vector<32x768xf32>
    %329 = arith.addf %325, %328 : vector<32x768xf32>
    %cst_113 = arith.constant 0.000000e+00 : f32
    %330 = vector.broadcast %cst_113 : f32 to vector<32x768xf32>
    %331 = arith.maximumf %329, %330 : vector<32x768xf32>
    %332 = arith.truncf %331 : vector<32x768xf32> to vector<32x768xbf16>
    %c0_114 = arith.constant 0 : index
    %c0_115 = arith.constant 0 : index
    %c0_116 = arith.constant 0 : index
    %333 = vector.load %arg12[%c0_114, %c0_115, %c0_116] : memref<1x768x192xbf16, #tpu.memory_space<vmem>>, vector<1x768x192xbf16>
    %334 = vector.shape_cast %333 : vector<1x768x192xbf16> to vector<768x192xbf16>
    %cst_117 = arith.constant dense<0.000000e+00> : vector<32x192xf32>
    %335 = tpu.matmul %332, %334, %cst_117 {dimension_numbers = #tpu.dot_dimension_numbers<[1], [0], [0], [1], [0, 0, 1, 1], [], []>} : vector<32x768xbf16>, vector<768x192xbf16>, vector<32x192xf32> -> vector<32x192xf32>
    %c0_118 = arith.constant 0 : index
    %c0_119 = arith.constant 0 : index
    %c0_120 = arith.constant 0 : index
    %336 = vector.load %arg13[%c0_118, %c0_119, %c0_120] : memref<1x1x192xf32, #tpu.memory_space<vmem>>, vector<1x1x192xf32>
    %337 = vector.shape_cast %336 : vector<1x1x192xf32> to vector<1x192xf32>
    %338 = vector.broadcast %337 : vector<1x192xf32> to vector<32x192xf32>
    %339 = arith.addf %335, %338 : vector<32x192xf32>
    %340 = arith.addf %295, %339 : vector<32x192xf32>
    %c0_121 = arith.constant 0 : index
    %c0_122 = arith.constant 0 : index
    %341 = vector.load %arg19[%c0_121, %c0_122] : memref<32x192xf32, #tpu.memory_space<vmem>>, vector<32x192xf32>
    tpu.vector_store %arg19[%c0_121, %c0_122], %340 {strides = array<i32>} : memref<32x192xf32, #tpu.memory_space<vmem>>, vector<32x192xf32>,
    %c11_i32 = arith.constant 11 : i32
    %342 = arith.cmpi eq, %arg0, %c11_i32 : i32
    %343 = arith.extui %342 : i1 to i32
    %c0_i32_123 = arith.constant 0 : i32
    %344 = arith.cmpi ne, %343, %c0_i32_123 : i32
    scf.if %344 {
      %c0_124 = arith.constant 0 : index
      %c0_125 = arith.constant 0 : index
      %345 = vector.load %arg14[%c0_124, %c0_125] : memref<1x192xf32, #tpu.memory_space<vmem>>, vector<1x192xf32>
      %c0_126 = arith.constant 0 : index
      %c0_127 = arith.constant 0 : index
      %346 = vector.load %arg15[%c0_126, %c0_127] : memref<1x192xf32, #tpu.memory_space<vmem>>, vector<1x192xf32>
      %cst_128 = arith.constant dense<0.000000e+00> : vector<32xf32>
      %347 = vector.multi_reduction <add>, %340, %cst_128 [1] : vector<32x192xf32> to vector<32xf32>
      %348 = vector.shape_cast %347 : vector<32xf32> to vector<32x1xf32>
      %cst_129 = arith.constant 1.920000e+02 : f32
      %349 = vector.broadcast %cst_129 : f32 to vector<32x1xf32>
      %350 = arith.divf %348, %349 : vector<32x1xf32>
      %351 = vector.broadcast %350 : vector<32x1xf32> to vector<32x192xf32>
      %352 = arith.subf %340, %351 : vector<32x192xf32>
      %353 = arith.mulf %352, %352 : vector<32x192xf32>
      %cst_130 = arith.constant dense<0.000000e+00> : vector<32xf32>
      %354 = vector.multi_reduction <add>, %353, %cst_130 [1] : vector<32x192xf32> to vector<32xf32>
      %355 = vector.shape_cast %354 : vector<32xf32> to vector<32x1xf32>
      %cst_131 = arith.constant 1.920000e+02 : f32
      %356 = vector.broadcast %cst_131 : f32 to vector<32x1xf32>
      %357 = arith.divf %355, %356 : vector<32x1xf32>
      %358 = vector.broadcast %350 : vector<32x1xf32> to vector<32x192xf32>
      %359 = arith.subf %340, %358 : vector<32x192xf32>
      %cst_132 = arith.constant 9.99999974E-6 : f32
      %360 = vector.broadcast %cst_132 : f32 to vector<32x1xf32>
      %361 = arith.addf %357, %360 : vector<32x1xf32>
      %362 = math.rsqrt %361 : vector<32x1xf32>
      %363 = vector.broadcast %362 : vector<32x1xf32> to vector<32x192xf32>
      %364 = arith.mulf %359, %363 : vector<32x192xf32>
      %365 = vector.broadcast %345 : vector<1x192xf32> to vector<32x192xf32>
      %366 = arith.mulf %364, %365 : vector<32x192xf32>
      %367 = vector.broadcast %346 : vector<1x192xf32> to vector<32x192xf32>
      %368 = arith.addf %366, %367 : vector<32x192xf32>
      %369 = arith.truncf %368 : vector<32x192xf32> to vector<32x192xbf16>
      %c0_133 = arith.constant 0 : index
      %c0_134 = arith.constant 0 : index
      %370 = vector.load %arg16[%c0_133, %c0_134] : memref<192x128xbf16, #tpu.memory_space<vmem>>, vector<192x128xbf16>
      %cst_135 = arith.constant dense<0.000000e+00> : vector<32x128xf32>
      %371 = tpu.matmul %369, %370, %cst_135 {dimension_numbers = #tpu.dot_dimension_numbers<[1], [0], [0], [1], [0, 0, 1, 1], [], []>} : vector<32x192xbf16>, vector<192x128xbf16>, vector<32x128xf32> -> vector<32x128xf32>
      %c0_136 = arith.constant 0 : index
      %c0_137 = arith.constant 0 : index
      %372 = vector.load %arg17[%c0_136, %c0_137] : memref<1x128xf32, #tpu.memory_space<vmem>>, vector<1x128xf32>
      %373 = vector.broadcast %372 : vector<1x128xf32> to vector<32x128xf32>
      %374 = arith.addf %371, %373 : vector<32x128xf32>
      %c0_138 = arith.constant 0 : index
      %c0_139 = arith.constant 0 : index
      %375 = vector.load %arg18[%c0_138, %c0_139] : memref<32x128xf32, #tpu.memory_space<vmem>>, vector<32x128xf32>
      tpu.vector_store %arg18[%c0_138, %c0_139], %374 {strides = array<i32>} : memref<32x128xf32, #tpu.memory_space<vmem>>, vector<32x128xf32>,
    } else {
    }
    return
  }
  func.func @transform_0(%arg0: i32) -> (i32, i32) {
    %c0_i32 = arith.constant 0 : i32
    %c0_i32_0 = arith.constant 0 : i32
    %c0_i32_1 = arith.constant 0 : i32
    return %c0_i32, %c0_i32_0 : i32, i32
  }
  func.func @transform_1(%arg0: i32) -> (i32, i32, i32) {
    %c0_i32 = arith.constant 0 : i32
    %c0_i32_0 = arith.constant 0 : i32
    %c0_i32_1 = arith.constant 0 : i32
    return %arg0, %c0_i32, %c0_i32_0 : i32, i32, i32
  }
  func.func @transform_2(%arg0: i32) -> (i32, i32, i32) {
    %c0_i32 = arith.constant 0 : i32
    %c0_i32_0 = arith.constant 0 : i32
    %c0_i32_1 = arith.constant 0 : i32
    return %arg0, %c0_i32, %c0_i32_0 : i32, i32, i32
  }
  func.func @transform_3(%arg0: i32) -> (i32, i32, i32, i32) {
    %c0_i32 = arith.constant 0 : i32
    %c0_i32_0 = arith.constant 0 : i32
    %c0_i32_1 = arith.constant 0 : i32
    %c0_i32_2 = arith.constant 0 : i32
    return %arg0, %c0_i32, %c0_i32_0, %c0_i32_1 : i32, i32, i32, i32
  }
  func.func @transform_4(%arg0: i32) -> (i32, i32, i32, i32) {
    %c0_i32 = arith.constant 0 : i32
    %c0_i32_0 = arith.constant 0 : i32
    %c0_i32_1 = arith.constant 0 : i32
    %c0_i32_2 = arith.constant 0 : i32
    return %arg0, %c0_i32, %c0_i32_0, %c0_i32_1 : i32, i32, i32, i32
  }
  func.func @transform_5(%arg0: i32) -> (i32, i32, i32) {
    %c0_i32 = arith.constant 0 : i32
    %c0_i32_0 = arith.constant 0 : i32
    %c0_i32_1 = arith.constant 0 : i32
    return %arg0, %c0_i32, %c0_i32_0 : i32, i32, i32
  }
  func.func @transform_6(%arg0: i32) -> (i32, i32, i32) {
    %c0_i32 = arith.constant 0 : i32
    %c0_i32_0 = arith.constant 0 : i32
    %c0_i32_1 = arith.constant 0 : i32
    return %arg0, %c0_i32, %c0_i32_0 : i32, i32, i32
  }
  func.func @transform_7(%arg0: i32) -> (i32, i32, i32) {
    %c0_i32 = arith.constant 0 : i32
    %c0_i32_0 = arith.constant 0 : i32
    %c0_i32_1 = arith.constant 0 : i32
    return %arg0, %c0_i32, %c0_i32_0 : i32, i32, i32
  }
  func.func @transform_8(%arg0: i32) -> (i32, i32, i32) {
    %c0_i32 = arith.constant 0 : i32
    %c0_i32_0 = arith.constant 0 : i32
    %c0_i32_1 = arith.constant 0 : i32
    return %arg0, %c0_i32, %c0_i32_0 : i32, i32, i32
  }
  func.func @transform_9(%arg0: i32) -> (i32, i32, i32) {
    %c0_i32 = arith.constant 0 : i32
    %c0_i32_0 = arith.constant 0 : i32
    %c0_i32_1 = arith.constant 0 : i32
    return %arg0, %c0_i32, %c0_i32_0 : i32, i32, i32
  }
  func.func @transform_10(%arg0: i32) -> (i32, i32, i32) {
    %c0_i32 = arith.constant 0 : i32
    %c0_i32_0 = arith.constant 0 : i32
    %c0_i32_1 = arith.constant 0 : i32
    return %arg0, %c0_i32, %c0_i32_0 : i32, i32, i32
  }
  func.func @transform_11(%arg0: i32) -> (i32, i32, i32) {
    %c0_i32 = arith.constant 0 : i32
    %c0_i32_0 = arith.constant 0 : i32
    %c0_i32_1 = arith.constant 0 : i32
    return %arg0, %c0_i32, %c0_i32_0 : i32, i32, i32
  }
  func.func @transform_12(%arg0: i32) -> (i32, i32, i32) {
    %c0_i32 = arith.constant 0 : i32
    %c0_i32_0 = arith.constant 0 : i32
    %c0_i32_1 = arith.constant 0 : i32
    return %arg0, %c0_i32, %c0_i32_0 : i32, i32, i32
  }
  func.func @transform_13(%arg0: i32) -> (i32, i32) {
    %c0_i32 = arith.constant 0 : i32
    %c0_i32_0 = arith.constant 0 : i32
    %c0_i32_1 = arith.constant 0 : i32
    return %c0_i32, %c0_i32_0 : i32, i32
  }
  func.func @transform_14(%arg0: i32) -> (i32, i32) {
    %c0_i32 = arith.constant 0 : i32
    %c0_i32_0 = arith.constant 0 : i32
    %c0_i32_1 = arith.constant 0 : i32
    return %c0_i32, %c0_i32_0 : i32, i32
  }
  func.func @transform_15(%arg0: i32) -> (i32, i32) {
    %c0_i32 = arith.constant 0 : i32
    %c0_i32_0 = arith.constant 0 : i32
    %c0_i32_1 = arith.constant 0 : i32
    return %c0_i32, %c0_i32_0 : i32, i32
  }
  func.func @transform_16(%arg0: i32) -> (i32, i32) {
    %c0_i32 = arith.constant 0 : i32
    %c0_i32_0 = arith.constant 0 : i32
    %c0_i32_1 = arith.constant 0 : i32
    return %c0_i32, %c0_i32_0 : i32, i32
  }
  func.func @transform_17(%arg0: i32) -> (i32, i32) {
    %c0_i32 = arith.constant 0 : i32
    %c0_i32_0 = arith.constant 0 : i32
    %c0_i32_1 = arith.constant 0 : i32
    return %c0_i32, %c0_i32_0 : i32, i32
  }
}

</mosaic_0001>

<bundles_post_ra>
// kernel: encoder_forward.1
= control target key start
LH: loop header
LB: loop body
LE: loop exit
PB: predicated region body
PF: predicated region fallthrough
CT: control target
= control target key end

     0   :  { %s11329_s0 = inlined_call_operand.vmem [shape: f32[32,192], index: 0, kind: input, shape index: {}]   ;;  %s11330_s1 = inlined_call_operand.vmem [shape: f32[12,1,192], index: 1, kind: input, shape index: {}]   ;;  %s11331_s2 = inlined_call_operand.vmem [shape: f32[12,1,192], index: 2, kind: input, shape index: {}]   ;;  %s11332_s3 = inlined_call_operand.vmem [shape: bf16[12,3,192,192], index: 3, kind: input, shape index: {}]   ;;  %s11333_s4 = inlined_call_operand.vmem [shape: f32[12,3,1,192], index: 4, kind: input, shape index: {}]   ;;  %s11334_s5 = inlined_call_operand.vmem [shape: bf16[12,192,192], index: 5, kind: input, shape index: {}]   ;;  %s11335_s6 = inlined_call_operand.vmem [shape: f32[12,1,192], index: 6, kind: input, shape index: {}]   ;;  %s11336_s7 = inlined_call_operand.vmem [shape: f32[12,1,192], index: 7, kind: input, shape index: {}]   ;;  %s11337_s8 = inlined_call_operand.vmem [shape: f32[12,1,192], index: 8, kind: input, shape index: {}]   ;;  %s11338_s9 = inlined_call_operand.vmem [shape: bf16[12,192,768], index: 9, kind: input, shape index: {}]   ;;  %s11339_s10 = inlined_call_operand.vmem [shape: f32[12,1,768], index: 10, kind: input, shape index: {}]   ;;  %s11340_s11 = inlined_call_operand.vmem [shape: bf16[12,768,192], index: 11, kind: input, shape index: {}]   ;;  %s11341_s12 = inlined_call_operand.vmem [shape: f32[12,1,192], index: 12, kind: input, shape index: {}]   ;;  %s11342_s13 = inlined_call_operand.vmem [shape: f32[1,192], index: 13, kind: input, shape index: {}]   ;;  %s11343_s14 = inlined_call_operand.vmem [shape: f32[1,192], index: 14, kind: input, shape index: {}]   ;;  %s11344_s15 = inlined_call_operand.vmem [shape: bf16[192,128], index: 15, kind: input, shape index: {}]   ;;  %s11345_s16 = inlined_call_operand.vmem [shape: f32[1,128], index: 16, kind: input, shape index: {}]   ;;  %s11346_s17 = inlined_call_operand.hbm [shape: f32[32,128], index: 17, kind: output, shape index: {}]  }
   0x1   :  { %11368 = sst [smem:[#allocation27_spill]] %s11329_s0 }
   0x2   :  { %11369 = sst [smem:[#allocation28_spill]] %s11330_s1 }
   0x3   :  { %11370 = sst [smem:[#allocation29_spill]] %s11332_s3 }
   0x4   :  { %11371 = sst [smem:[#allocation30_spill]] %s11333_s4 }
   0x5   :  { %11372 = sst [smem:[#allocation31_spill]] %s11342_s13 }
   0x6   :  { %11373 = sst [smem:[#allocation32_spill]] %s11343_s14 }
   0x7   :  { %11374 = sst [smem:[#allocation33_spill]] %s11344_s15 }
   0x8   :  { %11375 = sst [smem:[#allocation34_spill]] %s11345_s16 }
   0x9   :  { %11376 = sst [smem:[#allocation35_spill]] %s11346_s17 }
   0xa   :  { %22 = vsyncpa [#allocation5], 0  ;;  %s8736_s24 = smov 0  }
   0xb LB: > { %11377 = sst [smem:[#allocation7_spill]] %s8632_s24  ;;  %s8742_s25 = sadd.s32 4294967295, %s8632_s24   ;;  %s8632_s24 = sphi %s8736_s24, %s28_s24  }
   0xc   : > { %11378 = sst [smem:[#allocation8_spill]] %s8742_s25  ;;  %p6500_p0 = scmp.ge.s32.totalorder %s8632_s24, 1 }
   0xd   : > { %p585_p1 = scmp.lt.s32.totalorder %s8632_s24, 13 }
   0xf   : > { %p586_p2 = pnand %p6500_p0, %p585_p1 }
  0x11   : > { %589 = sbr.rel (%p586_p2) target bundleno = 2889 (0xb49), region = 88 }
  0x16   : > { %p679_p3 = scmp.lt.s32.totalorder %s8742_s25, 11  ;;  %s11380_s3 = sld [smem:[#allocation29_spill]] }
  0x17   : > { %s11381_s4 = sld [smem:[#allocation30_spill]] }
  0x18   : > { %s680_s26 = scalar_select %p679_p3, %s8742_s25, 11 }
  0x19   : > { %s11382_s22 = sld [smem:[#allocation8_spill]] }
  0x1a   : > { %s8748_s27 = sshll.u32 %s680_s26, 1  ;;  %s8137_s28 = smul.u32 576, %s680_s26 }
  0x1b   : > { %s8138_s24 = smul.u32 6, %s680_s26 }
  0x1c   : > { %s8761_s23 = scalar_lea.vmem %s11380_s3, %s8137_s28  ;;  %s8139_s17 = smul.u32 192, %s680_s26 }
  0x1d   : > { %s8770_s29 = scalar_lea.vmem %s11381_s4, %s8138_s24  ;;  %s712_s3 = scalar_lea.vmem %s11337_s8, %s8748_s27 }
  0x1e   : > { %s8779_s21 = scalar_lea.vmem %s11334_s5, %s8139_s17  ;;  %s8788_s13 = scalar_lea.vmem %s11338_s9, %s8137_s28 }
  0x1f   : > { %s8793_s4 = scalar_lea.vmem %s11339_s10, %s8138_s24  ;;  %s8140_s0 = smul.u32 768, %s680_s26 }
  0x20   : > { %s730_s17 = scalar_lea.vmem %s11341_s12, %s8748_s27  ;;  %p6511_p4 = scmp.ne.s32.totalorder %s11382_s22, 0 }
  0x21   : > { %s8802_s18 = scalar_lea.vmem %s11340_s11, %s8140_s0  ;;  %s11383_s16 = sld [smem:[#allocation27_spill]] (!%p6511_p4) }
  0x22   : > { %735 = sbr.rel (%p6511_p4) target bundleno = 50 (0x32), region = 92 }
  0x27   : > { %v736_v0 = vld [vmem:[%s11383_s16] sm:$0xff]  ;;  %v737_v1 = vld [vmem:[%s11383_s16 + $0x8] sm:$0xff]  ;;  %vm745_vm0 = vcmask 523264   ;;  %v738_v2 = vld [vmem:[%s11383_s16 + $0x10] sm:$0xff]  ;;  %v753_v3 = vlaneseq  ;;  %v8634_v12 = vmov -1e+30  }
  0x28   : > { %744 = vst [vmem:[#allocation2] sm:$0xff] %v736_v0  ;;  %v739_v4 = vld [vmem:[%s11383_s16 + $0x18] sm:$0xff]  ;;  %v740_v5 = vld [vmem:[%s11383_s16 + $0x20] sm:$0xff]  ;;  %v741_v8 = vld [vmem:[%s11383_s16 + $0x28] sm:$0xff]  ;;  %vm762_vm2 = vcmask 130048  }
  0x29   : > { %746 = vst.msk [vmem:[#allocation2 + $0x8] sm:$0xff] %vm745_vm0, %v737_v1  ;;  %v754_v6 = vshrl.u32 %v753_v3, 7  ;;  %v757_v7 = vand.u32 127, %v753_v3  ;;  %v742_v9 = vld [vmem:[%s11383_s16 + $0x30] sm:$0xff]  ;;  %v743_v11 = vld [vmem:[%s11383_s16 + $0x38] sm:$0xff] }
  0x2a   : > { %747 = vst [vmem:[#allocation2 + $0x10] sm:$0xff] %v738_v2 }
  0x2b   : > { %748 = vst.msk [vmem:[#allocation2 + $0x18] sm:$0xff] %vm745_vm0, %v739_v4  ;;  %vm758_vm1 = vcmp.le.s32.totalorder %v757_v7, %v754_v6  ;;  %v755_v10 = vadd.s32 8, %v754_v6 }
  0x2c   : > { %749 = vst [vmem:[#allocation2 + $0x20] sm:$0xff] %v740_v5  ;;  %v760_v13 = vsel %vm758_vm1, 0.0, %v8634_v12 }
  0x2d   : > { %750 = vst.msk [vmem:[#allocation2 + $0x28] sm:$0xff] %vm745_vm0, %v741_v8  ;;  %vm759_vm3 = vcmp.le.s32.totalorder %v757_v7, %v755_v10 }
  0x2e   : > { %751 = vst [vmem:[#allocation2 + $0x30] sm:$0xff] %v742_v9  ;;  %v761_v14 = vsel %vm759_vm3, 0.0, %v8634_v12 }
  0x2f   : > { %752 = vst.msk [vmem:[#allocation2 + $0x38] sm:$0xff] %vm745_vm0, %v743_v11 }
  0x30   : > { %763 = vst.msk [vmem:[#allocation3] sm:$0xff] %vm762_vm2, %v760_v13 }
  0x31   : > { %764 = vst.msk [vmem:[#allocation3 + $0x8] sm:$0xff] %vm762_vm2, %v761_v14 }
  0x32 PF: > { %vm775_vm4 = vcmask 523264   ;;  %v765_v17 = vld [vmem:[#allocation2] sm:$0xff]  ;;  %v766_v19 = vld [vmem:[#allocation2 + $0x8] sm:$0xff]  ;;  %v768_v24 = vld [vmem:[#allocation2 + $0x18] sm:$0xff]  ;;  %v8635_v31 = vmov 192.0   ;;  %s11385_s25 = sld [smem:[#allocation28_spill]]  ;;  %s11387_s1 = scalar_lea.vmem %s11331_s2, %s8748_s27 }
  0x33   : > { %v769_v15 = vld [vmem:[#allocation2 + $0x20] sm:$0xff]  ;;  %v776_v21 = vsel %vm775_vm4, %v766_v19, 0.0  ;;  %v767_v27 = vld [vmem:[#allocation2 + $0x10] sm:$0xff]  ;;  %v780_v28 = vsel %vm775_vm4, %v768_v24, 0.0  ;;  %8367 = vrcp.f32 %v8635_v31  ;;  %v7860_v7 = vld [vmem:[%s8761_s23 + $0x74] sm:$0xf0]  ;;  %s11426_s19 = scalar_lea.vmem %s11335_s6, %s8748_s27  ;;  %s11428_s30 = scalar_lea.vmem %s11336_s7, %s8748_s27 }
  0x34   : > { %v770_v16 = vld [vmem:[#allocation2 + $0x28] sm:$0xff]  ;;  %v777_v23 = vadd.f32 %v776_v21, %v765_v17  ;;  %v781_v30 = vadd.f32 %v780_v28, %v767_v27  ;;  %v6570_v6 = vld [vmem:[%s8761_s23 + $0x70] sm:$0xf]  ;;  %v7859_v8 = vld [vmem:[%s8761_s23 + $0x74] sm:$0xf]  ;;  %s8637_s22 = smov 80  }
  0x35   : > { %v784_v18 = vsel %vm775_vm4, %v770_v16, 0.0  ;;  %v771_v25 = vld [vmem:[#allocation2 + $0x30] sm:$0xff]  ;;  %v6571_v9 = vor.u32 %v7860_v7, %v6570_v6  ;;  %v6572_v10 = vld [vmem:[%s8761_s23 + $0x78] sm:$0xf0]  ;;  %v6562_v12 = vld [vmem:[%s8761_s23 + $0x60] sm:$0xf] }
  0x36   : > { %v785_v20 = vadd.f32 %v784_v18, %v769_v15  ;;  %v772_v22 = vld [vmem:[#allocation2 + $0x38] sm:$0xff]  ;;  %778 = vadd.xlane.f32.xlu0 %v777_v23  ;;  %v6575_v11 = vor.u32 %v7859_v8, %v6572_v10  ;;  %v7858_v13 = vld [vmem:[%s8761_s23 + $0x64] sm:$0xf0]  ;;  %v7857_v14 = vld [vmem:[%s8761_s23 + $0x64] sm:$0xf]  ;;  %s8638_s28 = smov 112  }
  0x37   : > { %v788_v26 = vsel %vm775_vm4, %v772_v22, 0.0  ;;  %1077 = vmatpush.bf16.msra.mxu0 %v6571_v9  ;;  %v6554_v18 = vld [vmem:[%s8761_s23 + $0x50] sm:$0xf]  ;;  %v6548_v28 = vld [vmem:[%s8761_s23 + $0x48] sm:$0xf0]  ;;  %s8639_s14 = smov 16  }
  0x38   : > { %786 = vadd.xlane.f32.xlu1 %v785_v20  ;;  %v789_v29 = vadd.f32 %v788_v26, %v771_v25  ;;  %1115 = vmatpush.bf16.msra.mxu2 %v6575_v11  ;;  %v7855_v20 = vld [vmem:[%s8761_s23 + $0x54] sm:$0xf]  ;;  %v7853_v26 = vld [vmem:[%s8761_s23 + $0x44] sm:$0xf]  ;;  %v7852_v31 = vld [vmem:[%s8761_s23 + $0x34] sm:$0xf0]  ;;  %s11386_s0 = scalar_lea.vmem %s11385_s25, %s8748_s27 }
  0x39   : > { %v8368_v32 = vpop.eup %8367  ;;  %v7863_v9 = vld [vmem:[%s8761_s23 + $0x94] sm:$0xf]  ;;  %v6588_v10 = vld [vmem:[%s8761_s23 + $0x98] sm:$0xf0]  ;;  %s8640_s15 = smov 32   ;;  %s8641_s24 = smov 96  }
  0x3a   : > { %v793_v33 = vmul.f32 192.0, %v8368_v32  ;;  %vm797_vm5 = vweird.f32 %v8368_v32  ;;  %s8642_s26 = smov 48   ;;  %vm1619_vm2 = vcmask 130048   ;;  %vm4056_vm3 = vcmask 261120  }
  0x3c   : > { %v794_v34 = vsub.f32 1.0, %v793_v33 }
  0x3e   : > { %782 = vadd.xlane.f32.xlu0 %v781_v30  ;;  %v795_v35 = vmul.f32 %v8368_v32, %v794_v34  ;;  %v6538_v30 = vld [vmem:[%s8761_s23 + $0x30] sm:$0xf]  ;;  %v7868_v34 = vld [vmem:[%s8761_s23 + $0xb4] sm:$0xf0] }
  0x3f   : > { %v6539_v33 = vor.u32 %v7852_v31, %v6538_v30  ;;  %v7884_v30 = vld [vmem:[%s8761_s23 + $0x134] sm:$0xf0]  ;;  %v7883_v31 = vld [vmem:[%s8761_s23 + $0x134] sm:$0xf] }
  0x40   : > { %790 = vadd.xlane.f32.xlu1 %v789_v29  ;;  %v796_v36 = vadd.f32 %v8368_v32, %v795_v35  ;;  %v6551_v29 = vor.u32 %v7853_v26, %v6548_v28  ;;  %v7851_v35 = vld [vmem:[%s8761_s23 + $0x34] sm:$0xf] }
  0x42   : > { %v8837_v37 = vsel %vm797_vm5, %v8368_v32, %v796_v36  ;;  %v6602_v32 = vld [vmem:[%s8761_s23 + $0xb0] sm:$0xf]  ;;  %v6540_v36 = vld [vmem:[%s8761_s23 + $0x38] sm:$0xf0]  ;;  %vm4061_vm5 = vcmask 392192  }
  0x43   : > { %11384 = vst [vmem:[#allocation9_spill] sm:$0xff] %v8837_v37 }
  0xa9   : > { %v779_v40 = vpop.xlane.xlu0 %778 }
  0xaa   : > { %v799_v41 = vmul.f32 %v8837_v37, %v779_v40  ;;  %v7867_v40 = vld [vmem:[%s8761_s23 + $0xb4] sm:$0xf] }
  0xab   : > { %v787_v38 = vpop.xlane.xlu1 %786 }
  0xac   : > { %v801_v39 = vmul.f32 %v8837_v37, %v787_v38  ;;  %v8845_v44 = vsub.f32 %v765_v17, %v799_v41  ;;  %v8847_v45 = vsub.f32 %v766_v19, %v799_v41  ;;  %v7856_v19 = vld [vmem:[%s8761_s23 + $0x54] sm:$0xf0]  ;;  %v6603_v38 = vor.u32 %v7868_v34, %v6602_v32  ;;  %v6604_v41 = vld [vmem:[%s8761_s23 + $0xb8] sm:$0xf0] }
  0xad   : > { %v6555_v21 = vor.u32 %v7856_v19, %v6554_v18  ;;  %v7862_v19 = vld [vmem:[%s8761_s23 + $0x84] sm:$0xf0]  ;;  %v6697_v34 = vld [vmem:[%s8761_s23 + $0x138] sm:$0xf0] }
  0xae   : > { %v8841_v42 = vsub.f32 %v769_v15, %v801_v39  ;;  %v8843_v43 = vsub.f32 %v770_v16, %v801_v39  ;;  %v811_v48 = vmul.f32 %v8845_v44, %v8845_v44  ;;  %v812_v49 = vmul.f32 %v8847_v45, %v8847_v45  ;;  %v6564_v16 = vld [vmem:[%s8761_s23 + $0x68] sm:$0xf0]  ;;  %1100 = vmatpush.bf16.msra.mxu1 %v6603_v38 }
  0xaf   : > { %v6563_v15 = vor.u32 %v7858_v13, %v6562_v12  ;;  %v6567_v17 = vor.u32 %v7857_v14, %v6564_v16  ;;  %v6543_v39 = vor.u32 %v7851_v35, %v6540_v36  ;;  %v6591_v13 = vor.u32 %v7863_v9, %v6588_v10  ;;  %v7846_v16 = vld [vmem:[%s8761_s23 + $0x4] sm:$0xf0]  ;;  %v773_v10 = vld [vmem:[%s11386_s0] sm:$0x3] }
  0xb0   : > { %v815_v46 = vmul.f32 %v8841_v42, %v8841_v42  ;;  %v816_v47 = vmul.f32 %v8843_v43, %v8843_v43  ;;  %v819_v53 = vsel %vm775_vm4, %v812_v49, 0.0  ;;  %v6594_v49 = vld [vmem:[%s8761_s23 + $0xa0] sm:$0xf]  ;;  %v6700_v38 = vor.u32 %v7883_v31, %v6697_v34  ;;  %v7892_v31 = vld [vmem:[%s8761_s23 + $0x174] sm:$0xf0] }
  0xb1   : > { %v783_v55 = vpop.xlane.xlu0 %782  ;;  %v820_v56 = vadd.f32 %v819_v53, %v811_v48  ;;  %1078 = vmatpush.bf16.msra.mxu0 %v6563_v15  ;;  %1116 = vmatpush.bf16.msra.mxu2 %v6567_v17  ;;  %v7850_v48 = vld [vmem:[%s8761_s23 + $0x24] sm:$0xf0]  ;;  %v6532_v53 = vld [vmem:[%s8761_s23 + $0x28] sm:$0xf0]  ;;  %v6514_v15 = vld [vmem:[%s8761_s23] sm:$0xf] }
  0xb2   : > { %v827_v50 = vsel %vm775_vm4, %v816_v47, 0.0  ;;  %v800_v57 = vmul.f32 %v8837_v37, %v783_v55  ;;  %v6530_v47 = vld [vmem:[%s8761_s23 + $0x20] sm:$0xf]  ;;  %v6515_v18 = vor.u32 %v7846_v16, %v6514_v15 }
  0xb3   : > { %v791_v51 = vpop.xlane.xlu1 %790  ;;  %v828_v52 = vadd.f32 %v827_v50, %v815_v46  ;;  %821 = vadd.xlane.f32.xlu2 %v820_v56  ;;  %v6607_v46 = vor.u32 %v7867_v40, %v6604_v41  ;;  %v6531_v50 = vor.u32 %v7850_v48, %v6530_v47  ;;  %v7865_v56 = vld [vmem:[%s8761_s23 + $0xa4] sm:$0xf]  ;;  %v6578_v17 = vld [vmem:[%s8761_s23 + $0x80] sm:$0xf]  ;;  %v7882_v40 = vld [vmem:[%s8761_s23 + $0x124] sm:$0xf0] }
  0xb4   : > { %v802_v54 = vmul.f32 %v8837_v37, %v791_v51  ;;  %v8865_v60 = vsub.f32 %v767_v27, %v800_v57  ;;  %v8867_v61 = vsub.f32 %v768_v24, %v800_v57  ;;  %v6546_v24 = vld [vmem:[%s8761_s23 + $0x40] sm:$0xf]  ;;  %v7866_v51 = vld [vmem:[%s8761_s23 + $0xa4] sm:$0xf0]  ;;  %v6596_v57 = vld [vmem:[%s8761_s23 + $0xa8] sm:$0xf0] }
  0xb5   : > { %829 = vadd.xlane.f32.xlu0 %v828_v52  ;;  %1079 = vmatpush.bf16.msra.mxu0 %v6555_v21  ;;  %v7849_v52 = vld [vmem:[%s8761_s23 + $0x24] sm:$0xf]  ;;  %v6689_v48 = vld [vmem:[%s8761_s23 + $0x128] sm:$0xf0]  ;;  %v774_v15 = vld [vmem:[%s11387_s1] sm:$0x3] }
  0xb6   : > { %v8861_v58 = vsub.f32 %v771_v25, %v802_v54  ;;  %v8863_v59 = vsub.f32 %v772_v22, %v802_v54  ;;  %v813_v0 = vmul.f32 %v8865_v60, %v8865_v60  ;;  %v814_v1 = vmul.f32 %v8867_v61, %v8867_v61  ;;  %v6556_v22 = vld [vmem:[%s8761_s23 + $0x58] sm:$0xf0]  ;;  %v7854_v25 = vld [vmem:[%s8761_s23 + $0x44] sm:$0xf0]  ;;  %1138 = vmatpush.bf16.msra.mxu3 %v6607_v46  ;;  %v7881_v41 = vld [vmem:[%s8761_s23 + $0x124] sm:$0xf] }
  0xb7   : > { %v6559_v23 = vor.u32 %v7855_v20, %v6556_v22  ;;  %v6547_v27 = vor.u32 %v7854_v25, %v6546_v24  ;;  %v6595_v54 = vor.u32 %v7866_v51, %v6594_v49  ;;  %v6535_v55 = vor.u32 %v7849_v52, %v6532_v53  ;;  %v7845_v20 = vld [vmem:[%s8761_s23 + $0x4] sm:$0xf]  ;;  %v6679_v51 = vld [vmem:[%s8761_s23 + $0x110] sm:$0xf]  ;;  %v7880_v52 = vld [vmem:[%s8761_s23 + $0x114] sm:$0xf0] }
  0xb8   : > { %v817_v62 = vmul.f32 %v8861_v58, %v8861_v58  ;;  %v818_v63 = vmul.f32 %v8863_v59, %v8863_v59  ;;  %v823_v4 = vsel %vm775_vm4, %v814_v1, 0.0  ;;  %v6586_v1 = vld [vmem:[%s8761_s23 + $0x90] sm:$0xf]  ;;  %v6579_v22 = vor.u32 %v7862_v19, %v6578_v17  ;;  %v7861_v24 = vld [vmem:[%s8761_s23 + $0x84] sm:$0xf] }
  0xb9   : > { %v824_v5 = vadd.f32 %v823_v4, %v813_v0  ;;  %1117 = vmatpush.bf16.msra.mxu2 %v6559_v23  ;;  %1080 = vmatpush.bf16.msra.mxu0 %v6547_v27  ;;  %v7848_v0 = vld [vmem:[%s8761_s23 + $0x14] sm:$0xf0]  ;;  %v7847_v4 = vld [vmem:[%s8761_s23 + $0x14] sm:$0xf]  ;;  %v6516_v23 = vld [vmem:[%s8761_s23 + $0x8] sm:$0xf0] }
  0xba   : > { %v831_v2 = vsel %vm775_vm4, %v818_v63, 0.0  ;;  %1101 = vmatpush.bf16.msra.mxu1 %v6595_v54  ;;  %v6522_v63 = vld [vmem:[%s8761_s23 + $0x10] sm:$0xf]  ;;  %v6519_v26 = vor.u32 %v7845_v20, %v6516_v23  ;;  %v6580_v27 = vld [vmem:[%s8761_s23 + $0x88] sm:$0xf0]  ;;  %v8985_v19 = vperm.slane %v773_v10, 1 }
  0xbb   : > { %v832_v3 = vadd.f32 %v831_v2, %v817_v62  ;;  %825 = vadd.xlane.f32.xlu2 %v824_v5  ;;  %v6599_v62 = vor.u32 %v7865_v56, %v6596_v57  ;;  %v6523_v2 = vor.u32 %v7848_v0, %v6522_v63  ;;  %v6524_v5 = vld [vmem:[%s8761_s23 + $0x18] sm:$0xf0]  ;;  %v6583_v28 = vor.u32 %v7861_v24, %v6580_v27  ;;  %v6663_v24 = vld [vmem:[%s8761_s23 + $0xf0] sm:$0xf] }
  0xbc   : > { %v6527_v8 = vor.u32 %v7847_v4, %v6524_v5  ;;  %v6681_v56 = vld [vmem:[%s8761_s23 + $0x118] sm:$0xf0]  ;;  %v7877_v4 = vld [vmem:[%s8761_s23 + $0x104] sm:$0xf]  ;;  %v6673_v5 = vld [vmem:[%s8761_s23 + $0x108] sm:$0xf0] }
  0xbd   : > { %833 = vadd.xlane.f32.xlu1 %v832_v3  ;;  %1118 = vmatpush.bf16.msra.mxu2 %v6551_v29  ;;  %v7864_v3 = vld [vmem:[%s8761_s23 + $0x94] sm:$0xf0]  ;;  %v6695_v29 = vld [vmem:[%s8761_s23 + $0x130] sm:$0xf] }
  0xbe   : > { %1081 = vmatpush.bf16.msra.mxu0 %v6539_v33  ;;  %1139 = vmatpush.bf16.msra.mxu3 %v6599_v62  ;;  %v6587_v7 = vor.u32 %v7864_v3, %v6586_v1  ;;  %v6696_v33 = vor.u32 %v7884_v30, %v6695_v29  ;;  %v6680_v62 = vor.u32 %v7880_v52, %v6679_v51  ;;  %v7878_v3 = vld [vmem:[%s8761_s23 + $0x104] sm:$0xf0]  ;;  %v6727_v27 = vld [vmem:[%s8761_s23 + $0x170] sm:$0xf] }
  0xc0   : > { %1102 = vmatpush.bf16.msra.mxu1 %v6587_v7 }
  0xc1   : > { %1119 = vmatpush.bf16.msra.mxu2 %v6543_v39  ;;  %v6687_v39 = vld [vmem:[%s8761_s23 + $0x120] sm:$0xf] }
  0xc2   : > { %1082 = vmatpush.bf16.msra.mxu0 %v6531_v50  ;;  %1140 = vmatpush.bf16.msra.mxu3 %v6591_v13  ;;  %v6688_v47 = vor.u32 %v7882_v40, %v6687_v39  ;;  %v6692_v50 = vor.u32 %v7881_v41, %v6689_v48 }
  0xc4   : > { %1103 = vmatpush.bf16.msra.mxu1 %v6579_v22 }
  0xc5   : > { %1120 = vmatpush.bf16.msra.mxu2 %v6535_v55  ;;  %v7879_v55 = vld [vmem:[%s8761_s23 + $0x114] sm:$0xf] }
  0xc6   : > { %1083 = vmatpush.bf16.msra.mxu0 %v6523_v2  ;;  %1141 = vmatpush.bf16.msra.mxu3 %v6583_v28  ;;  %v6684_v1 = vor.u32 %v7879_v55, %v6681_v56  ;;  %v6671_v2 = vld [vmem:[%s8761_s23 + $0x100] sm:$0xf]  ;;  %v8993_v28 = vperm.slane %v774_v15, 0  ;;  %v7890_v55 = vld [vmem:[%s8761_s23 + $0x164] sm:$0xf0] }
  0xc7   : > { %v7873_v56 = vld [vmem:[%s8761_s23 + $0xe4] sm:$0xf] }
  0xc8   : > { %1305 = vmatpush.bf16.msrb.mxu1 %v6696_v33  ;;  %v9000_v33 = vperm.slane %v774_v15, 1  ;;  %v7871_v15 = vld [vmem:[%s8761_s23 + $0xd4] sm:$0xf] }
  0xc9   : > { %1121 = vmatpush.bf16.msra.mxu2 %v6527_v8  ;;  %v6672_v8 = vor.u32 %v7878_v3, %v6671_v2  ;;  %v7889_v2 = vld [vmem:[%s8761_s23 + $0x164] sm:$0xf]  ;;  %v6721_v3 = vld [vmem:[%s8761_s23 + $0x168] sm:$0xf0] }
  0xca   : > { %1084 = vmatpush.bf16.msra.mxu0 %v6515_v18  ;;  %v8983_v18 = vperm.slane %v773_v10, 0 }
  0xcc   : > { %1306 = vmatpush.bf16.msrb.mxu1 %v6688_v47  ;;  %v6655_v47 = vld [vmem:[%s8761_s23 + $0xe0] sm:$0xf] }
  0xcd   : > { %1122 = vmatpush.bf16.msra.mxu2 %v6519_v26  ;;  %v7876_v26 = vld [vmem:[%s8761_s23 + $0xf4] sm:$0xf0] }
  0xce   : > { %1343 = vmatpush.bf16.msrb.mxu0 %v6700_v38  ;;  %v6664_v30 = vor.u32 %v7876_v26, %v6663_v24  ;;  %v7891_v38 = vld [vmem:[%s8761_s23 + $0x174] sm:$0xf]  ;;  %v6713_v24 = vld [vmem:[%s8761_s23 + $0x158] sm:$0xf0]  ;;  %v6639_v26 = vld [vmem:[%s8761_s23 + $0xc0] sm:$0xf] }
  0xd0   : > { %1307 = vmatpush.bf16.msrb.mxu1 %v6680_v62 }
  0xd2   : > { %1344 = vmatpush.bf16.msrb.mxu0 %v6692_v50 }
  0xd4   : > { %1308 = vmatpush.bf16.msrb.mxu1 %v6672_v8  ;;  %v7888_v8 = vld [vmem:[%s8761_s23 + $0x154] sm:$0xf0] }
  0xd6   : > { %1345 = vmatpush.bf16.msrb.mxu0 %v6684_v1 }
  0xd8   : > { %1309 = vmatpush.bf16.msrb.mxu1 %v6664_v30 }
 0x126   : > { %v822_v11 = vpop.xlane.xlu2 %821 }
 0x127   : > { %v835_v14 = vmul.f32 %v822_v11, %v8837_v37 }
 0x128   : > { %v830_v6 = vpop.xlane.xlu0 %829 }
 0x129   : > { %v837_v12 = vmul.f32 %v830_v6, %v8837_v37  ;;  %v8926_v21 = vadd.f32 1e-05, %v835_v14 }
 0x12b   : > { %v8930_v25 = vadd.f32 1e-05, %v837_v12  ;;  %8369 = vrsqrt.f32 %v8926_v21  ;;  %v6676_v12 = vor.u32 %v7877_v4, %v6673_v5  ;;  %vm849_vm7 = vweird.f32 %v8926_v21  ;;  %v6647_v4 = vld [vmem:[%s8761_s23 + $0xd0] sm:$0xf] }
 0x12c   : > { %v6724_v5 = vor.u32 %v7889_v2, %v6721_v3 }
 0x12d   : > { %8371 = vrsqrt.f32 %v8930_v25  ;;  %1346 = vmatpush.bf16.msrb.mxu0 %v6676_v12  ;;  %vm869_vm14 = vweird.f32 %v8930_v25 }
 0x12e   : > { %v826_v36 = vpop.xlane.xlu2 %825 }
 0x12f   : > { %v836_v46 = vmul.f32 %v826_v36, %v8837_v37  ;;  %v6665_v36 = vld [vmem:[%s8761_s23 + $0xf8] sm:$0xf0] }
 0x130   : > { %v834_v32 = vpop.xlane.xlu1 %833 }
 0x131   : > { %v838_v35 = vmul.f32 %v834_v32, %v8837_v37  ;;  %v8370_v53 = vpop.eup %8369  ;;  %v8949_v54 = vadd.f32 1e-05, %v836_v46  ;;  %v7875_v32 = vld [vmem:[%s8761_s23 + $0xf4] sm:$0xf]  ;;  %v6729_v46 = vld [vmem:[%s8761_s23 + $0x178] sm:$0xf0] }
 0x132   : > { %v844_v57 = vmul.f32 %v8370_v53, %v8926_v21  ;;  %vm850_vm6 = vweird.f32 %v8370_v53  ;;  %v6668_v41 = vor.u32 %v7875_v32, %v6665_v36  ;;  %v6732_v52 = vor.u32 %v7891_v38, %v6729_v46  ;;  %v6641_v38 = vld [vmem:[%s8761_s23 + $0xc8] sm:$0xf0] }
 0x133   : > { %v8945_v49 = vadd.f32 1e-05, %v838_v35  ;;  %v8956_v63 = vpop.eup %8371  ;;  %vm851_vm8 = vmor %vm849_vm7, %vm850_vm6  ;;  %v6728_v35 = vor.u32 %v7892_v31, %v6727_v27  ;;  %vm859_vm10 = vweird.f32 %v8949_v54  ;;  %v7870_v27 = vld [vmem:[%s8761_s23 + $0xc4] sm:$0xf0]  ;;  %vm4070_vm6 = vcmask 654336  }
 0x134   : > { %v845_v0 = vmul.f32 %v8370_v53, %v844_v57  ;;  %v864_v7 = vmul.f32 %v8956_v63, %v8930_v25  ;;  %1347 = vmatpush.bf16.msrb.mxu0 %v6668_v41  ;;  %v6657_v57 = vld [vmem:[%s8761_s23 + $0xe8] sm:$0xf0]  ;;  %1366 = vmatpush.bf16.msrb.mxu2 %v6732_v52  ;;  %v6640_v32 = vor.u32 %v7870_v27, %v6639_v26  ;;  %vm870_vm15 = vweird.f32 %v8956_v63 }
 0x135   : > { %8373 = vrsqrt.f32 %v8945_v49  ;;  %1328 = vmatpush.bf16.msrb.mxu3 %v6728_v35  ;;  %v6660_v1 = vor.u32 %v7873_v56, %v6657_v57  ;;  %vm879_vm12 = vweird.f32 %v8945_v49  ;;  %vm871_vm1 = vmor %vm869_vm14, %vm870_vm15  ;;  %v6822_v56 = vld [vmem:[%s8761_s23 + $0x1f8] sm:$0xf0]  ;;  %vm4075_vm7 = vcmask 785408  }
 0x136   : > { %8375 = vrsqrt.f32 %v8949_v54  ;;  %v846_v6 = vmul.f32 0.5, %v845_v0  ;;  %v865_v20 = vmul.f32 %v8956_v63, %v864_v7  ;;  %v6711_v7 = vld [vmem:[%s8761_s23 + $0x150] sm:$0xf] }
 0x138   : > { %v847_v11 = vsub.f32 1.5, %v846_v6  ;;  %v9005_v40 = vmul.f32 0.5, %v865_v20  ;;  %v7872_v6 = vld [vmem:[%s8761_s23 + $0xd4] sm:$0xf0]  ;;  %1348 = vmatpush.bf16.msrb.mxu0 %v6660_v1  ;;  %1367 = vmatpush.bf16.msrb.mxu2 %v6724_v5  ;;  %v7905_v1 = vld [vmem:[%s8761_s23 + $0x1e4] sm:$0xf] }
 0x13a   : > { %v848_v16 = vmul.f32 %v8370_v53, %v847_v11 }
 0x13b   : > { %v8964_v9 = vpop.eup %8373 }
 0x13c   : > { %v8971_v13 = vpop.eup %8375  ;;  %v874_v14 = vmul.f32 %v8964_v9, %v8945_v49  ;;  %v852_v23 = vsel %vm851_vm8, %v8370_v53, %v848_v16  ;;  %v7874_v53 = vld [vmem:[%s8761_s23 + $0xe4] sm:$0xf0]  ;;  %v6649_v16 = vld [vmem:[%s8761_s23 + $0xd8] sm:$0xf0]  ;;  %vm880_vm13 = vweird.f32 %v8964_v9  ;;  %vm4080_vm8 = vcmask 916480  }
 0x13d   : > { %v854_v17 = vmul.f32 %v8971_v13, %v8949_v54  ;;  %vm860_vm9 = vweird.f32 %v8971_v13  ;;  %v883_v39 = vmul.f32 %v852_v23, %v8845_v44  ;;  %v884_v48 = vmul.f32 %v852_v23, %v8847_v45  ;;  %v6719_v54 = vld [vmem:[%s8761_s23 + $0x160] sm:$0xf]  ;;  %vm881_vm0 = vmor %vm879_vm12, %vm880_vm13 }
 0x13e   : > { %v875_v22 = vmul.f32 %v8964_v9, %v874_v14  ;;  %vm9014_vm11 = vmor %vm859_vm10, %vm860_vm9  ;;  %v6656_v45 = vor.u32 %v7874_v53, %v6655_v47  ;;  %v6720_v0 = vor.u32 %v7890_v55, %v6719_v54  ;;  %v6648_v14 = vor.u32 %v7872_v6, %v6647_v4  ;;  %v6820_v54 = vld [vmem:[%s8761_s23 + $0x1f0] sm:$0xf]  ;;  %v7907_v55 = vld [vmem:[%s8761_s23 + $0x1f4] sm:$0xf] }
 0x13f   : > { %v855_v21 = vmul.f32 %v8971_v13, %v854_v17  ;;  %v896_v10 = vmul.f32 %v8983_v18, %v883_v39  ;;  %v897_v11 = vmul.f32 %v8985_v19, %v884_v48  ;;  %v7887_v17 = vld [vmem:[%s8761_s23 + $0x154] sm:$0xf]  ;;  %v6712_v23 = vor.u32 %v7888_v8, %v6711_v7  ;;  %v7885_v39 = vld [vmem:[%s8761_s23 + $0x144] sm:$0xf]  ;;  %v6804_v6 = vld [vmem:[%s8761_s23 + $0x1d0] sm:$0xf] }
 0x140   : > { %v8995_v29 = vmul.f32 0.5, %v875_v22  ;;  %1310 = vmatpush.bf16.msrb.mxu1 %v6656_v45  ;;  %1329 = vmatpush.bf16.msrb.mxu3 %v6720_v0  ;;  %v7908_v45 = vld [vmem:[%s8761_s23 + $0x1f4] sm:$0xf0]  ;;  %v7906_v0 = vld [vmem:[%s8761_s23 + $0x1e4] sm:$0xf0] }
 0x141   : > { %v856_v34 = vmul.f32 0.5, %v855_v21  ;;  %v6652_v21 = vor.u32 %v7871_v15, %v6649_v16  ;;  %v909_v41 = vadd.f32 %v8993_v28, %v896_v10  ;;  %v910_v46 = vadd.f32 %v9000_v33, %v897_v11  ;;  %v7904_v8 = vld [vmem:[%s8761_s23 + $0x1d4] sm:$0xf0]  ;;  %v6806_v10 = vld [vmem:[%s8761_s23 + $0x1d8] sm:$0xf0] }
 0x142   : > { %v877_v50 = vsub.f32 1.5, %v8995_v29  ;;  %v6703_v29 = vld [vmem:[%s8761_s23 + $0x140] sm:$0xf]  ;;  %v6821_v25 = vor.u32 %v7908_v45, %v6820_v54  ;;  %v6846_v54 = vld [vmem:[%s8761_s23 + $0x228] sm:$0xf0] }
 0x143   : > { %v857_v51 = vsub.f32 1.5, %v856_v34  ;;  %v7869_v34 = vld [vmem:[%s8761_s23 + $0xc4] sm:$0xf]  ;;  %1349 = vmatpush.bf16.msrb.mxu0 %v6652_v21  ;;  %v6796_v16 = vld [vmem:[%s8761_s23 + $0x1c0] sm:$0xf] }
 0x144   : > { %1311 = vmatpush.bf16.msrb.mxu1 %v6648_v14  ;;  %v878_v35 = vmul.f32 %v8964_v9, %v877_v50  ;;  %1330 = vmatpush.bf16.msrb.mxu3 %v6712_v23  ;;  %v6644_v44 = vor.u32 %v7869_v34, %v6641_v38  ;;  %v6805_v14 = vor.u32 %v7904_v8, %v6804_v6  ;;  %v6780_v38 = vld [vmem:[%s8761_s23 + $0x1a0] sm:$0xf]  ;;  %v6772_v45 = vld [vmem:[%s8761_s23 + $0x190] sm:$0xf] }
 0x145   : > { %v858_v62 = vmul.f32 %v8971_v13, %v857_v51  ;;  %v6828_v8 = vld [vmem:[%s8761_s23 + $0x200] sm:$0xf] }
 0x146   : > { %v882_v53 = vsel %vm881_vm0, %v8964_v9, %v878_v35  ;;  %v9086_v9 = vor.u32 %v7907_v55, %v6822_v56  ;;  %v7915_v35 = vld [vmem:[%s8761_s23 + $0x234] sm:$0xf]  ;;  %v7896_v55 = vld [vmem:[%s8761_s23 + $0x194] sm:$0xf0]  ;;  %v6836_v56 = vld [vmem:[%s8761_s23 + $0x210] sm:$0xf] }
 0x147   : > { %v862_v12 = vsel %vm9014_vm11, %v8971_v13, %v858_v62  ;;  %v867_v13 = vsub.f32 1.5, %v9005_v40  ;;  %v6705_v40 = vld [vmem:[%s8761_s23 + $0x148] sm:$0xf0]  ;;  %v6812_v62 = vld [vmem:[%s8761_s23 + $0x1e0] sm:$0xf]  ;;  %v889_v2 = vmul.f32 %v882_v53, %v8861_v58  ;;  %v890_v3 = vmul.f32 %v882_v53, %v8863_v59  ;;  %1350 = vmatpush.bf16.msrb.mxu0 %v6644_v44 }
 0x148   : > { %v885_v20 = vmul.f32 %v862_v12, %v8865_v60  ;;  %v886_v22 = vmul.f32 %v862_v12, %v8867_v61  ;;  %v6716_v60 = vor.u32 %v7887_v17, %v6713_v24  ;;  %v7886_v61 = vld [vmem:[%s8761_s23 + $0x144] sm:$0xf0]  ;;  %1312 = vmatpush.bf16.msrb.mxu1 %v6640_v32  ;;  %v6708_v52 = vor.u32 %v7885_v39, %v6705_v40  ;;  %v7903_v59 = vld [vmem:[%s8761_s23 + $0x1d4] sm:$0xf]  ;;  %v6782_v44 = vld [vmem:[%s8761_s23 + $0x1a8] sm:$0xf0] }
 0x149   : > { %v6704_v36 = vor.u32 %v7886_v61, %v6703_v29  ;;  %v868_v50 = vmul.f32 %v8956_v63, %v867_v13  ;;  %v6813_v4 = vor.u32 %v7906_v0, %v6812_v62  ;;  %v902_v11 = vmul.f32 %v8983_v18, %v889_v2  ;;  %v7900_v29 = vld [vmem:[%s8761_s23 + $0x1b4] sm:$0xf0]  ;;  %v6852_v61 = vld [vmem:[%s8761_s23 + $0x230] sm:$0xf]  ;;  %v7898_v40 = vld [vmem:[%s8761_s23 + $0x1a4] sm:$0xf0] }
 0x14a   : > { %v898_v30 = vmul.f32 %v8983_v18, %v885_v20  ;;  %v899_v31 = vmul.f32 %v8985_v19, %v886_v22  ;;  %1368 = vmatpush.bf16.msrb.mxu2 %v6716_v60  ;;  %v903_v12 = vmul.f32 %v8985_v19, %v890_v3  ;;  %v9106_v15 = vor.u32 %v7903_v59, %v6806_v10  ;;  %v7901_v20 = vld [vmem:[%s8761_s23 + $0x1c4] sm:$0xf]  ;;  %v6798_v22 = vld [vmem:[%s8761_s23 + $0x1c8] sm:$0xf0]  ;;  %v6788_v60 = vld [vmem:[%s8761_s23 + $0x1b0] sm:$0xf] }
 0x14b   : > { %1331 = vmatpush.bf16.msrb.mxu3 %v6704_v36  ;;  %v872_v57 = vsel %vm871_vm1, %v8956_v63, %v868_v50  ;;  %v6814_v63 = vld [vmem:[%s8761_s23 + $0x1e8] sm:$0xf0]  ;;  %v915_v23 = vadd.f32 %v8993_v28, %v902_v11  ;;  %v6854_v36 = vld [vmem:[%s8761_s23 + $0x238] sm:$0xf0]  ;;  %v7897_v50 = vld [vmem:[%s8761_s23 + $0x1a4] sm:$0xf]  ;;  %v6773_v3 = vor.u32 %v7896_v55, %v6772_v45 }
 0x14c   : > { %v911_v47 = vadd.f32 %v8993_v28, %v898_v30  ;;  %v912_v48 = vadd.f32 %v9000_v33, %v899_v31  ;;  %v9095_v5 = vor.u32 %v7905_v1, %v6814_v63  ;;  %v887_v7 = vmul.f32 %v872_v57, %v8841_v42  ;;  %v7899_v30 = vld [vmem:[%s8761_s23 + $0x1b4] sm:$0xf]  ;;  %v6790_v31 = vld [vmem:[%s8761_s23 + $0x1b8] sm:$0xf0]  ;;  %v7910_v59 = vld [vmem:[%s8761_s23 + $0x204] sm:$0xf0] }
 0x14d   : > { %v888_v58 = vmul.f32 %v872_v57, %v8843_v43  ;;  %v7902_v43 = vld [vmem:[%s8761_s23 + $0x1c4] sm:$0xf0]  ;;  %v916_v21 = vadd.f32 %v9000_v33, %v903_v12  ;;  %v9138_v34 = vor.u32 %v7899_v30, %v6790_v31  ;;  %v6857_v39 = vor.u32 %v7915_v35, %v6854_v36  ;;  %v7912_v57 = vld [vmem:[%s8761_s23 + $0x214] sm:$0xf0]  ;;  %v7895_v62 = vld [vmem:[%s8761_s23 + $0x194] sm:$0xf] }
 0x14e   : > { %v9070_v51 = vpack.c.bf16 %v911_v47, %v909_v41  ;;  %v9072_v49 = vpack.c.bf16 %v912_v48, %v910_v46  ;;  %1369 = vmatpush.bf16.msrb.mxu2 %v6708_v52  ;;  %v900_v17 = vmul.f32 %v8983_v18, %v887_v7  ;;  %v6797_v24 = vor.u32 %v7902_v43, %v6796_v16  ;;  %v6844_v41 = vld [vmem:[%s8761_s23 + $0x220] sm:$0xf]  ;;  %v7914_v46 = vld [vmem:[%s8761_s23 + $0x224] sm:$0xf0]  ;;  %v7913_v52 = vld [vmem:[%s8761_s23 + $0x224] sm:$0xf] }
 0x14f   : > { %v901_v42 = vmul.f32 %v8985_v19, %v888_v58  ;;  %v9117_v18 = vor.u32 %v7901_v20, %v6798_v22  ;;  %v6781_v47 = vor.u32 %v7898_v40, %v6780_v38  ;;  %v6845_v48 = vor.u32 %v7914_v46, %v6844_v41  ;;  %v6774_v0 = vld [vmem:[%s8761_s23 + $0x198] sm:$0xf0]  ;;  %v7911_v1 = vld [vmem:[%s8761_s23 + $0x214] sm:$0xf]  ;;  %v7894_v58 = vld [vmem:[%s8761_s23 + $0x184] sm:$0xf0] }
 0x150   : > { %1085 = vmatmul.bf16.vlgmr.msra.gmra.mxu0 %v9070_v51  ;;  %6608 = vmatmul.msk.bf16.vlgmr.msra.gmra.mxu1 %vm775_vm4, %v9072_v49  ;;  %v913_v19 = vadd.f32 %v8993_v28, %v900_v17  ;;  %v6789_v28 = vor.u32 %v7900_v29, %v6788_v60  ;;  %v6785_v53 = vor.u32 %v7897_v50, %v6782_v44  ;;  %v6838_v2 = vld [vmem:[%s8761_s23 + $0x218] sm:$0xf0]  ;;  %v7893_v10 = vld [vmem:[%s8761_s23 + $0x184] sm:$0xf]  ;;  %v6830_v17 = vld [vmem:[%s8761_s23 + $0x208] sm:$0xf0] }
 0x151   : > { %1123 = vmatmul.bf16.vlgmr.msra.gmra.mxu2 %v9070_v51  ;;  %6610 = vmatmul.msk.bf16.vlgmr.msra.gmra.mxu3 %vm775_vm4, %v9072_v49  ;;  %v914_v26 = vadd.f32 %v9000_v33, %v901_v42  ;;  %v7916_v33 = vld [vmem:[%s8761_s23 + $0x234] sm:$0xf0]  ;;  %v6837_v63 = vor.u32 %v7912_v57, %v6836_v56  ;;  %v6777_v6 = vor.u32 %v7895_v62, %v6774_v0  ;;  %v7909_v16 = vld [vmem:[%s8761_s23 + $0x204] sm:$0xf] }
 0x152   : > { %1533 = vmatpush.bf16.msra.mxu1 %v6821_v25  ;;  %1571 = vmatpush.bf16.msra.mxu0 %v9086_v9  ;;  %v9121_v27 = vpack.c.bf16 %v915_v23, %v913_v19  ;;  %v6853_v32 = vor.u32 %v7916_v33, %v6852_v61  ;;  %v6849_v25 = vor.u32 %v7913_v52, %v6846_v54 }
 0x153   : > { %v9123_v13 = vpack.c.bf16 %v916_v21, %v914_v26  ;;  %1594 = vmatpush.bf16.msra.mxu2 %v6857_v39  ;;  %v6841_v7 = vor.u32 %v7911_v1, %v6838_v2  ;;  %v6829_v12 = vor.u32 %v7910_v59, %v6828_v8  ;;  %v6833_v43 = vor.u32 %v7909_v16, %v6830_v17 }
 0x154   : > { %1556 = vmatpush.bf16.msra.mxu3 %v6853_v32 }
 0x156   : > { %1534 = vmatpush.bf16.msra.mxu1 %v6813_v4  ;;  %1572 = vmatpush.bf16.msra.mxu0 %v9095_v5  ;;  %v6764_v4 = vld [vmem:[%s8761_s23 + $0x180] sm:$0xf] }
 0x157   : > { %1595 = vmatpush.bf16.msra.mxu2 %v6849_v25  ;;  %v6765_v11 = vor.u32 %v7894_v58, %v6764_v4 }
 0x158   : > { %1557 = vmatpush.bf16.msra.mxu3 %v6845_v48 }
 0x15a   : > { %1535 = vmatpush.bf16.msra.mxu1 %v6805_v14  ;;  %1573 = vmatpush.bf16.msra.mxu0 %v9106_v15  ;;  %v6766_v14 = vld [vmem:[%s8761_s23 + $0x188] sm:$0xf0]  ;;  %s8636_s23 = smov 64  }
 0x15b   : > { %1596 = vmatpush.bf16.msra.mxu2 %v6841_v7  ;;  %v6769_v42 = vor.u32 %v7893_v10, %v6766_v14 }
 0x15c   : > { %1558 = vmatpush.bf16.msra.mxu3 %v6837_v63 }
 0x15e   : > { %1536 = vmatpush.bf16.msra.mxu1 %v6797_v24  ;;  %1574 = vmatpush.bf16.msra.mxu0 %v9117_v18 }
 0x15f   : > { %1597 = vmatpush.bf16.msra.mxu2 %v6833_v43 }
 0x160   : > { %1090 = vmatmul.bf16.gmra.mxu0 %v9121_v27  ;;  %6609 = vmatmul.msk.bf16.gmra.mxu1 %vm775_vm4, %v9123_v13 }
 0x161   : > { %1128 = vmatmul.bf16.gmra.mxu2 %v9121_v27  ;;  %6611 = vmatmul.msk.bf16.gmra.mxu3 %vm775_vm4, %v9123_v13 }
 0x162   : > { %1537 = vmatpush.bf16.msra.mxu1 %v6789_v28  ;;  %1575 = vmatpush.bf16.msra.mxu0 %v9138_v34 }
 0x163   : > { %1559 = vmatpush.bf16.msra.mxu3 %v6829_v12 }
 0x166   : > { %1538 = vmatpush.bf16.msra.mxu1 %v6781_v47  ;;  %1576 = vmatpush.bf16.msra.mxu0 %v6785_v53  ;;  %v9240_v47 = vld [vmem:[%s8770_s29 + $0x2] sm:$0x3] }
 0x167   : > { %v1181_v50 = vperm.slane %v9240_v47, 0 }
 0x16a   : > { %1539 = vmatpush.bf16.msra.mxu1 %v6773_v3  ;;  %1577 = vmatpush.bf16.msra.mxu0 %v6777_v6 }
 0x16e   : > { %1540 = vmatpush.bf16.msra.mxu1 %v6765_v11  ;;  %1578 = vmatpush.bf16.msra.mxu0 %v6769_v42  ;;  %v9287_v11 = vld [vmem:[%s8770_s29 + $0x4] sm:$0x3] }
 0x16f   : > { %v1409_v17 = vperm.slane %v9287_v11, 0 }
 0x170   : > { %1313 = vmatmul.bf16.vlgmr.msrb.gmra.mxu1 %v9070_v51  ;;  %1351 = vmatmul.bf16.vlgmr.msrb.gmra.mxu0 %v9070_v51 }
 0x171   : > { %6733 = vmatmul.msk.bf16.vlgmr.msrb.gmra.mxu3 %vm775_vm4, %v9072_v49  ;;  %6735 = vmatmul.msk.bf16.vlgmr.msrb.gmra.mxu2 %vm775_vm4, %v9072_v49 }
 0x172   : > { %8121 = vmatpush.bf16.msrb.mxu3 %v9086_v9  ;;  %v945_v9 = vld [vmem:[%s8770_s29] sm:$0x3] }
 0x173   : > { %v9208_v24 = vperm.slane %v945_v9, 1 }
 0x176   : > { %8122 = vmatpush.bf16.msrb.mxu3 %v9095_v5  ;;  %v9197_v5 = vperm.slane %v945_v9, 0 }
 0x17a   : > { %8123 = vmatpush.bf16.msrb.mxu3 %v9106_v15 }
 0x17e   : > { %8124 = vmatpush.bf16.msrb.mxu3 %v9117_v18 }
 0x180   : > { %1318 = vmatmul.bf16.gmra.mxu1 %v9121_v27  ;;  %1356 = vmatmul.bf16.gmra.mxu0 %v9121_v27 }
 0x181   : > { %6734 = vmatmul.msk.bf16.gmra.mxu3 %vm775_vm4, %v9123_v13  ;;  %6736 = vmatmul.msk.bf16.gmra.mxu2 %vm775_vm4, %v9123_v13 }
 0x182   : > { %8125 = vmatpush.bf16.msrb.mxu3 %v9138_v34 }
 0x186   : > { %8126 = vmatpush.bf16.msrb.mxu3 %v6785_v53 }
 0x18a   : > { %8127 = vmatpush.bf16.msrb.mxu3 %v6777_v6 }
 0x18e   : > { %8128 = vmatpush.bf16.msrb.mxu3 %v6769_v42 }
 0x190   : > { %1541 = vmatmul.bf16.vlgmr.msra.gmra.mxu1 %v9070_v51  ;;  %1579 = vmatmul.bf16.vlgmr.msra.gmra.mxu0 %v9070_v51 }
 0x191   : > { %6858 = vmatmul.msk.bf16.vlgmr.msra.gmra.mxu3 %vm775_vm4, %v9072_v49  ;;  %6860 = vmatmul.msk.bf16.vlgmr.msra.gmra.mxu2 %vm775_vm4, %v9072_v49 }
 0x1a0   : > { %1546 = vmatmul.bf16.gmra.mxu1 %v9121_v27 }
 0x1a1   : > { %6859 = vmatmul.msk.bf16.gmra.mxu3 %vm775_vm4, %v9123_v13  ;;  %6861 = vmatmul.msk.bf16.gmra.mxu2 %vm775_vm4, %v9123_v13 }
 0x1b1   : > { %1584 = vmatmul.bf16.vlgmr.msrb.gmra.mxu3 %v9121_v27 }
 0x1cd   : > { %v1086_v51 = vpop.f32.mrf.mxu0  ;;  %v1105_v15 = vpop.f32.mrf.mxu1 }
 0x1ce   : > { %v1087_v20 = vadd.f32 %v1086_v51, %v9197_v5 }
 0x1d0   : > { %v1106_v22 = vadd.f32 %v1105_v15, %v1087_v20 }
 0x1d2   : > { %v9200_v23 = vmul.f32 0.07216878, %v1106_v22 }
 0x1d4   : > { %v1143_v49 = vpop.f32.mrf.mxu3  ;;  %2372 = vrot.lane.b32.xlu0 %v9200_v23, %s8636_s23  ;;  %2180 = vrot.lane.b32.xlu2 %v9200_v23, %s8637_s22  ;;  %v1124_v18 = vpop.f32.mrf.mxu2 }
 0x1d5   : > { %1792 = vrot.lane.b32.xlu1 %v9200_v23, %s8638_s28  ;;  %v1107_v21 = vpop.f32.mrf.mxu1  ;;  %v1125_v19 = vadd.f32 %v1124_v18, %v9208_v24  ;;  %v1088_v60 = vpop.f32.mrf.mxu0 }
 0x1d6   : > { %v1089_v61 = vadd.f32 %v1088_v60, %v9197_v5 }
 0x1d7   : > { %v1144_v13 = vadd.f32 %v1143_v49, %v1125_v19 }
 0x1d8   : > { %v1108_v30 = vadd.f32 %v1107_v21, %v1089_v61 }
 0x1d9   : > { %v9217_v29 = vmul.f32 0.07216878, %v1144_v13 }
 0x1da   : > { %v1611_v31 = vmul.f32 0.07216878, %v1108_v30 }
 0x1dc   : > { %v1145_v26 = vpop.f32.mrf.mxu3  ;;  %2948 = vrot.lane.b32.xlu0 %v9200_v23, %s8639_s14  ;;  %2756 = vrot.lane.b32.xlu2 %v9200_v23, %s8640_s15  ;;  %v1126_v35 = vpop.f32.mrf.mxu2 }
 0x1dd   : > { %1988 = vrot.lane.b32.xlu1 %v9200_v23, %s8641_s24  ;;  %v1110_v27 = vpop.f32.mrf.mxu1  ;;  %v1091_v36 = vpop.f32.mrf.mxu0  ;;  %v1127_v38 = vadd.f32 %v1126_v35, %v9208_v24 }
 0x1de   : > { %v1092_v39 = vadd.f32 %v1091_v36, %v9197_v5 }
 0x1df   : > { %v1146_v46 = vadd.f32 %v1145_v26, %v1127_v38 }
 0x1e0   : > { %v1111_v48 = vadd.f32 %v1110_v27, %v1092_v39 }
 0x1e1   : > { %v9243_v44 = vmul.f32 0.07216878, %v1146_v46 }
 0x1e2   : > { %v9245_v52 = vmul.f32 0.07216878, %v1111_v48 }
 0x1e4   : > { %v1148_v28 = vpop.f32.mrf.mxu3  ;;  %3312 = vrot.lane.b32.xlu0 %v9217_v29, %s8638_s28  ;;  %3508 = vrot.lane.b32.xlu2 %v9217_v29, %s8641_s24  ;;  %v1129_v0 = vpop.f32.mrf.mxu2 }
 0x1e5   : > { %2564 = vrot.lane.b32.xlu1 %v9200_v23, %s8642_s26  ;;  %v9226_v33 = vpop.f32.mrf.mxu1  ;;  %v1130_v1 = vadd.f32 %v1129_v0, %v9208_v24  ;;  %v1093_v58 = vpop.f32.mrf.mxu0 }
 0x1e6   : > { %v1094_v10 = vadd.f32 %v1093_v58, %v9197_v5 }
 0x1e7   : > { %v1149_v6 = vadd.f32 %v1148_v28, %v1130_v1 }
 0x1e8   : > { %v1113_v16 = vadd.f32 %v9226_v33, %v1094_v10 }
 0x1e9   : > { %v9281_v59 = vmul.f32 0.07216878, %v1149_v6 }
 0x1ea   : > { %v1615_v42 = vmul.f32 0.07216878, %v1113_v16 }
 0x1ec   : > { %v9228_v32 = vpop.f32.mrf.mxu3  ;;  %2182 = vrot.lane.b32.xlu0 %v1611_v31, %s8637_s22  ;;  %3700 = vrot.lane.b32.xlu2 %v9217_v29, %s8637_s22 }
 0x1ed   : > { %2374 = vrot.lane.b32.xlu1 %v1611_v31, %s8636_s23  ;;  %v1314_v34 = vpop.f32.mrf.mxu1 }
 0x1ee   : > { %v1315_v25 = vadd.f32 %v1314_v34, %v1181_v50 }
 0x1f4   : > { %v1333_v40 = vpop.f32.mrf.mxu3  ;;  %2758 = vrot.lane.b32.xlu0 %v1611_v31, %s8640_s15  ;;  %1794 = vrot.lane.b32.xlu2 %v1611_v31, %s8638_s28 }
 0x1f5   : > { %2950 = vrot.lane.b32.xlu1 %v1611_v31, %s8639_s14  ;;  %v1316_v41 = vpop.f32.mrf.mxu1  ;;  %v9256_v56 = vadd.f32 %v1333_v40, %v1315_v25 }
 0x1f6   : > { %v1317_v53 = vadd.f32 %v1316_v41, %v1181_v50 }
 0x1fc   : > { %v1335_v54 = vpop.f32.mrf.mxu3  ;;  %3510 = vrot.lane.b32.xlu0 %v9243_v44, %s8641_s24  ;;  %1990 = vrot.lane.b32.xlu2 %v1611_v31, %s8641_s24 }
 0x1fd   : > { %v9250_v45 = vadd.f32 %v1335_v54, %v1317_v53  ;;  %2219 = vrot.lane.b32.xlu1 %v9245_v52, %s8637_s22  ;;  %v1319_v55 = vpop.f32.mrf.mxu1 }
 0x1fe   : > { %v1320_v7 = vadd.f32 %v1319_v55, %v1181_v50 }
 0x1ff   : > { %6862 = vmatpush.xpose.msk.msrb.mxu1 %vm1619_vm2, %v9250_v45 }
 0x203   : > { %6863 = vmatpush.xpose.msk.msrb.mxu1 %vm1619_vm2, %v9256_v56 }
 0x204   : > { %v1338_v57 = vpop.f32.mrf.mxu3  ;;  %2566 = vrot.lane.b32.xlu2 %v1611_v31, %s8642_s26  ;;  %2027 = vrot.lane.b32.xlu0 %v9245_v52, %s8641_s24 }
 0x205   : > { %2795 = vrot.lane.b32.xlu1 %v9245_v52, %s8640_s15  ;;  %v1321_v62 = vpop.f32.mrf.mxu1  ;;  %v9279_v8 = vadd.f32 %v1338_v57, %v1320_v7 }
 0x206   : > { %6864 = vmatmul.msk.f32.vlgmr.msrb.gmra.mxu1 %vm1619_vm2, %v9200_v23  ;;  %v1322_v2 = vadd.f32 %v1321_v62, %v1181_v50  ;;  %v1131_v23 = vpop.f32.mrf.mxu2 }
 0x207   : > { %v1132_v49 = vadd.f32 %v1131_v23, %v9208_v24 }
 0x209   : > { %v1151_v18 = vadd.f32 %v9228_v32, %v1132_v49  ;;  %v1352_v32 = vpop.f32.mrf.mxu0 }
 0x20b   : > { %v9313_v26 = vmul.f32 0.07216878, %v1151_v18 }
 0x20c   : > { %v1340_v3 = vpop.f32.mrf.mxu3  ;;  %3314 = vrot.lane.b32.xlu2 %v9243_v44, %s8638_s28  ;;  %2603 = vrot.lane.b32.xlu0 %v9245_v52, %s8642_s26 }
 0x20d   : > { %v9272_v63 = vadd.f32 %v1340_v3, %v1322_v2  ;;  %2987 = vrot.lane.b32.xlu1 %v9245_v52, %s8639_s14  ;;  %v1542_v4 = vpop.f32.mrf.mxu1 }
 0x20e   : > { %6865 = vmatmul.msk.f32.gmra.mxu1 %vm1619_vm2, %v1611_v31  ;;  %v1543_v43 = vadd.f32 %v1542_v4, %v1409_v17  ;;  %v9334_v31 = vperm.slane %v9240_v47, 1  ;;  %v1371_v35 = vpop.f32.mrf.mxu2 }
 0x20f   : > { %6866 = vmatpush.xpose.msk.msra.mxu3 %vm1619_vm2, %v9272_v63 }
 0x210   : > { %v1353_v36 = vadd.f32 %v1352_v32, %v9334_v31 }
 0x211   : > { %v1354_v54 = vpop.f32.mrf.mxu0 }
 0x212   : > { %v9341_v38 = vadd.f32 %v1371_v35, %v1353_v36  ;;  %v1355_v62 = vadd.f32 %v1354_v54, %v9334_v31 }
 0x213   : > { %6867 = vmatpush.xpose.msk.msra.mxu3 %vm1619_vm2, %v9279_v8 }
 0x214   : > { %v1561_v12 = vpop.f32.mrf.mxu3  ;;  %3702 = vrot.lane.b32.xlu2 %v9243_v44, %s8637_s22  ;;  %3351 = vrot.lane.b32.xlu0 %v9281_v59, %s8638_s28 }
 0x215   : > { %3739 = vrot.lane.b32.xlu1 %v9281_v59, %s8637_s22  ;;  %v1544_v14 = vpop.f32.mrf.mxu1  ;;  %v1562_v51 = vadd.f32 %v1561_v12, %v1543_v43 }
 0x216   : > { %6868 = vmatmul.msk.f32.vlgmr.msra.gmra.mxu3 %vm1619_vm2, %v9245_v52  ;;  %v1545_v9 = vadd.f32 %v1544_v14, %v1409_v17  ;;  %v1373_v57 = vpop.f32.mrf.mxu2 }
 0x217   : > { %v9392_v0 = vadd.f32 %v1373_v57, %v1355_v62 }
 0x219   : > { %v1357_v12 = vpop.f32.mrf.mxu0 }
 0x21a   : > { %v1358_v43 = vadd.f32 %v1357_v12, %v9334_v31 }
 0x21c   : > { %v1563_v5 = vpop.f32.mrf.mxu3  ;;  %3547 = vrot.lane.b32.xlu0 %v9281_v59, %s8641_s24  ;;  %1831 = vrot.lane.b32.xlu2 %v9245_v52, %s8638_s28 }
 0x21d   : > { %v1564_v15 = vadd.f32 %v1563_v5, %v1545_v9  ;;  %2029 = vrot.lane.b32.xlu1 %v1615_v42, %s8641_s24  ;;  %v1547_v20 = vpop.f32.mrf.mxu1 }
 0x21e   : > { %6869 = vmatmul.msk.f32.gmra.mxu3 %vm1619_vm2, %v1615_v42  ;;  %v1548_v27 = vadd.f32 %v1547_v20, %v1409_v17  ;;  %v1376_v14 = vpop.f32.mrf.mxu2 }
 0x21f   : > { %1754 = vmatpush.msrb.mxu0 %v1564_v15  ;;  %v9305_v22 = vpack.i.bf16 %v1562_v51, %v1564_v15  ;;  %v9443_v9 = vadd.f32 %v1376_v14, %v1358_v43  ;;  %v1410_v14 = vperm.slane %v9287_v11, 1 }
 0x221   : > { %1755 = vmatpush.msrb.mxu0 %v1562_v51  ;;  %v1359_v5 = vpop.f32.mrf.mxu0 }
 0x222   : > { %v1360_v49 = vadd.f32 %v1359_v5, %v9334_v31 }
 0x224   : > { %v1566_v21 = vpop.f32.mrf.mxu3  ;;  %1833 = vrot.lane.b32.xlu0 %v1615_v42, %s8638_s28  ;;  %2411 = vrot.lane.b32.xlu2 %v9245_v52, %s8636_s23 }
 0x225   : > { %2605 = vrot.lane.b32.xlu1 %v1615_v42, %s8642_s26  ;;  %v1549_v19 = vpop.f32.mrf.mxu1  ;;  %v1567_v24 = vadd.f32 %v1566_v21, %v1548_v27 }
 0x226   : > { %v1550_v13 = vadd.f32 %v1549_v19, %v1409_v17  ;;  %v1378_v51 = vpop.f32.mrf.mxu2 }
 0x227   : > { %v9458_v21 = vadd.f32 %v1378_v51, %v1360_v49 }
 0x22c   : > { %v1568_v60 = vpop.f32.mrf.mxu3  ;;  %2413 = vrot.lane.b32.xlu0 %v1615_v42, %s8636_s23  ;;  %2221 = vrot.lane.b32.xlu2 %v1615_v42, %s8637_s22 }
 0x22d   : > { %v1569_v61 = vadd.f32 %v1568_v60, %v1550_v13  ;;  %3353 = vrot.lane.b32.xlu1 %v9313_v26, %s8638_s28 }
 0x22e   : > { %v9319_v28 = vpop.permute.xlu2 %2180  ;;  %v9470_v27 = vpop.f32.mrf.mxu2 }
 0x22f   : > { %1783 = vmatpush.msra.mxu1 %v1569_v61  ;;  %v9321_v33 = vpack.i.bf16 %v1567_v24, %v1569_v61 }
 0x231   : > { %1784 = vmatpush.msra.mxu1 %v1567_v24 }
 0x234   : > { %2989 = vrot.lane.b32.xlu0 %v1615_v42, %s8639_s14  ;;  %2797 = vrot.lane.b32.xlu2 %v1615_v42, %s8640_s15  ;;  %v1585_v31 = vpop.f32.mrf.mxu3 }
 0x235   : > { %2184 = vrot.lane.b32.xlu1 %v9256_v56, %s8637_s22  ;;  %v1586_v49 = vadd.f32 %v1585_v31, %v1410_v14 }
 0x236   : > { %v9327_v30 = vpop.permute.xlu2 %2756  ;;  %v1601_v61 = vpop.f32.mrf.mxu2 }
 0x23c   : > { %3741 = vrot.lane.b32.xlu0 %v9313_v26, %s8637_s22  ;;  %3549 = vrot.lane.b32.xlu2 %v9313_v26, %s8641_s24  ;;  %v1587_v12 = vpop.f32.mrf.mxu3 }
 0x23d   : > { %2760 = vrot.lane.b32.xlu1 %v9256_v56, %s8640_s15  ;;  %v1588_v5 = vadd.f32 %v1587_v12, %v1410_v14 }
 0x23e   : > { %v9338_v34 = vpop.permute.xlu2 %3508  ;;  %v1604_v54 = vpop.f32.mrf.mxu2 }
 0x23f   : > { %v9521_v11 = vadd.f32 %v1604_v54, %v1586_v49 }
 0x241   : > { %11397 = vst [vmem:[#allocation17_spill] sm:$0xff] %v9521_v11 }
 0x244   : > { %1796 = vrot.lane.b32.xlu0 %v9256_v56, %s8638_s28  ;;  %2376 = vrot.lane.b32.xlu2 %v9256_v56, %s8636_s23 }
 0x245   : > { %3316 = vrot.lane.b32.xlu1 %v9341_v38, %s8638_s28 }
 0x246   : > { %v9349_v39 = vpop.permute.xlu2 %3700  ;;  %v9351_v40 = vpop.permute.xlu0 %2372 }
 0x247   : > { %v9353_v41 = vpop.permute.xlu1 %1792  ;;  %v1606_v51 = vpop.f32.mrf.mxu2 }
 0x24c   : > { %1992 = vrot.lane.b32.xlu0 %v9256_v56, %s8641_s24  ;;  %2952 = vrot.lane.b32.xlu2 %v9256_v56, %s8639_s14 }
 0x24d   : > { %3512 = vrot.lane.b32.xlu1 %v9341_v38, %s8641_s24 }
 0x24e   : > { %v9361_v46 = vpop.permute.xlu2 %1794  ;;  %v9363_v47 = vpop.permute.xlu0 %2948 }
 0x24f   : > { %v9365_v48 = vpop.permute.xlu1 %1988 }
 0x254   : > { %2568 = vrot.lane.b32.xlu0 %v9256_v56, %s8642_s26  ;;  %3704 = vrot.lane.b32.xlu2 %v9341_v38, %s8637_s22 }
 0x255   : > { %2378 = vrot.lane.b32.xlu1 %v9250_v45, %s8636_s23 }
 0x256   : > { %v9373_v50 = vpop.permute.xlu2 %1990  ;;  %v9375_v52 = vpop.permute.xlu0 %3312 }
 0x257   : > { %v9377_v53 = vpop.permute.xlu1 %2564 }
 0x25c   : > { %2186 = vrot.lane.b32.xlu0 %v9250_v45, %s8637_s22  ;;  %1798 = vrot.lane.b32.xlu2 %v9250_v45, %s8638_s28 }
 0x25d   : > { %2954 = vrot.lane.b32.xlu1 %v9250_v45, %s8639_s14 }
 0x25e   : > { %v9385_v55 = vpop.permute.xlu2 %2566  ;;  %v9387_v25 = vpop.permute.xlu0 %2182 }
 0x25f   : > { %v9389_v56 = vpop.permute.xlu1 %2374 }
 0x264   : > { %2762 = vrot.lane.b32.xlu0 %v9250_v45, %s8640_s15  ;;  %1994 = vrot.lane.b32.xlu2 %v9250_v45, %s8641_s24 }
 0x265   : > { %3706 = vrot.lane.b32.xlu1 %v9392_v0, %s8637_s22 }
 0x266   : > { %v9400_v1 = vpop.permute.xlu2 %3314  ;;  %v9402_v2 = vpop.permute.xlu0 %2758 }
 0x267   : > { %v9404_v3 = vpop.permute.xlu1 %2950 }
 0x26c   : > { %3514 = vrot.lane.b32.xlu0 %v9392_v0, %s8641_s24  ;;  %2570 = vrot.lane.b32.xlu2 %v9250_v45, %s8642_s26 }
 0x26d   : > { %1835 = vrot.lane.b32.xlu1 %v9279_v8, %s8638_s28 }
 0x26e   : > { %v9412_v4 = vpop.permute.xlu2 %3702  ;;  %v9414_v6 = vpop.permute.xlu0 %3510 }
 0x26f   : > { %v9416_v7 = vpop.permute.xlu1 %2219 }
 0x274   : > { %2223 = vrot.lane.b32.xlu0 %v9279_v8, %s8637_s22  ;;  %3318 = vrot.lane.b32.xlu2 %v9392_v0, %s8638_s28 }
 0x275   : > { %2415 = vrot.lane.b32.xlu1 %v9279_v8, %s8636_s23 }
 0x276   : > { %v9424_v58 = vpop.permute.xlu2 %1831  ;;  %v9426_v45 = vpop.permute.xlu0 %2027 }
 0x277   : > { %v9428_v10 = vpop.permute.xlu1 %2795 }
 0x27c   : > { %2799 = vrot.lane.b32.xlu0 %v9279_v8, %s8640_s15  ;;  %2031 = vrot.lane.b32.xlu2 %v9279_v8, %s8641_s24 }
 0x27d   : > { %2033 = vrot.lane.b32.xlu1 %v9272_v63, %s8641_s24 }
 0x27e   : > { %v9436_v16 = vpop.permute.xlu2 %2411  ;;  %v9438_v17 = vpop.permute.xlu0 %2603 }
 0x27f   : > { %v9440_v42 = vpop.permute.xlu1 %2987 }
 0x284   : > { %3551 = vrot.lane.b32.xlu0 %v9443_v9, %s8641_s24  ;;  %2607 = vrot.lane.b32.xlu2 %v9279_v8, %s8642_s26 }
 0x285   : > { %2609 = vrot.lane.b32.xlu1 %v9272_v63, %s8642_s26 }
 0x286   : > { %v9451_v15 = vpop.permute.xlu2 %2221  ;;  %v9453_v20 = vpop.permute.xlu0 %3351 }
 0x287   : > { %11390 = vst [vmem:[#allocation10_spill] sm:$0xff] %v9453_v20  ;;  %v9455_v23 = vpop.permute.xlu1 %3739 }
 0x288   : > { %11391 = vst [vmem:[#allocation11_spill] sm:$0xff] %v9455_v23 }
 0x28c   : > { %1837 = vrot.lane.b32.xlu0 %v9272_v63, %s8638_s28  ;;  %2991 = vrot.lane.b32.xlu2 %v9279_v8, %s8639_s14 }
 0x28d   : > { %3357 = vrot.lane.b32.xlu1 %v9458_v21, %s8638_s28 }
 0x28e   : > { %v9466_v18 = vpop.permute.xlu2 %2797  ;;  %v9468_v19 = vpop.permute.xlu0 %3547 }
 0x28f   : > { %11392 = vst [vmem:[#allocation12_spill] sm:$0xff] %v9468_v19  ;;  %v9472_v13 = vpop.permute.xlu1 %2029 }
 0x294   : > { %2417 = vrot.lane.b32.xlu0 %v9272_v63, %s8636_s23  ;;  %3355 = vrot.lane.b32.xlu2 %v9443_v9, %s8638_s28 }
 0x295   : > { %8173 = vrot.lane.b32.xlu1 %v9305_v22, %s8641_s24 }
 0x296   : > { %v9480_v8 = vpop.permute.xlu2 %3549  ;;  %v9482_v60 = vpop.permute.xlu0 %1833 }
 0x297   : > { %11393 = vst [vmem:[#allocation13_spill] sm:$0xff] %v9480_v8  ;;  %v9484_v24 = vpop.permute.xlu1 %2605  ;;  %v9519_v8 = vadd.f32 %v1606_v51, %v1588_v5  ;;  %v1580_v5 = vpop.f32.mrf.mxu0 }
 0x299   : > { %11396 = vst [vmem:[#allocation16_spill] sm:$0xff] %v9519_v8  ;;  %v9527_v19 = vpack.i.bf16 %v9521_v11, %v9519_v8 }
 0x29b   : > { %11398 = vst [vmem:[#allocation18_spill] sm:$0xff] %v9527_v19 }
 0x29c   : > { %2993 = vrot.lane.b32.xlu0 %v9272_v63, %s8639_s14  ;;  %3743 = vrot.lane.b32.xlu2 %v9443_v9, %s8637_s22 }
 0x29d   : > { %8188 = vrot.lane.b32.xlu1 %v9305_v22, %s8642_s26 }
 0x29e   : > { %v9492_v32 = vpop.permute.xlu2 %2376  ;;  %v9494_v35 = vpop.permute.xlu0 %2413 }
 0x29f   : > { %v9496_v36 = vpop.permute.xlu1 %3353  ;;  %v1582_v11 = vpop.f32.mrf.mxu0 }
 0x2a0   : > { %11394 = vst [vmem:[#allocation14_spill] sm:$0xff] %v9496_v36 }
 0x2a4   : > { %8168 = vrot.lane.b32.xlu0 %v9305_v22, %s8638_s28  ;;  %2225 = vrot.lane.b32.xlu2 %v9272_v63, %s8637_s22 }
 0x2a5   : > { %8213 = vrot.lane.b32.xlu1 %v9321_v33, %s8641_s24 }
 0x2a6   : > { %v9504_v57 = vpop.permute.xlu2 %2952  ;;  %v9506_v62 = vpop.permute.xlu0 %2989 }
 0x2a7   : > { %v2185_v43 = vpop.permute.xlu1 %2184 }
 0x2ac   : > { %8178 = vrot.lane.b32.xlu0 %v9305_v22, %s8637_s22  ;;  %2801 = vrot.lane.b32.xlu2 %v9272_v63, %s8640_s15 }
 0x2ad   : > { %8233 = vrot.lane.b32.xlu1 %v9321_v33, %s8640_s15 }
 0x2ae   : > { %v9515_v37 = vpop.permute.xlu2 %3704  ;;  %v9517_v23 = vpop.permute.xlu0 %3741 }
 0x2af   : > { %11395 = vst [vmem:[#allocation15_spill] sm:$0xff] %v9517_v23  ;;  %v9523_v12 = vpop.permute.xlu1 %2760 }
 0x2b4   : > { %8183 = vrot.lane.b32.xlu0 %v9305_v22, %s8636_s23  ;;  %3553 = vrot.lane.b32.xlu2 %v9458_v21, %s8641_s24 }
 0x2b5   : > { %8243 = vrot.lane.b32.xlu1 %v9527_v19, %s8638_s28 }
 0x2b6   : > { %v1799_v63 = vpop.permute.xlu2 %1798  ;;  %v1797_v31 = vpop.permute.xlu0 %1796 }
 0x2b7   : > { %6874 = vmatpush.xpose.msk.msrb.mxu2 %vm1619_vm2, %v1799_v63  ;;  %v9541_v54 = vpop.permute.xlu1 %3316  ;;  %v1583_v63 = vadd.f32 %v1582_v11, %v1410_v14 }
 0x2b9   : > { %v9551_v8 = vadd.f32 %v1601_v61, %v1583_v63 }
 0x2bb   : > { %6875 = vmatpush.xpose.msk.msrb.mxu2 %vm1619_vm2, %v1797_v31  ;;  %v1581_v31 = vadd.f32 %v1580_v5, %v1410_v14  ;;  %11399 = vst [vmem:[#allocation19_spill] sm:$0xff] %v9551_v8  ;;  %v9577_v5 = vld [vmem:[#allocation3] sm:$0xff] }
 0x2bc   : > { %8198 = vrot.lane.b32.xlu0 %v9305_v22, %s8639_s14  ;;  %3745 = vrot.lane.b32.xlu2 %v9458_v21, %s8637_s22 }
 0x2be   : > { %v1995_v51 = vpop.permute.xlu2 %1994  ;;  %6876 = vmatmul.msk.f32.vlgmr.msrb.gmra.mxu2 %vm1619_vm2, %v9353_v41  ;;  %v1993_v49 = vpop.permute.xlu0 %1992 }
 0x2bf   : > { %6886 = vmatpush.xpose.msk.msra.mxu2 %vm1619_vm2, %v1995_v51  ;;  %v9555_v23 = vpop.permute.xlu1 %3512  ;;  %v9558_v51 = vadd.f32 %v9470_v27, %v1581_v31 }
 0x2c1   : > { %11400 = vst [vmem:[#allocation20_spill] sm:$0xff] %v9558_v51  ;;  %v9562_v11 = vpack.i.bf16 %v9558_v51, %v9551_v8  ;;  %v9603_v51 = vld [vmem:[#allocation3 + $0x8] sm:$0xff] }
 0x2c3   : > { %6887 = vmatpush.xpose.msk.msra.mxu2 %vm1619_vm2, %v1993_v49  ;;  %11401 = vst [vmem:[#allocation21_spill] sm:$0xff] %v9562_v11  ;;  %v1649_v49 = vpop.f32.mrf.mxu1 }
 0x2c4   : > { %8228 = vrot.lane.b32.xlu0 %v9321_v33, %s8642_s26  ;;  %8193 = vrot.lane.b32.xlu2 %v9305_v22, %s8640_s15 }
 0x2c6   : > { %v2571_v19 = vpop.permute.xlu2 %2570  ;;  %6877 = vmatmul.msk.f32.gmra.mxu2 %vm1619_vm2, %v9361_v46  ;;  %v2569_v41 = vpop.permute.xlu0 %2568 }
 0x2c7   : > { %v2379_v46 = vpop.permute.xlu1 %2378 }
 0x2cc   : > { %8203 = vrot.lane.b32.xlu2 %v9562_v11, %s8638_s28 }
 0x2ce   : > { %v9566_v22 = vpop.permute.xlu2 %3318  ;;  %6888 = vmatmul.msk.f32.vlgmr.msra.gmra.mxu2 %vm1619_vm2, %v9365_v48  ;;  %v2187_v61 = vpop.permute.xlu0 %2186  ;;  %v9582_v48 = vadd.f32 %v1649_v49, %v9577_v5 }
 0x2cf   : > { %6898 = vmatpush.xpose.msk.msrb.mxu2 %vm1619_vm2, %v2187_v61  ;;  %v1684_v61 = vpop.f32.mrf.mxu3 }
 0x2d0   : > { %v1690_v63 = vsel %vm1619_vm2, %v9582_v48, -inf }
 0x2d3   : > { %6899 = vmatpush.xpose.msk.msrb.mxu2 %vm1619_vm2, %v2185_v43  ;;  %v2955_v43 = vpop.permute.xlu1 %2954 }
 0x2d4   : > { %8208 = vrot.lane.b32.xlu2 %v9321_v33, %s8638_s28 }
 0x2d6   : > { %v2032_v27 = vpop.permute.xlu2 %2031  ;;  %6889 = vmatmul.msk.f32.gmra.mxu2 %vm1619_vm2, %v9373_v50  ;;  %v2763_v14 = vpop.permute.xlu0 %2762 }
 0x2d7   : > { %6910 = vmatpush.xpose.msk.msra.mxu2 %vm1619_vm2, %v2379_v46  ;;  %v1652_v46 = vpop.f32.mrf.mxu1 }
 0x2db   : > { %6911 = vmatpush.xpose.msk.msra.mxu2 %vm1619_vm2, %v9492_v32  ;;  %v9596_v32 = vadd.f32 %v1684_v61, %v9577_v5  ;;  %v9601_v49 = vpop.permute.xlu1 %3706  ;;  %v1687_v61 = vpop.f32.mrf.mxu3 }
 0x2dc   : > { %8218 = vrot.lane.b32.xlu2 %v9321_v33, %s8637_s22 }
 0x2de   : > { %v9588_v31 = vpop.permute.xlu2 %2607  ;;  %6900 = vmatmul.msk.f32.vlgmr.msrb.gmra.mxu2 %vm1619_vm2, %v9319_v28  ;;  %v9592_v50 = vpop.permute.xlu0 %3514 }
 0x2df   : > { %1691 = vmax.xlane.f32.xlu1 %v1690_v63  ;;  %6922 = vmatpush.xpose.msk.msrb.mxu2 %vm1619_vm2, %v2571_v19  ;;  %v1696_v63 = vsel %vm1619_vm2, %v9596_v32, -inf }
 0x2e3   : > { %6923 = vmatpush.xpose.msk.msrb.mxu2 %vm1619_vm2, %v2569_v41  ;;  %v9612_v41 = vadd.f32 %v1652_v46, %v9603_v51  ;;  %v9626_v46 = vadd.f32 %v1687_v61, %v9603_v51 }
 0x2e4   : > { %8223 = vrot.lane.b32.xlu2 %v9321_v33, %s8636_s23 }
 0x2e5   : > { %v1693_v8 = vsel %vm1619_vm2, %v9612_v41, -inf }
 0x2e6   : > { %v9605_v28 = vpop.permute.xlu2 %2991  ;;  %6901 = vmatmul.msk.f32.gmra.mxu2 %vm1619_vm2, %v9387_v25  ;;  %v2224_v19 = vpop.permute.xlu0 %2223 }
 0x2e7   : > { %1697 = vmax.xlane.f32.xlu1 %v1696_v63  ;;  %v1836_v25 = vpop.permute.xlu1 %1835 }
 0x2ec   : > { %8238 = vrot.lane.b32.xlu2 %v9321_v33, %s8639_s14  ;;  %v1699_v33 = vsel %vm1619_vm2, %v9626_v46, -inf }
 0x2ee   : > { %1694 = vmax.xlane.f32.xlu0 %v1693_v8  ;;  %v9618_v11 = vpop.permute.xlu2 %3355  ;;  %6912 = vmatmul.msk.f32.vlgmr.msra.gmra.mxu2 %vm1619_vm2, %v9351_v40  ;;  %v9622_v36 = vpop.permute.xlu0 %2799 }
 0x2ef   : > { %6934 = vmatpush.xpose.msk.msra.mxu2 %vm1619_vm2, %v2763_v14  ;;  %v2416_v63 = vpop.permute.xlu1 %2415 }
 0x2f3   : > { %6935 = vmatpush.xpose.msk.msra.mxu2 %vm1619_vm2, %v9523_v12 }
 0x2f6   : > { %v9632_v8 = vpop.permute.xlu2 %3743  ;;  %1700 = vmax.xlane.f32.xlu0 %v1699_v33  ;;  %6913 = vmatmul.msk.f32.gmra.mxu2 %vm1619_vm2, %v9389_v56  ;;  %v9636_v40 = vpop.permute.xlu0 %3551  ;;  %v11407_v33 = vld [vmem:[#allocation10_spill] sm:$0xff] }
 0x2f7   : > { %v2034_v12 = vpop.permute.xlu1 %2033 }
 0x2fe   : > { %v2226_v20 = vpop.permute.xlu2 %2225  ;;  %6924 = vmatmul.msk.f32.vlgmr.msrb.gmra.mxu2 %vm1619_vm2, %v9377_v53  ;;  %v1838_v14 = vpop.permute.xlu0 %1837 }
 0x2ff   : > { %6946 = vmatpush.xpose.msk.msrb.mxu2 %vm1619_vm2, %v2955_v43  ;;  %6878 = vmatpush.xpose.msk.msrb.mxu3 %vm1619_vm2, %v1838_v14  ;;  %v2610_v43 = vpop.permute.xlu1 %2609 }
 0x303   : > { %6947 = vmatpush.xpose.msk.msrb.mxu2 %vm1619_vm2, %v9504_v57  ;;  %6879 = vmatpush.xpose.msk.msrb.mxu3 %vm1619_vm2, %v1836_v25 }
 0x306   : > { %v2802_v56 = vpop.permute.xlu2 %2801  ;;  %6880 = vmatmul.msk.f32.vlgmr.msrb.gmra.mxu3 %vm1619_vm2, %v9424_v58  ;;  %6925 = vmatmul.msk.f32.gmra.mxu2 %vm1619_vm2, %v9385_v55  ;;  %v2418_v53 = vpop.permute.xlu0 %2417 }
 0x307   : > { %6890 = vmatpush.xpose.msk.msra.mxu3 %vm1619_vm2, %v2034_v12  ;;  %v11408_v12 = vld [vmem:[#allocation14_spill] sm:$0xff] }
 0x30b   : > { %6891 = vmatpush.xpose.msk.msra.mxu3 %vm1619_vm2, %v2032_v27 }
 0x30e   : > { %v9653_v57 = vpop.permute.xlu2 %3553  ;;  %6881 = vmatmul.msk.f32.gmra.mxu3 %vm1619_vm2, %v9482_v60  ;;  %6936 = vmatmul.msk.f32.vlgmr.msra.gmra.mxu2 %vm1619_vm2, %v9327_v30  ;;  %v2994_v58 = vpop.permute.xlu0 %2993 }
 0x30f   : > { %6902 = vmatpush.xpose.msk.msrb.mxu3 %vm1619_vm2, %v2226_v20  ;;  %6958 = vmatpush.xpose.msk.msra.mxu2 %vm1619_vm2, %v9392_v0  ;;  %v9670_v30 = vpop.permute.xlu1 %3357 }
 0x313   : > { %6903 = vmatpush.xpose.msk.msrb.mxu3 %vm1619_vm2, %v2224_v19  ;;  %6959 = vmatpush.xpose.msk.msra.mxu2 %vm1619_vm2, %v9341_v38 }
 0x316   : > { %v9663_v55 = vpop.permute.xlu2 %3745  ;;  %6892 = vmatmul.msk.f32.vlgmr.msra.gmra.mxu3 %vm1619_vm2, %v9426_v45  ;;  %6937 = vmatmul.msk.f32.gmra.mxu2 %vm1619_vm2, %v9402_v2  ;;  %v8169_v20 = vpop.permute.xlu0 %8168 }
 0x317   : > { %6914 = vmatpush.xpose.msk.msra.mxu3 %vm1619_vm2, %v2418_v53  ;;  %v8170_v60 = vunpack.i.l.bf16 %v8169_v20  ;;  %v8171_v27 = vunpack.i.h.bf16 %v8169_v20  ;;  %v9681_v0 = vpop.permute.xlu1 %8173 }
 0x319   : > { %1942 = vmatpush.msra.mxu0 %v8170_v60 }
 0x31b   : > { %6915 = vmatpush.xpose.msk.msra.mxu3 %vm1619_vm2, %v2416_v63  ;;  %1943 = vmatpush.msra.mxu0 %v8171_v27 }
 0x31e   : > { %v9673_v38 = vpop.permute.xlu2 %8193  ;;  %6893 = vmatmul.msk.f32.gmra.mxu3 %vm1619_vm2, %v9472_v13  ;;  %6948 = vmatmul.msk.f32.vlgmr.msrb.gmra.mxu2 %vm1619_vm2, %v9363_v47 }
 0x31f   : > { %11402 = vst [vmem:[#allocation22_spill] sm:$0xff] %v9673_v38  ;;  %6970 = vmatpush.xpose.msk.msrb.mxu2 %vm1619_vm2, %v9566_v22  ;;  %v9694_v47 = vpop.permute.xlu1 %8188 }
 0x323   : > { %6971 = vmatpush.xpose.msk.msrb.mxu2 %vm1619_vm2, %v9541_v54 }
 0x326   : > { %v9685_v2 = vpop.permute.xlu2 %8203  ;;  %6904 = vmatmul.msk.f32.vlgmr.msrb.gmra.mxu3 %vm1619_vm2, %v9416_v7  ;;  %6949 = vmatmul.msk.f32.gmra.mxu2 %vm1619_vm2, %v9404_v3 }
 0x327   : > { %11403 = vst [vmem:[#allocation23_spill] sm:$0xff] %v9685_v2  ;;  %6926 = vmatpush.xpose.msk.msrb.mxu3 %vm1619_vm2, %v2610_v43  ;;  %v9704_v3 = vpop.permute.xlu1 %8213 }
 0x32b   : > { %6927 = vmatpush.xpose.msk.msrb.mxu3 %vm1619_vm2, %v9588_v31 }
 0x32e   : > { %v8209_v45 = vpop.permute.xlu2 %8208  ;;  %6905 = vmatmul.msk.f32.gmra.mxu3 %vm1619_vm2, %v9451_v15  ;;  %6960 = vmatmul.msk.f32.vlgmr.msra.gmra.mxu2 %vm1619_vm2, %v9217_v29  ;;  %v9711_v29 = vpop.permute.xlu0 %8178 }
 0x32f   : > { %v8210_v13 = vunpack.i.l.bf16 %v8209_v45  ;;  %6982 = vmatpush.xpose.msk.msra.mxu2 %vm1619_vm2, %v9592_v50  ;;  %v8211_v7 = vunpack.i.h.bf16 %v8209_v45 }
 0x331   : > { %1979 = vmatpush.msrb.mxu1 %v8210_v13 }
 0x333   : > { %6983 = vmatpush.xpose.msk.msra.mxu2 %vm1619_vm2, %v9555_v23  ;;  %1980 = vmatpush.msrb.mxu1 %v8211_v7  ;;  %v11410_v7 = vld [vmem:[#allocation13_spill] sm:$0xff] }
 0x336   : > { %6916 = vmatmul.msk.f32.vlgmr.msra.gmra.mxu3 %vm1619_vm2, %v9436_v16  ;;  %6961 = vmatmul.msk.f32.gmra.mxu2 %vm1619_vm2, %v9243_v44  ;;  %v9721_v16 = vpop.permute.xlu1 %8233 }
 0x337   : > { %6938 = vmatpush.xpose.msk.msra.mxu3 %vm1619_vm2, %v2802_v56  ;;  %11404 = vst [vmem:[#allocation24_spill] sm:$0xff] %v9721_v16 }
 0x33b   : > { %6939 = vmatpush.xpose.msk.msra.mxu3 %vm1619_vm2, %v9622_v36  ;;  %v9730_v36 = vpop.permute.xlu0 %8183 }
 0x33e   : > { %6917 = vmatmul.msk.f32.gmra.mxu3 %vm1619_vm2, %v9494_v35  ;;  %6972 = vmatmul.msk.f32.vlgmr.msrb.gmra.mxu2 %vm1619_vm2, %v9375_v52  ;;  %v9737_v35 = vpop.permute.xlu1 %8243 }
 0x33f   : > { %6994 = vmatpush.xpose.msk.msrb.mxu2 %vm1619_vm2, %v9601_v49  ;;  %11405 = vst [vmem:[#allocation25_spill] sm:$0xff] %v9737_v35 }
 0x341   : > { %v1825_v15 = vpop.f32.mrf.mxu2 }
 0x342   : > { %v9724_v44 = vadd.f32 %v1825_v15, %v9577_v5 }
 0x343   : > { %6995 = vmatpush.xpose.msk.msrb.mxu2 %vm1619_vm2, %v9515_v37 }
 0x344   : > { %v1870_v23 = vsel %vm1619_vm2, %v9724_v44, -inf }
 0x345   : > { %1871 = vmax.xlane.f32.xlu2 %v1870_v23 }
 0x346   : > { %6928 = vmatmul.msk.f32.vlgmr.msrb.gmra.mxu3 %vm1619_vm2, %v9438_v17  ;;  %6973 = vmatmul.msk.f32.gmra.mxu2 %vm1619_vm2, %v9400_v1  ;;  %v9750_v1 = vpop.permute.xlu0 %8198 }
 0x347   : > { %6950 = vmatpush.xpose.msk.msrb.mxu3 %vm1619_vm2, %v2994_v58  ;;  %11406 = vst [vmem:[#allocation26_spill] sm:$0xff] %v9750_v1 }
 0x349   : > { %v1828_v52 = vpop.f32.mrf.mxu2 }
 0x34a   : > { %v9740_v54 = vadd.f32 %v1828_v52, %v9603_v51 }
 0x34b   : > { %6951 = vmatpush.xpose.msk.msrb.mxu3 %vm1619_vm2, %v9605_v28 }
 0x34c   : > { %v1873_v37 = vsel %vm1619_vm2, %v9740_v54, -inf }
 0x34d   : > { %1874 = vmax.xlane.f32.xlu0 %v1873_v37 }
 0x34e   : > { %6929 = vmatmul.msk.f32.gmra.mxu3 %vm1619_vm2, %v9484_v24  ;;  %6984 = vmatmul.msk.f32.vlgmr.msra.gmra.mxu2 %vm1619_vm2, %v9338_v34  ;;  %v9759_v24 = vpop.permute.xlu0 %8228 }
 0x352   : > { %v1692_v17 = vpop.xlane.xlu1 %1691 }
 0x353   : > { %v1702_v22 = vsub.f32 %v9582_v48, %v1692_v17 }
 0x355   : > { %v1706_v31 = vmul.f32 1.442695, %v1702_v22  ;;  %v11411_v22 = vld [vmem:[#allocation11_spill] sm:$0xff] }
 0x356   : > { %6940 = vmatmul.msk.f32.vlgmr.msra.gmra.mxu3 %vm1619_vm2, %v9428_v10  ;;  %6985 = vmatmul.msk.f32.gmra.mxu2 %vm1619_vm2, %v9414_v6 }
 0x357   : > { %8377 = vpow2.f32 %v1706_v31  ;;  %6962 = vmatpush.xpose.msk.msra.mxu3 %vm1619_vm2, %v9458_v21 }
 0x35b   : > { %6963 = vmatpush.xpose.msk.msra.mxu3 %vm1619_vm2, %v9443_v9  ;;  %v2021_v9 = vpop.f32.mrf.mxu2 }
 0x35d   : > { %v9763_v34 = vpop.eup %8377 }
 0x35e   : > { %v1714_v48 = vsel %vm1619_vm2, %v9763_v34, 0.0  ;;  %6941 = vmatmul.msk.f32.gmra.mxu3 %vm1619_vm2, %v9466_v18  ;;  %6996 = vmatmul.msk.f32.vlgmr.msrb.gmra.mxu2 %vm1619_vm2, %v9349_v39 }
 0x35f   : > { %1715 = vadd.xlane.f32.xlu1 %v1714_v48 }
 0x361   : > { %v1695_v6 = vpop.xlane.xlu0 %1694 }
 0x362   : > { %v1703_v10 = vsub.f32 %v9612_v41, %v1695_v6 }
 0x363   : > { %v2024_v49 = vpop.f32.mrf.mxu2 }
 0x364   : > { %v1708_v21 = vmul.f32 1.442695, %v1703_v10 }
 0x366   : > { %8379 = vpow2.f32 %v1708_v21  ;;  %6952 = vmatmul.msk.f32.vlgmr.msrb.gmra.mxu3 %vm1619_vm2, %v9440_v42  ;;  %6997 = vmatmul.msk.f32.gmra.mxu2 %vm1619_vm2, %v9412_v4  ;;  %v9787_v42 = vadd.f32 %v2021_v9, %v9577_v5  ;;  %v1698_v4 = vpop.xlane.xlu1 %1697 }
 0x367   : > { %6974 = vmatpush.xpose.msk.msrb.mxu3 %vm1619_vm2, %v9670_v30  ;;  %v1704_v50 = vsub.f32 %v9596_v32, %v1698_v4 }
 0x368   : > { %v2066_v28 = vsel %vm1619_vm2, %v9787_v42, -inf }
 0x369   : > { %v1701_v19 = vpop.xlane.xlu0 %1700 }
 0x36a   : > { %v1705_v61 = vsub.f32 %v9626_v46, %v1701_v19 }
 0x36b   : > { %6975 = vmatpush.xpose.msk.msrb.mxu3 %vm1619_vm2, %v9618_v11  ;;  %v1710_v11 = vmul.f32 1.442695, %v1704_v50 }
 0x36c   : > { %v9780_v39 = vpop.eup %8379 }
 0x36d   : > { %v1717_v18 = vsel %vm1619_vm2, %v9780_v39, 0.0  ;;  %8381 = vpow2.f32 %v1710_v11 }
 0x36e   : > { %6953 = vmatmul.msk.f32.gmra.mxu3 %vm1619_vm2, %v9506_v62  ;;  %1718 = vadd.xlane.f32.xlu2 %v1717_v18  ;;  %v9797_v62 = vadd.f32 %v2024_v49, %v9603_v51  ;;  %v11412_v18 = vld [vmem:[#allocation15_spill] sm:$0xff] }
 0x370   : > { %v2069_v32 = vsel %vm1619_vm2, %v9797_v62, -inf }
 0x373   : > { %v9805_v41 = vpop.eup %8381 }
 0x374   : > { %v1720_v25 = vsel %vm1619_vm2, %v9805_v41, 0.0 }
 0x376   : > { %6964 = vmatmul.msk.f32.vlgmr.msra.gmra.mxu3 %vm1619_vm2, %v9281_v59  ;;  %2067 = vmax.xlane.f32.xlu2 %v2066_v28  ;;  %v2213_v59 = vpop.f32.mrf.mxu2 }
 0x377   : > { %6986 = vmatpush.xpose.msk.msra.mxu3 %vm1619_vm2, %v9653_v57  ;;  %v9847_v15 = vadd.f32 %v2213_v59, %v9577_v5 }
 0x379   : > { %v2258_v37 = vsel %vm1619_vm2, %v9847_v15, -inf }
 0x37b   : > { %6987 = vmatpush.xpose.msk.msra.mxu3 %vm1619_vm2, %v9636_v40  ;;  %v1712_v40 = vmul.f32 1.442695, %v1705_v61 }
 0x37d   : > { %8383 = vpow2.f32 %v1712_v40 }
 0x37e   : > { %6965 = vmatmul.msk.f32.gmra.mxu3 %vm1619_vm2, %v9313_v26  ;;  %2070 = vmax.xlane.f32.xlu2 %v2069_v32  ;;  %v2216_v63 = vpop.f32.mrf.mxu2 }
 0x37f   : > { %v9835_v20 = vadd.f32 %v2216_v63, %v9603_v51  ;;  %v9890_v63 = vpop.permute.xlu2 %8218 }
 0x381   : > { %v2261_v45 = vsel %vm1619_vm2, %v9835_v20, -inf }
 0x383   : > { %v9823_v56 = vpop.eup %8383 }
 0x386   : > { %6976 = vmatmul.msk.f32.vlgmr.msrb.gmra.mxu3 %vm1619_vm2, %v11407_v33  ;;  %1721 = vadd.xlane.f32.xlu2 %v1720_v25  ;;  %v2405_v57 = vpop.f32.mrf.mxu2 }
 0x387   : > { %6998 = vmatpush.xpose.msk.msrb.mxu3 %vm1619_vm2, %v9663_v55  ;;  %v11409_v55 = vld [vmem:[#allocation12_spill] sm:$0xff]  ;;  %v9850_v23 = vadd.f32 %v2405_v57, %v9577_v5 }
 0x389   : > { %v1864_v26 = vpop.f32.mrf.mxu3  ;;  %v2450_v17 = vsel %vm1619_vm2, %v9850_v23, -inf }
 0x38a   : > { %v9815_v14 = vadd.f32 %v1864_v26, %v9577_v5 }
 0x38b   : > { %6999 = vmatpush.xpose.msk.msrb.mxu3 %vm1619_vm2, %v9632_v8  ;;  %v1723_v8 = vsel %vm1619_vm2, %v9823_v56, 0.0 }
 0x38c   : > { %v1876_v46 = vsel %vm1619_vm2, %v9815_v14, -inf }
 0x38d   : > { %1877 = vmax.xlane.f32.xlu1 %v1876_v46 }
 0x38e   : > { %6977 = vmatmul.msk.f32.gmra.mxu3 %vm1619_vm2, %v11408_v12  ;;  %v2408_v13 = vpop.f32.mrf.mxu2 }
 0x38f   : > { %v9871_v4 = vadd.f32 %v2408_v13, %v9603_v51 }
 0x391   : > { %v1867_v53 = vpop.f32.mrf.mxu3  ;;  %v2453_v11 = vsel %vm1619_vm2, %v9871_v4, -inf }
 0x392   : > { %v9826_v43 = vadd.f32 %v1867_v53, %v9603_v51 }
 0x394   : > { %v1879_v58 = vsel %vm1619_vm2, %v9826_v43, -inf }
 0x395   : > { %1880 = vmax.xlane.f32.xlu0 %v1879_v58  ;;  %1724 = vadd.xlane.f32.xlu1 %v1723_v8  ;;  %v9902_v8 = vpop.permute.xlu2 %8223 }
 0x396   : > { %6988 = vmatmul.msk.f32.vlgmr.msra.gmra.mxu3 %vm1619_vm2, %v11409_v55  ;;  %v2597_v31 = vpop.f32.mrf.mxu2 }
 0x397   : > { %v9881_v59 = vadd.f32 %v2597_v31, %v9577_v5 }
 0x399   : > { %v2060_v60 = vpop.f32.mrf.mxu3  ;;  %v2642_v33 = vsel %vm1619_vm2, %v9881_v59, -inf }
 0x39a   : > { %v9838_v30 = vadd.f32 %v2060_v60, %v9577_v5 }
 0x39c   : > { %v2072_v27 = vsel %vm1619_vm2, %v9838_v30, -inf }
 0x39d   : > { %2073 = vmax.xlane.f32.xlu2 %v2072_v27  ;;  %2262 = vmax.xlane.f32.xlu1 %v2261_v45 }
 0x39e   : > { %6989 = vmatmul.msk.f32.gmra.mxu3 %vm1619_vm2, %v11410_v7  ;;  %v2600_v50 = vpop.f32.mrf.mxu2 }
 0x39f   : > { %v9893_v26 = vadd.f32 %v2600_v50, %v9603_v51 }
 0x3a1   : > { %v2063_v52 = vpop.f32.mrf.mxu3  ;;  %v2645_v57 = vsel %vm1619_vm2, %v9893_v26, -inf }
 0x3a2   : > { %v9859_v48 = vadd.f32 %v2063_v52, %v9603_v51 }
 0x3a4   : > { %v2075_v9 = vsel %vm1619_vm2, %v9859_v48, -inf }
 0x3a5   : > { %2259 = vmax.xlane.f32.xlu2 %v2258_v37  ;;  %2451 = vmax.xlane.f32.xlu1 %v2450_v17  ;;  %v9917_v17 = vpop.permute.xlu2 %8238 }
 0x3a6   : > { %7000 = vmatmul.msk.f32.vlgmr.msrb.gmra.mxu3 %vm1619_vm2, %v11411_v22  ;;  %v2789_v25 = vpop.f32.mrf.mxu2  ;;  %11413 = vst [vmem:[#allocation10_spill] sm:$0xff] %v9917_v17 }
 0x3a7   : > { %v9915_v7 = vadd.f32 %v2789_v25, %v9577_v5 }
 0x3a9   : > { %v2252_v6 = vpop.f32.mrf.mxu3  ;;  %v2834_v31 = vsel %vm1619_vm2, %v9915_v7, -inf }
 0x3aa   : > { %v9862_v10 = vadd.f32 %v2252_v6, %v9577_v5 }
 0x3ac   : > { %v2264_v21 = vsel %vm1619_vm2, %v9862_v10, -inf }
 0x3ad   : > { %2265 = vmax.xlane.f32.xlu0 %v2264_v21  ;;  %2076 = vmax.xlane.f32.xlu2 %v2075_v9 }
 0x3ae   : > { %7001 = vmatmul.msk.f32.gmra.mxu3 %vm1619_vm2, %v11412_v18  ;;  %v2792_v58 = vpop.f32.mrf.mxu2 }
 0x3af   : > { %v9905_v55 = vadd.f32 %v2792_v58, %v9603_v51 }
 0x3b1   : > { %v2255_v49 = vpop.f32.mrf.mxu3  ;;  %v2837_v13 = vsel %vm1619_vm2, %v9905_v55, -inf }
 0x3b2   : > { %v9874_v28 = vadd.f32 %v2255_v49, %v9603_v51 }
 0x3b4   : > { %v2267_v32 = vsel %vm1619_vm2, %v9874_v28, -inf }
 0x3b5   : > { %2454 = vmax.xlane.f32.xlu2 %v2453_v11  ;;  %2268 = vmax.xlane.f32.xlu1 %v2267_v32  ;;  %v8175_v11 = vunpack.i.l.bf16 %v9681_v0 }
 0x3b6   : > { %v2981_v52 = vpop.f32.mrf.mxu2 }
 0x3b8   : > { %v1872_v18 = vpop.xlane.xlu2 %1871 }
 0x3b9   : > { %v2444_v19 = vpop.f32.mrf.mxu3 }
 0x3ba   : > { %v9884_v61 = vadd.f32 %v2444_v19, %v9577_v5 }
 0x3bc   : > { %v2456_v40 = vsel %vm1619_vm2, %v9884_v61, -inf }
 0x3bd   : > { %2643 = vmax.xlane.f32.xlu2 %v2642_v33  ;;  %2457 = vmax.xlane.f32.xlu1 %v2456_v40  ;;  %v8176_v33 = vunpack.i.h.bf16 %v9681_v0 }
 0x3be   : > { %v2984_v32 = vpop.f32.mrf.mxu2 }
 0x3c1   : > { %v2447_v46 = vpop.f32.mrf.mxu3 }
 0x3c2   : > { %v9896_v12 = vadd.f32 %v2447_v46, %v9603_v51 }
 0x3c4   : > { %v2459_v53 = vsel %vm1619_vm2, %v9896_v12, -inf }
 0x3c5   : > { %2460 = vmax.xlane.f32.xlu2 %v2459_v53  ;;  %2646 = vmax.xlane.f32.xlu1 %v2645_v57  ;;  %v1882_v57 = vsub.f32 %v9724_v44, %v1872_v18 }
 0x3c9   : > { %v2636_v60 = vpop.f32.mrf.mxu3 }
 0x3ca   : > { %v9908_v27 = vadd.f32 %v2636_v60, %v9577_v5  ;;  %v3169_v60 = vpop.f32.mrf.mxu2 }
 0x3cc   : > { %v2648_v45 = vsel %vm1619_vm2, %v9908_v27, -inf }
 0x3cd   : > { %2649 = vmax.xlane.f32.xlu0 %v2648_v45  ;;  %2838 = vmax.xlane.f32.xlu2 %v2837_v13  ;;  %v1886_v45 = vmul.f32 1.442695, %v1882_v57  ;;  %v9947_v13 = vadd.f32 %v3169_v60, %v9577_v5 }
 0x3d1   : > { %v2639_v37 = vpop.f32.mrf.mxu3 }
 0x3d2   : > { %v1716_v22 = vpop.xlane.xlu1 %1715  ;;  %v9922_v6 = vadd.f32 %v2639_v37, %v9603_v51  ;;  %v9950_v37 = vadd.f32 %v2984_v32, %v9603_v51 }
 0x3d3   : > { %8385 = vrcp.f32 %v1716_v22 }
 0x3d4   : > { %v2651_v19 = vsel %vm1619_vm2, %v9922_v6, -inf }
 0x3d5   : > { %2835 = vmax.xlane.f32.xlu0 %v2834_v31 }
 0x3d9   : > { %v8386_v21 = vpop.eup %8385  ;;  %v2828_v9 = vpop.f32.mrf.mxu3 }
 0x3da   : > { %v1730_v50 = vmul.f32 %v8386_v21, %v9763_v34  ;;  %v9926_v49 = vadd.f32 %v2828_v9, %v9577_v5  ;;  %v9936_v34 = vadd.f32 %v2981_v52, %v9577_v5  ;;  %v3210_v9 = vsel %vm1619_vm2, %v9947_v13, -inf }
 0x3dc   : > { %6870 = vmatmul.msk.f32.vlgmr.msrb.gmra.mxu0 %vm1619_vm2, %v1730_v50  ;;  %v2840_v25 = vsel %vm1619_vm2, %v9926_v49, -inf  ;;  %v3026_v58 = vsel %vm1619_vm2, %v9936_v34, -inf  ;;  %v3029_v50 = vsel %vm1619_vm2, %v9950_v37, -inf }
 0x3dd   : > { %2136 = vmatpush.msrb.mxu0 %v8175_v11  ;;  %2652 = vmax.xlane.f32.xlu0 %v2651_v19  ;;  %v3172_v11 = vpop.f32.mrf.mxu2  ;;  %v1875_v19 = vpop.xlane.xlu0 %1874 }
 0x3de   : > { %2841 = vmax.xlane.f32.xlu2 %v2840_v25 }
 0x3df   : > { %2137 = vmatpush.msrb.mxu0 %v8176_v33 }
 0x3e1   : > { %v2831_v40 = vpop.f32.mrf.mxu3  ;;  %v1719_v53 = vpop.xlane.xlu2 %1718 }
 0x3e2   : > { %v9939_v46 = vadd.f32 %v2831_v40, %v9603_v51  ;;  %8387 = vrcp.f32 %v1719_v53  ;;  %v1883_v40 = vsub.f32 %v9740_v54, %v1875_v19 }
 0x3e3   : > { %8389 = vpow2.f32 %v1886_v45 }
 0x3e4   : > { %v2843_v0 = vsel %vm1619_vm2, %v9939_v46, -inf }
 0x3e5   : > { %3027 = vmax.xlane.f32.xlu0 %v3026_v58  ;;  %v9974_v58 = vadd.f32 %v3172_v11, %v9603_v51  ;;  %v3345_v45 = vpop.f32.mrf.mxu2 }
 0x3e6   : > { %2844 = vmax.xlane.f32.xlu2 %v2843_v0  ;;  %v1888_v0 = vmul.f32 1.442695, %v1883_v40 }
 0x3e8   : > { %v8388_v52 = vpop.eup %8387 }
 0x3e9   : > { %v3020_v22 = vpop.f32.mrf.mxu3  ;;  %v2068_v31 = vpop.xlane.xlu2 %2067  ;;  %v1731_v21 = vmul.f32 %v8388_v52, %v9780_v39 }
 0x3ea   : > { %v9953_v44 = vadd.f32 %v3020_v22, %v9577_v5  ;;  %v9963_v32 = vpop.eup %8389 }
 0x3eb   : > { %6871 = vmatmul.msk.f32.gmra.mxu0 %vm1619_vm2, %v1731_v21  ;;  %v1894_v53 = vsel %vm1619_vm2, %v9963_v32, 0.0  ;;  %v3213_v21 = vsel %vm1619_vm2, %v9974_v58, -inf }
 0x3ec   : > { %v3032_v18 = vsel %vm1619_vm2, %v9953_v44, -inf }
 0x3ed   : > { %3211 = vmax.xlane.f32.xlu0 %v3210_v9  ;;  %3033 = vmax.xlane.f32.xlu1 %v3032_v18 }
 0x3ee   : > { %3030 = vmax.xlane.f32.xlu2 %v3029_v50  ;;  %v9984_v50 = vadd.f32 %v3345_v45, %v9577_v5 }
 0x3f1   : > { %v3023_v39 = vpop.f32.mrf.mxu3  ;;  %v2071_v33 = vpop.xlane.xlu2 %2070 }
 0x3f2   : > { %v9966_v25 = vadd.f32 %v3023_v39, %v9603_v51 }
 0x3f4   : > { %v3035_v57 = vsel %vm1619_vm2, %v9966_v25, -inf }
 0x3f5   : > { %1895 = vadd.xlane.f32.xlu0 %v1894_v53  ;;  %3036 = vmax.xlane.f32.xlu1 %v3035_v57  ;;  %v8215_v57 = vunpack.i.l.bf16 %v9704_v3 }
 0x3f9   : > { %v3204_v60 = vpop.f32.mrf.mxu3  ;;  %v1722_v22 = vpop.xlane.xlu2 %1721 }
 0x3fa   : > { %v9977_v52 = vadd.f32 %v3204_v60, %v9577_v5  ;;  %8391 = vrcp.f32 %v1722_v22  ;;  %v3348_v22 = vpop.f32.mrf.mxu2 }
 0x3fb   : > { %8393 = vpow2.f32 %v1888_v0  ;;  %v2078_v0 = vsub.f32 %v9787_v42, %v2068_v31  ;;  %v10004_v31 = vadd.f32 %v3348_v22, %v9603_v51 }
 0x3fc   : > { %v3216_v54 = vsel %vm1619_vm2, %v9977_v52, -inf }
 0x3fd   : > { %3217 = vmax.xlane.f32.xlu2 %v3216_v54  ;;  %3214 = vmax.xlane.f32.xlu1 %v3213_v21  ;;  %v2082_v42 = vmul.f32 1.442695, %v2078_v0 }
 0x400   : > { %v1878_v9 = vpop.xlane.xlu1 %1877  ;;  %v8392_v18 = vpop.eup %8391 }
 0x401   : > { %v1884_v11 = vsub.f32 %v9815_v14, %v1878_v9  ;;  %v3207_v19 = vpop.f32.mrf.mxu3  ;;  %v9987_v39 = vpop.eup %8393  ;;  %v1732_v40 = vmul.f32 %v8392_v18, %v9805_v41  ;;  %v8216_v14 = vunpack.i.h.bf16 %v9704_v3  ;;  %v3390_v41 = vsel %vm1619_vm2, %v9984_v50, -inf }
 0x402   : > { %v9991_v53 = vadd.f32 %v3207_v19, %v9603_v51  ;;  %v1897_v54 = vsel %vm1619_vm2, %v9987_v39, 0.0  ;;  %v2079_v19 = vsub.f32 %v9797_v62, %v2071_v33 }
 0x403   : > { %v1890_v60 = vmul.f32 1.442695, %v1884_v11  ;;  %6872 = vmatmul.msk.f32.vlgmr.msra.gmra.mxu1 %vm1619_vm2, %v1732_v40  ;;  %v3393_v40 = vsel %vm1619_vm2, %v10004_v31, -inf }
 0x404   : > { %v3219_v45 = vsel %vm1619_vm2, %v9991_v53, -inf  ;;  %2171 = vmatpush.msra.mxu1 %v8215_v57 }
 0x405   : > { %8395 = vpow2.f32 %v1890_v60  ;;  %3220 = vmax.xlane.f32.xlu0 %v3219_v45  ;;  %3391 = vmax.xlane.f32.xlu1 %v3390_v41  ;;  %v3541_v60 = vpop.f32.mrf.mxu2  ;;  %v2084_v45 = vmul.f32 1.442695, %v2079_v19 }
 0x406   : > { %1898 = vadd.xlane.f32.xlu2 %v1897_v54  ;;  %2172 = vmatpush.msra.mxu1 %v8216_v14  ;;  %v10018_v62 = vadd.f32 %v3541_v60, %v9577_v5 }
 0x408   : > { %v1725_v21 = vpop.xlane.xlu1 %1724  ;;  %v1881_v9 = vpop.xlane.xlu0 %1880 }
 0x409   : > { %8397 = vrcp.f32 %v1725_v21  ;;  %v1885_v3 = vsub.f32 %v9826_v43, %v1881_v9  ;;  %v3384_v0 = vpop.f32.mrf.mxu3 }
 0x40a   : > { %8399 = vpow2.f32 %v2082_v42  ;;  %v10031_v19 = vadd.f32 %v3384_v0, %v9577_v5 }
 0x40b   : > { %v10007_v18 = vpop.eup %8395  ;;  %v1892_v11 = vmul.f32 1.442695, %v1885_v3 }
 0x40c   : > { %v1900_v57 = vsel %vm1619_vm2, %v10007_v18, 0.0  ;;  %v3396_v60 = vsel %vm1619_vm2, %v10031_v19, -inf }
 0x40d   : > { %8401 = vpow2.f32 %v1892_v11  ;;  %3394 = vmax.xlane.f32.xlu0 %v3393_v40  ;;  %1901 = vadd.xlane.f32.xlu1 %v1900_v57 }
 0x40e   : > { %8403 = vpow2.f32 %v2084_v45 }
 0x40f   : > { %v8398_v22 = vpop.eup %8397 }
 0x410   : > { %v2074_v43 = vpop.xlane.xlu2 %2073  ;;  %v1733_v14 = vmul.f32 %v8398_v22, %v9823_v56  ;;  %v10015_v41 = vpop.eup %8399  ;;  %v3586_v56 = vsel %vm1619_vm2, %v10018_v62, -inf }
 0x411   : > { %v2080_v54 = vsub.f32 %v9838_v30, %v2074_v43  ;;  %v2090_v42 = vsel %vm1619_vm2, %v10015_v41, 0.0  ;;  %v2263_v9 = vpop.xlane.xlu1 %2262  ;;  %v3387_v11 = vpop.f32.mrf.mxu3 }
 0x412   : > { %6873 = vmatmul.msk.f32.gmra.mxu1 %vm1619_vm2, %v1733_v14 }
 0x413   : > { %v10021_v33 = vpop.eup %8401  ;;  %v2086_v3 = vmul.f32 1.442695, %v2080_v54  ;;  %v10045_v54 = vadd.f32 %v3387_v11, %v9603_v51 }
 0x414   : > { %v1903_v21 = vsel %vm1619_vm2, %v10021_v33, 0.0  ;;  %v10033_v40 = vpop.eup %8403 }
 0x415   : > { %2091 = vadd.xlane.f32.xlu0 %v2090_v42  ;;  %1904 = vadd.xlane.f32.xlu2 %v1903_v21  ;;  %8405 = vpow2.f32 %v2086_v3  ;;  %v2093_v22 = vsel %vm1619_vm2, %v10033_v40, 0.0  ;;  %v2271_v21 = vsub.f32 %v9835_v20, %v2263_v9  ;;  %v3544_v3 = vpop.f32.mrf.mxu2 }
 0x416   : > { %3587 = vmax.xlane.f32.xlu1 %v3586_v56  ;;  %v10058_v20 = vadd.f32 %v3544_v3, %v9603_v51 }
 0x418   : > { %v2260_v30 = vpop.xlane.xlu2 %2259 }
 0x419   : > { %v2270_v57 = vsub.f32 %v9847_v15, %v2260_v30  ;;  %v10040_v43 = vpop.xlane.xlu1 %2451  ;;  %v3580_v42 = vpop.f32.mrf.mxu3 }
 0x41b   : > { %v2274_v45 = vmul.f32 1.442695, %v2270_v57  ;;  %v10042_v0 = vpop.eup %8405  ;;  %v3399_v57 = vsel %vm1619_vm2, %v10045_v54, -inf }
 0x41c   : > { %v2096_v30 = vsel %vm1619_vm2, %v10042_v0, 0.0 }
 0x41d   : > { %3397 = vmax.xlane.f32.xlu0 %v3396_v60  ;;  %8407 = vpow2.f32 %v2274_v45  ;;  %v2276_v60 = vmul.f32 1.442695, %v2271_v21  ;;  %v3733_v3 = vpop.f32.mrf.mxu2 }
 0x41e   : > { %2094 = vadd.xlane.f32.xlu1 %v2093_v22  ;;  %v10077_v2 = vadd.f32 %v3733_v3, %v9577_v5 }
 0x420   : > { %v2077_v14 = vpop.xlane.xlu2 %2076 }
 0x421   : > { %v2081_v15 = vsub.f32 %v9859_v48, %v2077_v14  ;;  %v2266_v48 = vpop.xlane.xlu0 %2265  ;;  %v3583_v45 = vpop.f32.mrf.mxu3 }
 0x422   : > { %v2272_v14 = vsub.f32 %v9862_v10, %v2266_v48  ;;  %v10087_v17 = vadd.f32 %v3583_v45, %v9603_v51 }
 0x423   : > { %v2088_v56 = vmul.f32 1.442695, %v2081_v15  ;;  %v10055_v35 = vpop.eup %8407 }
 0x424   : > { %v2282_v15 = vsel %vm1619_vm2, %v10055_v35, 0.0 }
 0x425   : > { %8409 = vpow2.f32 %v2088_v56  ;;  %2097 = vadd.xlane.f32.xlu0 %v2096_v30  ;;  %v3589_v56 = vsel %vm1619_vm2, %v10058_v20, -inf  ;;  %v10070_v30 = vadd.f32 %v3580_v42, %v9577_v5 }
 0x426   : > { %3400 = vmax.xlane.f32.xlu1 %v3399_v57  ;;  %8411 = vpow2.f32 %v2276_v60  ;;  %v2278_v57 = vmul.f32 1.442695, %v2272_v14  ;;  %v3778_v14 = vsel %vm1619_vm2, %v10077_v2, -inf }
 0x428   : > { %v10053_v11 = vpop.xlane.xlu2 %2454  ;;  %v2269_v22 = vpop.xlane.xlu1 %2268  ;;  %8413 = vpow2.f32 %v2278_v57 }
 0x429   : > { %v3772_v42 = vpop.f32.mrf.mxu3 }
 0x42a   : > { %v10090_v57 = vadd.f32 %v3772_v42, %v9577_v5  ;;  %v3595_v5 = vsel %vm1619_vm2, %v10087_v17, -inf }
 0x42b   : > { %v10060_v9 = vpop.eup %8409 }
 0x42c   : > { %v2099_v21 = vsel %vm1619_vm2, %v10060_v9, 0.0  ;;  %v10074_v48 = vpop.eup %8411  ;;  %v3784_v45 = vsel %vm1619_vm2, %v10090_v57, -inf }
 0x42d   : > { %2283 = vadd.xlane.f32.xlu0 %v2282_v15  ;;  %2100 = vadd.xlane.f32.xlu2 %v2099_v21  ;;  %v2273_v15 = vsub.f32 %v9874_v28, %v2269_v22  ;;  %v3592_v21 = vsel %vm1619_vm2, %v10070_v30, -inf }
 0x42e   : > { %3590 = vmax.xlane.f32.xlu1 %v3589_v56  ;;  %v2285_v56 = vsel %vm1619_vm2, %v10074_v48, 0.0  ;;  %v10093_v16 = vpop.eup %8413 }
 0x42f   : > { %v2280_v3 = vmul.f32 1.442695, %v2273_v15  ;;  %v3736_v15 = vpop.f32.mrf.mxu2 }
 0x430   : > { %v10072_v60 = vpop.xlane.xlu2 %2643  ;;  %v2458_v10 = vpop.xlane.xlu1 %2457 }
 0x431   : > { %8415 = vpow2.f32 %v2280_v3 }
 0x435   : > { %3593 = vmax.xlane.f32.xlu0 %v3592_v21  ;;  %2286 = vadd.xlane.f32.xlu2 %v2285_v56  ;;  %v2462_v21 = vsub.f32 %v9850_v23, %v10040_v43 }
 0x436   : > { %3779 = vmax.xlane.f32.xlu1 %v3778_v14  ;;  %v2463_v14 = vsub.f32 %v9871_v4, %v10053_v11  ;;  %v3775_v4 = vpop.f32.mrf.mxu3 }
 0x437   : > { %v2466_v42 = vmul.f32 1.442695, %v2462_v21  ;;  %v10107_v43 = vpop.eup %8415 }
 0x438   : > { %v2461_v28 = vpop.xlane.xlu2 %2460  ;;  %v2647_v22 = vpop.xlane.xlu1 %2646 }
 0x439   : > { %v2465_v1 = vsub.f32 %v9896_v12, %v2461_v28  ;;  %v2655_v56 = vsub.f32 %v9893_v26, %v2647_v22  ;;  %v2288_v12 = vsel %vm1619_vm2, %v10093_v16, 0.0  ;;  %v2464_v28 = vsub.f32 %v9884_v61, %v2458_v10 }
 0x43a   : > { %v10126_v10 = vadd.f32 %v3775_v4, %v9603_v51 }
 0x43b   : > { %v2472_v38 = vmul.f32 1.442695, %v2465_v1  ;;  %v2660_v23 = vmul.f32 1.442695, %v2655_v56  ;;  %v10105_v1 = vadd.f32 %v3736_v15, %v9603_v51  ;;  %v2291_v56 = vsel %vm1619_vm2, %v10107_v43, 0.0 }
 0x43c   : > { %v3787_v51 = vsel %vm1619_vm2, %v10126_v10, -inf }
 0x43d   : > { %8417 = vpow2.f32 %v2472_v38  ;;  %3785 = vmax.xlane.f32.xlu0 %v3784_v45  ;;  %3596 = vmax.xlane.f32.xlu2 %v3595_v5  ;;  %v3781_v21 = vsel %vm1619_vm2, %v10105_v1, -inf  ;;  %v2468_v45 = vmul.f32 1.442695, %v2463_v14 }
 0x43e   : > { %2289 = vadd.xlane.f32.xlu1 %v2288_v12  ;;  %8419 = vpow2.f32 %v2466_v42 }
 0x43f   : > { %8421 = vpow2.f32 %v2660_v23  ;;  %v2654_v23 = vsub.f32 %v9881_v59, %v10072_v60 }
 0x440   : > { %v2650_v26 = vpop.xlane.xlu0 %2649  ;;  %v2839_v12 = vpop.xlane.xlu2 %2838  ;;  %8423 = vpow2.f32 %v2468_v45 }
 0x441   : > { %v2656_v38 = vsub.f32 %v9908_v27, %v2650_v26  ;;  %v2470_v27 = vmul.f32 1.442695, %v2464_v28 }
 0x443   : > { %v10111_v3 = vpop.eup %8417  ;;  %v2662_v11 = vmul.f32 1.442695, %v2656_v38 }
 0x444   : > { %v2483_v22 = vsel %vm1619_vm2, %v10111_v3, 0.0  ;;  %v10121_v5 = vpop.eup %8419 }
 0x445   : > { %2484 = vadd.xlane.f32.xlu0 %v2483_v22  ;;  %3782 = vmax.xlane.f32.xlu2 %v3781_v21  ;;  %v10123_v61 = vpop.eup %8421  ;;  %8425 = vpow2.f32 %v2662_v11  ;;  %v2474_v14 = vsel %vm1619_vm2, %v10121_v5, 0.0 }
 0x446   : > { %2292 = vadd.xlane.f32.xlu1 %v2291_v56  ;;  %8427 = vpow2.f32 %v2470_v27  ;;  %v2669_v26 = vsel %vm1619_vm2, %v10123_v61, 0.0  ;;  %v10137_v28 = vpop.eup %8423 }
 0x447   : > { %v2477_v45 = vsel %vm1619_vm2, %v10137_v28, 0.0 }
 0x448   : > { %v2836_v15 = vpop.xlane.xlu0 %2835 }
 0x449   : > { %v2846_v42 = vsub.f32 %v9915_v7, %v2836_v15  ;;  %v2658_v7 = vmul.f32 1.442695, %v2654_v23 }
 0x44b   : > { %v2850_v38 = vmul.f32 1.442695, %v2846_v42  ;;  %v10139_v21 = vpop.eup %8425 }
 0x44c   : > { %v10141_v60 = vpop.eup %8427  ;;  %v2672_v27 = vsel %vm1619_vm2, %v10139_v21, 0.0 }
 0x44d   : > { %2670 = vadd.xlane.f32.xlu0 %v2669_v26  ;;  %2475 = vadd.xlane.f32.xlu2 %v2474_v14  ;;  %8429 = vpow2.f32 %v2850_v38  ;;  %v2480_v15 = vsel %vm1619_vm2, %v10141_v60, 0.0  ;;  %v2847_v38 = vsub.f32 %v9905_v55, %v2839_v12 }
 0x44e   : > { %3788 = vmax.xlane.f32.xlu1 %v3787_v51  ;;  %8431 = vpow2.f32 %v2658_v7 }
 0x450   : > { %v2653_v22 = vpop.xlane.xlu0 %2652 }
 0x451   : > { %v2842_v59 = vpop.xlane.xlu2 %2841  ;;  %v2657_v11 = vsub.f32 %v9922_v6, %v2653_v22 }
 0x452   : > { %v2848_v56 = vsub.f32 %v9926_v49, %v2842_v59 }
 0x453   : > { %v2664_v42 = vmul.f32 1.442695, %v2657_v11  ;;  %v10151_v23 = vpop.eup %8429 }
 0x454   : > { %v2854_v4 = vmul.f32 1.442695, %v2848_v56  ;;  %v10153_v14 = vpop.eup %8431  ;;  %v2858_v22 = vsel %vm1619_vm2, %v10151_v23, 0.0 }
 0x455   : > { %2478 = vadd.xlane.f32.xlu2 %v2477_v45  ;;  %2673 = vadd.xlane.f32.xlu0 %v2672_v27  ;;  %v2666_v56 = vsel %vm1619_vm2, %v10153_v14, 0.0 }
 0x456   : > { %8433 = vpow2.f32 %v2854_v4  ;;  %2481 = vadd.xlane.f32.xlu1 %v2480_v15 }
 0x457   : > { %8435 = vpow2.f32 %v2664_v42 }
 0x458   : > { %v3028_v49 = vpop.xlane.xlu0 %3027 }
 0x459   : > { %v2845_v26 = vpop.xlane.xlu2 %2844  ;;  %v3038_v27 = vsub.f32 %v9936_v34, %v3028_v49 }
 0x45a   : > { %v2849_v51 = vsub.f32 %v9939_v46, %v2845_v26  ;;  %v2852_v46 = vmul.f32 1.442695, %v2847_v38 }
 0x45c   : > { %v10156_v6 = vpop.eup %8433  ;;  %v2856_v7 = vmul.f32 1.442695, %v2849_v51 }
 0x45d   : > { %v2864_v59 = vsel %vm1619_vm2, %v10156_v6, 0.0  ;;  %2859 = vadd.xlane.f32.xlu0 %v2858_v22  ;;  %v10165_v55 = vpop.eup %8435 }
 0x45e   : > { %8437 = vpow2.f32 %v2856_v7  ;;  %2865 = vadd.xlane.f32.xlu2 %v2864_v59  ;;  %2667 = vadd.xlane.f32.xlu1 %v2666_v56  ;;  %v2675_v38 = vsel %vm1619_vm2, %v10165_v55, 0.0  ;;  %v3042_v7 = vmul.f32 1.442695, %v3038_v27 }
 0x45f   : > { %8439 = vpow2.f32 %v2852_v46 }
 0x460   : > { %v3034_v45 = vpop.xlane.xlu1 %3033  ;;  %v3212_v4 = vpop.xlane.xlu0 %3211 }
 0x461   : > { %v3031_v11 = vpop.xlane.xlu2 %3030  ;;  %v3040_v26 = vsub.f32 %v9953_v44, %v3034_v45  ;;  %v3222_v44 = vsub.f32 %v9947_v13, %v3212_v4  ;;  %v11414_v4 = vld [vmem:[#allocation21_spill] sm:$0xff] }
 0x462   : > { %v3039_v12 = vsub.f32 %v9950_v37, %v3031_v11 }
 0x463   : > { %v3046_v22 = vmul.f32 1.442695, %v3040_v26  ;;  %v3226_v11 = vmul.f32 1.442695, %v3222_v44 }
 0x464   : > { %v10169_v15 = vpop.eup %8437  ;;  %v3044_v42 = vmul.f32 1.442695, %v3039_v12 }
 0x465   : > { %v2867_v51 = vsel %vm1619_vm2, %v10169_v15, 0.0  ;;  %v10178_v49 = vpop.eup %8439 }
 0x466   : > { %8441 = vpow2.f32 %v3044_v42  ;;  %2868 = vadd.xlane.f32.xlu2 %v2867_v51  ;;  %2676 = vadd.xlane.f32.xlu1 %v2675_v38  ;;  %v2861_v46 = vsel %vm1619_vm2, %v10178_v49, 0.0  ;;  %v8180_v51 = vunpack.i.l.bf16 %v9711_v29 }
 0x468   : > { %v10176_v37 = vpop.xlane.xlu1 %3036  ;;  %v1896_v34 = vpop.xlane.xlu0 %1895 }
 0x469   : > { %8443 = vrcp.f32 %v1896_v34 }
 0x46a   : > { %8445 = vpow2.f32 %v3042_v7  ;;  %v8181_v7 = vunpack.i.h.bf16 %v9711_v29 }
 0x46b   : > { %8447 = vpow2.f32 %v3046_v22 }
 0x46c   : > { %v10180_v59 = vpop.eup %8441  ;;  %8449 = vpow2.f32 %v3226_v11 }
 0x46d   : > { %v3053_v56 = vsel %vm1619_vm2, %v10180_v59, 0.0 }
 0x46e   : > { %3054 = vadd.xlane.f32.xlu2 %v3053_v56  ;;  %2862 = vadd.xlane.f32.xlu1 %v2861_v46 }
 0x46f   : > { %v8444_v45 = vpop.eup %8443 }
 0x470   : > { %v1910_v12 = vmul.f32 %v8444_v45, %v9963_v32  ;;  %v3218_v27 = vpop.xlane.xlu2 %3217  ;;  %v3215_v42 = vpop.xlane.xlu1 %3214 }
 0x471   : > { %v10188_v26 = vpop.eup %8445  ;;  %v3223_v13 = vsub.f32 %v9974_v58, %v3215_v42  ;;  %8248 = vrot.lane.b32.xlu0 %v11414_v4, %s8641_s24  ;;  %v3224_v32 = vsub.f32 %v9977_v52, %v3218_v27 }
 0x472   : > { %v10194_v38 = vpop.eup %8447  ;;  %6882 = vmatmul.msk.f32.vlgmr.msra.gmra.mxu0 %vm1619_vm2, %v1910_v12  ;;  %v3050_v58 = vsel %vm1619_vm2, %v10188_v26, 0.0 }
 0x473   : > { %v3228_v22 = vmul.f32 1.442695, %v3223_v13  ;;  %2328 = vmatpush.msra.mxu0 %v8180_v51  ;;  %v3056_v34 = vsel %vm1619_vm2, %v10194_v38, 0.0  ;;  %v3230_v44 = vmul.f32 1.442695, %v3224_v32  ;;  %v10205_v45 = vpop.eup %8449 }
 0x474   : > { %v3234_v12 = vsel %vm1619_vm2, %v10205_v45, 0.0 }
 0x475   : > { %2329 = vmatpush.msra.mxu0 %v8181_v7  ;;  %8451 = vpow2.f32 %v3228_v22 }
 0x476   : > { %3057 = vadd.xlane.f32.xlu2 %v3056_v34  ;;  %3051 = vadd.xlane.f32.xlu1 %v3050_v58 }
 0x478   : > { %v10203_v56 = vpop.xlane.xlu0 %3220  ;;  %v3392_v46 = vpop.xlane.xlu1 %3391 }
 0x479   : > { %v1899_v29 = vpop.xlane.xlu2 %1898 }
 0x47a   : > { %8453 = vrcp.f32 %v1899_v29 }
 0x47b   : > { %v10207_v11 = vpop.eup %8451  ;;  %8455 = vpow2.f32 %v3230_v44 }
 0x47c   : > { %v3237_v52 = vsel %vm1619_vm2, %v10207_v11, 0.0 }
 0x47e   : > { %3238 = vadd.xlane.f32.xlu1 %v3237_v52  ;;  %3235 = vadd.xlane.f32.xlu2 %v3234_v12  ;;  %v3041_v52 = vsub.f32 %v9966_v25, %v10176_v37  ;;  %v8220_v12 = vunpack.i.l.bf16 %v9890_v63  ;;  %v3402_v37 = vsub.f32 %v9984_v50, %v3392_v46  ;;  %v11415_v50 = vld [vmem:[#allocation18_spill] sm:$0xff] }
 0x480   : > { %v8454_v27 = vpop.eup %8453  ;;  %v3395_v42 = vpop.xlane.xlu0 %3394 }
 0x481   : > { %v1902_v51 = vpop.xlane.xlu1 %1901  ;;  %v3403_v13 = vsub.f32 %v10004_v31, %v3395_v42  ;;  %v1911_v7 = vmul.f32 %v8454_v27, %v9987_v39  ;;  %v10215_v22 = vpop.eup %8455  ;;  %v8221_v42 = vunpack.i.h.bf16 %v9890_v63  ;;  %v8185_v63 = vunpack.i.l.bf16 %v9730_v36 }
 0x482   : > { %8457 = vrcp.f32 %v1902_v51  ;;  %v3240_v34 = vsel %vm1619_vm2, %v10215_v22, 0.0 }
 0x483   : > { %v3408_v32 = vmul.f32 1.442695, %v3403_v13  ;;  %6883 = vmatmul.msk.f32.gmra.mxu0 %vm1619_vm2, %v1911_v7  ;;  %v3048_v13 = vmul.f32 1.442695, %v3041_v52 }
 0x485   : > { %8459 = vpow2.f32 %v3408_v32 }
 0x486   : > { %3241 = vadd.xlane.f32.xlu1 %v3240_v34 }
 0x488   : > { %v8458_v58 = vpop.eup %8457  ;;  %v1905_v44 = vpop.xlane.xlu2 %1904 }
 0x489   : > { %v2092_v29 = vpop.xlane.xlu0 %2091  ;;  %v1912_v31 = vmul.f32 %v8458_v58, %v10007_v18  ;;  %v3588_v39 = vpop.xlane.xlu1 %3587  ;;  %8461 = vrcp.f32 %v1905_v44  ;;  %v8186_v44 = vunpack.i.h.bf16 %v9730_v36 }
 0x48a   : > { %8463 = vrcp.f32 %v2092_v29  ;;  %v3406_v29 = vmul.f32 1.442695, %v3402_v37 }
 0x48b   : > { %v10224_v27 = vpop.eup %8459  ;;  %6884 = vmatmul.msk.f32.vlgmr.msrb.gmra.mxu1 %vm1619_vm2, %v1912_v31  ;;  %8465 = vpow2.f32 %v3048_v13 }
 0x48c   : > { %2363 = vmatpush.msrb.mxu1 %v8220_v12  ;;  %v3417_v51 = vsel %vm1619_vm2, %v10224_v27, 0.0 }
 0x48e   : > { %2364 = vmatpush.msrb.mxu1 %v8221_v42  ;;  %3418 = vadd.xlane.f32.xlu1 %v3417_v51 }
 0x48f   : > { %v8462_v25 = vpop.eup %8461 }
 0x490   : > { %v8464_v18 = vpop.eup %8463  ;;  %v1913_v32 = vmul.f32 %v8462_v25, %v10021_v33 }
 0x491   : > { %v10231_v7 = vpop.xlane.xlu0 %3397  ;;  %v2106_v34 = vmul.f32 %v8464_v18, %v10015_v41  ;;  %v2095_v58 = vpop.xlane.xlu1 %2094  ;;  %v3225_v41 = vsub.f32 %v9991_v53, %v10203_v56  ;;  %v3598_v53 = vsub.f32 %v10018_v62, %v3588_v39 }
 0x492   : > { %8467 = vrcp.f32 %v2095_v58  ;;  %v10241_v33 = vpop.eup %8465  ;;  %v8226_v58 = vunpack.i.h.bf16 %v9902_v8 }
 0x493   : > { %6885 = vmatmul.msk.f32.gmra.mxu1 %vm1619_vm2, %v1913_v32  ;;  %6894 = vmatmul.msk.f32.vlgmr.msrb.gmra.mxu0 %vm1619_vm2, %v2106_v34  ;;  %8469 = vpow2.f32 %v3406_v29  ;;  %v3059_v42 = vsel %vm1619_vm2, %v10241_v33, 0.0  ;;  %v3232_v51 = vmul.f32 1.442695, %v3225_v41  ;;  %v3602_v62 = vmul.f32 1.442695, %v3598_v53 }
 0x494   : > { %2520 = vmatpush.msrb.mxu0 %v8185_v63 }
 0x496   : > { %2521 = vmatpush.msrb.mxu0 %v8186_v44  ;;  %8253 = vrot.lane.b32.xlu2 %v11415_v50, %s8641_s24 }
 0x498   : > { %v8468_v46 = vpop.eup %8467 }
 0x499   : > { %v2098_v52 = vpop.xlane.xlu0 %2097  ;;  %v3401_v31 = vpop.xlane.xlu1 %3400  ;;  %v2107_v12 = vmul.f32 %v8468_v46, %v10033_v40 }
 0x49a   : > { %8471 = vrcp.f32 %v2098_v52  ;;  %v3405_v36 = vsub.f32 %v10045_v54, %v3401_v31  ;;  %v10250_v25 = vpop.eup %8469  ;;  %v8225_v54 = vunpack.i.l.bf16 %v9902_v8 }
 0x49b   : > { %6895 = vmatmul.msk.f32.gmra.mxu0 %vm1619_vm2, %v2107_v12  ;;  %3060 = vadd.xlane.f32.xlu0 %v3059_v42  ;;  %v3414_v34 = vsel %vm1619_vm2, %v10250_v25, 0.0  ;;  %v8190_v12 = vunpack.i.l.bf16 %v9694_v47 }
 0x49c   : > { %v3412_v13 = vmul.f32 1.442695, %v3405_v36 }
 0x49e   : > { %8473 = vpow2.f32 %v3412_v13 }
 0x49f   : > { %8475 = vpow2.f32 %v3232_v51  ;;  %v8191_v51 = vunpack.i.h.bf16 %v9694_v47 }
 0x4a0   : > { %v8472_v18 = vpop.eup %8471  ;;  %v2101_v40 = vpop.xlane.xlu2 %2100 }
 0x4a1   : > { %v2108_v56 = vmul.f32 %v8472_v18, %v10042_v0  ;;  %v2284_v37 = vpop.xlane.xlu0 %2283  ;;  %v3591_v32 = vpop.xlane.xlu1 %3590  ;;  %8477 = vrcp.f32 %v2101_v40 }
 0x4a2   : > { %8479 = vrcp.f32 %v2284_v37  ;;  %v3599_v8 = vsub.f32 %v10058_v20, %v3591_v32  ;;  %v3404_v20 = vsub.f32 %v10031_v19, %v10231_v7 }
 0x4a3   : > { %6896 = vmatmul.msk.f32.vlgmr.msra.gmra.mxu1 %vm1619_vm2, %v2108_v56  ;;  %3415 = vadd.xlane.f32.xlu0 %v3414_v34  ;;  %8481 = vpow2.f32 %v3602_v62 }
 0x4a4   : > { %2555 = vmatpush.msra.mxu1 %v8225_v54  ;;  %v10259_v63 = vpop.eup %8473  ;;  %v3410_v56 = vmul.f32 1.442695, %v3404_v20 }
 0x4a5   : > { %v3423_v0 = vsel %vm1619_vm2, %v10259_v63, 0.0  ;;  %v10263_v39 = vpop.eup %8475 }
 0x4a6   : > { %2556 = vmatpush.msra.mxu1 %v8226_v58  ;;  %3424 = vadd.xlane.f32.xlu1 %v3423_v0  ;;  %v3243_v36 = vsel %vm1619_vm2, %v10263_v39, 0.0 }
 0x4a7   : > { %v8478_v44 = vpop.eup %8477 }
 0x4a8   : > { %v8480_v29 = vpop.eup %8479  ;;  %v2287_v46 = vpop.xlane.xlu2 %2286  ;;  %v2109_v41 = vmul.f32 %v8478_v44, %v10060_v9  ;;  %v8230_v44 = vunpack.i.l.bf16 %v9759_v24 }
 0x4a9   : > { %v2298_v52 = vmul.f32 %v8480_v29, %v10055_v35  ;;  %v3780_v31 = vpop.xlane.xlu1 %3779  ;;  %8483 = vrcp.f32 %v2287_v46  ;;  %v3594_v42 = vpop.xlane.xlu0 %3593  ;;  %v3604_v35 = vmul.f32 1.442695, %v3599_v8  ;;  %v8231_v46 = vunpack.i.h.bf16 %v9759_v24 }
 0x4aa   : > { %v10276_v9 = vpop.eup %8481  ;;  %v3600_v19 = vsub.f32 %v10070_v30, %v3594_v42 }
 0x4ab   : > { %6897 = vmatmul.msk.f32.gmra.mxu1 %vm1619_vm2, %v2109_v41  ;;  %6906 = vmatmul.msk.f32.vlgmr.msra.gmra.mxu0 %vm1619_vm2, %v2298_v52  ;;  %8485 = vpow2.f32 %v3604_v35  ;;  %v3610_v47 = vsel %vm1619_vm2, %v10276_v9, 0.0  ;;  %v3790_v41 = vsub.f32 %v10077_v2, %v3780_v31 }
 0x4ac   : > { %3244 = vadd.xlane.f32.xlu0 %v3243_v36  ;;  %2712 = vmatpush.msra.mxu0 %v8190_v12 }
 0x4ad   : > { %v3794_v24 = vmul.f32 1.442695, %v3790_v41 }
 0x4ae   : > { %2713 = vmatpush.msra.mxu0 %v8191_v51 }
 0x4af   : > { %v8484_v13 = vpop.eup %8483 }
 0x4b0   : > { %v3597_v18 = vpop.xlane.xlu2 %3596  ;;  %v2299_v53 = vmul.f32 %v8484_v13, %v10074_v48 }
 0x4b1   : > { %v3601_v40 = vsub.f32 %v10087_v17, %v3597_v18  ;;  %v2290_v37 = vpop.xlane.xlu1 %2289  ;;  %v3786_v54 = vpop.xlane.xlu0 %3785  ;;  %v3606_v17 = vmul.f32 1.442695, %v3600_v19 }
 0x4b2   : > { %8487 = vrcp.f32 %v2290_v37  ;;  %v10284_v32 = vpop.eup %8485  ;;  %v3792_v34 = vsub.f32 %v10090_v57, %v3786_v54 }
 0x4b3   : > { %6907 = vmatmul.msk.f32.gmra.mxu0 %vm1619_vm2, %v2299_v53  ;;  %8489 = vpow2.f32 %v3410_v56  ;;  %v3608_v7 = vmul.f32 1.442695, %v3601_v40  ;;  %v3613_v29 = vsel %vm1619_vm2, %v10284_v32, 0.0  ;;  %v11416_v53 = vld [vmem:[#allocation22_spill] sm:$0xff] }
 0x4b4   : > { %3611 = vadd.xlane.f32.xlu0 %v3610_v47  ;;  %v3798_v57 = vmul.f32 1.442695, %v3792_v34  ;;  %v8195_v56 = vunpack.i.l.bf16 %v11416_v53 }
 0x4b5   : > { %8491 = vpow2.f32 %v3608_v7  ;;  %v8196_v7 = vunpack.i.h.bf16 %v11416_v53 }
 0x4b8   : > { %v8488_v48 = vpop.eup %8487  ;;  %v3783_v58 = vpop.xlane.xlu2 %3782 }
 0x4b9   : > { %v2300_v62 = vmul.f32 %v8488_v48, %v10093_v16  ;;  %v2293_v0 = vpop.xlane.xlu1 %2292  ;;  %v10291_v30 = vpop.eup %8489 }
 0x4ba   : > { %8493 = vrcp.f32 %v2293_v0  ;;  %v3420_v16 = vsel %vm1619_vm2, %v10291_v30, 0.0  ;;  %v2485_v12 = vpop.xlane.xlu0 %2484 }
 0x4bb   : > { %6908 = vmatmul.msk.f32.vlgmr.msrb.gmra.mxu1 %vm1619_vm2, %v2300_v62  ;;  %8495 = vpow2.f32 %v3606_v17  ;;  %v10298_v8 = vpop.eup %8491  ;;  %v11417_v62 = vld [vmem:[#allocation24_spill] sm:$0xff] }
 0x4bc   : > { %3614 = vadd.xlane.f32.xlu0 %v3613_v29  ;;  %2747 = vmatpush.msrb.mxu1 %v8230_v44  ;;  %8497 = vpow2.f32 %v3798_v57  ;;  %v3619_v31 = vsel %vm1619_vm2, %v10298_v8, 0.0  ;;  %v8235_v0 = vunpack.i.l.bf16 %v11417_v62  ;;  %v8236_v29 = vunpack.i.h.bf16 %v11417_v62 }
 0x4be   : > { %2748 = vmatpush.msrb.mxu1 %v8231_v46 }
 0x4bf   : > { %8258 = vrot.lane.b32.xlu1 %v11414_v4, %s8637_s22  ;;  %3421 = vadd.xlane.f32.xlu2 %v3420_v16  ;;  %v3791_v4 = vsub.f32 %v10105_v1, %v3783_v58 }
 0x4c0   : > { %v8494_v52 = vpop.eup %8493  ;;  %v2476_v36 = vpop.xlane.xlu2 %2475 }
 0x4c1   : > { %8499 = vrcp.f32 %v2476_v36  ;;  %v3789_v42 = vpop.xlane.xlu1 %3788  ;;  %v2301_v2 = vmul.f32 %v8494_v52, %v10107_v43  ;;  %v10305_v51 = vpop.eup %8495  ;;  %v3796_v40 = vmul.f32 1.442695, %v3791_v4 }
 0x4c2   : > { %8501 = vpow2.f32 %v3794_v24  ;;  %v10309_v20 = vpop.eup %8497  ;;  %v3616_v35 = vsel %vm1619_vm2, %v10305_v51, 0.0  ;;  %v2671_v47 = vpop.xlane.xlu0 %2670  ;;  %v11418_v24 = vld [vmem:[#allocation26_spill] sm:$0xff] }
 0x4c3   : > { %6909 = vmatmul.msk.f32.gmra.mxu1 %vm1619_vm2, %v2301_v2  ;;  %v3808_v1 = vsel %vm1619_vm2, %v10309_v20, 0.0  ;;  %v8200_v2 = vunpack.i.l.bf16 %v11418_v24  ;;  %v8201_v4 = vunpack.i.h.bf16 %v11418_v24 }
 0x4c4   : > { %3620 = vadd.xlane.f32.xlu0 %v3619_v31 }
 0x4c7   : > { %v8500_v13 = vpop.eup %8499  ;;  %3617 = vadd.xlane.f32.xlu2 %v3616_v35 }
 0x4c8   : > { %v2490_v43 = vmul.f32 %v8500_v13, %v10121_v5  ;;  %v2479_v18 = vpop.xlane.xlu2 %2478  ;;  %v10318_v19 = vpop.eup %8501  ;;  %v11419_v13 = vld [vmem:[#allocation10_spill] sm:$0xff] }
 0x4c9   : > { %8503 = vrcp.f32 %v2479_v18  ;;  %v2482_v37 = vpop.xlane.xlu1 %2481  ;;  %v3802_v5 = vsel %vm1619_vm2, %v10318_v19, 0.0  ;;  %v8241_v53 = vunpack.i.h.bf16 %v11419_v13 }
 0x4ca   : > { %8505 = vrcp.f32 %v2482_v37  ;;  %6918 = vmatmul.msk.f32.vlgmr.msrb.gmra.mxu0 %vm1619_vm2, %v2490_v43  ;;  %v2674_v46 = vpop.xlane.xlu0 %2673  ;;  %v8240_v43 = vunpack.i.l.bf16 %v11419_v13 }
 0x4cb   : > { %2904 = vmatpush.msrb.mxu0 %v8195_v56  ;;  %8507 = vpow2.f32 %v3796_v40 }
 0x4cc   : > { %3809 = vadd.xlane.f32.xlu0 %v3808_v1  ;;  %8509 = vrcp.f32 %v2485_v12 }
 0x4cd   : > { %2905 = vmatpush.msrb.mxu0 %v8196_v7 }
 0x4cf   : > { %v8504_v54 = vpop.eup %8503  ;;  %3803 = vadd.xlane.f32.xlu2 %v3802_v5  ;;  %v11420_v5 = vld [vmem:[#allocation19_spill] sm:$0xff] }
 0x4d0   : > { %v8506_v48 = vpop.eup %8505  ;;  %v2491_v34 = vmul.f32 %v8504_v54, %v10137_v28 }
 0x4d1   : > { %v2492_v58 = vmul.f32 %v8506_v48, %v10141_v60  ;;  %v2668_v17 = vpop.xlane.xlu1 %2667  ;;  %v10327_v44 = vpop.eup %8507  ;;  %v3793_v60 = vsub.f32 %v10126_v10, %v3789_v42 }
 0x4d2   : > { %6919 = vmatmul.msk.f32.gmra.mxu0 %vm1619_vm2, %v2491_v34  ;;  %8511 = vrcp.f32 %v2668_v17  ;;  %v8510_v57 = vpop.eup %8509  ;;  %v2866_v41 = vpop.xlane.xlu2 %2865  ;;  %v3805_v28 = vsel %vm1619_vm2, %v10327_v44, 0.0 }
 0x4d3   : > { %6920 = vmatmul.msk.f32.vlgmr.msra.gmra.mxu1 %vm1619_vm2, %v2492_v58  ;;  %8513 = vrcp.f32 %v2674_v46  ;;  %v2493_v52 = vmul.f32 %v8510_v57, %v10111_v3  ;;  %v3800_v31 = vmul.f32 1.442695, %v3793_v60  ;;  %v2860_v42 = vpop.xlane.xlu0 %2859  ;;  %v11421_v58 = vld [vmem:[#allocation20_spill] sm:$0xff]  ;;  %v11423_v46 = vld [vmem:[#allocation17_spill] sm:$0xff]  ;;  %v11424_v60 = vld [vmem:[#allocation23_spill] sm:$0xff] }
 0x4d4   : > { %2939 = vmatpush.msra.mxu1 %v8235_v0  ;;  %8515 = vrcp.f32 %v2671_v47  ;;  %v10350_v47 = vpop.f32.mrf.mxu0  ;;  %v11422_v0 = vld [vmem:[#allocation16_spill] sm:$0xff] }
 0x4d5   : > { %8517 = vpow2.f32 %v3800_v31  ;;  %v11425_v31 = vld [vmem:[#allocation25_spill] sm:$0xff] }
 0x4d6   : > { %2940 = vmatpush.msra.mxu1 %v8236_v29 }
 0x4d7   : > { %3806 = vadd.xlane.f32.xlu2 %v3805_v28 }
 0x4d8   : > { %v8512_v16 = vpop.eup %8511 }
 0x4d9   : > { %v2682_v12 = vmul.f32 %v8512_v16, %v10153_v14  ;;  %v2677_v36 = vpop.xlane.xlu1 %2676  ;;  %v8514_v10 = vpop.eup %8513  ;;  %v8206_v16 = vunpack.i.h.bf16 %v11424_v60 }
 0x4da   : > { %v8516_v35 = vpop.eup %8515  ;;  %v2869_v3 = vpop.xlane.xlu2 %2868  ;;  %8519 = vrcp.f32 %v2677_v36  ;;  %v2684_v14 = vmul.f32 %v8514_v10, %v10139_v21  ;;  %v8246_v10 = vunpack.i.h.bf16 %v11425_v31 }
 0x4db   : > { %6921 = vmatmul.msk.f32.gmra.mxu1 %vm1619_vm2, %v2493_v52  ;;  %6930 = vmatmul.msk.f32.vlgmr.msra.gmra.mxu0 %vm1619_vm2, %v2682_v12  ;;  %8521 = vrcp.f32 %v2860_v42  ;;  %v2683_v18 = vmul.f32 %v8516_v35, %v10123_v61  ;;  %v10348_v40 = vpop.eup %8517  ;;  %v10380_v42 = vpop.f32.mrf.mxu1 }
 0x4dc   : > { %3096 = vmatpush.msra.mxu0 %v8200_v2  ;;  %8523 = vrcp.f32 %v2866_v41  ;;  %v3811_v21 = vsel %vm1619_vm2, %v10348_v40, 0.0  ;;  %v10360_v17 = vpop.f32.mrf.mxu0 }
 0x4de   : > { %3097 = vmatpush.msra.mxu0 %v8201_v4 }
 0x4e0   : > { %8263 = vrot.lane.b32.xlu0 %v11415_v50, %s8637_s22  ;;  %v8520_v50 = vpop.eup %8519 }
 0x4e1   : > { %v2863_v56 = vpop.xlane.xlu1 %2862  ;;  %v8522_v37 = vpop.eup %8521  ;;  %v2685_v61 = vmul.f32 %v8520_v50, %v10165_v55 }
 0x4e2   : > { %8525 = vrcp.f32 %v2863_v56  ;;  %v2874_v1 = vmul.f32 %v8522_v37, %v10151_v23  ;;  %v3055_v7 = vpop.xlane.xlu2 %3054  ;;  %v8524_v54 = vpop.eup %8523 }
 0x4e3   : > { %6932 = vmatmul.msk.f32.vlgmr.msrb.gmra.mxu1 %vm1619_vm2, %v2684_v14  ;;  %6931 = vmatmul.msk.f32.gmra.mxu0 %vm1619_vm2, %v2683_v18  ;;  %8527 = vrcp.f32 %v2869_v3  ;;  %v2876_v62 = vmul.f32 %v8524_v54, %v10156_v6  ;;  %v8249_v35 = vpop.permute.xlu0 %8248 }
 0x4e4   : > { %3131 = vmatpush.msrb.mxu1 %v8240_v43  ;;  %v8250_v13 = vunpack.i.l.bf16 %v8249_v35  ;;  %v8251_v43 = vunpack.i.h.bf16 %v8249_v35 }
 0x4e6   : > { %3132 = vmatpush.msrb.mxu1 %v8241_v53 }
 0x4e8   : > { %v8526_v34 = vpop.eup %8525 }
 0x4e9   : > { %3812 = vadd.xlane.f32.xlu1 %v3811_v21  ;;  %v3052_v48 = vpop.xlane.xlu1 %3051  ;;  %v2875_v23 = vmul.f32 %v8526_v34, %v10178_v49  ;;  %v8528_v29 = vpop.eup %8527  ;;  %v8205_v49 = vunpack.i.l.bf16 %v11424_v60 }
 0x4ea   : > { %8529 = vrcp.f32 %v3052_v48  ;;  %v3058_v55 = vpop.xlane.xlu2 %3057  ;;  %v2877_v28 = vmul.f32 %v8528_v29, %v10169_v15 }
 0x4eb   : > { %6933 = vmatmul.msk.f32.gmra.mxu1 %vm1619_vm2, %v2685_v61  ;;  %6942 = vmatmul.msk.f32.vlgmr.msrb.gmra.mxu0 %vm1619_vm2, %v2874_v1  ;;  %8531 = vrcp.f32 %v3058_v55 }
 0x4ec   : > { %3274 = vmatpush.msrb.mxu0 %v11420_v5  ;;  %8533 = vrcp.f32 %v3055_v7 }
 0x4ee   : > { %3275 = vmatpush.msrb.mxu0 %v11421_v58 }
 0x4ef   : > { %v1945_v41 = vpop.f32.mrf.mxu0 }
 0x4f0   : > { %v8530_v57 = vpop.eup %8529 }
 0x4f1   : > { %v3066_v6 = vmul.f32 %v8530_v57, %v10188_v26  ;;  %v8532_v52 = vpop.eup %8531  ;;  %v8245_v26 = vunpack.i.l.bf16 %v11425_v31  ;;  %v3239_v3 = vpop.xlane.xlu1 %3238 }
 0x4f2   : > { %v3236_v12 = vpop.xlane.xlu2 %3235  ;;  %v8534_v36 = vpop.eup %8533  ;;  %v3068_v2 = vmul.f32 %v8532_v52, %v10194_v38 }
 0x4f3   : > { %6944 = vmatmul.msk.f32.vlgmr.msra.gmra.mxu1 %vm1619_vm2, %v2876_v62  ;;  %6943 = vmatmul.msk.f32.gmra.mxu0 %vm1619_vm2, %v2875_v23  ;;  %8535 = vrcp.f32 %v3236_v12  ;;  %v3067_v4 = vmul.f32 %v8534_v36, %v10180_v59  ;;  %v10384_v59 = vpop.f32.mrf.mxu1 }
 0x4f4   : > { %3303 = vmatpush.msra.mxu1 %v11422_v0  ;;  %8537 = vrcp.f32 %v3239_v3 }
 0x4f6   : > { %3304 = vmatpush.msra.mxu1 %v11423_v46 }
 0x4f9   : > { %v8536_v38 = vpop.eup %8535  ;;  %v3242_v56 = vpop.xlane.xlu1 %3241 }
 0x4fa   : > { %v3250_v14 = vmul.f32 %v8536_v38, %v10205_v45  ;;  %v8538_v53 = vpop.eup %8537  ;;  %v8254_v34 = vpop.permute.xlu2 %8253 }
 0x4fb   : > { %6945 = vmatmul.msk.f32.gmra.mxu1 %vm1619_vm2, %v2877_v28  ;;  %6954 = vmatmul.msk.f32.vlgmr.msra.gmra.mxu0 %vm1619_vm2, %v3066_v6  ;;  %v3251_v37 = vmul.f32 %v8538_v53, %v10207_v11  ;;  %v8255_v0 = vunpack.i.l.bf16 %v8254_v34 }
 0x4fc   : > { %3462 = vmatpush.msra.mxu0 %v8205_v49 }
 0x4fe   : > { %3463 = vmatpush.msra.mxu0 %v8206_v16 }
 0x500   : > { %v1948_v24 = vpop.f32.mrf.mxu0 }
 0x501   : > { %v8267_v15 = vpack.i.bf16 %v1948_v24, %v1945_v41  ;;  %v3419_v54 = vpop.xlane.xlu1 %3418 }
 0x503   : > { %6956 = vmatmul.msk.f32.vlgmr.msrb.gmra.mxu1 %vm1619_vm2, %v3068_v2  ;;  %8268 = vrot.lane.b32.xlu0 %v8267_v15, %s8639_s14 }
 0x504   : > { %6955 = vmatmul.msk.f32.gmra.mxu0 %vm1619_vm2, %v3067_v4  ;;  %3499 = vmatpush.msrb.mxu1 %v8245_v26 }
 0x506   : > { %3500 = vmatpush.msrb.mxu1 %v8246_v10 }
 0x508   : > { %v1982_v21 = vpop.f32.mrf.mxu1 }
 0x50c   : > { %6966 = vmatmul.msk.f32.vlgmr.msrb.gmra.mxu0 %vm1619_vm2, %v3250_v14 }
 0x50d   : > { %3656 = vmatpush.msrb.mxu0 %v8250_v13 }
 0x50e   : > { %v3061_v18 = vpop.xlane.xlu0 %3060 }
 0x50f   : > { %3657 = vmatpush.msrb.mxu0 %v8251_v43  ;;  %8539 = vrcp.f32 %v3061_v18 }
 0x510   : > { %v2139_v50 = vpop.f32.mrf.mxu0  ;;  %8541 = vrcp.f32 %v3242_v56  ;;  %v1985_v62 = vpop.f32.mrf.mxu1 }
 0x511   : > { %v8277_v29 = vpack.i.bf16 %v1985_v62, %v1982_v21 }
 0x514   : > { %6967 = vmatmul.msk.f32.gmra.mxu0 %vm1619_vm2, %v3251_v37 }
 0x515   : > { %v8540_v61 = vpop.eup %8539 }
 0x516   : > { %v3416_v45 = vpop.xlane.xlu0 %3415  ;;  %v3069_v1 = vmul.f32 %v8540_v61, %v10241_v33  ;;  %v8542_v48 = vpop.eup %8541  ;;  %v8256_v33 = vunpack.i.h.bf16 %v8254_v34 }
 0x517   : > { %8543 = vrcp.f32 %v3416_v45  ;;  %v3252_v11 = vmul.f32 %v8542_v48, %v10215_v22 }
 0x518   : > { %v2142_v7 = vpop.f32.mrf.mxu0  ;;  %6957 = vmatmul.msk.f32.gmra.mxu1 %vm1619_vm2, %v3069_v1  ;;  %8545 = vrcp.f32 %v3419_v54 }
 0x519   : > { %v8272_v5 = vpack.i.bf16 %v2142_v7, %v2139_v50  ;;  %v3425_v6 = vpop.xlane.xlu1 %3424 }
 0x51b   : > { %8273 = vrot.lane.b32.xlu0 %v8272_v5, %s8640_s15 }
 0x51d   : > { %v8544_v58 = vpop.eup %8543 }
 0x51e   : > { %v3430_v23 = vmul.f32 %v8544_v58, %v10250_v25  ;;  %v8546_v46 = vpop.eup %8545 }
 0x51f   : > { %v3245_v55 = vpop.xlane.xlu0 %3244  ;;  %v3431_v25 = vmul.f32 %v8546_v46, %v10224_v27 }
 0x520   : > { %8547 = vrcp.f32 %v3245_v55  ;;  %6968 = vmatmul.msk.f32.vlgmr.msra.gmra.mxu1 %vm1619_vm2, %v3252_v11  ;;  %6978 = vmatmul.msk.f32.vlgmr.msra.gmra.mxu0 %vm1619_vm2, %v3430_v23  ;;  %v2174_v60 = vpop.f32.mrf.mxu1 }
 0x521   : > { %3691 = vmatpush.msra.mxu1 %v8255_v0 }
 0x523   : > { %3692 = vmatpush.msra.mxu1 %v8256_v33  ;;  %8278 = vrot.lane.b32.xlu0 %v8277_v29, %s8639_s14 }
 0x526   : > { %v8548_v57 = vpop.eup %8547 }
 0x527   : > { %v3612_v41 = vpop.xlane.xlu0 %3611  ;;  %v3253_v22 = vmul.f32 %v8548_v57, %v10263_v39 }
 0x528   : > { %8549 = vrcp.f32 %v3612_v41  ;;  %v2331_v28 = vpop.f32.mrf.mxu0  ;;  %6979 = vmatmul.msk.f32.gmra.mxu0 %vm1619_vm2, %v3431_v25  ;;  %v2177_v31 = vpop.f32.mrf.mxu1 }
 0x529   : > { %6969 = vmatmul.msk.f32.gmra.mxu1 %vm1619_vm2, %v3253_v22  ;;  %v8287_v4 = vpack.i.bf16 %v2177_v31, %v2174_v60 }
 0x52e   : > { %v8550_v49 = vpop.eup %8549 }
 0x52f   : > { %v3626_v16 = vmul.f32 %v8550_v49, %v10276_v9  ;;  %v3615_v52 = vpop.xlane.xlu0 %3614 }
 0x530   : > { %8551 = vrcp.f32 %v3615_v52  ;;  %v2334_v12 = vpop.f32.mrf.mxu0 }
 0x531   : > { %6990 = vmatmul.msk.f32.vlgmr.msrb.gmra.mxu0 %vm1619_vm2, %v3626_v16  ;;  %v8282_v36 = vpack.i.bf16 %v2334_v12, %v2331_v28  ;;  %v8259_v39 = vpop.permute.xlu1 %8258 }
 0x532   : > { %v8260_v24 = vunpack.i.l.bf16 %v8259_v39  ;;  %v3422_v27 = vpop.xlane.xlu2 %3421  ;;  %v8261_v2 = vunpack.i.h.bf16 %v8259_v39 }
 0x533   : > { %8553 = vrcp.f32 %v3422_v27  ;;  %8283 = vrot.lane.b32.xlu2 %v8282_v36, %s8642_s26 }
 0x534   : > { %3848 = vmatpush.msra.mxu0 %v8260_v24  ;;  %8555 = vrcp.f32 %v3425_v6 }
 0x536   : > { %v8552_v15 = vpop.eup %8551  ;;  %3849 = vmatpush.msra.mxu0 %v8261_v2 }
 0x537   : > { %v3627_v26 = vmul.f32 %v8552_v15, %v10284_v32  ;;  %v3621_v14 = vpop.xlane.xlu0 %3620 }
 0x538   : > { %v2366_v3 = vpop.f32.mrf.mxu1 }
 0x539   : > { %6991 = vmatmul.msk.f32.gmra.mxu0 %vm1619_vm2, %v3627_v26  ;;  %v8554_v9 = vpop.eup %8553 }
 0x53a   : > { %v3432_v10 = vmul.f32 %v8554_v9, %v10291_v30  ;;  %v3618_v35 = vpop.xlane.xlu2 %3617  ;;  %v8556_v38 = vpop.eup %8555 }
 0x53b   : > { %8288 = vrot.lane.b32.xlu2 %v8287_v4, %s8640_s15  ;;  %8557 = vrcp.f32 %v3618_v35  ;;  %v3433_v43 = vmul.f32 %v8556_v38, %v10259_v63  ;;  %v7064_v4 = vld [vmem:[%s8779_s21 + $0x70] sm:$0xf]  ;;  %v7931_v35 = vld [vmem:[%s8779_s21 + $0x74] sm:$0xf]  ;;  %v7066_v38 = vld [vmem:[%s8779_s21 + $0x78] sm:$0xf0] }
 0x53c   : > { %6980 = vmatmul.msk.f32.vlgmr.msrb.gmra.mxu1 %vm1619_vm2, %v3432_v10  ;;  %v7932_v10 = vld [vmem:[%s8779_s21 + $0x74] sm:$0xf0] }
 0x53f   : > { %v3810_v30 = vpop.xlane.xlu0 %3809 }
 0x540   : > { %v2369_v53 = vpop.f32.mrf.mxu1 }
 0x541   : > { %v8558_v32 = vpop.eup %8557  ;;  %v8307_v25 = vpack.i.bf16 %v2369_v53, %v2366_v3  ;;  %v7065_v3 = vor.u32 %v7932_v10, %v7064_v4  ;;  %v7058_v53 = vld [vmem:[%s8779_s21 + $0x68] sm:$0xf0]  ;;  %v7008_v4 = vld [vmem:[%s8779_s21] sm:$0xf]  ;;  %v7918_v10 = vld [vmem:[%s8779_s21 + $0x4] sm:$0xf0] }
 0x542   : > { %v3804_v13 = vpop.xlane.xlu2 %3803  ;;  %v3628_v50 = vmul.f32 %v8558_v32, %v10305_v51  ;;  %v7929_v32 = vld [vmem:[%s8779_s21 + $0x64] sm:$0xf] }
 0x543   : > { %8559 = vrcp.f32 %v3804_v13  ;;  %4257 = vmatpush.bf16.msra.mxu2 %v7065_v3  ;;  %v7056_v13 = vld [vmem:[%s8779_s21 + $0x60] sm:$0xf]  ;;  %v7917_v3 = vld [vmem:[%s8779_s21 + $0x4] sm:$0xf] }
 0x544   : > { %6981 = vmatmul.msk.f32.gmra.mxu1 %vm1619_vm2, %v3433_v43  ;;  %8561 = vrcp.f32 %v3621_v14  ;;  %v7069_v14 = vor.u32 %v7931_v35, %v7066_v38  ;;  %v7930_v43 = vld [vmem:[%s8779_s21 + $0x64] sm:$0xf0]  ;;  %v7009_v35 = vor.u32 %v7918_v10, %v7008_v4  ;;  %v7010_v38 = vld [vmem:[%s8779_s21 + $0x8] sm:$0xf0]  ;;  %v7080_v4 = vld [vmem:[%s8779_s21 + $0x90] sm:$0xf] }
 0x545   : > { %v7936_v10 = vld [vmem:[%s8779_s21 + $0x94] sm:$0xf0] }
 0x546   : > { %4295 = vmatpush.bf16.msrb.mxu0 %v7069_v14  ;;  %v7013_v14 = vor.u32 %v7917_v3, %v7010_v38  ;;  %v7081_v3 = vor.u32 %v7936_v10, %v7080_v4  ;;  %v7082_v38 = vld [vmem:[%s8779_s21 + $0x98] sm:$0xf0] }
 0x547   : > { %v2523_v18 = vpop.f32.mrf.mxu0 }
 0x549   : > { %v8560_v56 = vpop.eup %8559 }
 0x54a   : > { %v3818_v37 = vmul.f32 %v8560_v56, %v10318_v19  ;;  %v3807_v21 = vpop.xlane.xlu2 %3806  ;;  %v8562_v63 = vpop.eup %8561 }
 0x54b   : > { %8563 = vrcp.f32 %v3807_v21  ;;  %v3629_v51 = vmul.f32 %v8562_v63, %v10298_v8  ;;  %v7928_v21 = vld [vmem:[%s8779_s21 + $0x54] sm:$0xf0]  ;;  %v7927_v63 = vld [vmem:[%s8779_s21 + $0x54] sm:$0xf] }
 0x54c   : > { %6992 = vmatmul.msk.f32.vlgmr.msra.gmra.mxu1 %vm1619_vm2, %v3628_v50  ;;  %7002 = vmatmul.msk.f32.vlgmr.msra.gmra.mxu0 %vm1619_vm2, %v3818_v37  ;;  %8565 = vrcp.f32 %v3810_v30  ;;  %v7061_v30 = vor.u32 %v7929_v32, %v7058_v53  ;;  %v7048_v37 = vld [vmem:[%s8779_s21 + $0x50] sm:$0xf] }
 0x54e   : > { %4296 = vmatpush.bf16.msrb.mxu0 %v7061_v30  ;;  %v7939_v30 = vld [vmem:[%s8779_s21 + $0xb4] sm:$0xf] }
 0x54f   : > { %v2526_v61 = vpop.f32.mrf.mxu0 }
 0x550   : > { %v8292_v45 = vpack.i.bf16 %v2526_v61, %v2523_v18  ;;  %v10415_v1 = vpop.f32.mrf.mxu1  ;;  %v7057_v18 = vor.u32 %v7930_v43, %v7056_v13  ;;  %v7049_v61 = vor.u32 %v7928_v21, %v7048_v37 }
 0x551   : > { %v8564_v7 = vpop.eup %8563 }
 0x552   : > { %v8264_v5 = vpop.permute.xlu0 %8263  ;;  %8293 = vrot.lane.b32.xlu0 %v8292_v45, %s8636_s23  ;;  %v3819_v19 = vmul.f32 %v8564_v7, %v10327_v44  ;;  %v8566_v34 = vpop.eup %8565  ;;  %4258 = vmatpush.bf16.msra.mxu2 %v7057_v18  ;;  %v7050_v45 = vld [vmem:[%s8779_s21 + $0x58] sm:$0xf0] }
 0x553   : > { %v8265_v54 = vunpack.i.l.bf16 %v8264_v5  ;;  %v8266_v48 = vunpack.i.h.bf16 %v8264_v5  ;;  %v3820_v62 = vmul.f32 %v8566_v34, %v10309_v20  ;;  %v7053_v7 = vor.u32 %v7927_v63, %v7050_v45  ;;  %v7040_v5 = vld [vmem:[%s8779_s21 + $0x40] sm:$0xf]  ;;  %v7098_v63 = vld [vmem:[%s8779_s21 + $0xb8] sm:$0xf0]  ;;  %v7938_v45 = vld [vmem:[%s8779_s21 + $0xa4] sm:$0xf0] }
 0x554   : > { %6993 = vmatmul.msk.f32.gmra.mxu1 %vm1619_vm2, %v3629_v51  ;;  %7003 = vmatmul.msk.f32.gmra.mxu0 %vm1619_vm2, %v3819_v19  ;;  %v7925_v51 = vld [vmem:[%s8779_s21 + $0x44] sm:$0xf] }
 0x555   : > { %3883 = vmatpush.msrb.mxu1 %v8265_v54  ;;  %4297 = vmatpush.bf16.msrb.mxu0 %v7053_v7  ;;  %v7926_v54 = vld [vmem:[%s8779_s21 + $0x44] sm:$0xf0]  ;;  %v7101_v7 = vor.u32 %v7939_v30, %v7098_v63 }
 0x556   : > { %4259 = vmatpush.bf16.msra.mxu2 %v7049_v61  ;;  %v7041_v19 = vor.u32 %v7926_v54, %v7040_v5  ;;  %v7088_v61 = vld [vmem:[%s8779_s21 + $0xa0] sm:$0xf]  ;;  %v7090_v5 = vld [vmem:[%s8779_s21 + $0xa8] sm:$0xf0] }
 0x557   : > { %3884 = vmatpush.msrb.mxu1 %v8266_v48  ;;  %v7042_v48 = vld [vmem:[%s8779_s21 + $0x48] sm:$0xf0]  ;;  %v7089_v54 = vor.u32 %v7938_v45, %v7088_v61 }
 0x558   : > { %v2561_v58 = vpop.f32.mrf.mxu1  ;;  %v2715_v11 = vpop.f32.mrf.mxu0 }
 0x559   : > { %v8327_v56 = vpack.i.bf16 %v2561_v58, %v10415_v1  ;;  %4318 = vmatpush.bf16.msra.mxu1 %v7101_v7 }
 0x55a   : > { %4260 = vmatpush.bf16.msra.mxu2 %v7041_v19 }
 0x55c   : > { %v3813_v23 = vpop.xlane.xlu1 %3812  ;;  %7004 = vmatmul.msk.f32.vlgmr.msrb.gmra.mxu1 %vm1619_vm2, %v3820_v62  ;;  %v7032_v62 = vld [vmem:[%s8779_s21 + $0x30] sm:$0xf] }
 0x55d   : > { %8567 = vrcp.f32 %v3813_v23  ;;  %v7924_v23 = vld [vmem:[%s8779_s21 + $0x34] sm:$0xf0] }
 0x560   : > { %v2718_v55 = vpop.f32.mrf.mxu0  ;;  %v10424_v8 = vpop.f32.mrf.mxu1 }
 0x561   : > { %v8297_v44 = vpack.i.bf16 %v2718_v55, %v2715_v11  ;;  %v7045_v11 = vor.u32 %v7925_v51, %v7042_v48  ;;  %v7923_v55 = vld [vmem:[%s8779_s21 + $0x34] sm:$0xf] }
 0x563   : > { %v8568_v0 = vpop.eup %8567  ;;  %8298 = vrot.lane.b32.xlu0 %v8297_v44, %s8637_s22  ;;  %v7033_v44 = vor.u32 %v7924_v23, %v7032_v62  ;;  %4298 = vmatpush.bf16.msrb.mxu0 %v7045_v11 }
 0x564   : > { %v3821_v33 = vmul.f32 %v8568_v0, %v10348_v40  ;;  %v7034_v0 = vld [vmem:[%s8779_s21 + $0x38] sm:$0xf0] }
 0x565   : > { %4261 = vmatpush.bf16.msra.mxu2 %v7033_v44 }
 0x566   : > { %7005 = vmatmul.msk.f32.gmra.mxu1 %vm1619_vm2, %v3821_v33  ;;  %v7037_v33 = vor.u32 %v7923_v55, %v7034_v0 }
 0x568   : > { %v2907_v29 = vpop.f32.mrf.mxu0  ;;  %v10429_v46 = vpop.f32.mrf.mxu1  ;;  %4299 = vmatpush.bf16.msrb.mxu0 %v7037_v33 }
 0x569   : > { %v8337_v13 = vpack.i.bf16 %v10429_v46, %v10424_v8  ;;  %v7096_v8 = vld [vmem:[%s8779_s21 + $0xb0] sm:$0xf]  ;;  %v7940_v46 = vld [vmem:[%s8779_s21 + $0xb4] sm:$0xf0] }
 0x56a   : > { %v7097_v21 = vor.u32 %v7940_v46, %v7096_v8 }
 0x56c   : > { %4280 = vmatpush.bf16.msra.mxu3 %v7097_v21 }
 0x570   : > { %v2910_v57 = vpop.f32.mrf.mxu0  ;;  %v2942_v41 = vpop.f32.mrf.mxu1  ;;  %4281 = vmatpush.bf16.msra.mxu3 %v7089_v54 }
 0x571   : > { %v8302_v20 = vpack.i.bf16 %v2910_v57, %v2907_v29  ;;  %v7024_v57 = vld [vmem:[%s8779_s21 + $0x20] sm:$0xf] }
 0x573   : > { %8303 = vrot.lane.b32.xlu1 %v8302_v20, %s8641_s24  ;;  %v7922_v20 = vld [vmem:[%s8779_s21 + $0x24] sm:$0xf0] }
 0x574   : > { %4282 = vmatpush.bf16.msra.mxu3 %v7081_v3 }
 0x575   : > { %v10472_v29 = vpop.permute.xlu0 %8268 }
 0x576   : > { %v8270_v51 = vunpack.i.l.bf16 %v10472_v29 }
 0x578   : > { %v3099_v22 = vpop.f32.mrf.mxu0  ;;  %v2945_v28 = vpop.f32.mrf.mxu1  ;;  %v4052_v62 = vsel %vm1619_vm2, %v10350_v47, %v8270_v51 }
 0x579   : > { %v8342_v60 = vpack.i.bf16 %v2945_v28, %v2942_v41  ;;  %v7921_v41 = vld [vmem:[%s8779_s21 + $0x24] sm:$0xf] }
 0x57b   : > { %8308 = vrot.lane.b32.xlu1 %v8307_v25, %s8642_s26  ;;  %v7026_v25 = vld [vmem:[%s8779_s21 + $0x28] sm:$0xf0] }
 0x580   : > { %v3134_v16 = vpop.f32.mrf.mxu1 }
 0x581   : > { %v3102_v6 = vpop.f32.mrf.mxu0 }
 0x582   : > { %v8312_v49 = vpack.i.bf16 %v3102_v6, %v3099_v22  ;;  %v7025_v22 = vor.u32 %v7922_v20, %v7024_v57 }
 0x583   : > { %8343 = vrot.lane.b32.xlu1 %v8342_v60, %s8641_s24  ;;  %v7029_v60 = vor.u32 %v7921_v41, %v7026_v25 }
 0x584   : > { %8313 = vrot.lane.b32.xlu0 %v8312_v49, %s8638_s28  ;;  %v7016_v49 = vld [vmem:[%s8779_s21 + $0x10] sm:$0xf]  ;;  %4262 = vmatpush.bf16.msra.mxu2 %v7025_v22 }
 0x585   : > { %4300 = vmatpush.bf16.msrb.mxu0 %v7029_v60 }
 0x589   : > { %v10435_v40 = vpop.f32.mrf.mxu0 }
 0x591   : > { %v10437_v52 = vpop.f32.mrf.mxu0 }
 0x595   : > { %v3137_v12 = vpop.f32.mrf.mxu1 }
 0x596   : > { %v8347_v1 = vpack.i.bf16 %v3137_v12, %v3134_v16  ;;  %v7920_v16 = vld [vmem:[%s8779_s21 + $0x14] sm:$0xf0]  ;;  %v7919_v12 = vld [vmem:[%s8779_s21 + $0x14] sm:$0xf] }
 0x59d   : > { %v3465_v36 = vpop.f32.mrf.mxu0  ;;  %v10439_v27 = vpop.f32.mrf.mxu1 }
 0x5a5   : > { %v3468_v39 = vpop.f32.mrf.mxu0 }
 0x5a6   : > { %v8317_v24 = vpack.i.bf16 %v3468_v39, %v3465_v36  ;;  %v10442_v15 = vpop.f32.mrf.mxu1 }
 0x5a8   : > { %8318 = vrot.lane.b32.xlu2 %v8317_v24, %s8639_s14  ;;  %v7017_v24 = vor.u32 %v7920_v16, %v7016_v49 }
 0x5aa   : > { %4263 = vmatpush.bf16.msra.mxu2 %v7017_v24 }
 0x5ae   : > { %v3659_v2 = vpop.f32.mrf.mxu0  ;;  %4264 = vmatpush.bf16.msra.mxu2 %v7009_v35  ;;  %v7935_v35 = vld [vmem:[%s8779_s21 + $0x94] sm:$0xf] }
 0x5b6   : > { %v3662_v31 = vpop.f32.mrf.mxu0 }
 0x5b7   : > { %v8322_v26 = vpack.i.bf16 %v3662_v31, %v3659_v2  ;;  %v7018_v2 = vld [vmem:[%s8779_s21 + $0x18] sm:$0xf0] }
 0x5b8   : > { %v7021_v31 = vor.u32 %v7919_v12, %v7018_v2 }
 0x5b9   : > { %8323 = vrot.lane.b32.xlu0 %v8322_v26, %s8640_s15  ;;  %v10445_v9 = vpop.f32.mrf.mxu1  ;;  %v8274_v26 = vpop.permute.xlu0 %8273 }
 0x5ba   : > { %4301 = vmatpush.bf16.msrb.mxu0 %v7021_v31  ;;  %v8276_v19 = vunpack.i.h.bf16 %v8274_v26  ;;  %v8275_v48 = vunpack.i.l.bf16 %v8274_v26 }
 0x5bc   : > { %v4057_v33 = vsel %vm4056_vm3, %v4052_v62, %v8275_v48 }
 0x5be   : > { %4302 = vmatpush.bf16.msrb.mxu0 %v7013_v14  ;;  %v7085_v14 = vor.u32 %v7935_v35, %v7082_v38 }
 0x5c1   : > { %8328 = vrot.lane.b32.xlu0 %v8327_v56, %s8636_s23  ;;  %v10457_v50 = vpop.f32.mrf.mxu1  ;;  %v10491_v32 = vpop.permute.xlu0 %8278 }
 0x5c2   : > { %v8352_v18 = vpack.i.bf16 %v10457_v50, %v10445_v9  ;;  %v8271_v50 = vunpack.i.h.bf16 %v10472_v29 }
 0x5c4   : > { %v4053_v11 = vsel %vm1619_vm2, %v10360_v17, %v8271_v50 }
 0x5c5   : > { %v4058_v0 = vsel %vm4056_vm3, %v4053_v11, %v8276_v19 }
 0x5c9   : > { %8348 = vrot.lane.b32.xlu0 %v8347_v1, %s8638_s28  ;;  %v3694_v34 = vpop.f32.mrf.mxu1  ;;  %v3851_v58 = vpop.f32.mrf.mxu0  ;;  %v7937_v1 = vld [vmem:[%s8779_s21 + $0xa4] sm:$0xf] }
 0x5ca   : > { %v8294_v37 = vpop.permute.xlu0 %8293  ;;  %v7093_v9 = vor.u32 %v7937_v1, %v7090_v5  ;;  %v8281_v1 = vunpack.i.h.bf16 %v10491_v32  ;;  %v8280_v5 = vunpack.i.l.bf16 %v10491_v32 }
 0x5cb   : > { %v8296_v29 = vunpack.i.h.bf16 %v8294_v37  ;;  %v8295_v57 = vunpack.i.l.bf16 %v8294_v37 }
 0x5cc   : > { %4319 = vmatpush.bf16.msra.mxu1 %v7093_v9 }
 0x5d0   : > { %4320 = vmatpush.bf16.msra.mxu1 %v7085_v14 }
 0x5d1   : > { %v3697_v28 = vpop.f32.mrf.mxu1  ;;  %v3854_v6 = vpop.f32.mrf.mxu0 }
 0x5d2   : > { %v8357_v36 = vpack.i.bf16 %v3697_v28, %v3694_v34  ;;  %v8332_v39 = vpack.i.bf16 %v3854_v6, %v3851_v58  ;;  %v8284_v34 = vpop.permute.xlu2 %8283 }
 0x5d3   : > { %v8286_v23 = vunpack.i.h.bf16 %v8284_v34  ;;  %v8285_v55 = vunpack.i.l.bf16 %v8284_v34 }
 0x5d4   : > { %8358 = vrot.lane.b32.xlu1 %v8357_v36, %s8640_s15  ;;  %8333 = vrot.lane.b32.xlu2 %v8332_v39, %s8642_s26 }
 0x5d5   : > { %v8299_v58 = vpop.permute.xlu0 %8298  ;;  %v4063_v28 = vsel %vm4061_vm5, %v4058_v0, %v8286_v23  ;;  %v4062_v17 = vsel %vm4061_vm5, %v4057_v33, %v8285_v55 }
 0x5d6   : > { %v8301_v20 = vunpack.i.h.bf16 %v8299_v58  ;;  %v8300_v41 = vunpack.i.l.bf16 %v8299_v58  ;;  %v4067_v47 = vsel %vm775_vm4, %v4063_v28, %v8296_v29  ;;  %v4066_v6 = vsel %vm775_vm4, %v4062_v17, %v8295_v57 }
 0x5d8   : > { %v4072_v49 = vsel %vm4070_vm6, %v4067_v47, %v8301_v20  ;;  %v4071_v16 = vsel %vm4070_vm6, %v4066_v6, %v8300_v41 }
 0x5d9   : > { %v3886_v43 = vpop.f32.mrf.mxu1 }
 0x5da   : > { %v8289_v46 = vpop.permute.xlu2 %8288 }
 0x5db   : > { %v8291_v62 = vunpack.i.h.bf16 %v8289_v46  ;;  %v8290_v23 = vunpack.i.l.bf16 %v8289_v46 }
 0x5dc   : > { %8338 = vrot.lane.b32.xlu2 %v8337_v13, %s8637_s22  ;;  %v7072_v13 = vld [vmem:[%s8779_s21 + $0x80] sm:$0xf] }
 0x5e3   : > { %v3889_v53 = vpop.f32.mrf.mxu1 }
 0x5e4   : > { %v8362_v56 = vpack.i.bf16 %v3889_v53, %v3886_v43  ;;  %8353 = vrot.lane.b32.xlu2 %v8352_v18, %s8639_s14  ;;  %v7934_v43 = vld [vmem:[%s8779_s21 + $0x84] sm:$0xf0]  ;;  %v7933_v18 = vld [vmem:[%s8779_s21 + $0x84] sm:$0xf] }
 0x5e5   : > { %v8304_v44 = vpop.permute.xlu1 %8303  ;;  %v7073_v53 = vor.u32 %v7934_v43, %v7072_v13 }
 0x5e6   : > { %8363 = vrot.lane.b32.xlu0 %v8362_v56, %s8642_s26  ;;  %v8306_v22 = vunpack.i.h.bf16 %v8304_v44  ;;  %v8305_v25 = vunpack.i.l.bf16 %v8304_v44  ;;  %v7074_v56 = vld [vmem:[%s8779_s21 + $0x88] sm:$0xf0] }
 0x5e7   : > { %v7077_v8 = vor.u32 %v7933_v18, %v7074_v56  ;;  %4283 = vmatpush.bf16.msra.mxu3 %v7073_v53 }
 0x5e8   : > { %v4077_v39 = vsel %vm4075_vm7, %v4072_v49, %v8306_v22  ;;  %v4076_v24 = vsel %vm4075_vm7, %v4071_v16, %v8305_v25 }
 0x5e9   : > { %4321 = vmatpush.bf16.msra.mxu1 %v7077_v8 }
 0x5ed   : > { %v8309_v7 = vpop.permute.xlu1 %8308 }
 0x5ee   : > { %v8311_v44 = vunpack.i.h.bf16 %v8309_v7  ;;  %v8310_v0 = vunpack.i.l.bf16 %v8309_v7 }
 0x5f5   : > { %v8344_v25 = vpop.permute.xlu1 %8343 }
 0x5f6   : > { %v8314_v60 = vpop.permute.xlu0 %8313  ;;  %v8346_v49 = vunpack.i.h.bf16 %v8344_v25  ;;  %v8345_v16 = vunpack.i.l.bf16 %v8344_v25 }
 0x5f7   : > { %v8316_v12 = vunpack.i.h.bf16 %v8314_v60  ;;  %v8315_v36 = vunpack.i.l.bf16 %v8314_v60 }
 0x5f9   : > { %v4082_v2 = vsel %vm4080_vm8, %v4077_v39, %v8316_v12  ;;  %v4081_v31 = vsel %vm4080_vm8, %v4076_v24, %v8315_v36 }
 0x5fa   : > { %v4097_v26 = vpack.c.bf16 %v4082_v2, %v4081_v31 }
 0x5fc   : > { %4265 = vmatmul.bf16.vlgmr.msra.gmra.mxu2 %v4097_v26  ;;  %4303 = vmatmul.bf16.vlgmr.msrb.gmra.mxu0 %v4097_v26 }
 0x602   : > { %v8319_v30 = vpop.permute.xlu2 %8318 }
 0x603   : > { %v8321_v21 = vunpack.i.h.bf16 %v8319_v30  ;;  %v8320_v63 = vunpack.i.l.bf16 %v8319_v30 }
 0x605   : > { %v4086_v9 = vsel %vm1619_vm2, %v10437_v52, %v8321_v21  ;;  %v4085_v50 = vsel %vm1619_vm2, %v10435_v40, %v8320_v63  ;;  %v4055_v52 = vsel %vm1619_vm2, %v10384_v59, %v8281_v1  ;;  %v4054_v40 = vsel %vm1619_vm2, %v10380_v42, %v8280_v5 }
 0x606   : > { %v4060_v57 = vsel %vm4056_vm3, %v4055_v52, %v8291_v62  ;;  %v4059_v20 = vsel %vm4056_vm3, %v4054_v40, %v8290_v23  ;;  %v8578_v62 = vld [vmem:[#allocation2] sm:$0xff] }
 0x607   : > { %v4065_v22 = vsel %vm4061_vm5, %v4060_v57, %v8311_v44  ;;  %v4064_v59 = vsel %vm4061_vm5, %v4059_v20, %v8310_v0  ;;  %v8579_v0 = vld [vmem:[#allocation2 + $0x18] sm:$0xff]  ;;  %v8580_v20 = vld [vmem:[#allocation2 + $0x10] sm:$0xff] }
 0x62b   : > { %v8324_v37 = vpop.permute.xlu0 %8323 }
 0x62c   : > { %v8326_v61 = vunpack.i.h.bf16 %v8324_v37  ;;  %v8325_v45 = vunpack.i.l.bf16 %v8324_v37 }
 0x62e   : > { %v8334_v54 = vpop.permute.xlu2 %8333  ;;  %v4090_v48 = vsel %vm4056_vm3, %v4086_v9, %v8326_v61  ;;  %v4089_v34 = vsel %vm4056_vm3, %v4085_v50, %v8325_v45 }
 0x62f   : > { %v8336_v51 = vunpack.i.h.bf16 %v8334_v54  ;;  %v8335_v19 = vunpack.i.l.bf16 %v8334_v54 }
 0x631   : > { %v4094_v58 = vsel %vm4061_vm5, %v4090_v48, %v8336_v51  ;;  %v4093_v11 = vsel %vm4061_vm5, %v4089_v34, %v8335_v19  ;;  %v8577_v51 = vld [vmem:[#allocation2 + $0x8] sm:$0xff] }
 0x632   : > { %v4098_v32 = vpack.c.bf16 %v4094_v58, %v4093_v11 }
 0x633   : > { %v8329_v55 = vpop.permute.xlu0 %8328 }
 0x634   : > { %v8331_v33 = vunpack.i.h.bf16 %v8329_v55  ;;  %v8330_v29 = vunpack.i.l.bf16 %v8329_v55  ;;  %7102 = vmatmul.msk.bf16.vlgmr.msra.gmra.mxu3 %vm775_vm4, %v4098_v32  ;;  %7104 = vmatmul.msk.bf16.vlgmr.msra.gmra.mxu1 %vm775_vm4, %v4098_v32 }
 0x636   : > { %v8339_v41 = vpop.permute.xlu2 %8338  ;;  %v4069_v17 = vsel %vm775_vm4, %v4065_v22, %v8331_v33  ;;  %v4068_v47 = vsel %vm775_vm4, %v4064_v59, %v8330_v29 }
 0x637   : > { %v8341_v28 = vunpack.i.h.bf16 %v8339_v41  ;;  %v8340_v42 = vunpack.i.l.bf16 %v8339_v41 }
 0x639   : > { %v4074_v6 = vsel %vm4070_vm6, %v4069_v17, %v8341_v28  ;;  %v4073_v60 = vsel %vm4070_vm6, %v4068_v47, %v8340_v42 }
 0x63a   : > { %v4078_v24 = vsel %vm4075_vm7, %v4073_v60, %v8345_v16  ;;  %v4079_v2 = vsel %vm4075_vm7, %v4074_v6, %v8346_v49  ;;  %v8581_v49 = vld [vmem:[#allocation2 + $0x28] sm:$0xff] }
 0x63b   : > { %v8349_v12 = vpop.permute.xlu0 %8348 }
 0x63c   : > { %v8351_v36 = vunpack.i.h.bf16 %v8349_v12  ;;  %v8350_v39 = vunpack.i.l.bf16 %v8349_v12 }
 0x63e   : > { %v4083_v31 = vsel %vm4080_vm8, %v4078_v24, %v8350_v39  ;;  %v4084_v26 = vsel %vm4080_vm8, %v4079_v2, %v8351_v36  ;;  %v8354_v10 = vpop.permute.xlu2 %8353  ;;  %v8582_v2 = vld [vmem:[#allocation2 + $0x20] sm:$0xff] }
 0x63f   : > { %v4099_v4 = vpack.c.bf16 %v4084_v26, %v4083_v31  ;;  %v8356_v3 = vunpack.i.h.bf16 %v8354_v10  ;;  %v8355_v38 = vunpack.i.l.bf16 %v8354_v10 }
 0x641   : > { %4270 = vmatmul.bf16.gmra.mxu2 %v4099_v4  ;;  %4308 = vmatmul.bf16.gmra.mxu0 %v4099_v4  ;;  %v4088_v18 = vsel %vm1619_vm2, %v10442_v15, %v8356_v3  ;;  %v4087_v53 = vsel %vm1619_vm2, %v10439_v27, %v8355_v38  ;;  %v4125_v27 = vld [vmem:[%s11426_s19] sm:$0x3]  ;;  %v8583_v38 = vld [vmem:[#allocation2 + $0x38] sm:$0xff] }
 0x642   : > { %v4128_v61 = vperm.slane %v4125_v27, 1  ;;  %v4127_v5 = vperm.slane %v4125_v27, 0 }
 0x646   : > { %v8359_v35 = vpop.permute.xlu1 %8358 }
 0x647   : > { %v8361_v14 = vunpack.i.h.bf16 %v8359_v35  ;;  %v8360_v13 = vunpack.i.l.bf16 %v8359_v35 }
 0x649   : > { %v4091_v46 = vsel %vm4056_vm3, %v4087_v53, %v8360_v13  ;;  %v4092_v30 = vsel %vm4056_vm3, %v4088_v18, %v8361_v14  ;;  %v8584_v18 = vld [vmem:[#allocation2 + $0x30] sm:$0xff] }
 0x658   : > { %v8364_v43 = vpop.permute.xlu0 %8363 }
 0x659   : > { %v8366_v56 = vunpack.i.h.bf16 %v8364_v43  ;;  %v8365_v8 = vunpack.i.l.bf16 %v8364_v43 }
 0x65b   : > { %v4095_v37 = vsel %vm4061_vm5, %v4091_v46, %v8365_v8  ;;  %v4096_v21 = vsel %vm4061_vm5, %v4092_v30, %v8366_v56  ;;  %v11427_v30 = vld [vmem:[#allocation9_spill] sm:$0xff] }
 0x65c   : > { %v4100_v63 = vpack.c.bf16 %v4096_v21, %v4095_v37 }
 0x65e   : > { %7103 = vmatmul.msk.bf16.gmra.mxu3 %vm775_vm4, %v4100_v63  ;;  %7105 = vmatmul.msk.bf16.gmra.mxu1 %vm775_vm4, %v4100_v63 }
 0x679   : > { %v4304_v15 = vpop.f32.mrf.mxu0 }
 0x67a   : > { %v4305_v45 = vadd.f32 %v4304_v15, %v4128_v61 }
 0x67f   : > { %v4266_v7 = vpop.f32.mrf.mxu2 }
 0x680   : > { %v4267_v9 = vadd.f32 %v4266_v7, %v4127_v5 }
 0x681   : > { %v4306_v50 = vpop.f32.mrf.mxu0 }
 0x682   : > { %v4307_v58 = vadd.f32 %v4306_v50, %v4128_v61 }
 0x687   : > { %v4268_v32 = vpop.f32.mrf.mxu2 }
 0x688   : > { %v4269_v44 = vadd.f32 %v4268_v32, %v4127_v5 }
 0x6b1   : > { %v4323_v1 = vpop.f32.mrf.mxu1 }
 0x6b2   : > { %v4324_v54 = vadd.f32 %v4323_v1, %v4305_v45 }
 0x6b4   : > { %v10574_v19 = vadd.f32 %v8577_v51, %v4324_v54 }
 0x6b6   : > { %v4343_v52 = vsel %vm775_vm4, %v10574_v19, 0.0 }
 0x6b7   : > { %v4285_v48 = vpop.f32.mrf.mxu3 }
 0x6b8   : > { %v4286_v34 = vadd.f32 %v4285_v48, %v4267_v9 }
 0x6b9   : > { %v4325_v11 = vpop.f32.mrf.mxu1 }
 0x6ba   : > { %v10576_v23 = vadd.f32 %v8578_v62, %v4286_v34  ;;  %v4326_v55 = vadd.f32 %v4325_v11, %v4307_v58 }
 0x6bc   : > { %v4344_v40 = vadd.f32 %v4343_v52, %v10576_v23  ;;  %v10581_v33 = vadd.f32 %v8579_v0, %v4326_v55 }
 0x6be   : > { %4345 = vadd.xlane.f32.xlu2 %v4344_v40  ;;  %v4347_v22 = vsel %vm775_vm4, %v10581_v33, 0.0  ;;  %v4309_v25 = vpop.f32.mrf.mxu0 }
 0x6bf   : > { %v4287_v29 = vpop.f32.mrf.mxu3  ;;  %v4310_v28 = vadd.f32 %v4309_v25, %v4128_v61 }
 0x6c0   : > { %v4288_v57 = vadd.f32 %v4287_v29, %v4269_v44 }
 0x6c2   : > { %v10583_v41 = vadd.f32 %v8580_v20, %v4288_v57 }
 0x6c4   : > { %v4348_v59 = vadd.f32 %v4347_v22, %v10583_v41  ;;  %v4271_v42 = vpop.f32.mrf.mxu2 }
 0x6c5   : > { %v4272_v6 = vadd.f32 %v4271_v42, %v4127_v5  ;;  %v7986_v42 = vld [vmem:[%s8788_s13 + $0x164] sm:$0xf0] }
 0x6c6   : > { %4349 = vadd.xlane.f32.xlu1 %v4348_v59  ;;  %v4311_v60 = vpop.f32.mrf.mxu0 }
 0x6c7   : > { %v4312_v39 = vadd.f32 %v4311_v60, %v4128_v61 }
 0x6cc   : > { %v4273_v26 = vpop.f32.mrf.mxu2 }
 0x6cd   : > { %v4274_v3 = vadd.f32 %v4273_v26, %v4127_v5  ;;  %v7228_v26 = vld [vmem:[%s8788_s13 + $0xf0] sm:$0xf] }
 0x6db   : > { %v4328_v17 = vpop.f32.mrf.mxu1 }
 0x6dc   : > { %v4329_v47 = vadd.f32 %v4328_v17, %v4310_v28  ;;  %v7276_v28 = vld [vmem:[%s8788_s13 + $0x150] sm:$0xf]  ;;  %v7983_v17 = vld [vmem:[%s8788_s13 + $0x154] sm:$0xf] }
 0x6de   : > { %v10588_v16 = vadd.f32 %v8581_v49, %v4329_v47  ;;  %v7277_v47 = vor.u32 %v7986_v42, %v7276_v28  ;;  %v7252_v49 = vld [vmem:[%s8788_s13 + $0x120] sm:$0xf]  ;;  %v7132_v42 = vld [vmem:[%s8788_s13 + $0x30] sm:$0xf] }
 0x6e0   : > { %v4351_v10 = vsel %vm775_vm4, %v10588_v16, 0.0  ;;  %4933 = vmatpush.bf16.msrb.mxu3 %v7277_v47  ;;  %v7324_v47 = vld [vmem:[%s8788_s13 + $0x1b0] sm:$0xf] }
 0x6e1   : > { %v4290_v12 = vpop.f32.mrf.mxu3 }
 0x6e2   : > { %v4291_v36 = vadd.f32 %v4290_v12, %v4272_v6  ;;  %v7278_v6 = vld [vmem:[%s8788_s13 + $0x168] sm:$0xf0]  ;;  %v7980_v12 = vld [vmem:[%s8788_s13 + $0x134] sm:$0xf0] }
 0x6e3   : > { %v4330_v24 = vpop.f32.mrf.mxu1  ;;  %v7281_v60 = vor.u32 %v7983_v17, %v7278_v6  ;;  %v7950_v17 = vld [vmem:[%s8788_s13 + $0x44] sm:$0xf0] }
 0x6e4   : > { %v10590_v31 = vadd.f32 %v8582_v2, %v4291_v36  ;;  %v4331_v4 = vadd.f32 %v4330_v24, %v4312_v39  ;;  %v7977_v36 = vld [vmem:[%s8788_s13 + $0x124] sm:$0xf]  ;;  %v7253_v39 = vor.u32 %v7980_v12, %v7252_v49  ;;  %v7254_v24 = vld [vmem:[%s8788_s13 + $0x138] sm:$0xf0]  ;;  %v7998_v49 = vld [vmem:[%s8788_s13 + $0x1c4] sm:$0xf0] }
 0x6e5   : > { %4971 = vmatpush.bf16.msrb.mxu2 %v7281_v60  ;;  %v7257_v2 = vor.u32 %v7977_v36, %v7254_v24  ;;  %v7133_v60 = vor.u32 %v7950_v17, %v7132_v42  ;;  %v7947_v12 = vld [vmem:[%s8788_s13 + $0x34] sm:$0xf]  ;;  %v7134_v36 = vld [vmem:[%s8788_s13 + $0x48] sm:$0xf0]  ;;  %v7325_v24 = vor.u32 %v7998_v49, %v7324_v47 }
 0x6e6   : > { %v4352_v35 = vadd.f32 %v4351_v10, %v10590_v31  ;;  %v10595_v14 = vadd.f32 %v8583_v38, %v4331_v4  ;;  %4934 = vmatpush.bf16.msrb.mxu3 %v7253_v39  ;;  %v7974_v4 = vld [vmem:[%s8788_s13 + $0x104] sm:$0xf0]  ;;  %v7971_v10 = vld [vmem:[%s8788_s13 + $0xf4] sm:$0xf] }
 0x6e8   : > { %4353 = vadd.xlane.f32.xlu0 %v4352_v35  ;;  %v4355_v56 = vsel %vm775_vm4, %v10595_v14, 0.0  ;;  %v7229_v35 = vor.u32 %v7974_v4, %v7228_v26  ;;  %v7995_v26 = vld [vmem:[%s8788_s13 + $0x1b4] sm:$0xf]  ;;  %v7326_v4 = vld [vmem:[%s8788_s13 + $0x1c8] sm:$0xf0] }
 0x6e9   : > { %v4292_v13 = vpop.f32.mrf.mxu3  ;;  %4972 = vmatpush.bf16.msrb.mxu2 %v7257_v2  ;;  %v7137_v2 = vor.u32 %v7947_v12, %v7134_v36 }
 0x6ea   : > { %v4293_v43 = vadd.f32 %v4292_v13, %v4274_v3  ;;  %v7230_v3 = vld [vmem:[%s8788_s13 + $0x108] sm:$0xf0]  ;;  %4935 = vmatpush.bf16.msrb.mxu3 %v7229_v35  ;;  %v7204_v13 = vld [vmem:[%s8788_s13 + $0xc0] sm:$0xf] }
 0x6eb   : > { %v7233_v38 = vor.u32 %v7971_v10, %v7230_v3  ;;  %v7329_v10 = vor.u32 %v7995_v26, %v7326_v4  ;;  %v7108_v3 = vld [vmem:[%s8788_s13] sm:$0xf]  ;;  %v7984_v26 = vld [vmem:[%s8788_s13 + $0x15c] sm:$0xf] }
 0x6ec   : > { %v10597_v53 = vadd.f32 %v8584_v18, %v4293_v43  ;;  %v7968_v43 = vld [vmem:[%s8788_s13 + $0xd4] sm:$0xf0]  ;;  %v7965_v18 = vld [vmem:[%s8788_s13 + $0xc4] sm:$0xf] }
 0x6ed   : > { %4973 = vmatpush.bf16.msrb.mxu2 %v7233_v38  ;;  %v7944_v38 = vld [vmem:[%s8788_s13 + $0x14] sm:$0xf0] }
 0x6ee   : > { %v4356_v8 = vadd.f32 %v4355_v56, %v10597_v53  ;;  %v7205_v56 = vor.u32 %v7968_v43, %v7204_v13  ;;  %v7109_v13 = vor.u32 %v7944_v38, %v7108_v3  ;;  %v7300_v43 = vld [vmem:[%s8788_s13 + $0x180] sm:$0xf] }
 0x6f0   : > { %4357 = vadd.xlane.f32.xlu2 %v4356_v8  ;;  %v7206_v8 = vld [vmem:[%s8788_s13 + $0xd8] sm:$0xf0]  ;;  %4936 = vmatpush.bf16.msrb.mxu3 %v7205_v56  ;;  %v7941_v56 = vld [vmem:[%s8788_s13 + $0x4] sm:$0xf] }
 0x731   : > { %v4346_v46 = vpop.xlane.xlu2 %4345 }
 0x732   : > { %v4359_v37 = vmul.f32 %v4346_v46, %v11427_v30  ;;  %v7209_v46 = vor.u32 %v7965_v18, %v7206_v8  ;;  %v7992_v18 = vld [vmem:[%s8788_s13 + $0x194] sm:$0xf0] }
 0x733   : > { %v7301_v8 = vor.u32 %v7992_v18, %v7300_v43  ;;  %v7260_v18 = vld [vmem:[%s8788_s13 + $0x128] sm:$0xf] }
 0x734   : > { %v10604_v21 = vsub.f32 %v10576_v23, %v4359_v37  ;;  %v10607_v63 = vsub.f32 %v10574_v19, %v4359_v37  ;;  %4974 = vmatpush.bf16.msrb.mxu2 %v7209_v46  ;;  %v7180_v37 = vld [vmem:[%s8788_s13 + $0x90] sm:$0xf]  ;;  %v7110_v46 = vld [vmem:[%s8788_s13 + $0x18] sm:$0xf0] }
 0x736   : > { %v4371_v27 = vmul.f32 %v10604_v21, %v10604_v21  ;;  %v4372_v15 = vmul.f32 %v10607_v63, %v10607_v63 }
 0x738   : > { %v4379_v61 = vsel %vm775_vm4, %v4372_v15, 0.0  ;;  %v7372_v15 = vld [vmem:[%s8788_s13 + $0x210] sm:$0xf] }
 0x739   : > { %v4350_v45 = vpop.xlane.xlu1 %4349  ;;  %v4380_v7 = vadd.f32 %v4379_v61, %v4371_v27  ;;  %v7962_v27 = vld [vmem:[%s8788_s13 + $0xa4] sm:$0xf0] }
 0x73a   : > { %v4360_v1 = vmul.f32 %v4350_v45, %v11427_v30  ;;  %v7181_v61 = vor.u32 %v7962_v27, %v7180_v37  ;;  %v8010_v45 = vld [vmem:[%s8788_s13 + $0x224] sm:$0xf0]  ;;  %v7989_v37 = vld [vmem:[%s8788_s13 + $0x184] sm:$0xf]  ;;  %v7302_v27 = vld [vmem:[%s8788_s13 + $0x198] sm:$0xf0] }
 0x73b   : > { %4381 = vadd.xlane.f32.xlu1 %v4380_v7  ;;  %v7959_v7 = vld [vmem:[%s8788_s13 + $0x94] sm:$0xf] }
 0x73c   : > { %v10616_v5 = vsub.f32 %v10583_v41, %v4360_v1  ;;  %v10619_v54 = vsub.f32 %v10581_v33, %v4360_v1  ;;  %v7182_v1 = vld [vmem:[%s8788_s13 + $0xa8] sm:$0xf0]  ;;  %4937 = vmatpush.bf16.msrb.mxu3 %v7181_v61  ;;  %v7305_v61 = vor.u32 %v7989_v37, %v7302_v27  ;;  %v7262_v37 = vld [vmem:[%s8788_s13 + $0x140] sm:$0xf0] }
 0x73e   : > { %v4373_v9 = vmul.f32 %v10616_v5, %v10616_v5  ;;  %v4374_v50 = vmul.f32 %v10619_v54, %v10619_v54 }
 0x740   : > { %v4383_v51 = vsel %vm775_vm4, %v4374_v50, 0.0  ;;  %v7185_v50 = vor.u32 %v7959_v7, %v7182_v1 }
 0x741   : > { %v4384_v48 = vadd.f32 %v4383_v51, %v4373_v9  ;;  %v7373_v9 = vor.u32 %v8010_v45, %v7372_v15  ;;  %v8007_v51 = vld [vmem:[%s8788_s13 + $0x214] sm:$0xf]  ;;  %v7113_v15 = vor.u32 %v7941_v56, %v7110_v46  ;;  %v7981_v56 = vld [vmem:[%s8788_s13 + $0x13c] sm:$0xf0] }
 0x742   : > { %4975 = vmatpush.bf16.msrb.mxu2 %v7185_v50  ;;  %v7261_v46 = vor.u32 %v7981_v56, %v7260_v18  ;;  %v8002_v56 = vld [vmem:[%s8788_s13 + $0x1ec] sm:$0xf] }
 0x743   : > { %4385 = vadd.xlane.f32.xlu0 %v4384_v48  ;;  %v7374_v48 = vld [vmem:[%s8788_s13 + $0x228] sm:$0xf0]  ;;  %4956 = vmatpush.bf16.msrb.mxu1 %v7373_v9 }
 0x75b   : > { %v4354_v34 = vpop.xlane.xlu0 %4353 }
 0x75c   : > { %v4361_v58 = vmul.f32 %v4354_v34, %v11427_v30  ;;  %v7377_v34 = vor.u32 %v8007_v51, %v7374_v48 }
 0x75e   : > { %v10628_v11 = vsub.f32 %v10590_v31, %v4361_v58  ;;  %v10631_v62 = vsub.f32 %v10588_v16, %v4361_v58  ;;  %v7156_v58 = vld [vmem:[%s8788_s13 + $0x60] sm:$0xf]  ;;  %4994 = vmatpush.bf16.msra.mxu0 %v7377_v34 }
 0x760   : > { %v4375_v32 = vmul.f32 %v10628_v11, %v10628_v11  ;;  %v4376_v55 = vmul.f32 %v10631_v62, %v10631_v62 }
 0x762   : > { %v4387_v52 = vsel %vm775_vm4, %v4376_v55, 0.0  ;;  %v7348_v55 = vld [vmem:[%s8788_s13 + $0x1e0] sm:$0xf] }
 0x763   : > { %v4358_v40 = vpop.xlane.xlu2 %4357  ;;  %v4388_v44 = vadd.f32 %v4387_v52, %v4375_v32  ;;  %v7956_v32 = vld [vmem:[%s8788_s13 + $0x74] sm:$0xf0] }
 0x764   : > { %v4362_v0 = vmul.f32 %v4358_v40, %v11427_v30  ;;  %v7157_v52 = vor.u32 %v7956_v32, %v7156_v58  ;;  %v8004_v40 = vld [vmem:[%s8788_s13 + $0x1f4] sm:$0xf0] }
 0x765   : > { %4389 = vadd.xlane.f32.xlu2 %v4388_v44  ;;  %v7953_v44 = vld [vmem:[%s8788_s13 + $0x64] sm:$0xf] }
 0x766   : > { %v10640_v29 = vsub.f32 %v10597_v53, %v4362_v0  ;;  %v10643_v57 = vsub.f32 %v10595_v14, %v4362_v0  ;;  %v7158_v0 = vld [vmem:[%s8788_s13 + $0x78] sm:$0xf0]  ;;  %4938 = vmatpush.bf16.msrb.mxu3 %v7157_v52 }
 0x768   : > { %v4377_v20 = vmul.f32 %v10640_v29, %v10640_v29  ;;  %v4378_v22 = vmul.f32 %v10643_v57, %v10643_v57 }
 0x76a   : > { %v4391_v59 = vsel %vm775_vm4, %v4378_v22, 0.0  ;;  %v7161_v22 = vor.u32 %v7953_v44, %v7158_v0  ;;  %4939 = vmatpush.bf16.msrb.mxu3 %v7133_v60 }
 0x76b   : > { %v4392_v25 = vadd.f32 %v4391_v59, %v4377_v20  ;;  %v7349_v20 = vor.u32 %v8004_v40, %v7348_v55  ;;  %v8001_v59 = vld [vmem:[%s8788_s13 + $0x1e4] sm:$0xf]  ;;  %v4341_v40 = vld [vmem:[%s11428_s30] sm:$0x3] }
 0x76c   : > { %4976 = vmatpush.bf16.msrb.mxu2 %v7161_v22 }
 0x76d   : > { %4393 = vadd.xlane.f32.xlu1 %v4392_v25  ;;  %v7350_v25 = vld [vmem:[%s8788_s13 + $0x1f8] sm:$0xf0]  ;;  %4957 = vmatpush.bf16.msrb.mxu1 %v7349_v20  ;;  %v10705_v20 = vperm.slane %v4341_v40, 0 }
 0x76e   : > { %v7353_v28 = vor.u32 %v8001_v59, %v7350_v25  ;;  %4940 = vmatpush.bf16.msrb.mxu3 %v7109_v13  ;;  %v4342_v25 = vld [vmem:[%s712_s3] sm:$0x3] }
 0x76f   : > { %v10716_v47 = vperm.slane %v4342_v25, 0  ;;  %v10719_v60 = vperm.slane %v4342_v25, 1 }
 0x770   : > { %4995 = vmatpush.bf16.msra.mxu0 %v7353_v28  ;;  %4977 = vmatpush.bf16.msrb.mxu2 %v7137_v2  ;;  %v10713_v28 = vperm.slane %v4341_v40, 1  ;;  %v7987_v2 = vld [vmem:[%s8788_s13 + $0x16c] sm:$0xf0] }
 0x771   : > { %4958 = vmatpush.bf16.msrb.mxu1 %v7325_v24  ;;  %v7284_v24 = vld [vmem:[%s8788_s13 + $0x158] sm:$0xf] }
 0x774   : > { %4996 = vmatpush.bf16.msra.mxu0 %v7329_v10  ;;  %4978 = vmatpush.bf16.msrb.mxu2 %v7113_v15  ;;  %v7285_v10 = vor.u32 %v7987_v2, %v7284_v24  ;;  %v7236_v15 = vld [vmem:[%s8788_s13 + $0xf8] sm:$0xf]  ;;  %v7957_v2 = vld [vmem:[%s8788_s13 + $0x7c] sm:$0xf0] }
 0x775   : > { %4959 = vmatpush.bf16.msrb.mxu1 %v7301_v8  ;;  %v7978_v8 = vld [vmem:[%s8788_s13 + $0x12c] sm:$0xf] }
 0x776   : > { %5009 = vmatpush.bf16.msra.mxu3 %v7285_v10  ;;  %v7265_v27 = vor.u32 %v7978_v8, %v7262_v37  ;;  %v7358_v8 = vld [vmem:[%s8788_s13 + $0x200] sm:$0xf0] }
 0x777   : > { %v7361_v37 = vor.u32 %v8002_v56, %v7358_v8  ;;  %v7979_v56 = vld [vmem:[%s8788_s13 + $0x134] sm:$0xf]  ;;  %v7270_v8 = vld [vmem:[%s8788_s13 + $0x148] sm:$0xf0] }
 0x778   : > { %4997 = vmatpush.bf16.msra.mxu0 %v7305_v61  ;;  %v7975_v61 = vld [vmem:[%s8788_s13 + $0x10c] sm:$0xf0] }
 0x77a   : > { %5010 = vmatpush.bf16.msra.mxu3 %v7261_v46  ;;  %v7140_v46 = vld [vmem:[%s8788_s13 + $0x38] sm:$0xf] }
 0x7ae   : > { %v4382_v6 = vpop.xlane.xlu1 %4381 }
 0x7af   : > { %v4395_v39 = vmul.f32 %v4382_v6, %v11427_v30 }
 0x7b1   : > { %v4399_v35 = vadd.f32 1e-05, %v4395_v39 }
 0x7b3   : > { %8569 = vrsqrt.f32 %v4399_v35  ;;  %vm4409_vm10 = vweird.f32 %v4399_v35 }
 0x7b6   : > { %v4386_v45 = vpop.xlane.xlu0 %4385 }
 0x7b7   : > { %v4396_v7 = vmul.f32 %v4386_v45, %v11427_v30  ;;  %v7972_v45 = vld [vmem:[%s8788_s13 + $0xfc] sm:$0xf] }
 0x7b9   : > { %v8570_v1 = vpop.eup %8569  ;;  %v4400_v9 = vadd.f32 1e-05, %v4396_v7 }
 0x7ba   : > { %v4404_v50 = vmul.f32 %v8570_v1, %v4399_v35  ;;  %vm4410_vm9 = vweird.f32 %v8570_v1  ;;  %v7286_v35 = vld [vmem:[%s8788_s13 + $0x170] sm:$0xf0] }
 0x7bb   : > { %8571 = vrsqrt.f32 %v4400_v9  ;;  %vm4411_vm11 = vmor %vm4409_vm10, %vm4410_vm9  ;;  %vm4419_vm13 = vweird.f32 %v4400_v9  ;;  %v7289_v38 = vor.u32 %v7984_v26, %v7286_v35  ;;  %v7356_v26 = vld [vmem:[%s8788_s13 + $0x1e8] sm:$0xf] }
 0x7bc   : > { %v4405_v51 = vmul.f32 %v8570_v1, %v4404_v50 }
 0x7bd   : > { %5047 = vmatpush.bf16.msra.mxu2 %v7289_v38 }
 0x7be   : > { %v4406_v48 = vmul.f32 0.5, %v4405_v51 }
 0x7c0   : > { %v4407_v34 = vsub.f32 1.5, %v4406_v48 }
 0x7c1   : > { %v8572_v58 = vpop.eup %8571  ;;  %5048 = vmatpush.bf16.msra.mxu2 %v7265_v27  ;;  %v7951_v27 = vld [vmem:[%s8788_s13 + $0x4c] sm:$0xf0] }
 0x7c2   : > { %v4408_v32 = vmul.f32 %v8570_v1, %v4407_v34  ;;  %v4414_v55 = vmul.f32 %v8572_v58, %v4400_v9  ;;  %vm4420_vm12 = vweird.f32 %v8572_v58  ;;  %v7238_v9 = vld [vmem:[%s8788_s13 + $0x110] sm:$0xf0]  ;;  %v7212_v34 = vld [vmem:[%s8788_s13 + $0xc8] sm:$0xf] }
 0x7c3   : > { %vm4421_vm14 = vmor %vm4419_vm13, %vm4420_vm12  ;;  %v7241_v51 = vor.u32 %v7972_v45, %v7238_v9  ;;  %v7999_v45 = vld [vmem:[%s8788_s13 + $0x1cc] sm:$0xf0]  ;;  %v7141_v9 = vor.u32 %v7951_v27, %v7140_v46 }
 0x7c4   : > { %v4415_v52 = vmul.f32 %v8572_v58, %v4414_v55  ;;  %v4412_v44 = vsel %vm4411_vm11, %v8570_v1, %v4408_v32  ;;  %v7237_v1 = vor.u32 %v7975_v61, %v7236_v15  ;;  %v7966_v55 = vld [vmem:[%s8788_s13 + $0xcc] sm:$0xf]  ;;  %v7332_v15 = vld [vmem:[%s8788_s13 + $0x1b8] sm:$0xf] }
 0x7c5   : > { %v4443_v22 = vmul.f32 %v4412_v44, %v10604_v21  ;;  %v4444_v42 = vmul.f32 %v4412_v44, %v10607_v63  ;;  %5049 = vmatpush.bf16.msra.mxu2 %v7241_v51  ;;  %v7188_v44 = vld [vmem:[%s8788_s13 + $0x98] sm:$0xf]  ;;  %v7996_v51 = vld [vmem:[%s8788_s13 + $0x1bc] sm:$0xf] }
 0x7c6   : > { %v4416_v0 = vmul.f32 0.5, %v4415_v52  ;;  %5011 = vmatpush.bf16.msra.mxu3 %v7237_v1  ;;  %v7214_v52 = vld [vmem:[%s8788_s13 + $0xe0] sm:$0xf0]  ;;  %v7142_v1 = vld [vmem:[%s8788_s13 + $0x50] sm:$0xf0] }
 0x7c7   : > { %v4456_v21 = vmul.f32 %v10705_v20, %v4443_v22  ;;  %v4457_v49 = vmul.f32 %v10713_v28, %v4444_v42  ;;  %v7217_v40 = vor.u32 %v7966_v55, %v7214_v52  ;;  %v7380_v22 = vld [vmem:[%s8788_s13 + $0x218] sm:$0xf]  ;;  %v8011_v42 = vld [vmem:[%s8788_s13 + $0x22c] sm:$0xf0] }
 0x7c8   : > { %v4417_v59 = vsub.f32 1.5, %v4416_v0  ;;  %v7963_v0 = vld [vmem:[%s8788_s13 + $0xac] sm:$0xf0] }
 0x7c9   : > { %v4469_v4 = vadd.f32 %v10716_v47, %v4456_v21  ;;  %v4470_v3 = vadd.f32 %v10719_v60, %v4457_v49  ;;  %5050 = vmatpush.bf16.msra.mxu2 %v7217_v40  ;;  %v7189_v25 = vor.u32 %v7963_v0, %v7188_v44  ;;  %v7190_v21 = vld [vmem:[%s8788_s13 + $0xb0] sm:$0xf0]  ;;  %v7381_v49 = vor.u32 %v8011_v42, %v7380_v22  ;;  %v7945_v40 = vld [vmem:[%s8788_s13 + $0x1c] sm:$0xf0]  ;;  %v7308_v44 = vld [vmem:[%s8788_s13 + $0x188] sm:$0xf] }
 0x7ca   : > { %v4418_v17 = vmul.f32 %v8572_v58, %v4417_v59  ;;  %v7993_v0 = vld [vmem:[%s8788_s13 + $0x19c] sm:$0xf0]  ;;  %v7942_v22 = vld [vmem:[%s8788_s13 + $0xc] sm:$0xf] }
 0x7cb   : > { %5032 = vmatpush.bf16.msra.mxu1 %v7381_v49  ;;  %v7990_v42 = vld [vmem:[%s8788_s13 + $0x18c] sm:$0xf]  ;;  %v7309_v49 = vor.u32 %v7993_v0, %v7308_v44  ;;  %v7967_v0 = vld [vmem:[%s8788_s13 + $0xd4] sm:$0xf] }
 0x7cc   : > { %v4422_v6 = vsel %vm4421_vm14, %v8572_v58, %v4418_v17  ;;  %v7969_v58 = vld [vmem:[%s8788_s13 + $0xdc] sm:$0xf0]  ;;  %v7960_v17 = vld [vmem:[%s8788_s13 + $0x9c] sm:$0xf] }
 0x7cd   : > { %v4445_v12 = vmul.f32 %v4422_v6, %v10616_v5  ;;  %v4446_v36 = vmul.f32 %v4422_v6, %v10619_v54  ;;  %v7213_v32 = vor.u32 %v7969_v58, %v7212_v34  ;;  %v7334_v34 = vld [vmem:[%s8788_s13 + $0x1d0] sm:$0xf0]  ;;  %v7116_v58 = vld [vmem:[%s8788_s13 + $0x8] sm:$0xf] }
 0x7ce   : > { %v7337_v52 = vor.u32 %v7996_v51, %v7334_v34 }
 0x7cf   : > { %v4458_v39 = vmul.f32 %v10705_v20, %v4445_v12  ;;  %v4459_v63 = vmul.f32 %v10713_v28, %v4446_v36  ;;  %5012 = vmatpush.bf16.msra.mxu3 %v7213_v32  ;;  %v7193_v12 = vor.u32 %v7960_v17, %v7190_v21  ;;  %v8008_v36 = vld [vmem:[%s8788_s13 + $0x21c] sm:$0xf]  ;;  %v7310_v17 = vld [vmem:[%s8788_s13 + $0x1a0] sm:$0xf0] }
 0x7d1   : > { %v4471_v5 = vadd.f32 %v10716_v47, %v4458_v39  ;;  %v4472_v54 = vadd.f32 %v10719_v60, %v4459_v63  ;;  %v7382_v39 = vld [vmem:[%s8788_s13 + $0x230] sm:$0xf0]  ;;  %v7164_v63 = vld [vmem:[%s8788_s13 + $0x68] sm:$0xf]  ;;  %5051 = vmatpush.bf16.msra.mxu2 %v7193_v12 }
 0x7d2   : > { %v7385_v24 = vor.u32 %v8008_v36, %v7382_v39 }
 0x7d3   : > { %v10734_v13 = vpack.c.bf16 %v4471_v5, %v4469_v4  ;;  %v10736_v43 = vpack.c.bf16 %v4472_v54, %v4470_v3  ;;  %v8005_v4 = vld [vmem:[%s8788_s13 + $0x1fc] sm:$0xf0]  ;;  %5013 = vmatpush.bf16.msra.mxu3 %v7189_v25  ;;  %v7954_v5 = vld [vmem:[%s8788_s13 + $0x6c] sm:$0xf]  ;;  %v7166_v54 = vld [vmem:[%s8788_s13 + $0x80] sm:$0xf0] }
 0x7d4   : > { %v7357_v3 = vor.u32 %v8005_v4, %v7356_v26  ;;  %5070 = vmatpush.bf16.msrb.mxu0 %v7385_v24  ;;  %v7169_v18 = vor.u32 %v7954_v5, %v7166_v54  ;;  %v7292_v26 = vld [vmem:[%s8788_s13 + $0x160] sm:$0xf]  ;;  %v7988_v4 = vld [vmem:[%s8788_s13 + $0x174] sm:$0xf0]  ;;  %v7294_v54 = vld [vmem:[%s8788_s13 + $0x178] sm:$0xf0] }
 0x7d5   : > { %4941 = vmatmul.bf16.vlgmr.msrb.gmra.mxu3 %v10734_v13  ;;  %7394 = vmatmul.msk.bf16.vlgmr.msrb.gmra.mxu1 %vm775_vm4, %v10736_v43  ;;  %v7293_v5 = vor.u32 %v7988_v4, %v7292_v26  ;;  %v7958_v4 = vld [vmem:[%s8788_s13 + $0x84] sm:$0xf0] }
 0x7d6   : > { %4979 = vmatmul.bf16.vlgmr.msrb.gmra.mxu2 %v10734_v13  ;;  %7396 = vmatmul.msk.bf16.vlgmr.msra.gmra.mxu0 %vm775_vm4, %v10736_v43 }
 0x7d7   : > { %5033 = vmatpush.bf16.msra.mxu1 %v7357_v3  ;;  %5052 = vmatpush.bf16.msra.mxu2 %v7169_v18  ;;  %v7982_v18 = vld [vmem:[%s8788_s13 + $0x144] sm:$0xf0] }
 0x7d8   : > { %v4390_v7 = vpop.xlane.xlu2 %4389  ;;  %5071 = vmatpush.bf16.msrb.mxu0 %v7361_v37 }
 0x7d9   : > { %v4397_v50 = vmul.f32 %v4390_v7, %v11427_v30  ;;  %v7948_v7 = vld [vmem:[%s8788_s13 + $0x3c] sm:$0xf] }
 0x7da   : > { %v7145_v55 = vor.u32 %v7948_v7, %v7142_v1  ;;  %v7973_v1 = vld [vmem:[%s8788_s13 + $0x104] sm:$0xf] }
 0x7db   : > { %v10753_v48 = vadd.f32 1e-05, %v4397_v50  ;;  %v7333_v50 = vor.u32 %v7999_v45, %v7332_v15  ;;  %v7273_v15 = vor.u32 %v7979_v56, %v7270_v8  ;;  %v7976_v45 = vld [vmem:[%s8788_s13 + $0x114] sm:$0xf0]  ;;  %v7366_v56 = vld [vmem:[%s8788_s13 + $0x208] sm:$0xf0] }
 0x7dc   : > { %5053 = vmatpush.bf16.msra.mxu2 %v7145_v55  ;;  %5072 = vmatpush.bf16.msrb.mxu0 %v7337_v52  ;;  %v7220_v55 = vld [vmem:[%s8788_s13 + $0xd0] sm:$0xf]  ;;  %v7148_v8 = vld [vmem:[%s8788_s13 + $0x40] sm:$0xf] }
 0x7dd   : > { %8573 = vrsqrt.f32 %v10753_v48  ;;  %5034 = vmatpush.bf16.msra.mxu1 %v7333_v50  ;;  %vm4429_vm0 = vweird.f32 %v10753_v48 }
 0x7e0   : > { %v4394_v59 = vpop.xlane.xlu1 %4393 }
 0x7e1   : > { %v4398_v6 = vmul.f32 %v4394_v59, %v11427_v30  ;;  %v7165_v30 = vor.u32 %v7957_v2, %v7164_v63  ;;  %v7118_v59 = vld [vmem:[%s8788_s13 + $0x20] sm:$0xf0]  ;;  %v7313_v63 = vor.u32 %v7990_v42, %v7310_v17  ;;  %5035 = vmatpush.bf16.msra.mxu1 %v7309_v49  ;;  %v7964_v17 = vld [vmem:[%s8788_s13 + $0xb4] sm:$0xf0] }
 0x7e2   : > { %v7121_v12 = vor.u32 %v7942_v22, %v7118_v59  ;;  %v7222_v22 = vld [vmem:[%s8788_s13 + $0xe8] sm:$0xf0]  ;;  %v7961_v49 = vld [vmem:[%s8788_s13 + $0xa4] sm:$0xf] }
 0x7e3   : > { %v8574_v10 = vpop.eup %8573  ;;  %v10773_v35 = vadd.f32 1e-05, %v4398_v6  ;;  %5014 = vmatpush.bf16.msra.mxu3 %v7165_v30  ;;  %v7117_v6 = vor.u32 %v7945_v40, %v7116_v58  ;;  %v7985_v30 = vld [vmem:[%s8788_s13 + $0x164] sm:$0xf]  ;;  %5073 = vmatpush.bf16.msrb.mxu0 %v7313_v63  ;;  %v7225_v42 = vor.u32 %v7967_v0, %v7222_v22 }
 0x7e4   : > { %v4424_v38 = vmul.f32 %v8574_v10, %v10753_v48  ;;  %vm4430_vm15 = vweird.f32 %v8574_v10  ;;  %5054 = vmatpush.bf16.msra.mxu2 %v7121_v12  ;;  %v7297_v48 = vor.u32 %v7985_v30, %v7294_v54  ;;  %v7198_v12 = vld [vmem:[%s8788_s13 + $0xb8] sm:$0xf0]  ;;  %v8009_v63 = vld [vmem:[%s8788_s13 + $0x224] sm:$0xf]  ;;  %v7364_v30 = vld [vmem:[%s8788_s13 + $0x1f0] sm:$0xf] }
 0x7e5   : > { %8575 = vrsqrt.f32 %v10773_v35  ;;  %vm4431_vm1 = vmor %vm4429_vm0, %vm4430_vm15  ;;  %vm4439_vm3 = vweird.f32 %v10773_v35 }
 0x7e6   : > { %v4425_v61 = vmul.f32 %v8574_v10, %v4424_v38  ;;  %v7268_v38 = vld [vmem:[%s8788_s13 + $0x130] sm:$0xf] }
 0x7e7   : > { %5015 = vmatpush.bf16.msra.mxu3 %v7141_v9  ;;  %v7269_v37 = vor.u32 %v7982_v18, %v7268_v38  ;;  %v7246_v9 = vld [vmem:[%s8788_s13 + $0x118] sm:$0xf0]  ;;  %v7955_v38 = vld [vmem:[%s8788_s13 + $0x74] sm:$0xf] }
 0x7e8   : > { %v4426_v32 = vmul.f32 0.5, %v4425_v61  ;;  %5123 = vmatpush.bf16.msrb.mxu2 %v7297_v48  ;;  %v7244_v61 = vld [vmem:[%s8788_s13 + $0x100] sm:$0xf]  ;;  %v7174_v48 = vld [vmem:[%s8788_s13 + $0x88] sm:$0xf0] }
 0x7e9   : > { %v7245_v51 = vor.u32 %v7976_v45, %v7244_v61  ;;  %v8003_v18 = vld [vmem:[%s8788_s13 + $0x1f4] sm:$0xf]  ;;  %v7949_v61 = vld [vmem:[%s8788_s13 + $0x44] sm:$0xf] }
 0x7ea   : > { %v4427_v25 = vsub.f32 1.5, %v4426_v32  ;;  %v7249_v32 = vor.u32 %v7973_v1, %v7246_v9  ;;  %v7997_v1 = vld [vmem:[%s8788_s13 + $0x1c4] sm:$0xf]  ;;  %v7342_v9 = vld [vmem:[%s8788_s13 + $0x1d8] sm:$0xf0] }
 0x7eb   : > { %v8576_v21 = vpop.eup %8575  ;;  %5016 = vmatpush.bf16.msra.mxu3 %v7117_v6  ;;  %v8012_v6 = vld [vmem:[%s8788_s13 + $0x234] sm:$0xf0] }
 0x7ec   : > { %v4428_v36 = vmul.f32 %v8574_v10, %v4427_v25  ;;  %v4434_v39 = vmul.f32 %v8576_v21, %v10773_v35  ;;  %vm4440_vm2 = vweird.f32 %v8576_v21  ;;  %5124 = vmatpush.bf16.msrb.mxu2 %v7273_v15  ;;  %v7970_v35 = vld [vmem:[%s8788_s13 + $0xe4] sm:$0xf0]  ;;  %v8000_v15 = vld [vmem:[%s8788_s13 + $0x1d4] sm:$0xf0] }
 0x7ed   : > { %vm4441_vm5 = vmor %vm4439_vm3, %vm4440_vm2  ;;  %v7221_v44 = vor.u32 %v7970_v35, %v7220_v55  ;;  %v7994_v55 = vld [vmem:[%s8788_s13 + $0x1a4] sm:$0xf0]  ;;  %v7943_v35 = vld [vmem:[%s8788_s13 + $0x14] sm:$0xf] }
 0x7ee   : > { %v4435_v24 = vmul.f32 %v8576_v21, %v4434_v39  ;;  %v4432_v2 = vsel %vm4431_vm1, %v8574_v10, %v4428_v36  ;;  %v7201_v39 = vor.u32 %v7961_v49, %v7198_v12  ;;  %v8042_v49 = vld [vmem:[%s8802_s18 + $0xe4] sm:$0xf0] }
 0x7ef   : > { %v4447_v10 = vmul.f32 %v4432_v2, %v10628_v11  ;;  %5085 = vmatpush.bf16.msrb.mxu3 %v7293_v5  ;;  %v4448_v27 = vmul.f32 %v4432_v2, %v10631_v62  ;;  %v7172_v2 = vld [vmem:[%s8788_s13 + $0x70] sm:$0xf] }
 0x7f0   : > { %v4436_v3 = vmul.f32 0.5, %v4435_v24  ;;  %5125 = vmatpush.bf16.msrb.mxu2 %v7249_v32  ;;  %v7390_v24 = vld [vmem:[%s8788_s13 + $0x238] sm:$0xf0]  ;;  %v7173_v5 = vor.u32 %v7958_v4, %v7172_v2 }
 0x7f1   : > { %v4460_v11 = vmul.f32 %v10705_v20, %v4447_v10  ;;  %v4461_v62 = vmul.f32 %v10713_v28, %v4448_v27  ;;  %v7393_v26 = vor.u32 %v8009_v63, %v7390_v24  ;;  %v7952_v10 = vld [vmem:[%s8788_s13 + $0x54] sm:$0xf0]  ;;  %v7340_v27 = vld [vmem:[%s8788_s13 + $0x1c0] sm:$0xf]  ;;  %v7512_v24 = vld [vmem:[%s8802_s18 + $0xd0] sm:$0xf] }
 0x7f2   : > { %v4437_v46 = vsub.f32 1.5, %v4436_v3  ;;  %v8006_v3 = vld [vmem:[%s8788_s13 + $0x204] sm:$0xf0]  ;;  %v7149_v45 = vor.u32 %v7952_v10, %v7148_v8  ;;  %v8024_v63 = vld [vmem:[%s8802_s18 + $0x54] sm:$0xf0] }
 0x7f3   : > { %5086 = vmatpush.bf16.msrb.mxu3 %v7269_v37  ;;  %v4473_v59 = vadd.f32 %v10716_v47, %v4460_v11  ;;  %v7365_v54 = vor.u32 %v8006_v3, %v7364_v30  ;;  %5146 = vmatpush.bf16.msra.mxu0 %v7393_v26  ;;  %v7369_v37 = vor.u32 %v8003_v18, %v7366_v56  ;;  %v8040_v26 = vld [vmem:[%s8802_s18 + $0xd4] sm:$0xf0]  ;;  %v7440_v30 = vld [vmem:[%s8802_s18 + $0x40] sm:$0xf]  ;;  %v8022_v3 = vld [vmem:[%s8802_s18 + $0x44] sm:$0xf0] }
 0x7f4   : > { %v4438_v7 = vmul.f32 %v8576_v21, %v4437_v46  ;;  %5126 = vmatpush.bf16.msrb.mxu2 %v7225_v42  ;;  %v7177_v46 = vor.u32 %v7955_v38, %v7174_v48  ;;  %v7341_v11 = vor.u32 %v8000_v15, %v7340_v27  ;;  %v7513_v4 = vor.u32 %v8040_v26, %v7512_v24  ;;  %v7432_v38 = vld [vmem:[%s8802_s18 + $0x30] sm:$0xf]  ;;  %v8020_v48 = vld [vmem:[%s8802_s18 + $0x34] sm:$0xf0]  ;;  %v7488_v27 = vld [vmem:[%s8802_s18 + $0xa0] sm:$0xf] }
 0x7f5   : > { %v7433_v18 = vor.u32 %v8020_v48, %v7432_v38  ;;  %v7496_v56 = vld [vmem:[%s8802_s18 + $0xb0] sm:$0xf]  ;;  %v8036_v8 = vld [vmem:[%s8802_s18 + $0xb4] sm:$0xf0]  ;;  %v7648_v38 = vld [vmem:[%s8802_s18 + $0x1e0] sm:$0xf] }
 0x7f6   : > { %v4442_v50 = vsel %vm4441_vm5, %v8576_v21, %v4438_v7  ;;  %v7150_v7 = vld [vmem:[%s8788_s13 + $0x58] sm:$0xf0]  ;;  %v7497_v10 = vor.u32 %v8036_v8, %v7496_v56  ;;  %v8074_v56 = vld [vmem:[%s8802_s18 + $0x1e4] sm:$0xf0] }
 0x7f7   : > { %v4449_v34 = vmul.f32 %v4442_v50, %v10640_v29  ;;  %v4450_v58 = vmul.f32 %v4442_v50, %v10643_v57  ;;  %5087 = vmatpush.bf16.msrb.mxu3 %v7245_v51  ;;  %v4474_v29 = vadd.f32 %v10719_v60, %v4461_v62  ;;  %v7124_v50 = vld [vmem:[%s8788_s13 + $0x10] sm:$0xf]  ;;  %v7946_v51 = vld [vmem:[%s8788_s13 + $0x24] sm:$0xf0]  ;;  %5147 = vmatpush.bf16.msra.mxu0 %v7369_v37 }
 0x7f8   : > { %5127 = vmatpush.bf16.msrb.mxu2 %v7201_v39  ;;  %v7345_v62 = vor.u32 %v7997_v1, %v7342_v9  ;;  %v7125_v32 = vor.u32 %v7946_v51, %v7124_v50  ;;  %v7448_v39 = vld [vmem:[%s8802_s18 + $0x50] sm:$0xf]  ;;  %v8018_v37 = vld [vmem:[%s8802_s18 + $0x24] sm:$0xf0]  ;;  %v8016_v1 = vld [vmem:[%s8802_s18 + $0x14] sm:$0xf0]  ;;  %v7649_v8 = vor.u32 %v8074_v56, %v7648_v38 }
 0x7f9   : > { %v4462_v52 = vmul.f32 %v10705_v20, %v4449_v34  ;;  %v4463_v40 = vmul.f32 %v10713_v28, %v4450_v58  ;;  %v7153_v34 = vor.u32 %v7949_v61, %v7150_v7  ;;  %v7316_v58 = vld [vmem:[%s8788_s13 + $0x190] sm:$0xf]  ;;  %v7449_v2 = vor.u32 %v8024_v63, %v7448_v39  ;;  %v8034_v61 = vld [vmem:[%s8802_s18 + $0xa4] sm:$0xf0]  ;;  %v8032_v50 = vld [vmem:[%s8802_s18 + $0x94] sm:$0xf0] }
 0x7fa   : > { %v7317_v0 = vor.u32 %v7994_v55, %v7316_v58  ;;  %v7416_v7 = vld [vmem:[%s8802_s18 + $0x10] sm:$0xf]  ;;  %v7472_v58 = vld [vmem:[%s8802_s18 + $0x80] sm:$0xf]  ;;  %v7466_v38 = vld [vmem:[%s8802_s18 + $0x78] sm:$0xf0] }
 0x7fb   : > { %v4475_v57 = vadd.f32 %v10716_v47, %v4462_v52  ;;  %v4476_v25 = vadd.f32 %v10719_v60, %v4463_v40  ;;  %5088 = vmatpush.bf16.msrb.mxu3 %v7221_v44  ;;  %v7196_v47 = vld [vmem:[%s8788_s13 + $0xa0] sm:$0xf]  ;;  %v7126_v52 = vld [vmem:[%s8788_s13 + $0x28] sm:$0xf0]  ;;  %v7991_v40 = vld [vmem:[%s8788_s13 + $0x194] sm:$0xf]  ;;  %5148 = vmatpush.bf16.msra.mxu0 %v7345_v62 }
 0x7fc   : > { %v7388_v60 = vld [vmem:[%s8788_s13 + $0x220] sm:$0xf]  ;;  %v7197_v21 = vor.u32 %v7964_v17, %v7196_v47  ;;  %5128 = vmatpush.bf16.msrb.mxu2 %v7177_v46  ;;  %v7318_v44 = vld [vmem:[%s8788_s13 + $0x1a8] sm:$0xf0]  ;;  %v7129_v22 = vor.u32 %v7943_v35, %v7126_v52  ;;  %v8044_v47 = vld [vmem:[%s8802_s18 + $0xf4] sm:$0xf0] }
 0x7fd   : > { %v10828_v20 = vpack.c.bf16 %v4475_v57, %v4473_v59  ;;  %v10830_v28 = vpack.c.bf16 %v4476_v25, %v4474_v29  ;;  %v7389_v36 = vor.u32 %v8012_v6, %v7388_v60  ;;  %v7321_v59 = vor.u32 %v7991_v40, %v7318_v44  ;;  %v7464_v29 = vld [vmem:[%s8802_s18 + $0x70] sm:$0xf]  ;;  %v8028_v57 = vld [vmem:[%s8802_s18 + $0x74] sm:$0xf0]  ;;  %v7456_v17 = vld [vmem:[%s8802_s18 + $0x60] sm:$0xf] }
 0x7fe   : > { %v7528_v25 = vld [vmem:[%s8802_s18 + $0xf0] sm:$0xf]  ;;  %v7465_v42 = vor.u32 %v8028_v57, %v7464_v29  ;;  %v8026_v60 = vld [vmem:[%s8802_s18 + $0x64] sm:$0xf0]  ;;  %v7520_v6 = vld [vmem:[%s8802_s18 + $0xe0] sm:$0xf] }
 0x7ff   : > { %4946 = vmatmul.bf16.gmra.mxu3 %v10828_v20  ;;  %7395 = vmatmul.msk.bf16.gmra.mxu1 %vm775_vm4, %v10830_v28  ;;  %v7457_v12 = vor.u32 %v8026_v60, %v7456_v17  ;;  %v7424_v46 = vld [vmem:[%s8802_s18 + $0x20] sm:$0xf]  ;;  %v7480_v9 = vld [vmem:[%s8802_s18 + $0x90] sm:$0xf]  ;;  %s11429_s13 = sld [smem:[#allocation8_spill]] }
 0x800   : > { %4984 = vmatmul.bf16.gmra.mxu2 %v10828_v20  ;;  %7397 = vmatmul.msk.bf16.gmra.mxu0 %vm775_vm4, %v10830_v28  ;;  %v7425_v15 = vor.u32 %v8018_v37, %v7424_v46  ;;  %v7481_v51 = vor.u32 %v8032_v50, %v7480_v9  ;;  %v7408_v62 = vld [vmem:[%s8802_s18] sm:$0xf]  ;;  %v7656_v39 = vld [vmem:[%s8802_s18 + $0x1f0] sm:$0xf]  ;;  %v8056_v46 = vld [vmem:[%s8802_s18 + $0x154] sm:$0xf0] }
 0x801   : > { %5089 = vmatpush.bf16.msrb.mxu3 %v7197_v21  ;;  %5108 = vmatpush.bf16.msrb.mxu1 %v7389_v36  ;;  %v7529_v21 = vor.u32 %v8044_v47, %v7528_v25  ;;  %v7521_v36 = vor.u32 %v8042_v49, %v7520_v6  ;;  %v7640_v37 = vld [vmem:[%s8802_s18 + $0x1d0] sm:$0xf] }
 0x802   : > { %5129 = vmatpush.bf16.msrb.mxu2 %v7153_v34  ;;  %5149 = vmatpush.bf16.msra.mxu0 %v7321_v59  ;;  %v8014_v34 = vld [vmem:[%s8802_s18 + $0x4] sm:$0xf0] }
 0x805   : > { %5090 = vmatpush.bf16.msrb.mxu3 %v7173_v5  ;;  %5109 = vmatpush.bf16.msrb.mxu1 %v7365_v54  ;;  %v7504_v5 = vld [vmem:[%s8802_s18 + $0xc0] sm:$0xf]  ;;  %v8038_v54 = vld [vmem:[%s8802_s18 + $0xc4] sm:$0xf0]  ;;  %p7790_p5 = scmp.ne.s32.totalorder %s11429_s13, 11 }
 0x806   : > { %5130 = vmatpush.bf16.msrb.mxu2 %v7129_v22  ;;  %s11432_s15 = sld [smem:[#allocation31_spill]] (!%p7790_p5) }
 0x807   : > { %s11433_s29 = sld [smem:[#allocation32_spill]] (!%p7790_p5) }
 0x808   : > { %s11434_s25 = sld [smem:[#allocation34_spill]] (!%p7790_p5) }
 0x809   : > { %5091 = vmatpush.bf16.msrb.mxu3 %v7149_v45  ;;  %5110 = vmatpush.bf16.msrb.mxu1 %v7341_v11  ;;  %v7489_v45 = vor.u32 %v8034_v61, %v7488_v27  ;;  %v7417_v11 = vor.u32 %v8016_v1, %v7416_v7  ;;  %v8054_v7 = vld [vmem:[%s8802_s18 + $0x144] sm:$0xf0]  ;;  %v7632_v1 = vld [vmem:[%s8802_s18 + $0x1c0] sm:$0xf] }
 0x80d   : > { %5092 = vmatpush.bf16.msrb.mxu3 %v7125_v32  ;;  %5111 = vmatpush.bf16.msrb.mxu1 %v7317_v0  ;;  %v7409_v32 = vor.u32 %v8014_v34, %v7408_v62  ;;  %v8052_v62 = vld [vmem:[%s8802_s18 + $0x134] sm:$0xf0] }
 0x80f   : > { %5017 = vmatmul.bf16.vlgmr.msra.gmra.mxu3 %v10734_v13  ;;  %7398 = vmatmul.msk.bf16.vlgmr.msra.gmra.mxu1 %vm775_vm4, %v10736_v43 }
 0x810   : > { %5055 = vmatmul.bf16.vlgmr.msra.gmra.mxu2 %v10734_v13  ;;  %7400 = vmatmul.msk.bf16.vlgmr.msrb.gmra.mxu0 %vm775_vm4, %v10736_v43 }
 0x811   : > { %5779 = vmatpush.bf16.msra.mxu3 %v7465_v42  ;;  %5798 = vmatpush.bf16.msra.mxu1 %v7529_v21 }
 0x815   : > { %5780 = vmatpush.bf16.msra.mxu3 %v7457_v12  ;;  %5799 = vmatpush.bf16.msra.mxu1 %v7521_v36  ;;  %v7592_v12 = vld [vmem:[%s8802_s18 + $0x170] sm:$0xf]  ;;  %v8060_v36 = vld [vmem:[%s8802_s18 + $0x174] sm:$0xf0] }
 0x816   : > { %v7593_v24 = vor.u32 %v8060_v36, %v7592_v12  ;;  %v7600_v12 = vld [vmem:[%s8802_s18 + $0x180] sm:$0xf] }
 0x818   : > { %5817 = vmatpush.bf16.msra.mxu2 %v7593_v24 }
 0x819   : > { %5781 = vmatpush.bf16.msra.mxu3 %v7449_v2  ;;  %5800 = vmatpush.bf16.msra.mxu1 %v7513_v4  ;;  %v8076_v2 = vld [vmem:[%s8802_s18 + $0x1f4] sm:$0xf0] }
 0x81f   : > { %5022 = vmatmul.bf16.gmra.mxu3 %v10828_v20  ;;  %7399 = vmatmul.msk.bf16.gmra.mxu1 %vm775_vm4, %v10830_v28 }
 0x820   : > { %5060 = vmatmul.bf16.gmra.mxu2 %v10828_v20  ;;  %7401 = vmatmul.msk.bf16.gmra.mxu0 %vm775_vm4, %v10830_v28 }
 0x82f   : > { %5093 = vmatmul.bf16.vlgmr.msrb.gmra.mxu3 %v10734_v13  ;;  %7402 = vmatmul.msk.bf16.vlgmr.msrb.gmra.mxu1 %vm775_vm4, %v10736_v43 }
 0x830   : > { %5131 = vmatmul.bf16.vlgmr.msrb.gmra.mxu2 %v10734_v13  ;;  %7404 = vmatmul.msk.bf16.vlgmr.msra.gmra.mxu0 %vm775_vm4, %v10736_v43  ;;  %v7441_v13 = vor.u32 %v8022_v3, %v7440_v30  ;;  %v7505_v43 = vor.u32 %v8038_v54, %v7504_v5  ;;  %v7657_v30 = vor.u32 %v8076_v2, %v7656_v39  ;;  %v7584_v54 = vld [vmem:[%s8802_s18 + $0x160] sm:$0xf]  ;;  %v8062_v39 = vld [vmem:[%s8802_s18 + $0x184] sm:$0xf0] }
 0x832   : > { %5782 = vmatpush.bf16.msra.mxu3 %v7441_v13  ;;  %5801 = vmatpush.bf16.msra.mxu1 %v7505_v43  ;;  %v8058_v43 = vld [vmem:[%s8802_s18 + $0x164] sm:$0xf0] }
 0x833   : > { %5836 = vmatpush.bf16.msrb.mxu0 %v7657_v30  ;;  %v7784_v30 = vld [vmem:[%s8802_s18 + $0x2f0] sm:$0xf] }
 0x836   : > { %5783 = vmatpush.bf16.msra.mxu3 %v7433_v18  ;;  %5802 = vmatpush.bf16.msra.mxu1 %v7497_v10  ;;  %v7585_v18 = vor.u32 %v8058_v43, %v7584_v54  ;;  %v7576_v10 = vld [vmem:[%s8802_s18 + $0x150] sm:$0xf]  ;;  %v8108_v54 = vld [vmem:[%s8802_s18 + $0x2f4] sm:$0xf0]  ;;  %v8027_v43 = vld [vmem:[%s8802_s18 + $0x74] sm:$0xf] }
 0x837   : > { %5837 = vmatpush.bf16.msrb.mxu0 %v7649_v8  ;;  %v7577_v27 = vor.u32 %v8056_v46, %v7576_v10  ;;  %v7785_v56 = vor.u32 %v8108_v54, %v7784_v30  ;;  %v7469_v8 = vor.u32 %v8027_v43, %v7466_v38  ;;  %v8043_v10 = vld [vmem:[%s8802_s18 + $0xf4] sm:$0xf]  ;;  %v7530_v46 = vld [vmem:[%s8802_s18 + $0xf8] sm:$0xf0]  ;;  %v8102_v54 = vld [vmem:[%s8802_s18 + $0x2c4] sm:$0xf0] }
 0x838   : > { %5818 = vmatpush.bf16.msra.mxu2 %v7585_v18 }
 0x83a   : > { %5784 = vmatpush.bf16.msra.mxu3 %v7425_v15  ;;  %5803 = vmatpush.bf16.msra.mxu1 %v7489_v45  ;;  %v8072_v15 = vld [vmem:[%s8802_s18 + $0x1d4] sm:$0xf0]  ;;  %v7568_v45 = vld [vmem:[%s8802_s18 + $0x140] sm:$0xf] }
 0x83b   : > { %v7641_v61 = vor.u32 %v8072_v15, %v7640_v37  ;;  %v7569_v9 = vor.u32 %v8054_v7, %v7568_v45  ;;  %v7533_v37 = vor.u32 %v8043_v10, %v7530_v46  ;;  %v7712_v15 = vld [vmem:[%s8802_s18 + $0x260] sm:$0xf] }
 0x83c   : > { %5819 = vmatpush.bf16.msra.mxu2 %v7577_v27 }
 0x83d   : > { %5838 = vmatpush.bf16.msrb.mxu0 %v7641_v61  ;;  %v8090_v61 = vld [vmem:[%s8802_s18 + $0x264] sm:$0xf0] }
 0x83e   : > { %5785 = vmatpush.bf16.msra.mxu3 %v7417_v11  ;;  %5804 = vmatpush.bf16.msra.mxu1 %v7481_v51  ;;  %v8070_v11 = vld [vmem:[%s8802_s18 + $0x1c4] sm:$0xf0]  ;;  %v7560_v51 = vld [vmem:[%s8802_s18 + $0x130] sm:$0xf]  ;;  %v7713_v7 = vor.u32 %v8090_v61, %v7712_v15 }
 0x83f   : > { %5098 = vmatmul.bf16.gmra.mxu3 %v10828_v20  ;;  %7403 = vmatmul.msk.bf16.gmra.mxu1 %vm775_vm4, %v10830_v28  ;;  %v7633_v50 = vor.u32 %v8070_v11, %v7632_v1  ;;  %v7561_v34 = vor.u32 %v8052_v62, %v7560_v51  ;;  %v7776_v1 = vld [vmem:[%s8802_s18 + $0x2e0] sm:$0xf]  ;;  %v7458_v51 = vld [vmem:[%s8802_s18 + $0x68] sm:$0xf0]  ;;  %v8041_v62 = vld [vmem:[%s8802_s18 + $0xe4] sm:$0xf] }
 0x840   : > { %5136 = vmatmul.bf16.gmra.mxu2 %v10828_v20  ;;  %7405 = vmatmul.msk.bf16.gmra.mxu0 %vm775_vm4, %v10830_v28  ;;  %v8030_v20 = vld [vmem:[%s8802_s18 + $0x84] sm:$0xf0]  ;;  %v10927_v28 = vld [vmem:[%s8793_s4] sm:$0x3f] }
 0x841   : > { %v7473_v55 = vor.u32 %v8030_v20, %v7472_v58  ;;  %v10930_v44 = vperm.slane %v10927_v28, 0  ;;  %v10933_v22 = vperm.slane %v10927_v28, 1  ;;  %5820 = vmatpush.bf16.msra.mxu2 %v7569_v9  ;;  %5839 = vmatpush.bf16.msrb.mxu0 %v7633_v50  ;;  %v7624_v58 = vld [vmem:[%s8802_s18 + $0x1b0] sm:$0xf]  ;;  %v8106_v9 = vld [vmem:[%s8802_s18 + $0x2e4] sm:$0xf0] }
 0x842   : > { %5786 = vmatpush.bf16.msra.mxu3 %v7409_v32  ;;  %v8068_v32 = vld [vmem:[%s8802_s18 + $0x1b4] sm:$0xf0]  ;;  %v7777_v11 = vor.u32 %v8106_v9, %v7776_v1  ;;  %v8025_v50 = vld [vmem:[%s8802_s18 + $0x64] sm:$0xf]  ;;  %v11022_v15 = vperm.slane %v10927_v28, 2  ;;  %v11025_v61 = vperm.slane %v10927_v28, 3 }
 0x843   : > { %5805 = vmatpush.bf16.msra.mxu1 %v7473_v55  ;;  %v7625_v20 = vor.u32 %v8068_v32, %v7624_v58  ;;  %v7552_v55 = vld [vmem:[%s8802_s18 + $0x120] sm:$0xf]  ;;  %v7461_v58 = vor.u32 %v8025_v50, %v7458_v51  ;;  %v7522_v32 = vld [vmem:[%s8802_s18 + $0xe8] sm:$0xf0]  ;;  %v7688_v1 = vld [vmem:[%s8802_s18 + $0x230] sm:$0xf] }
 0x844   : > { %v8084_v9 = vld [vmem:[%s8802_s18 + $0x234] sm:$0xf0]  ;;  %v7752_v51 = vld [vmem:[%s8802_s18 + $0x2b0] sm:$0xf] }
 0x845   : > { %5821 = vmatpush.bf16.msra.mxu2 %v7561_v34  ;;  %5840 = vmatpush.bf16.msrb.mxu0 %v7625_v20  ;;  %v7689_v50 = vor.u32 %v8084_v9, %v7688_v1 }
 0x847   : > { %5874 = vmatpush.bf16.msrb.mxu1 %v7785_v56  ;;  %v7442_v56 = vld [vmem:[%s8802_s18 + $0x48] sm:$0xf0] }
 0x84b   : > { %5875 = vmatpush.bf16.msrb.mxu1 %v7777_v11 }
 0x852   : > { %v4961_v35 = vpop.f32.mrf.mxu1 }
 0x853   : > { %v4999_v40 = vpop.f32.mrf.mxu0 }
 0x858   : > { %v4942_v52 = vpop.f32.mrf.mxu3 }
 0x859   : > { %v4980_v0 = vpop.f32.mrf.mxu2  ;;  %v4943_v59 = vadd.f32 %v4942_v52, %v10930_v44  ;;  %v7616_v52 = vld [vmem:[%s8802_s18 + $0x1a0] sm:$0xf] }
 0x85a   : > { %v4981_v29 = vadd.f32 %v4980_v0, %v10933_v22  ;;  %v4963_v60 = vpop.f32.mrf.mxu1  ;;  %v8066_v0 = vld [vmem:[%s8802_s18 + $0x1a4] sm:$0xf0] }
 0x85b   : > { %v4962_v25 = vadd.f32 %v4961_v35, %v4943_v59  ;;  %v5001_v6 = vpop.f32.mrf.mxu0  ;;  %v8050_v35 = vld [vmem:[%s8802_s18 + $0x124] sm:$0xf0]  ;;  %v7617_v59 = vor.u32 %v8066_v0, %v7616_v52  ;;  %v7525_v52 = vor.u32 %v8041_v62, %v7522_v32  ;;  %v8088_v0 = vld [vmem:[%s8802_s18 + $0x254] sm:$0xf0] }
 0x85c   : > { %v5000_v17 = vadd.f32 %v4999_v40, %v4981_v29  ;;  %v7553_v40 = vor.u32 %v8050_v35, %v7552_v55  ;;  %v7544_v29 = vld [vmem:[%s8802_s18 + $0x110] sm:$0xf]  ;;  %v8100_v62 = vld [vmem:[%s8802_s18 + $0x2b4] sm:$0xf0] }
 0x85d   : > { %v5161_v26 = vmax.f32 %v4962_v25, 0.0  ;;  %5841 = vmatpush.bf16.msrb.mxu0 %v7617_v59  ;;  %v7608_v25 = vld [vmem:[%s8802_s18 + $0x190] sm:$0xf]  ;;  %v7753_v32 = vor.u32 %v8100_v62, %v7752_v51  ;;  %v7664_v51 = vld [vmem:[%s8802_s18 + $0x200] sm:$0xf] }
 0x85e   : > { %v5162_v3 = vmax.f32 %v5000_v17, 0.0  ;;  %5822 = vmatpush.bf16.msra.mxu2 %v7553_v40  ;;  %v8064_v17 = vld [vmem:[%s8802_s18 + $0x194] sm:$0xf0]  ;;  %v7704_v40 = vld [vmem:[%s8802_s18 + $0x250] sm:$0xf] }
 0x85f   : > { %v7768_v59 = vld [vmem:[%s8802_s18 + $0x2d0] sm:$0xf] }
 0x860   : > { %v4944_v57 = vpop.f32.mrf.mxu3 }
 0x861   : > { %v4945_v42 = vadd.f32 %v4944_v57, %v10930_v44  ;;  %v4982_v47 = vpop.f32.mrf.mxu2  ;;  %v8048_v57 = vld [vmem:[%s8802_s18 + $0x114] sm:$0xf0] }
 0x862   : > { %v4983_v21 = vadd.f32 %v4982_v47, %v10933_v22  ;;  %v7545_v47 = vor.u32 %v8048_v57, %v7544_v29 }
 0x863   : > { %v4964_v49 = vadd.f32 %v4963_v60, %v4945_v42 }
 0x864   : > { %v5002_v63 = vadd.f32 %v5001_v6, %v4983_v21  ;;  %v7609_v21 = vor.u32 %v8064_v17, %v7608_v25  ;;  %5823 = vmatpush.bf16.msra.mxu2 %v7545_v47  ;;  %v7536_v6 = vld [vmem:[%s8802_s18 + $0x100] sm:$0xf]  ;;  %v7705_v47 = vor.u32 %v8088_v0, %v7704_v40  ;;  %v8104_v17 = vld [vmem:[%s8802_s18 + $0x2d4] sm:$0xf0] }
 0x865   : > { %v5167_v4 = vmax.f32 %v4964_v49, 0.0  ;;  %v8046_v49 = vld [vmem:[%s8802_s18 + $0x104] sm:$0xf0] }
 0x866   : > { %v5168_v5 = vmax.f32 %v5002_v63, 0.0  ;;  %5842 = vmatpush.bf16.msrb.mxu0 %v7609_v21  ;;  %v7537_v36 = vor.u32 %v8046_v49, %v7536_v6  ;;  %v7601_v63 = vor.u32 %v8062_v39, %v7600_v12  ;;  %v7769_v49 = vor.u32 %v8104_v17, %v7768_v59  ;;  %v7680_v59 = vld [vmem:[%s8802_s18 + $0x220] sm:$0xf] }
 0x867   : > { %v10943_v13 = vpack.c.bf16 %v5167_v4, %v5161_v26  ;;  %v7720_v26 = vld [vmem:[%s8802_s18 + $0x270] sm:$0xf]  ;;  %v8092_v4 = vld [vmem:[%s8802_s18 + $0x274] sm:$0xf0]  ;;  %v7744_v17 = vld [vmem:[%s8802_s18 + $0x2a0] sm:$0xf] }
 0x868   : > { %v10948_v48 = vpack.c.bf16 %v5168_v5, %v5162_v3  ;;  %5824 = vmatpush.bf16.msra.mxu2 %v7537_v36  ;;  %v7721_v5 = vor.u32 %v8092_v4, %v7720_v26  ;;  %v7514_v36 = vld [vmem:[%s8802_s18 + $0xd8] sm:$0xf0]  ;;  %5876 = vmatpush.bf16.msrb.mxu1 %v7769_v49  ;;  %v8086_v26 = vld [vmem:[%s8802_s18 + $0x244] sm:$0xf0]  ;;  %v7426_v49 = vld [vmem:[%s8802_s18 + $0x28] sm:$0xf0] }
 0x869   : > { %5787 = vmatmul.bf16.vlgmr.msra.gmra.mxu3 %v10943_v13 }
 0x86a   : > { %5806 = vmatmul.bf16.vlgmr.msra.gmra.mxu1 %v10948_v48  ;;  %5843 = vmatpush.bf16.msrb.mxu0 %v7601_v63 }
 0x86b   : > { %5855 = vmatpush.bf16.msrb.mxu3 %v7721_v5  ;;  %v7760_v5 = vld [vmem:[%s8802_s18 + $0x2c0] sm:$0xf] }
 0x86c   : > { %5893 = vmatpush.bf16.msrb.mxu2 %v7469_v8  ;;  %v7761_v38 = vor.u32 %v8102_v54, %v7760_v5  ;;  %v8037_v8 = vld [vmem:[%s8802_s18 + $0xc4] sm:$0xf] }
 0x86e   : > { %5912 = vmatpush.bf16.msra.mxu0 %v7533_v37  ;;  %5877 = vmatpush.bf16.msrb.mxu1 %v7761_v38 }
 0x86f   : > { %5856 = vmatpush.bf16.msrb.mxu3 %v7713_v7 }
 0x870   : > { %5894 = vmatpush.bf16.msrb.mxu2 %v7461_v58 }
 0x872   : > { %5913 = vmatpush.bf16.msra.mxu0 %v7525_v52  ;;  %5878 = vmatpush.bf16.msrb.mxu1 %v7753_v32 }
 0x873   : > { %5857 = vmatpush.bf16.msrb.mxu3 %v7705_v47 }
 0x87c   : > { %v4966_v42 = vpop.f32.mrf.mxu1 }
 0x87d   : > { %v5004_v60 = vpop.f32.mrf.mxu0 }
 0x882   : > { %v4947_v24 = vpop.f32.mrf.mxu3 }
 0x883   : > { %v4985_v2 = vpop.f32.mrf.mxu2  ;;  %v4948_v27 = vadd.f32 %v4947_v24, %v10930_v44 }
 0x884   : > { %v4968_v3 = vpop.f32.mrf.mxu1  ;;  %v4986_v45 = vadd.f32 %v4985_v2, %v10933_v22  ;;  %v7696_v2 = vld [vmem:[%s8802_s18 + $0x240] sm:$0xf] }
 0x885   : > { %v5006_v18 = vpop.f32.mrf.mxu0  ;;  %v4967_v20 = vadd.f32 %v4966_v42, %v4948_v27  ;;  %v8023_v42 = vld [vmem:[%s8802_s18 + $0x54] sm:$0xf]  ;;  %v7506_v27 = vld [vmem:[%s8802_s18 + $0xc8] sm:$0xf0] }
 0x886   : > { %v5005_v29 = vadd.f32 %v5004_v60, %v4986_v45  ;;  %v8039_v60 = vld [vmem:[%s8802_s18 + $0xd4] sm:$0xf]  ;;  %v7509_v7 = vor.u32 %v8037_v8, %v7506_v27 }
 0x887   : > { %v7517_v39 = vor.u32 %v8039_v60, %v7514_v36  ;;  %v5173_v63 = vmax.f32 %v4967_v20, 0.0  ;;  %v7434_v20 = vld [vmem:[%s8802_s18 + $0x38] sm:$0xf0] }
 0x888   : > { %v5174_v4 = vmax.f32 %v5005_v29, 0.0  ;;  %v8082_v29 = vld [vmem:[%s8802_s18 + $0x224] sm:$0xf0] }
 0x889   : > { %5914 = vmatpush.bf16.msra.mxu0 %v7517_v39  ;;  %v7681_v47 = vor.u32 %v8082_v29, %v7680_v59 }
 0x88a   : > { %v4949_v34 = vpop.f32.mrf.mxu3 }
 0x88b   : > { %v4950_v55 = vadd.f32 %v4949_v34, %v10930_v44  ;;  %v4987_v35 = vpop.f32.mrf.mxu2  ;;  %v7450_v44 = vld [vmem:[%s8802_s18 + $0x58] sm:$0xf0]  ;;  %v8019_v34 = vld [vmem:[%s8802_s18 + $0x34] sm:$0xf] }
 0x88c   : > { %v4988_v57 = vadd.f32 %v4987_v35, %v10933_v22  ;;  %v11000_v25 = vpop.f32.mrf.mxu1  ;;  %v7453_v12 = vor.u32 %v8023_v42, %v7450_v44  ;;  %v7498_v35 = vld [vmem:[%s8802_s18 + $0xb8] sm:$0xf0]  ;;  %v7437_v52 = vor.u32 %v8019_v34, %v7434_v20  ;;  %v8098_v42 = vld [vmem:[%s8802_s18 + $0x2a4] sm:$0xf0]  ;;  %v7728_v20 = vld [vmem:[%s8802_s18 + $0x280] sm:$0xf] }
 0x88d   : > { %v4969_v21 = vadd.f32 %v4968_v3, %v4950_v55  ;;  %v11005_v6 = vpop.f32.mrf.mxu0  ;;  %v7697_v3 = vor.u32 %v8086_v26, %v7696_v2  ;;  %5915 = vmatpush.bf16.msra.mxu0 %v7509_v7  ;;  %v8035_v55 = vld [vmem:[%s8802_s18 + $0xb4] sm:$0xf]  ;;  %v7745_v44 = vor.u32 %v8098_v42, %v7744_v17  ;;  %v7672_v26 = vld [vmem:[%s8802_s18 + $0x210] sm:$0xf] }
 0x88e   : > { %v5007_v22 = vadd.f32 %v5006_v18, %v4988_v57  ;;  %5895 = vmatpush.bf16.msrb.mxu2 %v7453_v12  ;;  %v8021_v18 = vld [vmem:[%s8802_s18 + $0x44] sm:$0xf]  ;;  %v7501_v40 = vor.u32 %v8035_v55, %v7498_v35  ;;  %v8094_v55 = vld [vmem:[%s8802_s18 + $0x284] sm:$0xf0] }
 0x88f   : > { %v5179_v24 = vmax.f32 %v4969_v21, 0.0  ;;  %5858 = vmatpush.bf16.msrb.mxu3 %v7697_v3  ;;  %v7445_v37 = vor.u32 %v8021_v18, %v7442_v56  ;;  %v8017_v21 = vld [vmem:[%s8802_s18 + $0x24] sm:$0xf]  ;;  %5879 = vmatpush.bf16.msrb.mxu1 %v7745_v44  ;;  %v8096_v18 = vld [vmem:[%s8802_s18 + $0x294] sm:$0xf0] }
 0x890   : > { %v5180_v30 = vmax.f32 %v5007_v22, 0.0  ;;  %v8033_v12 = vld [vmem:[%s8802_s18 + $0xa4] sm:$0xf]  ;;  %v7429_v36 = vor.u32 %v8017_v21, %v7426_v49  ;;  %v7490_v22 = vld [vmem:[%s8802_s18 + $0xa8] sm:$0xf0] }
 0x891   : > { %v11013_v43 = vpack.c.bf16 %v5179_v24, %v5173_v63  ;;  %5916 = vmatpush.bf16.msra.mxu0 %v7501_v40  ;;  %v7493_v2 = vor.u32 %v8033_v12, %v7490_v22  ;;  %v7418_v56 = vld [vmem:[%s8802_s18 + $0x18] sm:$0xf0]  ;;  %v7410_v40 = vld [vmem:[%s8802_s18 + $0x8] sm:$0xf0]  ;;  %v8059_v44 = vld [vmem:[%s8802_s18 + $0x174] sm:$0xf] }
 0x892   : > { %v5018_v10 = vpop.f32.mrf.mxu3  ;;  %v11018_v46 = vpack.c.bf16 %v5180_v30, %v5174_v4  ;;  %5896 = vmatpush.bf16.msrb.mxu2 %v7445_v37  ;;  %v8080_v4 = vld [vmem:[%s8802_s18 + $0x214] sm:$0xf0]  ;;  %v7736_v30 = vld [vmem:[%s8802_s18 + $0x290] sm:$0xf]  ;;  %v7594_v21 = vld [vmem:[%s8802_s18 + $0x178] sm:$0xf0] }
 0x893   : > { %v5056_v45 = vpop.f32.mrf.mxu2  ;;  %5792 = vmatmul.bf16.gmra.mxu3 %v11013_v43  ;;  %v5019_v0 = vadd.f32 %v5018_v10, %v11022_v15  ;;  %v7673_v38 = vor.u32 %v8080_v4, %v7672_v26  ;;  %v7737_v37 = vor.u32 %v8096_v18, %v7736_v30  ;;  %v8075_v49 = vld [vmem:[%s8802_s18 + $0x1f4] sm:$0xf]  ;;  %v7786_v4 = vld [vmem:[%s8802_s18 + $0x2f8] sm:$0xf0] }
 0x894   : > { %5811 = vmatmul.bf16.gmra.mxu1 %v11018_v46  ;;  %v5039_v11 = vpop.f32.mrf.mxu1  ;;  %5859 = vmatpush.bf16.msrb.mxu3 %v7689_v50  ;;  %v5057_v57 = vadd.f32 %v5056_v45, %v11025_v61  ;;  %v7482_v45 = vld [vmem:[%s8802_s18 + $0x98] sm:$0xf0]  ;;  %v8091_v22 = vld [vmem:[%s8802_s18 + $0x274] sm:$0xf] }
 0x895   : > { %v5077_v58 = vpop.f32.mrf.mxu0  ;;  %v5038_v39 = vadd.f32 %v11000_v25, %v5019_v0  ;;  %v8015_v25 = vld [vmem:[%s8802_s18 + $0x14] sm:$0xf]  ;;  %5917 = vmatpush.bf16.msra.mxu0 %v7493_v2  ;;  %5880 = vmatpush.bf16.msrb.mxu1 %v7737_v37  ;;  %v8029_v0 = vld [vmem:[%s8802_s18 + $0x84] sm:$0xf] }
 0x896   : > { %5897 = vmatpush.bf16.msrb.mxu2 %v7437_v52  ;;  %v5076_v3 = vadd.f32 %v11005_v6, %v5057_v57  ;;  %v7421_v27 = vor.u32 %v8015_v25, %v7418_v56  ;;  %v8031_v6 = vld [vmem:[%s8802_s18 + $0x94] sm:$0xf]  ;;  %v8013_v52 = vld [vmem:[%s8802_s18 + $0x4] sm:$0xf] }
 0x897   : > { %v7485_v1 = vor.u32 %v8031_v6, %v7482_v45  ;;  %v5163_v9 = vmax.f32 %v5038_v39, 0.0  ;;  %v7413_v57 = vor.u32 %v8013_v52, %v7410_v40  ;;  %v7722_v39 = vld [vmem:[%s8802_s18 + $0x278] sm:$0xf0]  ;;  %v8107_v26 = vld [vmem:[%s8802_s18 + $0x2f4] sm:$0xf] }
 0x898   : > { %5860 = vmatpush.bf16.msrb.mxu3 %v7681_v47  ;;  %v5164_v62 = vmax.f32 %v5076_v3, 0.0  ;;  %v7474_v47 = vld [vmem:[%s8802_s18 + $0x88] sm:$0xf0]  ;;  %v7725_v2 = vor.u32 %v8091_v22, %v7722_v39  ;;  %v7789_v30 = vor.u32 %v8107_v26, %v7786_v4  ;;  %v8073_v56 = vld [vmem:[%s8802_s18 + $0x1e4] sm:$0xf] }
 0x899   : > { %5918 = vmatpush.bf16.msra.mxu0 %v7485_v1  ;;  %v7477_v42 = vor.u32 %v8029_v0, %v7474_v47  ;;  %v7714_v6 = vld [vmem:[%s8802_s18 + $0x268] sm:$0xf0]  ;;  %v8105_v45 = vld [vmem:[%s8802_s18 + $0x2e4] sm:$0xf]  ;;  %v7642_v40 = vld [vmem:[%s8802_s18 + $0x1d8] sm:$0xf0] }
 0x89a   : > { %v5020_v60 = vpop.f32.mrf.mxu3  ;;  %5898 = vmatpush.bf16.msrb.mxu2 %v7429_v36  ;;  %v7658_v36 = vld [vmem:[%s8802_s18 + $0x1f8] sm:$0xf0]  ;;  %v8087_v0 = vld [vmem:[%s8802_s18 + $0x254] sm:$0xf]  ;;  %v8085_v4 = vld [vmem:[%s8802_s18 + $0x244] sm:$0xf] }
 0x89b   : > { %v5021_v63 = vadd.f32 %v5020_v60, %v11022_v15  ;;  %v5058_v24 = vpop.f32.mrf.mxu2  ;;  %v7597_v60 = vor.u32 %v8059_v44, %v7594_v21  ;;  %v8103_v47 = vld [vmem:[%s8802_s18 + $0x2d4] sm:$0xf] }
 0x89c   : > { %v5059_v5 = vadd.f32 %v5058_v24, %v11025_v61  ;;  %v11054_v54 = vpop.f32.mrf.mxu1  ;;  %5861 = vmatpush.bf16.msrb.mxu3 %v7673_v38  ;;  %v7661_v24 = vor.u32 %v8075_v49, %v7658_v36  ;;  %v7586_v38 = vld [vmem:[%s8802_s18 + $0x168] sm:$0xf0] }
 0x89d   : > { %v5040_v8 = vadd.f32 %v5039_v11, %v5021_v63  ;;  %v11059_v10 = vpop.f32.mrf.mxu0  ;;  %v8078_v11 = vld [vmem:[%s8802_s18 + $0x204] sm:$0xf0]  ;;  %5919 = vmatpush.bf16.msra.mxu0 %v7477_v42 }
 0x89e   : > { %v5078_v7 = vadd.f32 %v5077_v58, %v5059_v5  ;;  %5899 = vmatpush.bf16.msrb.mxu2 %v7421_v27  ;;  %v7665_v32 = vor.u32 %v8078_v11, %v7664_v51  ;;  %v7729_v58 = vor.u32 %v8094_v55, %v7728_v20  ;;  %v8057_v5 = vld [vmem:[%s8802_s18 + $0x164] sm:$0xf]  ;;  %v8071_v20 = vld [vmem:[%s8802_s18 + $0x1d4] sm:$0xf] }
 0x89f   : > { %v5169_v50 = vmax.f32 %v5040_v8, 0.0  ;;  %v7589_v25 = vor.u32 %v8057_v5, %v7586_v38  ;;  %v7650_v8 = vld [vmem:[%s8802_s18 + $0x1e8] sm:$0xf0]  ;;  %v8089_v27 = vld [vmem:[%s8802_s18 + $0x264] sm:$0xf]  ;;  %v11121_v5 = vperm.slane %v10927_v28, 4 }
 0x8a0   : > { %v5170_v34 = vmax.f32 %v5078_v7, 0.0  ;;  %5862 = vmatpush.bf16.msrb.mxu3 %v7665_v32  ;;  %5881 = vmatpush.bf16.msrb.mxu1 %v7729_v58  ;;  %v7653_v37 = vor.u32 %v8073_v56, %v7650_v8  ;;  %v7717_v1 = vor.u32 %v8089_v27, %v7714_v6  ;;  %v7578_v32 = vld [vmem:[%s8802_s18 + $0x158] sm:$0xf0]  ;;  %v7762_v8 = vld [vmem:[%s8802_s18 + $0x2c8] sm:$0xf0] }
 0x8a1   : > { %v11067_v35 = vpack.c.bf16 %v5169_v50, %v5163_v9  ;;  %v7778_v9 = vld [vmem:[%s8802_s18 + $0x2e8] sm:$0xf0]  ;;  %v8051_v6 = vld [vmem:[%s8802_s18 + $0x134] sm:$0xf] }
 0x8a2   : > { %v11072_v59 = vpack.c.bf16 %v5170_v34, %v5164_v62  ;;  %v5023_v29 = vpop.f32.mrf.mxu3  ;;  %5900 = vmatpush.bf16.msrb.mxu2 %v7413_v57  ;;  %v7781_v62 = vor.u32 %v8105_v45, %v7778_v9  ;;  %v8055_v34 = vld [vmem:[%s8802_s18 + $0x154] sm:$0xf]  ;;  %v7562_v45 = vld [vmem:[%s8802_s18 + $0x138] sm:$0xf0] }
 0x8a3   : > { %v5061_v17 = vpop.f32.mrf.mxu2  ;;  %5825 = vmatmul.bf16.vlgmr.msra.gmra.mxu2 %v11067_v35  ;;  %v5024_v3 = vadd.f32 %v5023_v29, %v11022_v15  ;;  %v7581_v52 = vor.u32 %v8055_v34, %v7578_v32  ;;  %v7645_v29 = vor.u32 %v8071_v20, %v7642_v40  ;;  %v8083_v9 = vld [vmem:[%s8802_s18 + $0x234] sm:$0xf]  ;;  %v7754_v34 = vld [vmem:[%s8802_s18 + $0x2b8] sm:$0xf0]  ;;  %v8049_v32 = vld [vmem:[%s8802_s18 + $0x124] sm:$0xf] }
 0x8a4   : > { %5844 = vmatmul.bf16.vlgmr.msrb.gmra.mxu0 %v11072_v59  ;;  %v5044_v12 = vpop.f32.mrf.mxu1  ;;  %5931 = vmatpush.bf16.msra.mxu3 %v7597_v60  ;;  %v5062_v18 = vadd.f32 %v5061_v17, %v11025_v61  ;;  %v7770_v17 = vld [vmem:[%s8802_s18 + $0x2d8] sm:$0xf0]  ;;  %v7570_v60 = vld [vmem:[%s8802_s18 + $0x148] sm:$0xf0] }
 0x8a5   : > { %v5082_v63 = vpop.f32.mrf.mxu0  ;;  %5950 = vmatpush.bf16.msra.mxu1 %v7661_v24  ;;  %5988 = vmatpush.bf16.msrb.mxu0 %v7789_v30  ;;  %v5043_v50 = vadd.f32 %v11054_v54, %v5024_v3  ;;  %v7706_v54 = vld [vmem:[%s8802_s18 + $0x258] sm:$0xf0]  ;;  %v7634_v24 = vld [vmem:[%s8802_s18 + $0x1c8] sm:$0xf0]  ;;  %v8101_v3 = vld [vmem:[%s8802_s18 + $0x2c4] sm:$0xf] }
 0x8a6   : > { %5969 = vmatpush.bf16.msra.mxu2 %v7725_v2  ;;  %v5081_v55 = vadd.f32 %v11059_v10, %v5062_v18  ;;  %v7709_v57 = vor.u32 %v8087_v0, %v7706_v54  ;;  %v7698_v30 = vld [vmem:[%s8802_s18 + $0x248] sm:$0xf0]  ;;  %v11124_v18 = vperm.slane %v10927_v28, 5  ;;  %v7765_v27 = vor.u32 %v8101_v3, %v7762_v8  ;;  %v8067_v28 = vld [vmem:[%s8802_s18 + $0x1b4] sm:$0xf] }
 0x8a7   : > { %v5175_v10 = vmax.f32 %v5043_v50, 0.0  ;;  %v7701_v56 = vor.u32 %v8085_v4, %v7698_v30  ;;  %v7690_v50 = vld [vmem:[%s8802_s18 + $0x238] sm:$0xf0] }
 0x8a8   : > { %5932 = vmatpush.bf16.msra.mxu3 %v7589_v25  ;;  %v5176_v36 = vmax.f32 %v5081_v55, 0.0  ;;  %v7554_v55 = vld [vmem:[%s8802_s18 + $0x128] sm:$0xf0]  ;;  %v7738_v8 = vld [vmem:[%s8802_s18 + $0x298] sm:$0xf0] }
 0x8a9   : > { %5951 = vmatpush.bf16.msra.mxu1 %v7653_v37  ;;  %5989 = vmatpush.bf16.msrb.mxu0 %v7781_v62  ;;  %v8099_v62 = vld [vmem:[%s8802_s18 + $0x2b4] sm:$0xf]  ;;  %v7557_v0 = vor.u32 %v8049_v32, %v7554_v55 }
 0x8aa   : > { %v5025_v7 = vpop.f32.mrf.mxu3  ;;  %5970 = vmatpush.bf16.msra.mxu2 %v7717_v1  ;;  %v7626_v1 = vld [vmem:[%s8802_s18 + $0x1b8] sm:$0xf0]  ;;  %v7757_v20 = vor.u32 %v8099_v62, %v7754_v34  ;;  %v7666_v62 = vld [vmem:[%s8802_s18 + $0x208] sm:$0xf0] }
 0x8ab   : > { %v5026_v51 = vadd.f32 %v5025_v7, %v11022_v15  ;;  %v5063_v11 = vpop.f32.mrf.mxu2  ;;  %v7565_v7 = vor.u32 %v8051_v6, %v7562_v45 }
 0x8ac   : > { %v5064_v58 = vadd.f32 %v5063_v11, %v11025_v61  ;;  %v11107_v44 = vpop.f32.mrf.mxu1  ;;  %5933 = vmatpush.bf16.msra.mxu3 %v7581_v52  ;;  %v7773_v61 = vor.u32 %v8103_v47, %v7770_v17  ;;  %v7693_v11 = vor.u32 %v8083_v9, %v7690_v50  ;;  %v7618_v52 = vld [vmem:[%s8802_s18 + $0x1a8] sm:$0xf0] }
 0x8ad   : > { %v5045_v15 = vadd.f32 %v5044_v12, %v5026_v51  ;;  %v11109_v49 = vpop.f32.mrf.mxu0  ;;  %5952 = vmatpush.bf16.msra.mxu1 %v7645_v29  ;;  %v8053_v12 = vld [vmem:[%s8802_s18 + $0x144] sm:$0xf]  ;;  %v7629_v51 = vor.u32 %v8067_v28, %v7626_v1  ;;  %v7682_v29 = vld [vmem:[%s8802_s18 + $0x228] sm:$0xf0] }
 0x8ae   : > { %v5083_v42 = vadd.f32 %v5082_v63, %v5064_v58  ;;  %5971 = vmatpush.bf16.msra.mxu2 %v7709_v57  ;;  %v7573_v39 = vor.u32 %v8053_v12, %v7570_v60  ;;  %v8069_v63 = vld [vmem:[%s8802_s18 + $0x1c4] sm:$0xf]  ;;  %5990 = vmatpush.bf16.msrb.mxu0 %v7773_v61  ;;  %v7746_v61 = vld [vmem:[%s8802_s18 + $0x2a8] sm:$0xf0]  ;;  %v8047_v12 = vld [vmem:[%s8802_s18 + $0x114] sm:$0xf] }
 0x8af   : > { %v5181_v21 = vmax.f32 %v5045_v15, 0.0  ;;  %v7637_v26 = vor.u32 %v8069_v63, %v7634_v24  ;;  %v8065_v58 = vld [vmem:[%s8802_s18 + $0x1a4] sm:$0xf]  ;;  %v7546_v60 = vld [vmem:[%s8802_s18 + $0x118] sm:$0xf0] }
 0x8b0   : > { %v5182_v22 = vmax.f32 %v5083_v42, 0.0  ;;  %5934 = vmatpush.bf16.msra.mxu3 %v7573_v39  ;;  %v7621_v54 = vor.u32 %v8065_v58, %v7618_v52  ;;  %v8081_v15 = vld [vmem:[%s8802_s18 + $0x224] sm:$0xf]  ;;  %v7549_v39 = vor.u32 %v8047_v12, %v7546_v60  ;;  %v7610_v63 = vld [vmem:[%s8802_s18 + $0x198] sm:$0xf0] }
 0x8b1   : > { %v11115_v2 = vpack.c.bf16 %v5181_v21, %v5175_v10  ;;  %5953 = vmatpush.bf16.msra.mxu1 %v7637_v26  ;;  %v7685_v17 = vor.u32 %v8081_v15, %v7682_v29  ;;  %v8097_v42 = vld [vmem:[%s8802_s18 + $0x2a4] sm:$0xf]  ;;  %v8079_v24 = vld [vmem:[%s8802_s18 + $0x214] sm:$0xf]  ;;  %v7674_v26 = vld [vmem:[%s8802_s18 + $0x218] sm:$0xf0] }
 0x8b2   : > { %v5094_v38 = vpop.f32.mrf.mxu3  ;;  %v11126_v25 = vpack.c.bf16 %v5182_v22, %v5176_v36  ;;  %5972 = vmatpush.bf16.msra.mxu2 %v7701_v56  ;;  %5991 = vmatpush.bf16.msrb.mxu0 %v7765_v27  ;;  %v7749_v21 = vor.u32 %v8097_v42, %v7746_v61  ;;  %v8063_v36 = vld [vmem:[%s8802_s18 + $0x194] sm:$0xf]  ;;  %v7677_v45 = vor.u32 %v8079_v24, %v7674_v26  ;;  %v8061_v1 = vld [vmem:[%s8802_s18 + $0x184] sm:$0xf] }
 0x8b3   : > { %v5132_v37 = vpop.f32.mrf.mxu2  ;;  %5830 = vmatmul.bf16.gmra.mxu2 %v11115_v2  ;;  %v5095_v40 = vadd.f32 %v5094_v38, %v11121_v5  ;;  %v7613_v38 = vor.u32 %v8063_v36, %v7610_v63  ;;  %v8095_v56 = vld [vmem:[%s8802_s18 + $0x294] sm:$0xf] }
 0x8b4   : > { %5849 = vmatmul.bf16.gmra.mxu0 %v11126_v25  ;;  %5935 = vmatpush.bf16.msra.mxu3 %v7565_v7  ;;  %v5133_v57 = vadd.f32 %v5132_v37, %v11124_v18  ;;  %v5115_v47 = vpop.f32.mrf.mxu1  ;;  %v8045_v37 = vld [vmem:[%s8802_s18 + $0x104] sm:$0xf]  ;;  %v7741_v7 = vor.u32 %v8095_v56, %v7738_v8 }
 0x8b5   : > { %5954 = vmatpush.bf16.msra.mxu1 %v7629_v51  ;;  %v5153_v10 = vpop.f32.mrf.mxu0  ;;  %v5114_v4 = vadd.f32 %v11107_v44, %v5095_v40  ;;  %v7538_v44 = vld [vmem:[%s8802_s18 + $0x108] sm:$0xf0] }
 0x8b6   : > { %5973 = vmatpush.bf16.msra.mxu2 %v7693_v11  ;;  %5992 = vmatpush.bf16.msrb.mxu0 %v7757_v20  ;;  %v5152_v27 = vadd.f32 %v11109_v49, %v5133_v57  ;;  %v7541_v50 = vor.u32 %v8045_v37, %v7538_v44  ;;  %v7602_v51 = vld [vmem:[%s8802_s18 + $0x188] sm:$0xf0]  ;;  %v8077_v11 = vld [vmem:[%s8802_s18 + $0x204] sm:$0xf] }
 0x8b7   : > { %v5165_v34 = vmax.f32 %v5114_v4, 0.0  ;;  %v8093_v49 = vld [vmem:[%s8802_s18 + $0x284] sm:$0xf]  ;;  %v7730_v20 = vld [vmem:[%s8802_s18 + $0x288] sm:$0xf0]  ;;  %v7605_v40 = vor.u32 %v8061_v1, %v7602_v51  ;;  %s11431_s18 = sld [smem:[#allocation33_spill]] (!%p7790_p5) }
 0x8b8   : > { %5936 = vmatpush.bf16.msra.mxu3 %v7557_v0  ;;  %v5166_v55 = vmax.f32 %v5152_v27, 0.0  ;;  %v7669_v0 = vor.u32 %v8077_v11, %v7666_v62  ;;  %v7733_v57 = vor.u32 %v8093_v49, %v7730_v20 }
 0x8b9   : > { %5955 = vmatpush.bf16.msra.mxu1 %v7621_v54 }
 0x8ba   : > { %v5096_v22 = vpop.f32.mrf.mxu3  ;;  %5974 = vmatpush.bf16.msra.mxu2 %v7685_v17  ;;  %5993 = vmatpush.bf16.msrb.mxu0 %v7749_v21 }
 0x8bb   : > { %v5097_v30 = vadd.f32 %v5096_v22, %v11121_v5  ;;  %v5134_v3 = vpop.f32.mrf.mxu2 }
 0x8bc   : > { %v5135_v6 = vadd.f32 %v5134_v3, %v11124_v18  ;;  %5937 = vmatpush.bf16.msra.mxu3 %v7549_v39  ;;  %v5118_v15 = vpop.f32.mrf.mxu1 }
 0x8bd   : > { %v5116_v28 = vadd.f32 %v5115_v47, %v5097_v30  ;;  %5956 = vmatpush.bf16.msra.mxu1 %v7613_v38  ;;  %v5156_v47 = vpop.f32.mrf.mxu0 }
 0x8be   : > { %v5154_v9 = vadd.f32 %v5153_v10, %v5135_v6  ;;  %5975 = vmatpush.bf16.msra.mxu2 %v7677_v45  ;;  %5994 = vmatpush.bf16.msrb.mxu0 %v7741_v7 }
 0x8bf   : > { %v5171_v32 = vmax.f32 %v5116_v28, 0.0 }
 0x8c0   : > { %v5172_v58 = vmax.f32 %v5154_v9, 0.0  ;;  %5938 = vmatpush.bf16.msra.mxu3 %v7541_v50 }
 0x8c1   : > { %v5189_v52 = vpack.c.bf16 %v5171_v32, %v5165_v34  ;;  %5957 = vmatpush.bf16.msra.mxu1 %v7605_v40 }
 0x8c2   : > { %v5190_v54 = vpack.c.bf16 %v5172_v58, %v5166_v55  ;;  %v5099_v29 = vpop.f32.mrf.mxu3  ;;  %5976 = vmatpush.bf16.msra.mxu2 %v7669_v0  ;;  %5995 = vmatpush.bf16.msrb.mxu0 %v7733_v57 }
 0x8c3   : > { %v5137_v17 = vpop.f32.mrf.mxu2  ;;  %5863 = vmatmul.bf16.vlgmr.msrb.gmra.mxu3 %v5189_v52  ;;  %5901 = vmatmul.bf16.vlgmr.msrb.gmra.mxu2 %v10943_v13  ;;  %v5100_v42 = vadd.f32 %v5099_v29, %v11121_v5 }
 0x8c4   : > { %5882 = vmatmul.bf16.vlgmr.msrb.gmra.mxu1 %v5190_v54  ;;  %5920 = vmatmul.bf16.vlgmr.msra.gmra.mxu0 %v10948_v48  ;;  %v5138_v61 = vadd.f32 %v5137_v17, %v11124_v18  ;;  %v5120_v22 = vpop.f32.mrf.mxu1 }
 0x8c5   : > { %v5119_v21 = vadd.f32 %v5118_v15, %v5100_v42  ;;  %v5158_v13 = vpop.f32.mrf.mxu0 }
 0x8c6   : > { %v5157_v36 = vadd.f32 %v5156_v47, %v5138_v61 }
 0x8c7   : > { %v5177_v48 = vmax.f32 %v5119_v21, 0.0 }
 0x8c8   : > { %v5178_v4 = vmax.f32 %v5157_v36, 0.0 }
 0x8ca   : > { %v5101_v10 = vpop.f32.mrf.mxu3 }
 0x8cb   : > { %v5102_v12 = vadd.f32 %v5101_v10, %v11121_v5  ;;  %v5139_v60 = vpop.f32.mrf.mxu2 }
 0x8cc   : > { %v5140_v39 = vadd.f32 %v5139_v60, %v11124_v18 }
 0x8cd   : > { %v5121_v63 = vadd.f32 %v5120_v22, %v5102_v12 }
 0x8ce   : > { %v5159_v24 = vadd.f32 %v5158_v13, %v5140_v39 }
 0x8cf   : > { %v5183_v26 = vmax.f32 %v5121_v63, 0.0 }
 0x8d0   : > { %v5184_v30 = vmax.f32 %v5159_v24, 0.0 }
 0x8d1   : > { %v5195_v3 = vpack.c.bf16 %v5183_v26, %v5177_v48 }
 0x8d2   : > { %v5196_v38 = vpack.c.bf16 %v5184_v30, %v5178_v4 }
 0x8d3   : > { %5868 = vmatmul.bf16.gmra.mxu3 %v5195_v3  ;;  %5906 = vmatmul.bf16.gmra.mxu2 %v11013_v43 }
 0x8d4   : > { %5887 = vmatmul.bf16.gmra.mxu1 %v5196_v38  ;;  %5925 = vmatmul.bf16.gmra.mxu0 %v11018_v46 }
 0x8e3   : > { %5939 = vmatmul.bf16.vlgmr.msra.gmra.mxu3 %v11067_v35  ;;  %5977 = vmatmul.bf16.vlgmr.msra.gmra.mxu2 %v5189_v52 }
 0x8e4   : > { %5958 = vmatmul.bf16.vlgmr.msra.gmra.mxu1 %v11072_v59  ;;  %5996 = vmatmul.bf16.vlgmr.msrb.gmra.mxu0 %v5190_v54  ;;  %v5293_v59 = vld [vmem:[%s730_s17] sm:$0x3] }
 0x8e5   : > { %v5295_v44 = vperm.slane %v5293_v59, 0 }
 0x8e7   : > { %v5807_v5 = vpop.f32.mrf.mxu1 }
 0x8ec   : > { %v5788_v56 = vpop.f32.mrf.mxu3 }
 0x8ed   : > { %v5789_v7 = vadd.f32 %v5788_v56, %v5295_v44 }
 0x8ef   : > { %v5809_v8 = vpop.f32.mrf.mxu1  ;;  %v5808_v50 = vadd.f32 %v5807_v5, %v5789_v7 }
 0x8f3   : > { %5944 = vmatmul.bf16.gmra.mxu3 %v11115_v2  ;;  %5982 = vmatmul.bf16.gmra.mxu2 %v5195_v3 }
 0x8f4   : > { %5963 = vmatmul.bf16.gmra.mxu1 %v11126_v25  ;;  %6001 = vmatmul.bf16.gmra.mxu0 %v5196_v38  ;;  %v5790_v46 = vpop.f32.mrf.mxu3  ;;  %v5296_v38 = vperm.slane %v5293_v59, 1 }
 0x8f5   : > { %v5791_v34 = vadd.f32 %v5790_v46, %v5295_v44 }
 0x8f7   : > { %v5810_v55 = vadd.f32 %v5809_v8, %v5791_v34 }
 0x911   : > { %v5812_v35 = vpop.f32.mrf.mxu1 }
 0x916   : > { %v5793_v2 = vpop.f32.mrf.mxu3 }
 0x917   : > { %v5794_v15 = vadd.f32 %v5793_v2, %v5295_v44 }
 0x919   : > { %v5814_v25 = vpop.f32.mrf.mxu1  ;;  %v5813_v42 = vadd.f32 %v5812_v35, %v5794_v15 }
 0x91e   : > { %v5795_v1 = vpop.f32.mrf.mxu3 }
 0x91f   : > { %v5796_v36 = vadd.f32 %v5795_v1, %v5295_v44 }
 0x921   : > { %v5845_v18 = vpop.f32.mrf.mxu0  ;;  %v5815_v63 = vadd.f32 %v5814_v25, %v5796_v36 }
 0x926   : > { %v5826_v43 = vpop.f32.mrf.mxu2 }
 0x927   : > { %v5827_v51 = vadd.f32 %v5826_v43, %v5808_v50 }
 0x929   : > { %v5847_v37 = vpop.f32.mrf.mxu0  ;;  %v5846_v32 = vadd.f32 %v5845_v18, %v5827_v51 }
 0x92e   : > { %v5828_v27 = vpop.f32.mrf.mxu2 }
 0x92f   : > { %v5829_v52 = vadd.f32 %v5828_v27, %v5810_v55 }
 0x931   : > { %v5850_v6 = vpop.f32.mrf.mxu0  ;;  %v5848_v57 = vadd.f32 %v5847_v37, %v5829_v52 }
 0x936   : > { %v5831_v45 = vpop.f32.mrf.mxu2 }
 0x937   : > { %v5832_v10 = vadd.f32 %v5831_v45, %v5813_v42 }
 0x939   : > { %v5852_v28 = vpop.f32.mrf.mxu0  ;;  %v5851_v39 = vadd.f32 %v5850_v6, %v5832_v10 }
 0x93e   : > { %v5833_v9 = vpop.f32.mrf.mxu2 }
 0x93f   : > { %v5834_v48 = vadd.f32 %v5833_v9, %v5815_v63 }
 0x941   : > { %v5883_v11 = vpop.f32.mrf.mxu1  ;;  %v5921_v62 = vpop.f32.mrf.mxu0  ;;  %v5853_v5 = vadd.f32 %v5852_v28, %v5834_v48 }
 0x946   : > { %v5864_v49 = vpop.f32.mrf.mxu3  ;;  %v5902_v20 = vpop.f32.mrf.mxu2 }
 0x947   : > { %v5865_v58 = vadd.f32 %v5864_v49, %v5846_v32  ;;  %v5903_v43 = vadd.f32 %v5902_v20, %v5296_v38 }
 0x949   : > { %v5884_v40 = vadd.f32 %v5883_v11, %v5865_v58  ;;  %v5885_v0 = vpop.f32.mrf.mxu1  ;;  %v5923_v54 = vpop.f32.mrf.mxu0  ;;  %v5922_v35 = vadd.f32 %v5921_v62, %v5903_v43 }
 0x94b   : > { %v11187_v29 = vadd.f32 %v5884_v40, %v10576_v23 }
 0x94d   : > { %6015 = vst [vmem:[#allocation2] sm:$0xff] %v11187_v29 }
 0x94e   : > { %v5866_v47 = vpop.f32.mrf.mxu3  ;;  %v5904_v17 = vpop.f32.mrf.mxu2 }
 0x94f   : > { %v5867_v61 = vadd.f32 %v5866_v47, %v5848_v57  ;;  %v5905_v59 = vadd.f32 %v5904_v17, %v5296_v38 }
 0x951   : > { %v5886_v21 = vadd.f32 %v5885_v0, %v5867_v61  ;;  %v5888_v12 = vpop.f32.mrf.mxu1  ;;  %v5926_v60 = vpop.f32.mrf.mxu0  ;;  %v5924_v7 = vadd.f32 %v5923_v54, %v5905_v59 }
 0x953   : > { %v11191_v22 = vadd.f32 %v5886_v21, %v10583_v41 }
 0x955   : > { %6017 = vst [vmem:[#allocation2 + $0x10] sm:$0xff] %v11191_v22 }
 0x956   : > { %v5869_v23 = vpop.f32.mrf.mxu3  ;;  %v5907_v13 = vpop.f32.mrf.mxu2 }
 0x957   : > { %v5870_v24 = vadd.f32 %v5869_v23, %v5851_v39  ;;  %v5908_v11 = vadd.f32 %v5907_v13, %v5296_v38 }
 0x959   : > { %v5889_v26 = vadd.f32 %v5888_v12, %v5870_v24  ;;  %v5890_v4 = vpop.f32.mrf.mxu1  ;;  %v5928_v3 = vpop.f32.mrf.mxu0  ;;  %v5927_v49 = vadd.f32 %v5926_v60, %v5908_v11 }
 0x95b   : > { %v11195_v30 = vadd.f32 %v5889_v26, %v10590_v31 }
 0x95d   : > { %6019 = vst [vmem:[#allocation2 + $0x20] sm:$0xff] %v11195_v30 }
 0x95e   : > { %v5871_v41 = vpop.f32.mrf.mxu3  ;;  %v5909_v18 = vpop.f32.mrf.mxu2 }
 0x95f   : > { %v5872_v56 = vadd.f32 %v5871_v41, %v5853_v5  ;;  %v5910_v0 = vadd.f32 %v5909_v18, %v5296_v38 }
 0x961   : > { %v5891_v8 = vadd.f32 %v5890_v4, %v5872_v56  ;;  %v5959_v37 = vpop.f32.mrf.mxu1  ;;  %v5997_v27 = vpop.f32.mrf.mxu0  ;;  %v5929_v47 = vadd.f32 %v5928_v3, %v5910_v0 }
 0x963   : > { %v11199_v46 = vadd.f32 %v5891_v8, %v10597_v53 }
 0x965   : > { %6021 = vst [vmem:[#allocation2 + $0x30] sm:$0xff] %v11199_v46 }
 0x966   : > { %v5940_v31 = vpop.f32.mrf.mxu3  ;;  %v5978_v6 = vpop.f32.mrf.mxu2 }
 0x967   : > { %v5941_v2 = vadd.f32 %v5940_v31, %v5922_v35 }
 0x969   : > { %v5960_v45 = vadd.f32 %v5959_v37, %v5941_v2  ;;  %v5961_v25 = vpop.f32.mrf.mxu1  ;;  %v5999_v53 = vpop.f32.mrf.mxu0 }
 0x96b   : > { %v5979_v44 = vadd.f32 %v5978_v6, %v5960_v45 }
 0x96d   : > { %v5998_v28 = vadd.f32 %v5997_v27, %v5979_v44 }
 0x96e   : > { %v5942_v1 = vpop.f32.mrf.mxu3  ;;  %v5980_v9 = vpop.f32.mrf.mxu2 }
 0x96f   : > { %v6008_v50 = vadd.f32 %v5998_v28, %v10574_v19  ;;  %v5943_v51 = vadd.f32 %v5942_v1, %v5924_v7 }
 0x971   : > { %6016 = vst.msk [vmem:[#allocation2 + $0x8] sm:$0xff] %vm775_vm4, %v6008_v50  ;;  %v5962_v34 = vadd.f32 %v5961_v25, %v5943_v51  ;;  %v5964_v20 = vpop.f32.mrf.mxu1  ;;  %v6002_v19 = vpop.f32.mrf.mxu0 }
 0x973   : > { %v5981_v62 = vadd.f32 %v5980_v9, %v5962_v34 }
 0x975   : > { %v6000_v32 = vadd.f32 %v5999_v53, %v5981_v62 }
 0x976   : > { %v5945_v55 = vpop.f32.mrf.mxu3  ;;  %v5983_v40 = vpop.f32.mrf.mxu2 }
 0x977   : > { %v6010_v58 = vadd.f32 %v6000_v32, %v10581_v33  ;;  %v5946_v52 = vadd.f32 %v5945_v55, %v5927_v49 }
 0x979   : > { %6018 = vst.msk [vmem:[#allocation2 + $0x18] sm:$0xff] %vm775_vm4, %v6010_v58  ;;  %v5965_v54 = vadd.f32 %v5964_v20, %v5946_v52  ;;  %v5966_v10 = vpop.f32.mrf.mxu1  ;;  %v6004_v60 = vpop.f32.mrf.mxu0 }
 0x97b   : > { %v5984_v15 = vadd.f32 %v5983_v40, %v5965_v54 }
 0x97d   : > { %v6003_v57 = vadd.f32 %v6002_v19, %v5984_v15 }
 0x97e   : > { %v5947_v17 = vpop.f32.mrf.mxu3  ;;  %v5985_v12 = vpop.f32.mrf.mxu2 }
 0x97f   : > { %v6012_v42 = vadd.f32 %v6003_v57, %v10588_v16  ;;  %v5948_v61 = vadd.f32 %v5947_v17, %v5929_v47 }
 0x981   : > { %6020 = vst.msk [vmem:[#allocation2 + $0x28] sm:$0xff] %vm775_vm4, %v6012_v42  ;;  %v5967_v21 = vadd.f32 %v5966_v10, %v5948_v61 }
 0x983   : > { %v5986_v33 = vadd.f32 %v5985_v12, %v5967_v21 }
 0x985   : > { %v6005_v36 = vadd.f32 %v6004_v60, %v5986_v33  ;;  %6026 = sbr.rel (%p7790_p5) target bundleno = 2878 (0xb3e), region = 96 }
 0x987   : > { %v6014_v39 = vadd.f32 %v6005_v36, %v10595_v14 }
 0x989   : > { %6022 = vst.msk [vmem:[#allocation2 + $0x38] sm:$0xff] %vm775_vm4, %v6014_v39 }
 0x98a   : > { %v6037_v23 = vsel %vm775_vm4, %v6012_v42, 0.0  ;;  %v6029_v16 = vsel %vm775_vm4, %v6008_v50, 0.0  ;;  %v6041_v24 = vsel %vm775_vm4, %v6014_v39, 0.0  ;;  %v6033_v48 = vsel %vm775_vm4, %v6010_v58, 0.0  ;;  %v11430_v38 = vld [vmem:[#allocation9_spill] sm:$0xff]  ;;  %v8116_v32 = vld [vmem:[%s11431_s18 + $0x38] sm:$0xff] }
 0x98b   : > { %v6038_v13 = vadd.f32 %v6037_v23, %v11195_v30  ;;  %v6030_v63 = vadd.f32 %v6029_v16, %v11187_v29  ;;  %v6042_v14 = vadd.f32 %v6041_v24, %v11199_v46  ;;  %v6034_v26 = vadd.f32 %v6033_v48, %v11191_v22  ;;  %6273 = vmatpush.bf16.msra.mxu0 %v8116_v32  ;;  %v8115_v49 = vld [vmem:[%s11431_s18 + $0x30] sm:$0xff]  ;;  %v8114_v20 = vld [vmem:[%s11431_s18 + $0x28] sm:$0xff]  ;;  %v8113_v55 = vld [vmem:[%s11431_s18 + $0x20] sm:$0xff] }
 0x98c   : > { %8129 = vmatpush.bf16.msra.mxu2 %v8116_v32  ;;  %v8120_v52 = vld [vmem:[%s11431_s18 + $0x58] sm:$0xff]  ;;  %v8111_v40 = vld [vmem:[%s11431_s18 + $0x10] sm:$0xff]  ;;  %v8110_v54 = vld [vmem:[%s11431_s18 + $0x8] sm:$0xff] }
 0x98d   : > { %6039 = vadd.xlane.f32.xlu1 %v6038_v13  ;;  %6031 = vadd.xlane.f32.xlu0 %v6030_v63  ;;  %v8119_v0 = vld [vmem:[%s11431_s18 + $0x50] sm:$0xff]  ;;  %v8118_v19 = vld [vmem:[%s11431_s18 + $0x48] sm:$0xff]  ;;  %v8117_v61 = vld [vmem:[%s11431_s18 + $0x40] sm:$0xff] }
 0x98e   : > { %6296 = vmatpush.bf16.msra.mxu1 %v8120_v52 }
 0x98f   : > { %6274 = vmatpush.bf16.msra.mxu0 %v8115_v49 }
 0x990   : > { %8130 = vmatpush.bf16.msra.mxu2 %v8115_v49 }
 0x992   : > { %6297 = vmatpush.bf16.msra.mxu1 %v8119_v0 }
 0x993   : > { %6275 = vmatpush.bf16.msra.mxu0 %v8114_v20 }
 0x994   : > { %8131 = vmatpush.bf16.msra.mxu2 %v8114_v20 }
 0x995   : > { %6043 = vadd.xlane.f32.xlu1 %v6042_v14  ;;  %6035 = vadd.xlane.f32.xlu0 %v6034_v26 }
 0x996   : > { %6298 = vmatpush.bf16.msra.mxu1 %v8118_v19 }
 0x997   : > { %6276 = vmatpush.bf16.msra.mxu0 %v8113_v55 }
 0x998   : > { %8132 = vmatpush.bf16.msra.mxu2 %v8113_v55 }
 0x99a   : > { %6299 = vmatpush.bf16.msra.mxu1 %v8117_v61 }
 0xa00   : > { %v6040_v4 = vpop.xlane.xlu1 %6039  ;;  %v6032_v3 = vpop.xlane.xlu0 %6031 }
 0xa01   : > { %v6047_v5 = vmul.f32 %v6040_v4, %v11430_v38  ;;  %v6045_v41 = vmul.f32 %v6032_v3, %v11430_v38 }
 0xa03   : > { %v11222_v18 = vsub.f32 %v11195_v30, %v6047_v5  ;;  %v11224_v56 = vsub.f32 %v6012_v42, %v6047_v5  ;;  %v11227_v43 = vsub.f32 %v11187_v29, %v6045_v41  ;;  %v11229_v8 = vsub.f32 %v6008_v50, %v6045_v41  ;;  %v8109_v42 = vld [vmem:[%s11431_s18] sm:$0xff] }
 0xa05   : > { %v6061_v37 = vmul.f32 %v11222_v18, %v11222_v18  ;;  %v6062_v27 = vmul.f32 %v11224_v56, %v11224_v56  ;;  %v6057_v35 = vmul.f32 %v11227_v43, %v11227_v43  ;;  %v6058_v30 = vmul.f32 %v11229_v8, %v11229_v8 }
 0xa07   : > { %v6073_v31 = vsel %vm775_vm4, %v6062_v27, 0.0  ;;  %v6065_v6 = vsel %vm775_vm4, %v6058_v30, 0.0 }
 0xa08   : > { %v6044_v29 = vpop.xlane.xlu1 %6043  ;;  %v6036_v2 = vpop.xlane.xlu0 %6035  ;;  %v6074_v59 = vadd.f32 %v6073_v31, %v6061_v37  ;;  %v6066_v45 = vadd.f32 %v6065_v6, %v6057_v35 }
 0xa09   : > { %v6048_v44 = vmul.f32 %v6044_v29, %v11430_v38  ;;  %v6046_v25 = vmul.f32 %v6036_v2, %v11430_v38 }
 0xa0a   : > { %6075 = vadd.xlane.f32.xlu0 %v6074_v59  ;;  %6067 = vadd.xlane.f32.xlu2 %v6066_v45  ;;  %v6027_v59 = vld [vmem:[%s11432_s15] sm:$0x3] }
 0xa0b   : > { %v11244_v28 = vsub.f32 %v11199_v46, %v6048_v44  ;;  %v11246_v7 = vsub.f32 %v6014_v39, %v6048_v44  ;;  %v11249_v1 = vsub.f32 %v11191_v22, %v6046_v25  ;;  %v11251_v9 = vsub.f32 %v6010_v58, %v6046_v25  ;;  %v8112_v58 = vld [vmem:[%s11431_s18 + $0x18] sm:$0xff] }
 0xa0c   : > { %6277 = vmatpush.bf16.msra.mxu0 %v8112_v58  ;;  %8133 = vmatpush.bf16.msra.mxu2 %v8112_v58 }
 0xa0d   : > { %v6063_v50 = vmul.f32 %v11244_v28, %v11244_v28  ;;  %v6064_v51 = vmul.f32 %v11246_v7, %v11246_v7  ;;  %v6059_v53 = vmul.f32 %v11249_v1, %v11249_v1  ;;  %v6060_v46 = vmul.f32 %v11251_v9, %v11251_v9 }
 0xa0f   : > { %v6077_v11 = vsel %vm775_vm4, %v6064_v51, 0.0  ;;  %v6069_v34 = vsel %vm775_vm4, %v6060_v46, 0.0  ;;  %v6028_v51 = vld [vmem:[%s11433_s29] sm:$0x3] }
 0xa10   : > { %v6078_v22 = vadd.f32 %v6077_v11, %v6063_v50  ;;  %v6070_v62 = vadd.f32 %v6069_v34, %v6059_v53  ;;  %6278 = vmatpush.bf16.msra.mxu0 %v8111_v40  ;;  %8134 = vmatpush.bf16.msra.mxu2 %v8111_v40  ;;  %v6138_v53 = vperm.slane %v6027_v59, 0  ;;  %v6151_v20 = vperm.slane %v6028_v51, 0 }
 0xa11   : > { %v6152_v40 = vperm.slane %v6028_v51, 1 }
 0xa12   : > { %6079 = vadd.xlane.f32.xlu1 %v6078_v22  ;;  %6071 = vadd.xlane.f32.xlu2 %v6070_v62  ;;  %v6139_v62 = vperm.slane %v6027_v59, 1 }
 0xa14   : > { %6279 = vmatpush.bf16.msra.mxu0 %v8110_v54  ;;  %8135 = vmatpush.bf16.msra.mxu2 %v8110_v54 }
 0xa18   : > { %6280 = vmatpush.bf16.msra.mxu0 %v8109_v42  ;;  %8136 = vmatpush.bf16.msra.mxu2 %v8109_v42 }
 0xa7d   : > { %v6068_v15 = vpop.xlane.xlu2 %6067  ;;  %v6076_v57 = vpop.xlane.xlu0 %6075 }
 0xa7e   : > { %v6081_v47 = vmul.f32 %v6068_v15, %v11430_v38  ;;  %v6083_v17 = vmul.f32 %v6076_v57, %v11430_v38 }
 0xa80   : > { %v6085_v10 = vadd.f32 1e-05, %v6081_v47  ;;  %v6087_v21 = vadd.f32 1e-05, %v6083_v17 }
 0xa82   : > { %8586 = vrsqrt.f32 %v6085_v10  ;;  %vm6115_vm6 = vweird.f32 %v6087_v21  ;;  %vm6095_vm9 = vweird.f32 %v6085_v10 }
 0xa83   : > { %8588 = vrsqrt.f32 %v6087_v21 }
 0xa85   : > { %v6080_v12 = vpop.xlane.xlu1 %6079  ;;  %v6072_v33 = vpop.xlane.xlu2 %6071 }
 0xa86   : > { %v6084_v60 = vmul.f32 %v6080_v12, %v11430_v38  ;;  %v6082_v36 = vmul.f32 %v6072_v33, %v11430_v38 }
 0xa88   : > { %v8587_v39 = vpop.eup %8586  ;;  %v6088_v23 = vadd.f32 1e-05, %v6084_v60  ;;  %v6086_v16 = vadd.f32 1e-05, %v6082_v36 }
 0xa89   : > { %v8589_v13 = vpop.eup %8588  ;;  %v6090_v63 = vmul.f32 %v8587_v39, %v6085_v10  ;;  %vm6096_vm8 = vweird.f32 %v8587_v39 }
 0xa8a   : > { %v6110_v24 = vmul.f32 %v8589_v13, %v6087_v21  ;;  %8590 = vrsqrt.f32 %v6088_v23  ;;  %vm6116_vm7 = vweird.f32 %v8589_v13  ;;  %vm6097_vm11 = vmor %vm6095_vm9, %vm6096_vm8  ;;  %vm6125_vm12 = vweird.f32 %v6088_v23 }
 0xa8b   : > { %v6091_v48 = vmul.f32 %v8587_v39, %v6090_v63  ;;  %8592 = vrsqrt.f32 %v6086_v16  ;;  %vm6117_vm10 = vmor %vm6115_vm6, %vm6116_vm7  ;;  %vm6105_vm0 = vweird.f32 %v6086_v16 }
 0xa8c   : > { %v6111_v14 = vmul.f32 %v8589_v13, %v6110_v24 }
 0xa8d   : > { %v6092_v26 = vmul.f32 0.5, %v6091_v48 }
 0xa8e   : > { %v6112_v4 = vmul.f32 0.5, %v6111_v14 }
 0xa8f   : > { %v6093_v3 = vsub.f32 1.5, %v6092_v26 }
 0xa90   : > { %v8591_v5 = vpop.eup %8590  ;;  %v6113_v41 = vsub.f32 1.5, %v6112_v4 }
 0xa91   : > { %v8593_v37 = vpop.eup %8592  ;;  %v6120_v27 = vmul.f32 %v8591_v5, %v6088_v23  ;;  %v6094_v38 = vmul.f32 %v8587_v39, %v6093_v3  ;;  %vm6126_vm13 = vweird.f32 %v8591_v5 }
 0xa92   : > { %v6114_v35 = vmul.f32 %v8589_v13, %v6113_v41  ;;  %v6100_v30 = vmul.f32 %v8593_v37, %v6086_v16  ;;  %vm6106_vm14 = vweird.f32 %v8593_v37  ;;  %vm6127_vm15 = vmor %vm6125_vm12, %vm6126_vm13  ;;  %v8585_v16 = vld [vmem:[%s11434_s25] ss:$0 sm:$0xff] }
 0xa93   : > { %v6121_v31 = vmul.f32 %v8591_v5, %v6120_v27  ;;  %v6098_v44 = vsel %vm6097_vm11, %v8587_v39, %v6094_v38  ;;  %vm6107_vm1 = vmor %vm6105_vm0, %vm6106_vm14 }
 0xa94   : > { %v6101_v6 = vmul.f32 %v8593_v37, %v6100_v30  ;;  %v6118_v29 = vsel %vm6117_vm10, %v8589_v13, %v6114_v35  ;;  %v6129_v34 = vmul.f32 %v6098_v44, %v11227_v43  ;;  %v6130_v22 = vmul.f32 %v6098_v44, %v11229_v8 }
 0xa95   : > { %v6122_v2 = vmul.f32 0.5, %v6121_v31  ;;  %v6133_v46 = vmul.f32 %v6118_v29, %v11222_v18 }
 0xa96   : > { %v6102_v45 = vmul.f32 0.5, %v6101_v6  ;;  %v6142_v18 = vmul.f32 %v6138_v53, %v6129_v34  ;;  %v6143_v43 = vmul.f32 %v6139_v62, %v6130_v22 }
 0xa97   : > { %v6123_v25 = vsub.f32 1.5, %v6122_v2  ;;  %v6146_v52 = vmul.f32 %v6138_v53, %v6133_v46 }
 0xa98   : > { %v6103_v50 = vsub.f32 1.5, %v6102_v45  ;;  %v6155_v17 = vadd.f32 %v6151_v20, %v6142_v18  ;;  %v6156_v61 = vadd.f32 %v6152_v40, %v6143_v43 }
 0xa99   : > { %v6124_v11 = vmul.f32 %v8591_v5, %v6123_v25  ;;  %v6159_v57 = vadd.f32 %v6151_v20, %v6146_v52 }
 0xa9a   : > { %v6104_v32 = vmul.f32 %v8593_v37, %v6103_v50 }
 0xa9b   : > { %v6128_v49 = vsel %vm6127_vm15, %v8591_v5, %v6124_v11 }
 0xa9c   : > { %v6108_v55 = vsel %vm6107_vm1, %v8593_v37, %v6104_v32  ;;  %v6135_v58 = vmul.f32 %v6128_v49, %v11244_v28 }
 0xa9d   : > { %v6131_v0 = vmul.f32 %v6108_v55, %v11249_v1  ;;  %v6132_v54 = vmul.f32 %v6108_v55, %v11251_v9  ;;  %v6136_v1 = vmul.f32 %v6128_v49, %v11246_v7  ;;  %v6134_v9 = vmul.f32 %v6118_v29, %v11224_v56 }
 0xa9e   : > { %v6148_v19 = vmul.f32 %v6138_v53, %v6135_v58 }
 0xa9f   : > { %v6144_v8 = vmul.f32 %v6138_v53, %v6131_v0  ;;  %v6145_v15 = vmul.f32 %v6139_v62, %v6132_v54  ;;  %v6149_v33 = vmul.f32 %v6139_v62, %v6136_v1  ;;  %v6147_v60 = vmul.f32 %v6139_v62, %v6134_v9 }
 0xaa0   : > { %v6161_v47 = vadd.f32 %v6151_v20, %v6148_v19 }
 0xaa1   : > { %v6157_v42 = vadd.f32 %v6151_v20, %v6144_v8  ;;  %v6158_v10 = vadd.f32 %v6152_v40, %v6145_v15  ;;  %v6162_v36 = vadd.f32 %v6152_v40, %v6149_v33  ;;  %v6160_v39 = vadd.f32 %v6152_v40, %v6147_v60 }
 0xaa2   : > { %v6165_v21 = vpack.c.bf16 %v6161_v47, %v6159_v57 }
 0xaa3   : > { %v6163_v12 = vpack.c.bf16 %v6157_v42, %v6155_v17  ;;  %v6164_v28 = vpack.c.bf16 %v6158_v10, %v6156_v61  ;;  %v6166_v23 = vpack.c.bf16 %v6162_v36, %v6160_v39 }
 0xaa4   : > { %6286 = vmatmul.bf16.vlgmr.msra.gmra.mxu2 %v6165_v21 }
 0xaa5   : > { %6281 = vmatmul.bf16.vlgmr.msra.gmra.mxu0 %v6163_v12  ;;  %7839 = vmatmul.msk.bf16.vlgmr.msra.gmra.mxu1 %vm775_vm4, %v6164_v28 }
 0xab5   : > { %7840 = vmatmul.msk.bf16.gmra.mxu1 %vm775_vm4, %v6166_v23 }
 0xb22   : > { %v6282_v13 = vpop.f32.mrf.mxu0  ;;  %v6301_v63 = vpop.f32.mrf.mxu1 }
 0xb23   : > { %v6283_v24 = vadd.f32 %v8585_v16, %v6282_v13 }
 0xb25   : > { %v6302_v48 = vadd.f32 %v6301_v63, %v6283_v24 }
 0xb27   : > { %6311 = vst [vmem:[#allocation4] sm:$0xff] %v6302_v48  ;;  %v6287_v56 = vpop.f32.mrf.mxu2 }
 0xb28   : > { %v6288_v3 = vadd.f32 %v8585_v16, %v6287_v56 }
 0xb2a   : > { %v6284_v14 = vpop.f32.mrf.mxu0  ;;  %v6303_v7 = vpop.f32.mrf.mxu1 }
 0xb2b   : > { %v6285_v26 = vadd.f32 %v8585_v16, %v6284_v14 }
 0xb2d   : > { %v6304_v4 = vadd.f32 %v6303_v7, %v6285_v26 }
 0xb2f   : > { %6312 = vst [vmem:[#allocation4 + $0x8] sm:$0xff] %v6304_v4  ;;  %v6289_v37 = vpop.f32.mrf.mxu2 }
 0xb30   : > { %v6290_v27 = vadd.f32 %v8585_v16, %v6289_v37 }
 0xb32   : > { %v6306_v5 = vpop.f32.mrf.mxu1 }
 0xb33   : > { %v6307_v41 = vadd.f32 %v6306_v5, %v6288_v3 }
 0xb35   : > { %6313 = vst [vmem:[#allocation4 + $0x10] sm:$0xff] %v6307_v41 }
 0xb3a   : > { %v6308_v38 = vpop.f32.mrf.mxu1 }
 0xb3b   : > { %v6309_v35 = vadd.f32 %v6308_v38, %v6290_v27 }
 0xb3d   : > { %6314 = vst [vmem:[#allocation4 + $0x18] sm:$0xff] %v6309_v35 }
 0xb3e PF: > { %s11435_s0 = sld [smem:[#allocation8_spill]]  ;;  %s8643_s30 = smov [#allocation4]  }
 0xb3f   : > { %s6320_s20 = sshll.u32 %s8643_s30, 4  ;;  %s11436_s4 = sld [smem:[#allocation35_spill]]  ;;  %s6321_s20 = int_to_ptr.vmem [resolvable:$true] %s6320_s20 }
 0xb40   : > { %s8644_s27 = smov 128   ;;  %s8645_s17 = smov 8  }
 0xb44   : > { %p8145_p6 = scmp.eq.s32.totalorder %s11435_s0, 11 }
 0xb45   : > { %s6322_s13 = sshll.u32 %s11436_s4, 4  ;;  %s6323_s13 = int_to_ptr.hbm [resolvable:$true] %s6322_s13 }
 0xb46   : > { %8142 = dma.vmem_to_hbm [thread:$0]  (%p8145_p6), %s6321_s20, 512, %s6323_s13, [#allocation5], %s8644_s27, %s8644_s27, %s8645_s17  }
 0xb47   : > { %8627 = dma.done.wait (%p8145_p6), [#allocation5], 512  }
 0xb48   : > { %8629 = vsyncadd (%p8145_p6), [#allocation5], 4294966784 }
 0xb49 PF: > { %s11437_s23 = sld [smem:[#allocation7_spill]] }
 0xb4f   : > { %s28_s24 = sadd.s32 1, %s11437_s23  }
 0xb50   : > { %p25_p7 = scmp.ge.s32.totalorder %s28_s24, 14  }
 0xb52   :  { %27 = sbr.rel (!%p25_p7) target bundleno = 11 (0xb), region = 160 }
 0xb57   :  { %6339 = vsyncpa [#allocation5], 1 }
 0xb58   :  { %6341 = vsyncpa [#allocation5 + $0x1], 1 }

</bundles_post_ra>
